<compile_context>
chip_gen: v6e
topology: v6e:2x2x1
jax: 0.10.0
libtpu: 0.0.40
codegen_flags: <defaults>
</compile_context>

<pallas_src>
import functools

import jax
import jax.numpy as jnp
from jax.experimental import pallas as pl
from jax.experimental.pallas import tpu as pltpu

_MIB = 1024 * 1024


def _resblock_kernel(xflat_ref, mask_ref, w1_ref, b1_ref, w2_ref, b2_ref,
                     o_ref, hbuf_ref, *, Wp, P, n_valid, eps):
    """One full ResBlock for one sample.

    xflat_ref: (1, R, C) zero-padded image, flattened row-major with padded
               width Wp, plus 2 trailing zero rows (R = (H+2)*Wp + 2).
    mask_ref:  (P, 1) f32, 1.0 on the H*W real output positions, 0.0 on the
               2 ghost columns per row (P = H*Wp).
    w*_ref:    (9, C, C) f32 conv taps, t = ky*3 + kx, layout (Cin, Cout).
    b*_ref:    (1, C) f32 biases.
    o_ref:     (1, R, C) output in the same padded-flat layout (feeds the next
               ResBlock directly).
    hbuf_ref:  (R, C) f32 VMEM scratch holding the re-padded intermediate.
    """
    mask = mask_ref[...]                      # (P, 1)
    inv_n = 1.0 / n_valid

    def conv3x3(get_tap, w_ref, b_ref):
        # Implicit GEMM: 9 contiguous tap slices, each one MXU matmul.
        acc = jnp.dot(get_tap(0), w_ref[0], preferred_element_type=jnp.float32)
        for t in range(1, 9):
            ky, kx = divmod(t, 3)
            acc = acc + jnp.dot(get_tap(ky * Wp + kx), w_ref[t],
                                preferred_element_type=jnp.float32)
        return acc + b_ref[...]               # (P, C) f32

    def inorm(acc):
        # Per-channel stats over the n_valid real pixels (ghost rows masked);
        # centered variance -> no cancellation.
        mean = jnp.sum(acc * mask, axis=0, keepdims=True) * inv_n     # (1, C)
        d = (acc - mean) * mask               # centered; exactly 0 on ghosts
        var = jnp.sum(d * d, axis=0, keepdims=True) * inv_n
        return d * jax.lax.rsqrt(var + eps)

    # ---- conv1 (MXU) + InstanceNorm + ReLU fused --------------------------
    h1 = jnp.maximum(
        inorm(conv3x3(
            lambda off: xflat_ref[0, off:off + P, :].astype(jnp.float32),
            w1_ref, b1_ref)),
        0.0)

    # ---- re-pad the intermediate into VMEM scratch -------------------------
    # Ghost columns of h1 are already 0, so only the top/bottom pad rows need
    # the explicit zero fill.
    hbuf_ref[...] = jnp.zeros_like(hbuf_ref)
    hbuf_ref[Wp + 1:Wp + 1 + P, :] = h1

    # ---- conv2 (MXU) + InstanceNorm + residual fused ------------------------
    h2 = inorm(conv3x3(lambda off: hbuf_ref[off:off + P, :], w2_ref, b2_ref))
    res = xflat_ref[0, Wp + 1:Wp + 1 + P, :].astype(jnp.float32)

    # Residual is 0 on ghost rows too, so the written slab is already a valid
    # zero-padded image for the next block.
    o_ref[...] = jnp.zeros_like(o_ref)
    o_ref[0, Wp + 1:Wp + 1 + P, :] = (h2 + res).astype(o_ref.dtype)


def resblocks_pallas(x_nchw, params, *, eps=1e-5):
    """MUNIT ResBlocks forward (norm='in', activation='relu', zero padding).

    x_nchw: (N, C, H, W).  params: list of (w1, b1, w2, b2) per ResBlock with
    w*: (C, C, 3, 3) in PyTorch OIHW layout, b*: (C,).
    """
    N, C, H, W = x_nchw.shape
    Hp, Wp = H + 2, W + 2
    P = H * Wp                    # work rows (real pixels + 2 ghosts per row)
    R = Hp * Wp + 2               # padded-flat rows + 2 overflow rows
    dtype = x_nchw.dtype
    itemsize = jnp.dtype(dtype).itemsize

    # ---- layout glue: NCHW -> zero-padded NHWC -> (N, R, C) flat -----------
    x_nhwc = jnp.transpose(x_nchw, (0, 2, 3, 1))
    xp = jnp.pad(x_nhwc, ((0, 0), (1, 1), (1, 1), (0, 0)))
    xflat = jnp.pad(xp.reshape(N, Hp * Wp, C), ((0, 0), (0, 2), (0, 0)))

    # Validity mask over work rows: 1.0 where the column is a real pixel.
    col = jnp.arange(P, dtype=jnp.int32) % Wp
    mask = (col < W).astype(jnp.float32).reshape(P, 1)

    # ---- generation-aware VMEM budget ---------------------------------------
    blk = R * C * itemsize
    vmem_need = (4 * blk                      # double-buffered in + out blocks
                 + R * C * 4                  # hbuf scratch
                 + 2 * 9 * C * C * 4 + 2 * C * 4 + P * 4
                 + 10 * P * C * 4             # f32 temporaries (acc, d, taps..)
                 + 8 * _MIB)                  # compiler-internal headroom
    try:
        vmem_cap = pltpu.get_tpu_info().vmem_capacity_bytes
    except Exception:                         # pragma: no cover
        vmem_cap = 64 * _MIB
    vmem_limit = int(min(max(vmem_need, 32 * _MIB), (3 * vmem_cap) // 4))

    cost = pl.CostEstimate(
        flops=int(N * 2 * 2 * 9 * C * C * H * W),
        transcendentals=int(N * 2 * C),
        bytes_accessed=int(N * 2 * R * C * itemsize + 2 * 9 * C * C * 4),
    )

    kernel = functools.partial(_resblock_kernel, Wp=Wp, P=P,
                               n_valid=H * W, eps=float(eps))
    resblock_call = pl.pallas_call(
        kernel,
        out_shape=jax.ShapeDtypeStruct((N, R, C), dtype),
        grid_spec=pltpu.PrefetchScalarGridSpec(
            num_scalar_prefetch=0,
            grid=(N,),
            in_specs=[
                pl.BlockSpec((1, R, C), lambda n: (n, 0, 0)),   # padded-flat x
                pl.BlockSpec((P, 1), lambda n: (0, 0)),         # ghost mask
                pl.BlockSpec((9, C, C), lambda n: (0, 0, 0)),   # conv1 taps
                pl.BlockSpec((1, C), lambda n: (0, 0)),         # conv1 bias
                pl.BlockSpec((9, C, C), lambda n: (0, 0, 0)),   # conv2 taps
                pl.BlockSpec((1, C), lambda n: (0, 0)),         # conv2 bias
            ],
            out_specs=pl.BlockSpec((1, R, C), lambda n: (n, 0, 0)),
            scratch_shapes=[pltpu.VMEM((R, C), jnp.float32)],
        ),
        compiler_params=pltpu.CompilerParams(
            dimension_semantics=("parallel",),
            vmem_limit_bytes=vmem_limit,
        ),
        cost_estimate=cost,
    )

    cur = xflat
    for (w1, b1, w2, b2) in params:
        # PyTorch OIHW (Cout, Cin, 3, 3) -> (ky, kx, Cin, Cout) -> (9, Cin, Cout)
        w1t = jnp.transpose(w1, (2, 3, 1, 0)).reshape(9, C, C).astype(jnp.float32)
        w2t = jnp.transpose(w2, (2, 3, 1, 0)).reshape(9, C, C).astype(jnp.float32)
        cur = resblock_call(cur, mask, w1t,
                            b1.reshape(1, C).astype(jnp.float32),
                            w2t, b2.reshape(1, C).astype(jnp.float32))

    # ---- layout glue back: padded-flat -> NHWC interior -> NCHW -------------
    out = cur[:, :Hp * Wp, :].reshape(N, Hp, Wp, C)[:, 1:H + 1, 1:W + 1, :]
    return jnp.transpose(out, (0, 3, 1, 2))


def resblocks_ref(x, params, eps=1e-5):
    """Pure-JAX reference (NCHW), matching PyTorch ResBlocks(norm='in', relu)."""
    def inorm(h):
        mean = h.mean(axis=(2, 3), keepdims=True)
        var = ((h - mean) ** 2).mean(axis=(2, 3), keepdims=True)
        return (h - mean) * jax.lax.rsqrt(var + eps)

    def conv(h, w, b):
        y = jax.lax.conv_general_dilated(
            h, w, window_strides=(1, 1), padding=((1, 1), (1, 1)),
            dimension_numbers=("NCHW", "OIHW", "NCHW"),
            precision=jax.lax.Precision.HIGHEST)
        return y + b.reshape(1, -1, 1, 1)

    out = x
    for (w1, b1, w2, b2) in params:
        h = jnp.maximum(inorm(conv(out, w1, b1)), 0.0)
        h = inorm(conv(h, w2, b2))
        out = out + h
    return out


if __name__ == "__main__":
    key = jax.random.PRNGKey(0)
    N, C, H, W = 2, 4, 16, 16
    num_blocks = 2

    keys = jax.random.split(key, 1 + 4 * num_blocks)
    x = jax.random.normal(keys[0], (N, C, H, W), dtype=jnp.float32)

    params = []
    k = 1
    for _ in range(num_blocks):
        w1 = 0.2 * jax.random.normal(keys[k], (C, C, 3, 3), dtype=jnp.float32); k += 1
        b1 = 0.1 * jax.random.normal(keys[k], (C,), dtype=jnp.float32); k += 1
        w2 = 0.2 * jax.random.normal(keys[k], (C, C, 3, 3), dtype=jnp.float32); k += 1
        b2 = 0.1 * jax.random.normal(keys[k], (C,), dtype=jnp.float32); k += 1
        params.append((w1, b1, w2, b2))

    fwd = jax.jit(functools.partial(resblocks_pallas, eps=1e-5))
    out = jax.block_until_ready(fwd(x, params))
    assert out.shape == (N, C, H, W)

    ref = resblocks_ref(x, params, eps=1e-5)
    max_err = float(jnp.max(jnp.abs(out - ref)))
    # Tolerance covers MXU f32 pass decomposition vs. XLA conv algorithm
    # differences; structural errors would be O(0.1 - 1).
    assert jnp.allclose(out, ref, atol=1e-2, rtol=1e-2), f"max |err| = {max_err}"
    print("KERNEL_OK")
</pallas_src>

<mosaic_0001>
module attributes {stable_mosaic.version = 11 : i64} {
  func.func @_resblock_kernel(%arg0: i32, %arg1: memref<1x326x4xf32, #tpu.memory_space<vmem>>, %arg2: memref<288x1xf32, #tpu.memory_space<vmem>>, %arg3: memref<9x4x4xf32, #tpu.memory_space<vmem>>, %arg4: memref<1x4xf32, #tpu.memory_space<vmem>>, %arg5: memref<9x4x4xf32, #tpu.memory_space<vmem>>, %arg6: memref<1x4xf32, #tpu.memory_space<vmem>>, %arg7: memref<1x326x4xf32, #tpu.memory_space<vmem>>, %arg8: memref<326x4xf32, #tpu.memory_space<vmem>>) attributes {dimension_semantics = [#tpu.dimension_semantics<parallel>], iteration_bounds = array<i64: 2>, scalar_prefetch = 0 : i64, scratch_operands = 1 : i64, tpu.core_type = #tpu.core_type<tc>, window_params = [{transform_indices = @transform_0, window_bounds = array<i64: 1, 326, 4>}, {pipeline_mode = #tpu.pipeline_mode<synchronous>, transform_indices = @transform_1, window_bounds = array<i64: 288, 1>}, {pipeline_mode = #tpu.pipeline_mode<synchronous>, transform_indices = @transform_2, window_bounds = array<i64: 9, 4, 4>}, {pipeline_mode = #tpu.pipeline_mode<synchronous>, transform_indices = @transform_3, window_bounds = array<i64: 1, 4>}, {pipeline_mode = #tpu.pipeline_mode<synchronous>, transform_indices = @transform_4, window_bounds = array<i64: 9, 4, 4>}, {pipeline_mode = #tpu.pipeline_mode<synchronous>, transform_indices = @transform_5, window_bounds = array<i64: 1, 4>}, {transform_indices = @transform_6, window_bounds = array<i64: 1, 326, 4>}]} {
    %c0 = arith.constant 0 : index
    %c0_0 = arith.constant 0 : index
    %0 = vector.load %arg2[%c0, %c0_0] : memref<288x1xf32, #tpu.memory_space<vmem>>, vector<288x1xf32>
    %c0_1 = arith.constant 0 : index
    %c0_2 = arith.constant 0 : index
    %c0_3 = arith.constant 0 : index
    %1 = vector.load %arg1[%c0_1, %c0_2, %c0_3] : memref<1x326x4xf32, #tpu.memory_space<vmem>>, vector<1x288x4xf32>
    %2 = vector.shape_cast %1 : vector<1x288x4xf32> to vector<288x4xf32>
    %c0_4 = arith.constant 0 : index
    %c0_5 = arith.constant 0 : index
    %c0_6 = arith.constant 0 : index
    %3 = vector.load %arg3[%c0_4, %c0_5, %c0_6] : memref<9x4x4xf32, #tpu.memory_space<vmem>>, vector<1x4x4xf32>
    %4 = vector.shape_cast %3 : vector<1x4x4xf32> to vector<4x4xf32>
    %cst = arith.constant dense<0.000000e+00> : vector<288x4xf32>
    %5 = tpu.matmul %2, %4, %cst {dimension_numbers = #tpu.dot_dimension_numbers<[1], [0], [0], [1], [0, 0, 1, 1], [], []>} : vector<288x4xf32>, vector<4x4xf32>, vector<288x4xf32> -> vector<288x4xf32>
    %c0_7 = arith.constant 0 : index
    %c1 = arith.constant 1 : index
    %c0_8 = arith.constant 0 : index
    %6 = vector.load %arg1[%c0_7, %c1, %c0_8] : memref<1x326x4xf32, #tpu.memory_space<vmem>>, vector<1x288x4xf32>
    %7 = vector.shape_cast %6 : vector<1x288x4xf32> to vector<288x4xf32>
    %c1_9 = arith.constant 1 : index
    %c0_10 = arith.constant 0 : index
    %c0_11 = arith.constant 0 : index
    %8 = vector.load %arg3[%c1_9, %c0_10, %c0_11] : memref<9x4x4xf32, #tpu.memory_space<vmem>>, vector<1x4x4xf32>
    %9 = vector.shape_cast %8 : vector<1x4x4xf32> to vector<4x4xf32>
    %cst_12 = arith.constant dense<0.000000e+00> : vector<288x4xf32>
    %10 = tpu.matmul %7, %9, %cst_12 {dimension_numbers = #tpu.dot_dimension_numbers<[1], [0], [0], [1], [0, 0, 1, 1], [], []>} : vector<288x4xf32>, vector<4x4xf32>, vector<288x4xf32> -> vector<288x4xf32>
    %11 = arith.addf %5, %10 : vector<288x4xf32>
    %c0_13 = arith.constant 0 : index
    %c2 = arith.constant 2 : index
    %c0_14 = arith.constant 0 : index
    %12 = vector.load %arg1[%c0_13, %c2, %c0_14] : memref<1x326x4xf32, #tpu.memory_space<vmem>>, vector<1x288x4xf32>
    %13 = vector.shape_cast %12 : vector<1x288x4xf32> to vector<288x4xf32>
    %c2_15 = arith.constant 2 : index
    %c0_16 = arith.constant 0 : index
    %c0_17 = arith.constant 0 : index
    %14 = vector.load %arg3[%c2_15, %c0_16, %c0_17] : memref<9x4x4xf32, #tpu.memory_space<vmem>>, vector<1x4x4xf32>
    %15 = vector.shape_cast %14 : vector<1x4x4xf32> to vector<4x4xf32>
    %cst_18 = arith.constant dense<0.000000e+00> : vector<288x4xf32>
    %16 = tpu.matmul %13, %15, %cst_18 {dimension_numbers = #tpu.dot_dimension_numbers<[1], [0], [0], [1], [0, 0, 1, 1], [], []>} : vector<288x4xf32>, vector<4x4xf32>, vector<288x4xf32> -> vector<288x4xf32>
    %17 = arith.addf %11, %16 : vector<288x4xf32>
    %c0_19 = arith.constant 0 : index
    %c18 = arith.constant 18 : index
    %c0_20 = arith.constant 0 : index
    %18 = vector.load %arg1[%c0_19, %c18, %c0_20] : memref<1x326x4xf32, #tpu.memory_space<vmem>>, vector<1x288x4xf32>
    %19 = vector.shape_cast %18 : vector<1x288x4xf32> to vector<288x4xf32>
    %c3 = arith.constant 3 : index
    %c0_21 = arith.constant 0 : index
    %c0_22 = arith.constant 0 : index
    %20 = vector.load %arg3[%c3, %c0_21, %c0_22] : memref<9x4x4xf32, #tpu.memory_space<vmem>>, vector<1x4x4xf32>
    %21 = vector.shape_cast %20 : vector<1x4x4xf32> to vector<4x4xf32>
    %cst_23 = arith.constant dense<0.000000e+00> : vector<288x4xf32>
    %22 = tpu.matmul %19, %21, %cst_23 {dimension_numbers = #tpu.dot_dimension_numbers<[1], [0], [0], [1], [0, 0, 1, 1], [], []>} : vector<288x4xf32>, vector<4x4xf32>, vector<288x4xf32> -> vector<288x4xf32>
    %23 = arith.addf %17, %22 : vector<288x4xf32>
    %c0_24 = arith.constant 0 : index
    %c19 = arith.constant 19 : index
    %c0_25 = arith.constant 0 : index
    %24 = vector.load %arg1[%c0_24, %c19, %c0_25] : memref<1x326x4xf32, #tpu.memory_space<vmem>>, vector<1x288x4xf32>
    %25 = vector.shape_cast %24 : vector<1x288x4xf32> to vector<288x4xf32>
    %c4 = arith.constant 4 : index
    %c0_26 = arith.constant 0 : index
    %c0_27 = arith.constant 0 : index
    %26 = vector.load %arg3[%c4, %c0_26, %c0_27] : memref<9x4x4xf32, #tpu.memory_space<vmem>>, vector<1x4x4xf32>
    %27 = vector.shape_cast %26 : vector<1x4x4xf32> to vector<4x4xf32>
    %cst_28 = arith.constant dense<0.000000e+00> : vector<288x4xf32>
    %28 = tpu.matmul %25, %27, %cst_28 {dimension_numbers = #tpu.dot_dimension_numbers<[1], [0], [0], [1], [0, 0, 1, 1], [], []>} : vector<288x4xf32>, vector<4x4xf32>, vector<288x4xf32> -> vector<288x4xf32>
    %29 = arith.addf %23, %28 : vector<288x4xf32>
    %c0_29 = arith.constant 0 : index
    %c20 = arith.constant 20 : index
    %c0_30 = arith.constant 0 : index
    %30 = vector.load %arg1[%c0_29, %c20, %c0_30] : memref<1x326x4xf32, #tpu.memory_space<vmem>>, vector<1x288x4xf32>
    %31 = vector.shape_cast %30 : vector<1x288x4xf32> to vector<288x4xf32>
    %c5 = arith.constant 5 : index
    %c0_31 = arith.constant 0 : index
    %c0_32 = arith.constant 0 : index
    %32 = vector.load %arg3[%c5, %c0_31, %c0_32] : memref<9x4x4xf32, #tpu.memory_space<vmem>>, vector<1x4x4xf32>
    %33 = vector.shape_cast %32 : vector<1x4x4xf32> to vector<4x4xf32>
    %cst_33 = arith.constant dense<0.000000e+00> : vector<288x4xf32>
    %34 = tpu.matmul %31, %33, %cst_33 {dimension_numbers = #tpu.dot_dimension_numbers<[1], [0], [0], [1], [0, 0, 1, 1], [], []>} : vector<288x4xf32>, vector<4x4xf32>, vector<288x4xf32> -> vector<288x4xf32>
    %35 = arith.addf %29, %34 : vector<288x4xf32>
    %c0_34 = arith.constant 0 : index
    %c36 = arith.constant 36 : index
    %c0_35 = arith.constant 0 : index
    %36 = vector.load %arg1[%c0_34, %c36, %c0_35] : memref<1x326x4xf32, #tpu.memory_space<vmem>>, vector<1x288x4xf32>
    %37 = vector.shape_cast %36 : vector<1x288x4xf32> to vector<288x4xf32>
    %c6 = arith.constant 6 : index
    %c0_36 = arith.constant 0 : index
    %c0_37 = arith.constant 0 : index
    %38 = vector.load %arg3[%c6, %c0_36, %c0_37] : memref<9x4x4xf32, #tpu.memory_space<vmem>>, vector<1x4x4xf32>
    %39 = vector.shape_cast %38 : vector<1x4x4xf32> to vector<4x4xf32>
    %cst_38 = arith.constant dense<0.000000e+00> : vector<288x4xf32>
    %40 = tpu.matmul %37, %39, %cst_38 {dimension_numbers = #tpu.dot_dimension_numbers<[1], [0], [0], [1], [0, 0, 1, 1], [], []>} : vector<288x4xf32>, vector<4x4xf32>, vector<288x4xf32> -> vector<288x4xf32>
    %41 = arith.addf %35, %40 : vector<288x4xf32>
    %c0_39 = arith.constant 0 : index
    %c37 = arith.constant 37 : index
    %c0_40 = arith.constant 0 : index
    %42 = vector.load %arg1[%c0_39, %c37, %c0_40] : memref<1x326x4xf32, #tpu.memory_space<vmem>>, vector<1x288x4xf32>
    %43 = vector.shape_cast %42 : vector<1x288x4xf32> to vector<288x4xf32>
    %c7 = arith.constant 7 : index
    %c0_41 = arith.constant 0 : index
    %c0_42 = arith.constant 0 : index
    %44 = vector.load %arg3[%c7, %c0_41, %c0_42] : memref<9x4x4xf32, #tpu.memory_space<vmem>>, vector<1x4x4xf32>
    %45 = vector.shape_cast %44 : vector<1x4x4xf32> to vector<4x4xf32>
    %cst_43 = arith.constant dense<0.000000e+00> : vector<288x4xf32>
    %46 = tpu.matmul %43, %45, %cst_43 {dimension_numbers = #tpu.dot_dimension_numbers<[1], [0], [0], [1], [0, 0, 1, 1], [], []>} : vector<288x4xf32>, vector<4x4xf32>, vector<288x4xf32> -> vector<288x4xf32>
    %47 = arith.addf %41, %46 : vector<288x4xf32>
    %c0_44 = arith.constant 0 : index
    %c38 = arith.constant 38 : index
    %c0_45 = arith.constant 0 : index
    %48 = vector.load %arg1[%c0_44, %c38, %c0_45] : memref<1x326x4xf32, #tpu.memory_space<vmem>>, vector<1x288x4xf32>
    %49 = vector.shape_cast %48 : vector<1x288x4xf32> to vector<288x4xf32>
    %c8 = arith.constant 8 : index
    %c0_46 = arith.constant 0 : index
    %c0_47 = arith.constant 0 : index
    %50 = vector.load %arg3[%c8, %c0_46, %c0_47] : memref<9x4x4xf32, #tpu.memory_space<vmem>>, vector<1x4x4xf32>
    %51 = vector.shape_cast %50 : vector<1x4x4xf32> to vector<4x4xf32>
    %cst_48 = arith.constant dense<0.000000e+00> : vector<288x4xf32>
    %52 = tpu.matmul %49, %51, %cst_48 {dimension_numbers = #tpu.dot_dimension_numbers<[1], [0], [0], [1], [0, 0, 1, 1], [], []>} : vector<288x4xf32>, vector<4x4xf32>, vector<288x4xf32> -> vector<288x4xf32>
    %53 = arith.addf %47, %52 : vector<288x4xf32>
    %c0_49 = arith.constant 0 : index
    %c0_50 = arith.constant 0 : index
    %54 = vector.load %arg4[%c0_49, %c0_50] : memref<1x4xf32, #tpu.memory_space<vmem>>, vector<1x4xf32>
    %55 = vector.broadcast %54 : vector<1x4xf32> to vector<288x4xf32>
    %56 = arith.addf %53, %55 : vector<288x4xf32>
    %57 = vector.broadcast %0 : vector<288x1xf32> to vector<288x4xf32>
    %58 = arith.mulf %56, %57 : vector<288x4xf32>
    %cst_51 = arith.constant dense<0.000000e+00> : vector<4xf32>
    %59 = vector.multi_reduction <add>, %58, %cst_51 [0] : vector<288x4xf32> to vector<4xf32>
    %60 = vector.shape_cast %59 : vector<4xf32> to vector<1x4xf32>
    %cst_52 = arith.constant 3.906250e-03 : f32
    %61 = vector.broadcast %cst_52 : f32 to vector<1x4xf32>
    %62 = arith.mulf %60, %61 : vector<1x4xf32>
    %63 = vector.broadcast %62 : vector<1x4xf32> to vector<288x4xf32>
    %64 = arith.subf %56, %63 : vector<288x4xf32>
    %65 = vector.broadcast %0 : vector<288x1xf32> to vector<288x4xf32>
    %66 = arith.mulf %64, %65 : vector<288x4xf32>
    %67 = arith.mulf %66, %66 : vector<288x4xf32>
    %cst_53 = arith.constant dense<0.000000e+00> : vector<4xf32>
    %68 = vector.multi_reduction <add>, %67, %cst_53 [0] : vector<288x4xf32> to vector<4xf32>
    %69 = vector.shape_cast %68 : vector<4xf32> to vector<1x4xf32>
    %cst_54 = arith.constant 3.906250e-03 : f32
    %70 = vector.broadcast %cst_54 : f32 to vector<1x4xf32>
    %71 = arith.mulf %69, %70 : vector<1x4xf32>
    %cst_55 = arith.constant 9.99999974E-6 : f32
    %72 = vector.broadcast %cst_55 : f32 to vector<1x4xf32>
    %73 = arith.addf %71, %72 : vector<1x4xf32>
    %74 = math.rsqrt %73 : vector<1x4xf32>
    %75 = vector.broadcast %74 : vector<1x4xf32> to vector<288x4xf32>
    %76 = arith.mulf %66, %75 : vector<288x4xf32>
    %cst_56 = arith.constant 0.000000e+00 : f32
    %77 = vector.broadcast %cst_56 : f32 to vector<288x4xf32>
    %78 = arith.maximumf %76, %77 : vector<288x4xf32>
    %cst_57 = arith.constant 0.000000e+00 : f32
    %79 = vector.broadcast %cst_57 : f32 to vector<326x4xf32>
    %c0_58 = arith.constant 0 : index
    %c0_59 = arith.constant 0 : index
    %80 = vector.load %arg8[%c0_58, %c0_59] : memref<326x4xf32, #tpu.memory_space<vmem>>, vector<326x4xf32>
    tpu.vector_store %arg8[%c0_58, %c0_59], %79 {strides = array<i32>} : memref<326x4xf32, #tpu.memory_space<vmem>>, vector<326x4xf32>,
    %c19_60 = arith.constant 19 : index
    %c0_61 = arith.constant 0 : index
    %81 = vector.load %arg8[%c19_60, %c0_61] : memref<326x4xf32, #tpu.memory_space<vmem>>, vector<288x4xf32>
    tpu.vector_store %arg8[%c19_60, %c0_61], %78 {strides = array<i32>} : memref<326x4xf32, #tpu.memory_space<vmem>>, vector<288x4xf32>,
    %c0_62 = arith.constant 0 : index
    %c0_63 = arith.constant 0 : index
    %82 = vector.load %arg8[%c0_62, %c0_63] : memref<326x4xf32, #tpu.memory_space<vmem>>, vector<288x4xf32>
    %c0_64 = arith.constant 0 : index
    %c0_65 = arith.constant 0 : index
    %c0_66 = arith.constant 0 : index
    %83 = vector.load %arg5[%c0_64, %c0_65, %c0_66] : memref<9x4x4xf32, #tpu.memory_space<vmem>>, vector<1x4x4xf32>
    %84 = vector.shape_cast %83 : vector<1x4x4xf32> to vector<4x4xf32>
    %cst_67 = arith.constant dense<0.000000e+00> : vector<288x4xf32>
    %85 = tpu.matmul %82, %84, %cst_67 {dimension_numbers = #tpu.dot_dimension_numbers<[1], [0], [0], [1], [0, 0, 1, 1], [], []>} : vector<288x4xf32>, vector<4x4xf32>, vector<288x4xf32> -> vector<288x4xf32>
    %c1_68 = arith.constant 1 : index
    %c0_69 = arith.constant 0 : index
    %86 = vector.load %arg8[%c1_68, %c0_69] : memref<326x4xf32, #tpu.memory_space<vmem>>, vector<288x4xf32>
    %c1_70 = arith.constant 1 : index
    %c0_71 = arith.constant 0 : index
    %c0_72 = arith.constant 0 : index
    %87 = vector.load %arg5[%c1_70, %c0_71, %c0_72] : memref<9x4x4xf32, #tpu.memory_space<vmem>>, vector<1x4x4xf32>
    %88 = vector.shape_cast %87 : vector<1x4x4xf32> to vector<4x4xf32>
    %cst_73 = arith.constant dense<0.000000e+00> : vector<288x4xf32>
    %89 = tpu.matmul %86, %88, %cst_73 {dimension_numbers = #tpu.dot_dimension_numbers<[1], [0], [0], [1], [0, 0, 1, 1], [], []>} : vector<288x4xf32>, vector<4x4xf32>, vector<288x4xf32> -> vector<288x4xf32>
    %90 = arith.addf %85, %89 : vector<288x4xf32>
    %c2_74 = arith.constant 2 : index
    %c0_75 = arith.constant 0 : index
    %91 = vector.load %arg8[%c2_74, %c0_75] : memref<326x4xf32, #tpu.memory_space<vmem>>, vector<288x4xf32>
    %c2_76 = arith.constant 2 : index
    %c0_77 = arith.constant 0 : index
    %c0_78 = arith.constant 0 : index
    %92 = vector.load %arg5[%c2_76, %c0_77, %c0_78] : memref<9x4x4xf32, #tpu.memory_space<vmem>>, vector<1x4x4xf32>
    %93 = vector.shape_cast %92 : vector<1x4x4xf32> to vector<4x4xf32>
    %cst_79 = arith.constant dense<0.000000e+00> : vector<288x4xf32>
    %94 = tpu.matmul %91, %93, %cst_79 {dimension_numbers = #tpu.dot_dimension_numbers<[1], [0], [0], [1], [0, 0, 1, 1], [], []>} : vector<288x4xf32>, vector<4x4xf32>, vector<288x4xf32> -> vector<288x4xf32>
    %95 = arith.addf %90, %94 : vector<288x4xf32>
    %c18_80 = arith.constant 18 : index
    %c0_81 = arith.constant 0 : index
    %96 = vector.load %arg8[%c18_80, %c0_81] : memref<326x4xf32, #tpu.memory_space<vmem>>, vector<288x4xf32>
    %c3_82 = arith.constant 3 : index
    %c0_83 = arith.constant 0 : index
    %c0_84 = arith.constant 0 : index
    %97 = vector.load %arg5[%c3_82, %c0_83, %c0_84] : memref<9x4x4xf32, #tpu.memory_space<vmem>>, vector<1x4x4xf32>
    %98 = vector.shape_cast %97 : vector<1x4x4xf32> to vector<4x4xf32>
    %cst_85 = arith.constant dense<0.000000e+00> : vector<288x4xf32>
    %99 = tpu.matmul %96, %98, %cst_85 {dimension_numbers = #tpu.dot_dimension_numbers<[1], [0], [0], [1], [0, 0, 1, 1], [], []>} : vector<288x4xf32>, vector<4x4xf32>, vector<288x4xf32> -> vector<288x4xf32>
    %100 = arith.addf %95, %99 : vector<288x4xf32>
    %c19_86 = arith.constant 19 : index
    %c0_87 = arith.constant 0 : index
    %101 = vector.load %arg8[%c19_86, %c0_87] : memref<326x4xf32, #tpu.memory_space<vmem>>, vector<288x4xf32>
    %c4_88 = arith.constant 4 : index
    %c0_89 = arith.constant 0 : index
    %c0_90 = arith.constant 0 : index
    %102 = vector.load %arg5[%c4_88, %c0_89, %c0_90] : memref<9x4x4xf32, #tpu.memory_space<vmem>>, vector<1x4x4xf32>
    %103 = vector.shape_cast %102 : vector<1x4x4xf32> to vector<4x4xf32>
    %cst_91 = arith.constant dense<0.000000e+00> : vector<288x4xf32>
    %104 = tpu.matmul %101, %103, %cst_91 {dimension_numbers = #tpu.dot_dimension_numbers<[1], [0], [0], [1], [0, 0, 1, 1], [], []>} : vector<288x4xf32>, vector<4x4xf32>, vector<288x4xf32> -> vector<288x4xf32>
    %105 = arith.addf %100, %104 : vector<288x4xf32>
    %c20_92 = arith.constant 20 : index
    %c0_93 = arith.constant 0 : index
    %106 = vector.load %arg8[%c20_92, %c0_93] : memref<326x4xf32, #tpu.memory_space<vmem>>, vector<288x4xf32>
    %c5_94 = arith.constant 5 : index
    %c0_95 = arith.constant 0 : index
    %c0_96 = arith.constant 0 : index
    %107 = vector.load %arg5[%c5_94, %c0_95, %c0_96] : memref<9x4x4xf32, #tpu.memory_space<vmem>>, vector<1x4x4xf32>
    %108 = vector.shape_cast %107 : vector<1x4x4xf32> to vector<4x4xf32>
    %cst_97 = arith.constant dense<0.000000e+00> : vector<288x4xf32>
    %109 = tpu.matmul %106, %108, %cst_97 {dimension_numbers = #tpu.dot_dimension_numbers<[1], [0], [0], [1], [0, 0, 1, 1], [], []>} : vector<288x4xf32>, vector<4x4xf32>, vector<288x4xf32> -> vector<288x4xf32>
    %110 = arith.addf %105, %109 : vector<288x4xf32>
    %c36_98 = arith.constant 36 : index
    %c0_99 = arith.constant 0 : index
    %111 = vector.load %arg8[%c36_98, %c0_99] : memref<326x4xf32, #tpu.memory_space<vmem>>, vector<288x4xf32>
    %c6_100 = arith.constant 6 : index
    %c0_101 = arith.constant 0 : index
    %c0_102 = arith.constant 0 : index
    %112 = vector.load %arg5[%c6_100, %c0_101, %c0_102] : memref<9x4x4xf32, #tpu.memory_space<vmem>>, vector<1x4x4xf32>
    %113 = vector.shape_cast %112 : vector<1x4x4xf32> to vector<4x4xf32>
    %cst_103 = arith.constant dense<0.000000e+00> : vector<288x4xf32>
    %114 = tpu.matmul %111, %113, %cst_103 {dimension_numbers = #tpu.dot_dimension_numbers<[1], [0], [0], [1], [0, 0, 1, 1], [], []>} : vector<288x4xf32>, vector<4x4xf32>, vector<288x4xf32> -> vector<288x4xf32>
    %115 = arith.addf %110, %114 : vector<288x4xf32>
    %c37_104 = arith.constant 37 : index
    %c0_105 = arith.constant 0 : index
    %116 = vector.load %arg8[%c37_104, %c0_105] : memref<326x4xf32, #tpu.memory_space<vmem>>, vector<288x4xf32>
    %c7_106 = arith.constant 7 : index
    %c0_107 = arith.constant 0 : index
    %c0_108 = arith.constant 0 : index
    %117 = vector.load %arg5[%c7_106, %c0_107, %c0_108] : memref<9x4x4xf32, #tpu.memory_space<vmem>>, vector<1x4x4xf32>
    %118 = vector.shape_cast %117 : vector<1x4x4xf32> to vector<4x4xf32>
    %cst_109 = arith.constant dense<0.000000e+00> : vector<288x4xf32>
    %119 = tpu.matmul %116, %118, %cst_109 {dimension_numbers = #tpu.dot_dimension_numbers<[1], [0], [0], [1], [0, 0, 1, 1], [], []>} : vector<288x4xf32>, vector<4x4xf32>, vector<288x4xf32> -> vector<288x4xf32>
    %120 = arith.addf %115, %119 : vector<288x4xf32>
    %c38_110 = arith.constant 38 : index
    %c0_111 = arith.constant 0 : index
    %121 = vector.load %arg8[%c38_110, %c0_111] : memref<326x4xf32, #tpu.memory_space<vmem>>, vector<288x4xf32>
    %c8_112 = arith.constant 8 : index
    %c0_113 = arith.constant 0 : index
    %c0_114 = arith.constant 0 : index
    %122 = vector.load %arg5[%c8_112, %c0_113, %c0_114] : memref<9x4x4xf32, #tpu.memory_space<vmem>>, vector<1x4x4xf32>
    %123 = vector.shape_cast %122 : vector<1x4x4xf32> to vector<4x4xf32>
    %cst_115 = arith.constant dense<0.000000e+00> : vector<288x4xf32>
    %124 = tpu.matmul %121, %123, %cst_115 {dimension_numbers = #tpu.dot_dimension_numbers<[1], [0], [0], [1], [0, 0, 1, 1], [], []>} : vector<288x4xf32>, vector<4x4xf32>, vector<288x4xf32> -> vector<288x4xf32>
    %125 = arith.addf %120, %124 : vector<288x4xf32>
    %c0_116 = arith.constant 0 : index
    %c0_117 = arith.constant 0 : index
    %126 = vector.load %arg6[%c0_116, %c0_117] : memref<1x4xf32, #tpu.memory_space<vmem>>, vector<1x4xf32>
    %127 = vector.broadcast %126 : vector<1x4xf32> to vector<288x4xf32>
    %128 = arith.addf %125, %127 : vector<288x4xf32>
    %129 = vector.broadcast %0 : vector<288x1xf32> to vector<288x4xf32>
    %130 = arith.mulf %128, %129 : vector<288x4xf32>
    %cst_118 = arith.constant dense<0.000000e+00> : vector<4xf32>
    %131 = vector.multi_reduction <add>, %130, %cst_118 [0] : vector<288x4xf32> to vector<4xf32>
    %132 = vector.shape_cast %131 : vector<4xf32> to vector<1x4xf32>
    %cst_119 = arith.constant 3.906250e-03 : f32
    %133 = vector.broadcast %cst_119 : f32 to vector<1x4xf32>
    %134 = arith.mulf %132, %133 : vector<1x4xf32>
    %135 = vector.broadcast %134 : vector<1x4xf32> to vector<288x4xf32>
    %136 = arith.subf %128, %135 : vector<288x4xf32>
    %137 = vector.broadcast %0 : vector<288x1xf32> to vector<288x4xf32>
    %138 = arith.mulf %136, %137 : vector<288x4xf32>
    %139 = arith.mulf %138, %138 : vector<288x4xf32>
    %cst_120 = arith.constant dense<0.000000e+00> : vector<4xf32>
    %140 = vector.multi_reduction <add>, %139, %cst_120 [0] : vector<288x4xf32> to vector<4xf32>
    %141 = vector.shape_cast %140 : vector<4xf32> to vector<1x4xf32>
    %cst_121 = arith.constant 3.906250e-03 : f32
    %142 = vector.broadcast %cst_121 : f32 to vector<1x4xf32>
    %143 = arith.mulf %141, %142 : vector<1x4xf32>
    %cst_122 = arith.constant 9.99999974E-6 : f32
    %144 = vector.broadcast %cst_122 : f32 to vector<1x4xf32>
    %145 = arith.addf %143, %144 : vector<1x4xf32>
    %146 = math.rsqrt %145 : vector<1x4xf32>
    %147 = vector.broadcast %146 : vector<1x4xf32> to vector<288x4xf32>
    %148 = arith.mulf %138, %147 : vector<288x4xf32>
    %c0_123 = arith.constant 0 : index
    %c19_124 = arith.constant 19 : index
    %c0_125 = arith.constant 0 : index
    %149 = vector.load %arg1[%c0_123, %c19_124, %c0_125] : memref<1x326x4xf32, #tpu.memory_space<vmem>>, vector<1x288x4xf32>
    %150 = vector.shape_cast %149 : vector<1x288x4xf32> to vector<288x4xf32>
    %cst_126 = arith.constant 0.000000e+00 : f32
    %151 = vector.broadcast %cst_126 : f32 to vector<1x326x4xf32>
    %c0_127 = arith.constant 0 : index
    %c0_128 = arith.constant 0 : index
    %c0_129 = arith.constant 0 : index
    %152 = vector.load %arg7[%c0_127, %c0_128, %c0_129] : memref<1x326x4xf32, #tpu.memory_space<vmem>>, vector<1x326x4xf32>
    tpu.vector_store %arg7[%c0_127, %c0_128, %c0_129], %151 {strides = array<i32>} : memref<1x326x4xf32, #tpu.memory_space<vmem>>, vector<1x326x4xf32>,
    %153 = arith.addf %148, %150 : vector<288x4xf32>
    %c0_130 = arith.constant 0 : index
    %c19_131 = arith.constant 19 : index
    %c0_132 = arith.constant 0 : index
    %154 = vector.load %arg7[%c0_130, %c19_131, %c0_132] : memref<1x326x4xf32, #tpu.memory_space<vmem>>, vector<1x288x4xf32>
    %155 = vector.shape_cast %154 : vector<1x288x4xf32> to vector<288x4xf32>
    %156 = vector.shape_cast %153 : vector<288x4xf32> to vector<1x288x4xf32>
    tpu.vector_store %arg7[%c0_130, %c19_131, %c0_132], %156 {strides = array<i32>} : memref<1x326x4xf32, #tpu.memory_space<vmem>>, vector<1x288x4xf32>,
    return
  }
  func.func @transform_0(%arg0: i32) -> (i32, i32, i32) {
    %c0_i32 = arith.constant 0 : i32
    %c0_i32_0 = arith.constant 0 : i32
    %c0_i32_1 = arith.constant 0 : i32
    return %arg0, %c0_i32, %c0_i32_0 : i32, i32, i32
  }
  func.func @transform_1(%arg0: i32) -> (i32, i32) {
    %c0_i32 = arith.constant 0 : i32
    %c0_i32_0 = arith.constant 0 : i32
    %c0_i32_1 = arith.constant 0 : i32
    return %c0_i32, %c0_i32_0 : i32, i32
  }
  func.func @transform_2(%arg0: i32) -> (i32, i32, i32) {
    %c0_i32 = arith.constant 0 : i32
    %c0_i32_0 = arith.constant 0 : i32
    %c0_i32_1 = arith.constant 0 : i32
    %c0_i32_2 = arith.constant 0 : i32
    return %c0_i32, %c0_i32_0, %c0_i32_1 : i32, i32, i32
  }
  func.func @transform_3(%arg0: i32) -> (i32, i32) {
    %c0_i32 = arith.constant 0 : i32
    %c0_i32_0 = arith.constant 0 : i32
    %c0_i32_1 = arith.constant 0 : i32
    return %c0_i32, %c0_i32_0 : i32, i32
  }
  func.func @transform_4(%arg0: i32) -> (i32, i32, i32) {
    %c0_i32 = arith.constant 0 : i32
    %c0_i32_0 = arith.constant 0 : i32
    %c0_i32_1 = arith.constant 0 : i32
    %c0_i32_2 = arith.constant 0 : i32
    return %c0_i32, %c0_i32_0, %c0_i32_1 : i32, i32, i32
  }
  func.func @transform_5(%arg0: i32) -> (i32, i32) {
    %c0_i32 = arith.constant 0 : i32
    %c0_i32_0 = arith.constant 0 : i32
    %c0_i32_1 = arith.constant 0 : i32
    return %c0_i32, %c0_i32_0 : i32, i32
  }
  func.func @transform_6(%arg0: i32) -> (i32, i32, i32) {
    %c0_i32 = arith.constant 0 : i32
    %c0_i32_0 = arith.constant 0 : i32
    %c0_i32_1 = arith.constant 0 : i32
    return %arg0, %c0_i32, %c0_i32_0 : i32, i32, i32
  }
}

</mosaic_0001>

<bundles_post_ra>
// kernel: resblocks_pallas.2
= control target key start
LH: loop header
LB: loop body
LE: loop exit
PB: predicated region body
PF: predicated region fallthrough
CT: control target
= control target key end

     0   :  { %s11573_s21 = smov 0   ;;  %s15949_s0 = inlined_call_operand.vmem [shape: f32[2,326,4], index: 0, kind: input, shape index: {}]   ;;  %s15950_s1 = inlined_call_operand.vmem [shape: f32[288,1], index: 1, kind: input, shape index: {}]   ;;  %s15951_s2 = inlined_call_operand.vmem [shape: f32[9,4,4], index: 2, kind: input, shape index: {}]   ;;  %s15952_s3 = inlined_call_operand.vmem [shape: f32[1,4], index: 3, kind: input, shape index: {}]   ;;  %s15953_s4 = inlined_call_operand.vmem [shape: f32[9,4,4], index: 4, kind: input, shape index: {}]   ;;  %s15954_s5 = inlined_call_operand.vmem [shape: f32[1,4], index: 5, kind: input, shape index: {}]   ;;  %s15955_s6 = inlined_call_operand.vmem [shape: f32[2,326,4], index: 6, kind: output, shape index: {}]  }
   0x1 LB: > { %s9144_s22 = sadd.s32 4294967295, %s11534_s21   ;;  %p9148_p0 = scmp.ge.s32.totalorder %s11534_s21, 1  ;;  %s11534_s21 = sphi %s11573_s21, %s16_s21  }
   0x2   : > { %p212_p1 = scmp.lt.s32.totalorder %s11534_s21, 3 }
   0x4   : > { %p213_p2 = pnand %p9148_p0, %p212_p1 }
   0x6   : > { %216 = sbr.rel (%p213_p2) target bundleno = 1432 (0x598), region = 44 }
   0xb   : > { %v9151_v0 = vld [vmem:[%s15951_s2 + $0x4] sm:$0xf]  ;;  %vm472_vm0 = vcmask 1043456   ;;  %v324_v1 = vld [vmem:[%s15951_s2] sm:$0xf]  ;;  %p242_p3 = scmp.lt.s32.totalorder %s9144_s22, 1 }
   0xc   : > { %10503 = vmatprep.subr.msk.mxu0 %vm472_vm0, %v9151_v0  ;;  %10559 = vmatprep.subr.msk.mxu1 %vm472_vm0, %v324_v1  ;;  %v9226_v2 = vld [vmem:[%s15951_s2 + $0x8] sm:$0xf]  ;;  %v9264_v3 = vld [vmem:[%s15951_s2 + $0xc] sm:$0xf]  ;;  %vm363_vm1 = vcmask 31744   ;;  %vm4724_vm2 = vcmask 29696  }
   0xd   : > { %10504 = vmatpush3.msk.msra.mxu0 %vm472_vm0, %v9151_v0  ;;  %s16389_s22 = smov (!%p242_p3, %s9144_s22), 1  ;;  %10560 = vmatpush3.msk.msra.mxu1 %vm472_vm0, %v324_v1  ;;  %v11622_v10 = vld [vmem:[%s15951_s2 + $0x10] sm:$0xf]  ;;  %v11701_v47 = vld [vmem:[%s15951_s2 + $0x14] sm:$0xf] }
   0xe   : > { %10615 = vmatprep.subr.msk.mxu0 %vm472_vm0, %v9226_v2  ;;  %10671 = vmatprep.subr.msk.mxu1 %vm472_vm0, %v9264_v3  ;;  %s11511_s7 = smul.u32 328, %s16389_s22 }
  0x10   : > { %s11607_s10 = scalar_lea.vmem %s15949_s0, %s11511_s7  ;;  %s14225_s15 = scalar_lea.vmem %s15955_s6, %s11511_s7 }
  0x11   : > { %v325_v4 = vld [vmem:[%s11607_s10 + $0x1] sm:$0xff]  ;;  %v326_v6 = vld [vmem:[%s11607_s10 + $0x9] sm:$0xff]  ;;  %v327_v8 = vld [vmem:[%s11607_s10 + $0x11] sm:$0xff] }
  0x12   : > { %v288_v5 = vld [vmem:[%s11607_s10] sm:$0xff]  ;;  %10505 = vmatprep.mubr.msk.f32.mxu0 %vm363_vm1, %v325_v4  ;;  %v289_v7 = vld [vmem:[%s11607_s10 + $0x8] sm:$0xff]  ;;  %v290_v9 = vld [vmem:[%s11607_s10 + $0x10] sm:$0xff] }
  0x13   : > { %10561 = vmatprep.mubr.msk.f32.mxu1 %vm363_vm1, %v288_v5  ;;  %10506 = vmatmul.mubr.msk.f32.vlgmr.msra.gmra.mxu0 %vm363_vm1, %v326_v6  ;;  %v328_v11 = vld [vmem:[%s11607_s10 + $0x19] sm:$0xff]  ;;  %v329_v13 = vld [vmem:[%s11607_s10 + $0x21] sm:$0xff]  ;;  %v330_v15 = vld [vmem:[%s11607_s10 + $0x29] sm:$0xff] }
  0x14   : > { %10562 = vmatmul.mubr.msk.f32.vlgmr.msra.gmra.mxu1 %vm363_vm1, %v289_v7  ;;  %10616 = vmatpush3.msk.msra.mxu0 %vm472_vm0, %v9226_v2  ;;  %v291_v12 = vld [vmem:[%s11607_s10 + $0x18] sm:$0xff]  ;;  %v292_v14 = vld [vmem:[%s11607_s10 + $0x20] sm:$0xff]  ;;  %v293_v16 = vld [vmem:[%s11607_s10 + $0x28] sm:$0xff] }
  0x15   : > { %10508 = vmatprep.mubr.msk.f32.mxu0 %vm363_vm1, %v327_v8  ;;  %10564 = vmatprep.mubr.msk.f32.mxu1 %vm363_vm1, %v290_v9  ;;  %v331_v17 = vld [vmem:[%s11607_s10 + $0x31] sm:$0xff]  ;;  %v332_v19 = vld [vmem:[%s11607_s10 + $0x39] sm:$0xff]  ;;  %v333_v21 = vld [vmem:[%s11607_s10 + $0x41] sm:$0xff] }
  0x16   : > { %10672 = vmatpush3.msk.msra.mxu1 %vm472_vm0, %v9264_v3  ;;  %10727 = vmatprep.subr.msk.mxu0 %vm472_vm0, %v11622_v10  ;;  %v294_v18 = vld [vmem:[%s11607_s10 + $0x30] sm:$0xff]  ;;  %v295_v20 = vld [vmem:[%s11607_s10 + $0x38] sm:$0xff]  ;;  %v296_v22 = vld [vmem:[%s11607_s10 + $0x40] sm:$0xff] }
  0x17   : > { %10509 = vmatmul.mubr.msk.f32.gmra.mxu0 %vm363_vm1, %v328_v11  ;;  %v334_v23 = vld [vmem:[%s11607_s10 + $0x49] sm:$0xff]  ;;  %v335_v25 = vld [vmem:[%s11607_s10 + $0x51] sm:$0xff]  ;;  %v336_v27 = vld [vmem:[%s11607_s10 + $0x59] sm:$0xff]  ;;  %10783 = vmatprep.subr.msk.mxu1 %vm472_vm0, %v11701_v47 }
  0x18   : > { %10565 = vmatmul.mubr.msk.f32.gmra.mxu1 %vm363_vm1, %v291_v12  ;;  %10511 = vmatprep.mubr.msk.f32.mxu0 %vm363_vm1, %v329_v13  ;;  %v297_v24 = vld [vmem:[%s11607_s10 + $0x48] sm:$0xff]  ;;  %v298_v26 = vld [vmem:[%s11607_s10 + $0x50] sm:$0xff]  ;;  %v299_v28 = vld [vmem:[%s11607_s10 + $0x58] sm:$0xff] }
  0x19   : > { %10567 = vmatprep.mubr.msk.f32.mxu1 %vm363_vm1, %v292_v14  ;;  %v337_v29 = vld [vmem:[%s11607_s10 + $0x61] sm:$0xff]  ;;  %v338_v31 = vld [vmem:[%s11607_s10 + $0x69] sm:$0xff]  ;;  %v339_v33 = vld [vmem:[%s11607_s10 + $0x71] sm:$0xff] }
  0x1a   : > { %v300_v30 = vld [vmem:[%s11607_s10 + $0x60] sm:$0xff]  ;;  %v301_v32 = vld [vmem:[%s11607_s10 + $0x68] sm:$0xff]  ;;  %v302_v34 = vld [vmem:[%s11607_s10 + $0x70] sm:$0xff] }
  0x1b   : > { %10512 = vmatmul.mubr.msk.f32.gmra.mxu0 %vm363_vm1, %v330_v15  ;;  %v340_v35 = vld [vmem:[%s11607_s10 + $0x79] sm:$0xff]  ;;  %v341_v37 = vld [vmem:[%s11607_s10 + $0x81] sm:$0xff]  ;;  %v342_v39 = vld [vmem:[%s11607_s10 + $0x89] sm:$0xff] }
  0x1c   : > { %10568 = vmatmul.mubr.msk.f32.gmra.mxu1 %vm363_vm1, %v293_v16  ;;  %10514 = vmatprep.mubr.msk.f32.mxu0 %vm363_vm1, %v331_v17  ;;  %v303_v36 = vld [vmem:[%s11607_s10 + $0x78] sm:$0xff]  ;;  %v304_v38 = vld [vmem:[%s11607_s10 + $0x80] sm:$0xff]  ;;  %v305_v40 = vld [vmem:[%s11607_s10 + $0x88] sm:$0xff] }
  0x1d   : > { %10570 = vmatprep.mubr.msk.f32.mxu1 %vm363_vm1, %v294_v18  ;;  %v343_v41 = vld [vmem:[%s11607_s10 + $0x91] sm:$0xff]  ;;  %v344_v43 = vld [vmem:[%s11607_s10 + $0x99] sm:$0xff]  ;;  %v345_v45 = vld [vmem:[%s11607_s10 + $0xa1] sm:$0xff] }
  0x1e   : > { %v306_v42 = vld [vmem:[%s11607_s10 + $0x90] sm:$0xff]  ;;  %v307_v44 = vld [vmem:[%s11607_s10 + $0x98] sm:$0xff]  ;;  %v308_v46 = vld [vmem:[%s11607_s10 + $0xa0] sm:$0xff] }
  0x1f   : > { %10515 = vmatmul.mubr.msk.f32.gmra.mxu0 %vm363_vm1, %v332_v19  ;;  %v346_v48 = vld [vmem:[%s11607_s10 + $0xa9] sm:$0xff]  ;;  %v347_v50 = vld [vmem:[%s11607_s10 + $0xb1] sm:$0xff]  ;;  %v348_v52 = vld [vmem:[%s11607_s10 + $0xb9] sm:$0xff] }
  0x20   : > { %10571 = vmatmul.mubr.msk.f32.gmra.mxu1 %vm363_vm1, %v295_v20  ;;  %10517 = vmatprep.mubr.msk.f32.mxu0 %vm363_vm1, %v333_v21  ;;  %v309_v49 = vld [vmem:[%s11607_s10 + $0xa8] sm:$0xff]  ;;  %v310_v51 = vld [vmem:[%s11607_s10 + $0xb0] sm:$0xff]  ;;  %v311_v53 = vld [vmem:[%s11607_s10 + $0xb8] sm:$0xff] }
  0x21   : > { %10573 = vmatprep.mubr.msk.f32.mxu1 %vm363_vm1, %v296_v22  ;;  %v349_v54 = vld [vmem:[%s11607_s10 + $0xc1] sm:$0xff]  ;;  %v350_v56 = vld [vmem:[%s11607_s10 + $0xc9] sm:$0xff]  ;;  %v351_v58 = vld [vmem:[%s11607_s10 + $0xd1] sm:$0xff] }
  0x22   : > { %v312_v55 = vld [vmem:[%s11607_s10 + $0xc0] sm:$0xff]  ;;  %v313_v57 = vld [vmem:[%s11607_s10 + $0xc8] sm:$0xff]  ;;  %v314_v59 = vld [vmem:[%s11607_s10 + $0xd0] sm:$0xff] }
  0x23   : > { %10518 = vmatmul.mubr.msk.f32.gmra.mxu0 %vm363_vm1, %v334_v23  ;;  %v352_v60 = vld [vmem:[%s11607_s10 + $0xd9] sm:$0xff]  ;;  %v353_v62 = vld [vmem:[%s11607_s10 + $0xe1] sm:$0xff]  ;;  %v354_v0 = vld [vmem:[%s11607_s10 + $0xe9] sm:$0xff] }
  0x24   : > { %10574 = vmatmul.mubr.msk.f32.gmra.mxu1 %vm363_vm1, %v297_v24  ;;  %10520 = vmatprep.mubr.msk.f32.mxu0 %vm363_vm1, %v335_v25  ;;  %v315_v61 = vld [vmem:[%s11607_s10 + $0xd8] sm:$0xff]  ;;  %v316_v63 = vld [vmem:[%s11607_s10 + $0xe0] sm:$0xff]  ;;  %v317_v1 = vld [vmem:[%s11607_s10 + $0xe8] sm:$0xff] }
  0x25   : > { %10576 = vmatprep.mubr.msk.f32.mxu1 %vm363_vm1, %v298_v26  ;;  %v355_v2 = vld [vmem:[%s11607_s10 + $0xf1] sm:$0xff]  ;;  %v356_v4 = vld [vmem:[%s11607_s10 + $0xf9] sm:$0xff]  ;;  %v357_v6 = vld [vmem:[%s11607_s10 + $0x101] sm:$0xff] }
  0x26   : > { %v318_v3 = vld [vmem:[%s11607_s10 + $0xf0] sm:$0xff]  ;;  %v319_v5 = vld [vmem:[%s11607_s10 + $0xf8] sm:$0xff]  ;;  %v320_v7 = vld [vmem:[%s11607_s10 + $0x100] sm:$0xff] }
  0x27   : > { %10521 = vmatmul.mubr.msk.f32.gmra.mxu0 %vm363_vm1, %v336_v27  ;;  %v358_v8 = vld [vmem:[%s11607_s10 + $0x109] sm:$0xff]  ;;  %v359_v11 = vld [vmem:[%s11607_s10 + $0x111] sm:$0xff]  ;;  %v360_v13 = vld [vmem:[%s11607_s10 + $0x119] sm:$0xff] }
  0x28   : > { %10577 = vmatmul.mubr.msk.f32.gmra.mxu1 %vm363_vm1, %v299_v28  ;;  %10523 = vmatprep.mubr.msk.f32.mxu0 %vm363_vm1, %v337_v29  ;;  %v321_v9 = vld [vmem:[%s11607_s10 + $0x108] sm:$0xff]  ;;  %v322_v12 = vld [vmem:[%s11607_s10 + $0x110] sm:$0xff]  ;;  %v323_v14 = vld [vmem:[%s11607_s10 + $0x118] sm:$0xff] }
  0x29   : > { %10579 = vmatprep.mubr.msk.f32.mxu1 %vm363_vm1, %v300_v30  ;;  %v1077_v15 = vld [vmem:[%s11607_s10 + $0x2] sm:$0xff]  ;;  %v1507_v16 = vld [vmem:[%s11607_s10 + $0x12] sm:$0xff]  ;;  %v1078_v17 = vld [vmem:[%s11607_s10 + $0xa] sm:$0xff] }
  0x2a   : > { %v1508_v18 = vld [vmem:[%s11607_s10 + $0x1a] sm:$0xff]  ;;  %v1509_v19 = vld [vmem:[%s11607_s10 + $0x22] sm:$0xff]  ;;  %v1510_v21 = vld [vmem:[%s11607_s10 + $0x2a] sm:$0xff] }
  0x2b   : > { %10524 = vmatmul.mubr.msk.f32.gmra.mxu0 %vm363_vm1, %v338_v31  ;;  %v11781_v20 = vld [vmem:[%s15951_s2 + $0x18] sm:$0xf]  ;;  %v1513_v23 = vld [vmem:[%s11607_s10 + $0x42] sm:$0xff]  ;;  %v1514_v24 = vld [vmem:[%s11607_s10 + $0x4a] sm:$0xff] }
  0x2c   : > { %10580 = vmatmul.mubr.msk.f32.gmra.mxu1 %vm363_vm1, %v301_v32  ;;  %10526 = vmatprep.mubr.msk.f32.mxu0 %vm363_vm1, %v339_v33  ;;  %v1511_v22 = vld [vmem:[%s11607_s10 + $0x32] sm:$0xff]  ;;  %v1516_v26 = vld [vmem:[%s11607_s10 + $0x5a] sm:$0xff]  ;;  %v1517_v28 = vld [vmem:[%s11607_s10 + $0x62] sm:$0xff] }
  0x2d   : > { %10582 = vmatprep.mubr.msk.f32.mxu1 %vm363_vm1, %v302_v34  ;;  %v1515_v25 = vld [vmem:[%s11607_s10 + $0x52] sm:$0xff]  ;;  %v11813_v27 = vld [vmem:[%s15951_s2 + $0x1c] sm:$0xf]  ;;  %v1518_v29 = vld [vmem:[%s11607_s10 + $0x6a] sm:$0xff] }
  0x2e   : > { %v1519_v30 = vld [vmem:[%s11607_s10 + $0x72] sm:$0xff]  ;;  %v1520_v31 = vld [vmem:[%s11607_s10 + $0x7a] sm:$0xff]  ;;  %v1521_v32 = vld [vmem:[%s11607_s10 + $0x82] sm:$0xff] }
  0x2f   : > { %10527 = vmatmul.mubr.msk.f32.gmra.mxu0 %vm363_vm1, %v340_v35  ;;  %v1522_v33 = vld [vmem:[%s11607_s10 + $0x8a] sm:$0xff]  ;;  %v1523_v34 = vld [vmem:[%s11607_s10 + $0x92] sm:$0xff]  ;;  %v1524_v35 = vld [vmem:[%s11607_s10 + $0x9a] sm:$0xff] }
  0x30   : > { %10583 = vmatmul.mubr.msk.f32.gmra.mxu1 %vm363_vm1, %v303_v36  ;;  %10529 = vmatprep.mubr.msk.f32.mxu0 %vm363_vm1, %v341_v37  ;;  %v1525_v36 = vld [vmem:[%s11607_s10 + $0xa2] sm:$0xff]  ;;  %v1526_v37 = vld [vmem:[%s11607_s10 + $0xaa] sm:$0xff] }
  0x31   : > { %10585 = vmatprep.mubr.msk.f32.mxu1 %vm363_vm1, %v304_v38  ;;  %v1527_v38 = vld [vmem:[%s11607_s10 + $0xb2] sm:$0xff] }
  0x33   : > { %10530 = vmatmul.mubr.msk.f32.gmra.mxu0 %vm363_vm1, %v342_v39  ;;  %v1528_v39 = vld [vmem:[%s11607_s10 + $0xba] sm:$0xff] }
  0x34   : > { %10586 = vmatmul.mubr.msk.f32.gmra.mxu1 %vm363_vm1, %v305_v40  ;;  %10532 = vmatprep.mubr.msk.f32.mxu0 %vm363_vm1, %v343_v41  ;;  %v1529_v40 = vld [vmem:[%s11607_s10 + $0xc2] sm:$0xff]  ;;  %v1530_v41 = vld [vmem:[%s11607_s10 + $0xca] sm:$0xff] }
  0x35   : > { %10588 = vmatprep.mubr.msk.f32.mxu1 %vm363_vm1, %v306_v42  ;;  %v1531_v42 = vld [vmem:[%s11607_s10 + $0xd2] sm:$0xff] }
  0x37   : > { %10533 = vmatmul.mubr.msk.f32.gmra.mxu0 %vm363_vm1, %v344_v43  ;;  %v1532_v43 = vld [vmem:[%s11607_s10 + $0xda] sm:$0xff] }
  0x38   : > { %10589 = vmatmul.mubr.msk.f32.gmra.mxu1 %vm363_vm1, %v307_v44  ;;  %10535 = vmatprep.mubr.msk.f32.mxu0 %vm363_vm1, %v345_v45  ;;  %v1533_v44 = vld [vmem:[%s11607_s10 + $0xe2] sm:$0xff]  ;;  %v1534_v45 = vld [vmem:[%s11607_s10 + $0xea] sm:$0xff] }
  0x39   : > { %10591 = vmatprep.mubr.msk.f32.mxu1 %vm363_vm1, %v308_v46  ;;  %v1535_v46 = vld [vmem:[%s11607_s10 + $0xf2] sm:$0xff] }
  0x3b   : > { %10536 = vmatmul.mubr.msk.f32.gmra.mxu0 %vm363_vm1, %v346_v48  ;;  %v1537_v48 = vld [vmem:[%s11607_s10 + $0x102] sm:$0xff] }
  0x3c   : > { %10592 = vmatmul.mubr.msk.f32.gmra.mxu1 %vm363_vm1, %v309_v49  ;;  %10538 = vmatprep.mubr.msk.f32.mxu0 %vm363_vm1, %v347_v50  ;;  %v1538_v49 = vld [vmem:[%s11607_s10 + $0x10a] sm:$0xff]  ;;  %v1539_v50 = vld [vmem:[%s11607_s10 + $0x112] sm:$0xff] }
  0x3d   : > { %10594 = vmatprep.mubr.msk.f32.mxu1 %vm363_vm1, %v310_v51  ;;  %v1540_v51 = vld [vmem:[%s11607_s10 + $0x11a] sm:$0xff] }
  0x3f   : > { %10539 = vmatmul.mubr.msk.f32.gmra.mxu0 %vm363_vm1, %v348_v52  ;;  %v1541_v52 = vld [vmem:[%s11607_s10 + $0x122] sm:$0xff] }
  0x40   : > { %10595 = vmatmul.mubr.msk.f32.gmra.mxu1 %vm363_vm1, %v311_v53  ;;  %10541 = vmatprep.mubr.msk.f32.mxu0 %vm363_vm1, %v349_v54  ;;  %v1542_v53 = vld [vmem:[%s11607_s10 + $0x12a] sm:$0xff]  ;;  %v1937_v54 = vld [vmem:[%s11607_s10 + $0x13] sm:$0xff] }
  0x41   : > { %10597 = vmatprep.mubr.msk.f32.mxu1 %vm363_vm1, %v312_v55  ;;  %v2367_v55 = vld [vmem:[%s11607_s10 + $0x14] sm:$0xff] }
  0x43   : > { %10542 = vmatmul.mubr.msk.f32.gmra.mxu0 %vm363_vm1, %v350_v56  ;;  %v1938_v56 = vld [vmem:[%s11607_s10 + $0x1b] sm:$0xff] }
  0x44   : > { %10598 = vmatmul.mubr.msk.f32.gmra.mxu1 %vm363_vm1, %v313_v57  ;;  %10544 = vmatprep.mubr.msk.f32.mxu0 %vm363_vm1, %v351_v58  ;;  %v2368_v57 = vld [vmem:[%s11607_s10 + $0x1c] sm:$0xff] }
  0x45   : > { %10600 = vmatprep.mubr.msk.f32.mxu1 %vm363_vm1, %v314_v59  ;;  %v1939_v58 = vld [vmem:[%s11607_s10 + $0x23] sm:$0xff] }
  0x46   : > { %v11905_v59 = vld [vmem:[%s11607_s10 + $0x24] sm:$0xff] }
  0x47   : > { %10545 = vmatmul.mubr.msk.f32.gmra.mxu0 %vm363_vm1, %v352_v60  ;;  %v11912_v60 = vld [vmem:[%s15951_s2 + $0x20] sm:$0xf] }
  0x48   : > { %10601 = vmatmul.mubr.msk.f32.gmra.mxu1 %vm363_vm1, %v315_v61  ;;  %10547 = vmatprep.mubr.msk.f32.mxu0 %vm363_vm1, %v353_v62  ;;  %v1940_v61 = vld [vmem:[%s11607_s10 + $0x2b] sm:$0xff] }
  0x49   : > { %10603 = vmatprep.mubr.msk.f32.mxu1 %vm363_vm1, %v316_v63  ;;  %v11919_v62 = vld [vmem:[%s11607_s10 + $0x2c] sm:$0xff] }
  0x4a   : > { %v1941_v63 = vld [vmem:[%s11607_s10 + $0x33] sm:$0xff] }
  0x4b   : > { %10548 = vmatmul.mubr.msk.f32.gmra.mxu0 %vm363_vm1, %v354_v0  ;;  %v11925_v0 = vld [vmem:[%s11607_s10 + $0x34] sm:$0xff] }
  0x4c   : > { %10604 = vmatmul.mubr.msk.f32.gmra.mxu1 %vm363_vm1, %v317_v1  ;;  %10550 = vmatprep.mubr.msk.f32.mxu0 %vm363_vm1, %v355_v2  ;;  %v1942_v1 = vld [vmem:[%s11607_s10 + $0x3b] sm:$0xff] }
  0x4d   : > { %10606 = vmatprep.mubr.msk.f32.mxu1 %vm363_vm1, %v318_v3  ;;  %v11939_v2 = vld [vmem:[%s11607_s10 + $0x3c] sm:$0xff] }
  0x4e   : > { %v1943_v3 = vld [vmem:[%s11607_s10 + $0x43] sm:$0xff] }
  0x4f   : > { %10551 = vmatmul.mubr.msk.f32.gmra.mxu0 %vm363_vm1, %v356_v4  ;;  %v11943_v4 = vld [vmem:[%s11607_s10 + $0x44] sm:$0xff] }
  0x50   : > { %10607 = vmatmul.mubr.msk.f32.gmra.mxu1 %vm363_vm1, %v319_v5  ;;  %10553 = vmatprep.mubr.msk.f32.mxu0 %vm363_vm1, %v357_v6  ;;  %v1944_v5 = vld [vmem:[%s11607_s10 + $0x4b] sm:$0xff] }
  0x51   : > { %10609 = vmatprep.mubr.msk.f32.mxu1 %vm363_vm1, %v320_v7  ;;  %v11953_v6 = vld [vmem:[%s11607_s10 + $0x4c] sm:$0xff] }
  0x52   : > { %v1945_v7 = vld [vmem:[%s11607_s10 + $0x53] sm:$0xff] }
  0x53   : > { %10554 = vmatmul.mubr.msk.f32.gmra.mxu0 %vm363_vm1, %v358_v8  ;;  %v11957_v8 = vld [vmem:[%s11607_s10 + $0x54] sm:$0xff] }
  0x54   : > { %10610 = vmatmul.mubr.msk.f32.gmra.mxu1 %vm363_vm1, %v321_v9  ;;  %10556 = vmatprep.mubr.msk.f32.mxu0 %vm363_vm1, %v359_v11  ;;  %v1946_v9 = vld [vmem:[%s11607_s10 + $0x5b] sm:$0xff] }
  0x55   : > { %10612 = vmatprep.mubr.msk.f32.mxu1 %vm363_vm1, %v322_v12  ;;  %v11967_v11 = vld [vmem:[%s11607_s10 + $0x5c] sm:$0xff] }
  0x56   : > { %v1947_v12 = vld [vmem:[%s11607_s10 + $0x63] sm:$0xff] }
  0x57   : > { %10557 = vmatmul.mubr.msk.f32.gmra.mxu0 %vm363_vm1, %v360_v13  ;;  %v11971_v13 = vld [vmem:[%s11607_s10 + $0x64] sm:$0xff] }
  0x58   : > { %10613 = vmatmul.mubr.msk.f32.gmra.mxu1 %vm363_vm1, %v323_v14  ;;  %10617 = vmatprep.mubr.msk.f32.mxu0 %vm363_vm1, %v1077_v15  ;;  %v1948_v14 = vld [vmem:[%s11607_s10 + $0x6b] sm:$0xff] }
  0x59   : > { %10673 = vmatprep.mubr.msk.f32.mxu1 %vm363_vm1, %v1507_v16  ;;  %v11981_v15 = vld [vmem:[%s11607_s10 + $0x6c] sm:$0xff] }
  0x5b   : > { %10618 = vmatmul.mubr.msk.f32.vlgmr.msra.gmra.mxu0 %vm363_vm1, %v1078_v17  ;;  %v11985_v17 = vld [vmem:[%s11607_s10 + $0x74] sm:$0xff] }
  0x5c   : > { %10674 = vmatmul.mubr.msk.f32.vlgmr.msra.gmra.mxu1 %vm363_vm1, %v1508_v18  ;;  %10728 = vmatpush3.msk.msra.mxu0 %vm472_vm0, %v11622_v10  ;;  %v1512_v10 = vld [vmem:[%s11607_s10 + $0x3a] sm:$0xff] }
  0x5d   : > { %10620 = vmatprep.mubr.msk.f32.mxu0 %vm363_vm1, %v1507_v16  ;;  %10676 = vmatprep.mubr.msk.f32.mxu1 %vm363_vm1, %v1509_v19  ;;  %v1949_v16 = vld [vmem:[%s11607_s10 + $0x73] sm:$0xff] }
  0x5e   : > { %10784 = vmatpush3.msk.msra.mxu1 %vm472_vm0, %v11701_v47  ;;  %10839 = vmatprep.subr.msk.mxu0 %vm472_vm0, %v11781_v20  ;;  %v1536_v47 = vld [vmem:[%s11607_s10 + $0xfa] sm:$0xff] }
  0x5f   : > { %10621 = vmatmul.mubr.msk.f32.gmra.mxu0 %vm363_vm1, %v1508_v18  ;;  %10895 = vmatprep.subr.msk.mxu1 %vm472_vm0, %v11813_v27  ;;  %v252_v18 = vld [vmem:[%s15950_s1] sm:$0xff] }
  0x60   : > { %10677 = vmatmul.mubr.msk.f32.gmra.mxu1 %vm363_vm1, %v1510_v21  ;;  %10623 = vmatprep.mubr.msk.f32.mxu0 %vm363_vm1, %v1509_v19  ;;  %v1950_v19 = vld [vmem:[%s11607_s10 + $0x7b] sm:$0xff] }
  0x61   : > { %10679 = vmatprep.mubr.msk.f32.mxu1 %vm363_vm1, %v1511_v22 }
  0x63   : > { %10624 = vmatmul.mubr.msk.f32.gmra.mxu0 %vm363_vm1, %v1510_v21  ;;  %v1951_v21 = vld [vmem:[%s11607_s10 + $0x83] sm:$0xff] }
  0x64   : > { %10680 = vmatmul.mubr.msk.f32.gmra.mxu1 %vm363_vm1, %v1512_v10  ;;  %10626 = vmatprep.mubr.msk.f32.mxu0 %vm363_vm1, %v1511_v22  ;;  %v12002_v22 = vld [vmem:[%s11607_s10 + $0x84] sm:$0xff] }
  0x65   : > { %10682 = vmatprep.mubr.msk.f32.mxu1 %vm363_vm1, %v1513_v23 }
  0x67   : > { %10627 = vmatmul.mubr.msk.f32.gmra.mxu0 %vm363_vm1, %v1512_v10  ;;  %v11536_v10 = vmov 0  }
  0x68   : > { %10683 = vmatmul.mubr.msk.f32.gmra.mxu1 %vm363_vm1, %v1514_v24  ;;  %10629 = vmatprep.mubr.msk.f32.mxu0 %vm363_vm1, %v1513_v23  ;;  %v254_v23 = vld [vmem:[%s15950_s1 + $0x10] sm:$0xff] }
  0x69   : > { %10685 = vmatprep.mubr.msk.f32.mxu1 %vm363_vm1, %v1515_v25  ;;  %11522 = vset.pattern.permute.xlu0 %v11536_v10 }
  0x6a   : > { %11523 = vset.pattern.permute.xlu1 %v11536_v10  ;;  %4132 = vperm.xlu0 %11522, %v252_v18   ;;  %v12144_v18 = vld [vmem:[%s11607_s10 + $0xf4] sm:$0xff] }
  0x6b   : > { %10630 = vmatmul.mubr.msk.f32.gmra.mxu0 %vm363_vm1, %v1514_v24  ;;  %v253_v24 = vld [vmem:[%s15950_s1 + $0x8] sm:$0xff]  ;;  %4142 = vperm.xlu1 %11523, %v254_v23   ;;  %v267_v23 = vld [vmem:[%s15950_s1 + $0x78] sm:$0xff] }
  0x6c   : > { %10686 = vmatmul.mubr.msk.f32.gmra.mxu1 %vm363_vm1, %v1516_v26  ;;  %10632 = vmatprep.mubr.msk.f32.mxu0 %vm363_vm1, %v1515_v25  ;;  %v1952_v25 = vld [vmem:[%s11607_s10 + $0x8b] sm:$0xff] }
  0x6d   : > { %10688 = vmatprep.mubr.msk.f32.mxu1 %vm363_vm1, %v1517_v28 }
  0x6e   : > { %4137 = vperm.xlu0 %11522, %v253_v24   ;;  %v268_v24 = vld [vmem:[%s15950_s1 + $0x80] sm:$0xff] }
  0x6f   : > { %10633 = vmatmul.mubr.msk.f32.gmra.mxu0 %vm363_vm1, %v1516_v26  ;;  %v12018_v26 = vld [vmem:[%s11607_s10 + $0x8c] sm:$0xff] }
  0x70   : > { %10689 = vmatmul.mubr.msk.f32.gmra.mxu1 %vm363_vm1, %v1518_v29  ;;  %10635 = vmatprep.mubr.msk.f32.mxu0 %vm363_vm1, %v1517_v28  ;;  %v12022_v28 = vld [vmem:[%s11607_s10 + $0x94] sm:$0xff] }
  0x71   : > { %10691 = vmatprep.mubr.msk.f32.mxu1 %vm363_vm1, %v1519_v30 }
  0x73   : > { %10636 = vmatmul.mubr.msk.f32.gmra.mxu0 %vm363_vm1, %v1518_v29  ;;  %v255_v29 = vld [vmem:[%s15950_s1 + $0x18] sm:$0xff] }
  0x74   : > { %10692 = vmatmul.mubr.msk.f32.gmra.mxu1 %vm363_vm1, %v1520_v31  ;;  %10638 = vmatprep.mubr.msk.f32.mxu0 %vm363_vm1, %v1519_v30  ;;  %v256_v30 = vld [vmem:[%s15950_s1 + $0x20] sm:$0xff] }
  0x75   : > { %10694 = vmatprep.mubr.msk.f32.mxu1 %vm363_vm1, %v1521_v32  ;;  %4147 = vperm.xlu1 %11523, %v255_v29   ;;  %v12164_v29 = vld [vmem:[%s11607_s10 + $0xfc] sm:$0xff] }
  0x76   : > { %4152 = vperm.xlu0 %11522, %v256_v30  }
  0x77   : > { %10639 = vmatmul.mubr.msk.f32.gmra.mxu0 %vm363_vm1, %v1520_v31  ;;  %v1954_v31 = vld [vmem:[%s11607_s10 + $0x9b] sm:$0xff] }
  0x78   : > { %10695 = vmatmul.mubr.msk.f32.gmra.mxu1 %vm363_vm1, %v1522_v33  ;;  %10641 = vmatprep.mubr.msk.f32.mxu0 %vm363_vm1, %v1521_v32  ;;  %v12038_v32 = vld [vmem:[%s11607_s10 + $0x9c] sm:$0xff] }
  0x79   : > { %10697 = vmatprep.mubr.msk.f32.mxu1 %vm363_vm1, %v1523_v34 }
  0x7b   : > { %10642 = vmatmul.mubr.msk.f32.gmra.mxu0 %vm363_vm1, %v1522_v33  ;;  %v1955_v33 = vld [vmem:[%s11607_s10 + $0xa3] sm:$0xff] }
  0x7c   : > { %10698 = vmatmul.mubr.msk.f32.gmra.mxu1 %vm363_vm1, %v1524_v35  ;;  %10644 = vmatprep.mubr.msk.f32.mxu0 %vm363_vm1, %v1523_v34  ;;  %v12042_v34 = vld [vmem:[%s11607_s10 + $0xa4] sm:$0xff] }
  0x7d   : > { %10700 = vmatprep.mubr.msk.f32.mxu1 %vm363_vm1, %v1525_v36 }
  0x7f   : > { %10645 = vmatmul.mubr.msk.f32.gmra.mxu0 %vm363_vm1, %v1524_v35  ;;  %v257_v35 = vld [vmem:[%s15950_s1 + $0x28] sm:$0xff] }
  0x80   : > { %10701 = vmatmul.mubr.msk.f32.gmra.mxu1 %vm363_vm1, %v1526_v37  ;;  %10647 = vmatprep.mubr.msk.f32.mxu0 %vm363_vm1, %v1525_v36  ;;  %v258_v36 = vld [vmem:[%s15950_s1 + $0x30] sm:$0xff] }
  0x81   : > { %10703 = vmatprep.mubr.msk.f32.mxu1 %vm363_vm1, %v1527_v38  ;;  %4157 = vperm.xlu1 %11523, %v257_v35   ;;  %v12168_v35 = vld [vmem:[%s11607_s10 + $0x104] sm:$0xff] }
  0x82   : > { %4162 = vperm.xlu0 %11522, %v258_v36  }
  0x83   : > { %10648 = vmatmul.mubr.msk.f32.gmra.mxu0 %vm363_vm1, %v1526_v37  ;;  %v1956_v37 = vld [vmem:[%s11607_s10 + $0xab] sm:$0xff] }
  0x84   : > { %10704 = vmatmul.mubr.msk.f32.gmra.mxu1 %vm363_vm1, %v1528_v39  ;;  %10650 = vmatprep.mubr.msk.f32.mxu0 %vm363_vm1, %v1527_v38  ;;  %v12058_v38 = vld [vmem:[%s11607_s10 + $0xac] sm:$0xff] }
  0x85   : > { %10706 = vmatprep.mubr.msk.f32.mxu1 %vm363_vm1, %v1529_v40 }
  0x87   : > { %10651 = vmatmul.mubr.msk.f32.gmra.mxu0 %vm363_vm1, %v1528_v39  ;;  %v1957_v39 = vld [vmem:[%s11607_s10 + $0xb3] sm:$0xff] }
  0x88   : > { %10707 = vmatmul.mubr.msk.f32.gmra.mxu1 %vm363_vm1, %v1530_v41  ;;  %10653 = vmatprep.mubr.msk.f32.mxu0 %vm363_vm1, %v1529_v40  ;;  %v12062_v40 = vld [vmem:[%s11607_s10 + $0xb4] sm:$0xff] }
  0x89   : > { %10709 = vmatprep.mubr.msk.f32.mxu1 %vm363_vm1, %v1531_v42 }
  0x8b   : > { %10654 = vmatmul.mubr.msk.f32.gmra.mxu0 %vm363_vm1, %v1530_v41  ;;  %v259_v41 = vld [vmem:[%s15950_s1 + $0x38] sm:$0xff] }
  0x8c   : > { %10710 = vmatmul.mubr.msk.f32.gmra.mxu1 %vm363_vm1, %v1532_v43  ;;  %10656 = vmatprep.mubr.msk.f32.mxu0 %vm363_vm1, %v1531_v42  ;;  %v260_v42 = vld [vmem:[%s15950_s1 + $0x40] sm:$0xff] }
  0x8d   : > { %10712 = vmatprep.mubr.msk.f32.mxu1 %vm363_vm1, %v1533_v44  ;;  %4167 = vperm.xlu1 %11523, %v259_v41   ;;  %v269_v41 = vld [vmem:[%s15950_s1 + $0x88] sm:$0xff] }
  0x8e   : > { %4172 = vperm.xlu0 %11522, %v260_v42   ;;  %v270_v42 = vld [vmem:[%s15950_s1 + $0x90] sm:$0xff] }
  0x8f   : > { %10657 = vmatmul.mubr.msk.f32.gmra.mxu0 %vm363_vm1, %v1532_v43  ;;  %v1958_v43 = vld [vmem:[%s11607_s10 + $0xbb] sm:$0xff] }
  0x90   : > { %10713 = vmatmul.mubr.msk.f32.gmra.mxu1 %vm363_vm1, %v1534_v45  ;;  %10659 = vmatprep.mubr.msk.f32.mxu0 %vm363_vm1, %v1533_v44  ;;  %v12078_v44 = vld [vmem:[%s11607_s10 + $0xbc] sm:$0xff] }
  0x91   : > { %10715 = vmatprep.mubr.msk.f32.mxu1 %vm363_vm1, %v1535_v46 }
  0x93   : > { %10660 = vmatmul.mubr.msk.f32.gmra.mxu0 %vm363_vm1, %v1534_v45  ;;  %v1959_v45 = vld [vmem:[%s11607_s10 + $0xc3] sm:$0xff] }
  0x94   : > { %10716 = vmatmul.mubr.msk.f32.gmra.mxu1 %vm363_vm1, %v1536_v47  ;;  %10662 = vmatprep.mubr.msk.f32.mxu0 %vm363_vm1, %v1535_v46  ;;  %v12082_v46 = vld [vmem:[%s11607_s10 + $0xc4] sm:$0xff] }
  0x95   : > { %10718 = vmatprep.mubr.msk.f32.mxu1 %vm363_vm1, %v1537_v48 }
  0x97   : > { %10663 = vmatmul.mubr.msk.f32.gmra.mxu0 %vm363_vm1, %v1536_v47  ;;  %v261_v47 = vld [vmem:[%s15950_s1 + $0x48] sm:$0xff] }
  0x98   : > { %10719 = vmatmul.mubr.msk.f32.gmra.mxu1 %vm363_vm1, %v1538_v49  ;;  %10665 = vmatprep.mubr.msk.f32.mxu0 %vm363_vm1, %v1537_v48  ;;  %v262_v48 = vld [vmem:[%s15950_s1 + $0x50] sm:$0xff] }
  0x99   : > { %10721 = vmatprep.mubr.msk.f32.mxu1 %vm363_vm1, %v1539_v50  ;;  %4177 = vperm.xlu1 %11523, %v261_v47   ;;  %v12188_v47 = vld [vmem:[%s11607_s10 + $0x10c] sm:$0xff] }
  0x9a   : > { %4182 = vperm.xlu0 %11522, %v262_v48  }
  0x9b   : > { %10666 = vmatmul.mubr.msk.f32.gmra.mxu0 %vm363_vm1, %v1538_v49  ;;  %v1960_v49 = vld [vmem:[%s11607_s10 + $0xcb] sm:$0xff] }
  0x9c   : > { %10722 = vmatmul.mubr.msk.f32.gmra.mxu1 %vm363_vm1, %v1540_v51  ;;  %10668 = vmatprep.mubr.msk.f32.mxu0 %vm363_vm1, %v1539_v50  ;;  %v12098_v50 = vld [vmem:[%s11607_s10 + $0xcc] sm:$0xff] }
  0x9d   : > { %10724 = vmatprep.mubr.msk.f32.mxu1 %vm363_vm1, %v1541_v52  ;;  %v12102_v52 = vld [vmem:[%s11607_s10 + $0xd4] sm:$0xff] }
  0x9f   : > { %10669 = vmatmul.mubr.msk.f32.gmra.mxu0 %vm363_vm1, %v1540_v51  ;;  %v1961_v51 = vld [vmem:[%s11607_s10 + $0xd3] sm:$0xff] }
  0xa0   : > { %10725 = vmatmul.mubr.msk.f32.gmra.mxu1 %vm363_vm1, %v1542_v53  ;;  %10729 = vmatprep.mubr.msk.f32.mxu0 %vm363_vm1, %v1937_v54  ;;  %v263_v53 = vld [vmem:[%s15950_s1 + $0x58] sm:$0xff]  ;;  %v264_v54 = vld [vmem:[%s15950_s1 + $0x60] sm:$0xff] }
  0xa1   : > { %10785 = vmatprep.mubr.msk.f32.mxu1 %vm363_vm1, %v2367_v55  ;;  %v1962_v55 = vld [vmem:[%s11607_s10 + $0xdb] sm:$0xff]  ;;  %4187 = vperm.xlu1 %11523, %v263_v53  }
  0xa2   : > { %4192 = vperm.xlu0 %11522, %v264_v54   ;;  %v12192_v53 = vld [vmem:[%s11607_s10 + $0x114] sm:$0xff] }
  0xa3   : > { %10730 = vmatmul.mubr.msk.f32.vlgmr.msra.gmra.mxu0 %vm363_vm1, %v1938_v56  ;;  %v12118_v56 = vld [vmem:[%s11607_s10 + $0xdc] sm:$0xff] }
  0xa4   : > { %10786 = vmatmul.mubr.msk.f32.vlgmr.msra.gmra.mxu1 %vm363_vm1, %v2368_v57  ;;  %10840 = vmatpush3.msk.msra.mxu0 %vm472_vm0, %v11781_v20  ;;  %v11998_v20 = vld [vmem:[%s11607_s10 + $0x7c] sm:$0xff] }
  0xa5   : > { %10732 = vmatprep.mubr.msk.f32.mxu0 %vm363_vm1, %v1939_v58  ;;  %10788 = vmatprep.mubr.msk.f32.mxu1 %vm363_vm1, %v11905_v59  ;;  %v1963_v57 = vld [vmem:[%s11607_s10 + $0xe3] sm:$0xff] }
  0xa6   : > { %10896 = vmatpush3.msk.msra.mxu1 %vm472_vm0, %v11813_v27  ;;  %10951 = vmatprep.subr.msk.mxu0 %vm472_vm0, %v11912_v60  ;;  %v1953_v27 = vld [vmem:[%s11607_s10 + $0x93] sm:$0xff]  ;;  %v12122_v58 = vld [vmem:[%s11607_s10 + $0xe4] sm:$0xff] }
  0xa7   : > { %10733 = vmatmul.mubr.msk.f32.gmra.mxu0 %vm363_vm1, %v1940_v61 }
  0xa8   : > { %10789 = vmatmul.mubr.msk.f32.gmra.mxu1 %vm363_vm1, %v11919_v62  ;;  %10735 = vmatprep.mubr.msk.f32.mxu0 %vm363_vm1, %v1941_v63 }
  0xa9   : > { %10791 = vmatprep.mubr.msk.f32.mxu1 %vm363_vm1, %v11925_v0 }
  0xab   : > { %10736 = vmatmul.mubr.msk.f32.gmra.mxu0 %vm363_vm1, %v1942_v1  ;;  %v265_v1 = vld [vmem:[%s15950_s1 + $0x68] sm:$0xff] }
  0xac   : > { %10792 = vmatmul.mubr.msk.f32.gmra.mxu1 %vm363_vm1, %v11939_v2  ;;  %10738 = vmatprep.mubr.msk.f32.mxu0 %vm363_vm1, %v1943_v3  ;;  %v266_v3 = vld [vmem:[%s15950_s1 + $0x70] sm:$0xff] }
  0xad   : > { %10794 = vmatprep.mubr.msk.f32.mxu1 %vm363_vm1, %v11943_v4  ;;  %4197 = vperm.xlu1 %11523, %v265_v1  }
  0xae   : > { %4202 = vperm.xlu0 %11522, %v266_v3   ;;  %v1970_v3 = vld [vmem:[%s11607_s10 + $0x11b] sm:$0xff] }
  0xaf   : > { %10739 = vmatmul.mubr.msk.f32.gmra.mxu0 %vm363_vm1, %v1944_v5 }
  0xb0   : > { %10795 = vmatmul.mubr.msk.f32.gmra.mxu1 %vm363_vm1, %v11953_v6  ;;  %10741 = vmatprep.mubr.msk.f32.mxu0 %vm363_vm1, %v1945_v7  ;;  %v1964_v7 = vld [vmem:[%s11607_s10 + $0xeb] sm:$0xff] }
  0xb1   : > { %10797 = vmatprep.mubr.msk.f32.mxu1 %vm363_vm1, %v11957_v8  ;;  %4207 = vperm.xlu1 %11523, %v267_v23  }
  0xb2   : > { %4212 = vperm.xlu0 %11522, %v268_v24  }
  0xb3   : > { %10742 = vmatmul.mubr.msk.f32.gmra.mxu0 %vm363_vm1, %v1946_v9  ;;  %v12140_v9 = vld [vmem:[%s11607_s10 + $0xec] sm:$0xff] }
  0xb4   : > { %10798 = vmatmul.mubr.msk.f32.gmra.mxu1 %vm363_vm1, %v11967_v11  ;;  %10744 = vmatprep.mubr.msk.f32.mxu0 %vm363_vm1, %v1947_v12 }
  0xb5   : > { %10800 = vmatprep.mubr.msk.f32.mxu1 %vm363_vm1, %v11971_v13  ;;  %4217 = vperm.xlu1 %11523, %v269_v41  }
  0xb6   : > { %4222 = vperm.xlu0 %11522, %v270_v42   ;;  %v3227_v42 = vld [vmem:[%s11607_s10 + $0x25] sm:$0xff] }
  0xb7   : > { %10745 = vmatmul.mubr.msk.f32.gmra.mxu0 %vm363_vm1, %v1948_v14 }
  0xb8   : > { %10801 = vmatmul.mubr.msk.f32.gmra.mxu1 %vm363_vm1, %v11981_v15  ;;  %10747 = vmatprep.mubr.msk.f32.mxu0 %vm363_vm1, %v1949_v16  ;;  %v1965_v16 = vld [vmem:[%s11607_s10 + $0xf3] sm:$0xff] }
  0xb9   : > { %10803 = vmatprep.mubr.msk.f32.mxu1 %vm363_vm1, %v11985_v17 }
  0xbb   : > { %10748 = vmatmul.mubr.msk.f32.gmra.mxu0 %vm363_vm1, %v1950_v19 }
  0xbc   : > { %10804 = vmatmul.mubr.msk.f32.gmra.mxu1 %vm363_vm1, %v11998_v20  ;;  %10750 = vmatprep.mubr.msk.f32.mxu0 %vm363_vm1, %v1951_v21 }
  0xbd   : > { %10806 = vmatprep.mubr.msk.f32.mxu1 %vm363_vm1, %v12002_v22 }
  0xbf   : > { %10751 = vmatmul.mubr.msk.f32.gmra.mxu0 %vm363_vm1, %v1952_v25 }
  0xc0   : > { %10807 = vmatmul.mubr.msk.f32.gmra.mxu1 %vm363_vm1, %v12018_v26  ;;  %10753 = vmatprep.mubr.msk.f32.mxu0 %vm363_vm1, %v1953_v27  ;;  %v1966_v27 = vld [vmem:[%s11607_s10 + $0xfb] sm:$0xff] }
  0xc1   : > { %10809 = vmatprep.mubr.msk.f32.mxu1 %vm363_vm1, %v12022_v28 }
  0xc3   : > { %10754 = vmatmul.mubr.msk.f32.gmra.mxu0 %vm363_vm1, %v1954_v31 }
  0xc4   : > { %10810 = vmatmul.mubr.msk.f32.gmra.mxu1 %vm363_vm1, %v12038_v32  ;;  %10756 = vmatprep.mubr.msk.f32.mxu0 %vm363_vm1, %v1955_v33  ;;  %v1967_v33 = vld [vmem:[%s11607_s10 + $0x103] sm:$0xff] }
  0xc5   : > { %10812 = vmatprep.mubr.msk.f32.mxu1 %vm363_vm1, %v12042_v34 }
  0xc7   : > { %10757 = vmatmul.mubr.msk.f32.gmra.mxu0 %vm363_vm1, %v1956_v37 }
  0xc8   : > { %10813 = vmatmul.mubr.msk.f32.gmra.mxu1 %vm363_vm1, %v12058_v38  ;;  %10759 = vmatprep.mubr.msk.f32.mxu0 %vm363_vm1, %v1957_v39 }
  0xc9   : > { %10815 = vmatprep.mubr.msk.f32.mxu1 %vm363_vm1, %v12062_v40 }
  0xcb   : > { %10760 = vmatmul.mubr.msk.f32.gmra.mxu0 %vm363_vm1, %v1958_v43 }
  0xcc   : > { %10816 = vmatmul.mubr.msk.f32.gmra.mxu1 %vm363_vm1, %v12078_v44  ;;  %10762 = vmatprep.mubr.msk.f32.mxu0 %vm363_vm1, %v1959_v45  ;;  %v1968_v45 = vld [vmem:[%s11607_s10 + $0x10b] sm:$0xff] }
  0xcd   : > { %10818 = vmatprep.mubr.msk.f32.mxu1 %vm363_vm1, %v12082_v46 }
  0xcf   : > { %10763 = vmatmul.mubr.msk.f32.gmra.mxu0 %vm363_vm1, %v1960_v49 }
  0xd0   : > { %10819 = vmatmul.mubr.msk.f32.gmra.mxu1 %vm363_vm1, %v12098_v50  ;;  %10765 = vmatprep.mubr.msk.f32.mxu0 %vm363_vm1, %v1961_v51  ;;  %v1969_v51 = vld [vmem:[%s11607_s10 + $0x113] sm:$0xff] }
  0xd1   : > { %10821 = vmatprep.mubr.msk.f32.mxu1 %vm363_vm1, %v12102_v52 }
  0xd3   : > { %v10507_v61 = vpop.f32.mrf.mxu0  ;;  %10766 = vmatmul.mubr.msk.f32.gmra.mxu0 %vm363_vm1, %v1962_v55 }
  0xd4   : > { %v10563_v63 = vpop.f32.mrf.mxu1  ;;  %10822 = vmatmul.mubr.msk.f32.gmra.mxu1 %vm363_vm1, %v12118_v56  ;;  %10768 = vmatprep.mubr.msk.f32.mxu0 %vm363_vm1, %v1963_v57 }
  0xd5   : > { %v12133_v5 = vadd.f32 %v10563_v63, %v10507_v61  ;;  %10824 = vmatprep.mubr.msk.f32.mxu1 %vm363_vm1, %v12122_v58  ;;  %v542_v12 = vpop.f32.mrf.mxu0  ;;  %v271_v61 = vld [vmem:[%s15950_s1 + $0x98] sm:$0xff]  ;;  %v272_v63 = vld [vmem:[%s15950_s1 + $0xa0] sm:$0xff] }
  0xd6   : > { %v898_v14 = vpop.f32.mrf.mxu1  ;;  %4227 = vperm.xlu1 %11523, %v271_v61   ;;  %4232 = vperm.xlu0 %11522, %v272_v63   ;;  %v3228_v61 = vld [vmem:[%s11607_s10 + $0x2d] sm:$0xff] }
  0xd7   : > { %v12146_v19 = vadd.f32 %v898_v14, %v542_v12  ;;  %v10510_v21 = vpop.f32.mrf.mxu0  ;;  %10769 = vmatmul.mubr.msk.f32.gmra.mxu0 %vm363_vm1, %v1964_v7  ;;  %v12212_v7 = vld [vmem:[%s11607_s10 + $0x11c] sm:$0xff] }
  0xd8   : > { %v10566_v10 = vpop.f32.mrf.mxu1  ;;  %10825 = vmatmul.mubr.msk.f32.gmra.mxu1 %vm363_vm1, %v12140_v9  ;;  %10771 = vmatprep.mubr.msk.f32.mxu0 %vm363_vm1, %v1965_v16  ;;  %v1971_v16 = vld [vmem:[%s11607_s10 + $0x123] sm:$0xff] }
  0xd9   : > { %v12157_v25 = vadd.f32 %v10566_v10, %v10510_v21  ;;  %10827 = vmatprep.mubr.msk.f32.mxu1 %vm363_vm1, %v12144_v18  ;;  %v552_v30 = vpop.f32.mrf.mxu0  ;;  %v12216_v21 = vld [vmem:[%s11607_s10 + $0x124] sm:$0xff] }
  0xda   : > { %v908_v31 = vpop.f32.mrf.mxu1 }
  0xdb   : > { %v12170_v36 = vadd.f32 %v908_v31, %v552_v30  ;;  %v10513_v37 = vpop.f32.mrf.mxu0  ;;  %10772 = vmatmul.mubr.msk.f32.gmra.mxu0 %vm363_vm1, %v1966_v27  ;;  %v273_v27 = vld [vmem:[%s15950_s1 + $0xa8] sm:$0xff]  ;;  %v274_v30 = vld [vmem:[%s15950_s1 + $0xb0] sm:$0xff] }
  0xdc   : > { %v10569_v39 = vpop.f32.mrf.mxu1  ;;  %10828 = vmatmul.mubr.msk.f32.gmra.mxu1 %vm363_vm1, %v12164_v29  ;;  %10774 = vmatprep.mubr.msk.f32.mxu0 %vm363_vm1, %v1967_v33  ;;  %v1972_v33 = vld [vmem:[%s11607_s10 + $0x12b] sm:$0xff] }
  0xdd   : > { %v12181_v43 = vadd.f32 %v10569_v39, %v10513_v37  ;;  %10830 = vmatprep.mubr.msk.f32.mxu1 %vm363_vm1, %v12168_v35  ;;  %v562_v48 = vpop.f32.mrf.mxu0  ;;  %v12236_v37 = vld [vmem:[%s11607_s10 + $0x12c] sm:$0xff]  ;;  %4237 = vperm.xlu1 %11523, %v273_v27  }
  0xde   : > { %v918_v49 = vpop.f32.mrf.mxu1  ;;  %4242 = vperm.xlu0 %11522, %v274_v30   ;;  %v3230_v30 = vld [vmem:[%s11607_s10 + $0x3d] sm:$0xff] }
  0xdf   : > { %v12194_v54 = vadd.f32 %v918_v49, %v562_v48  ;;  %v10516_v55 = vpop.f32.mrf.mxu0  ;;  %10775 = vmatmul.mubr.msk.f32.gmra.mxu0 %vm363_vm1, %v1968_v45 }
  0xe0   : > { %v10572_v57 = vpop.f32.mrf.mxu1  ;;  %10831 = vmatmul.mubr.msk.f32.gmra.mxu1 %vm363_vm1, %v12188_v47  ;;  %10777 = vmatprep.mubr.msk.f32.mxu0 %vm363_vm1, %v1969_v51  ;;  %v275_v51 = vld [vmem:[%s15950_s1 + $0xb8] sm:$0xff] }
  0xe1   : > { %v12205_v1 = vadd.f32 %v10572_v57, %v10516_v55  ;;  %10833 = vmatprep.mubr.msk.f32.mxu1 %vm363_vm1, %v12192_v53  ;;  %v572_v12 = vpop.f32.mrf.mxu0  ;;  %v276_v55 = vld [vmem:[%s15950_s1 + $0xc0] sm:$0xff]  ;;  %4247 = vperm.xlu1 %11523, %v275_v51   ;;  %v3232_v51 = vld [vmem:[%s11607_s10 + $0x4d] sm:$0xff] }
  0xe2   : > { %v928_v14 = vpop.f32.mrf.mxu1  ;;  %4252 = vperm.xlu0 %11522, %v276_v55  }
  0xe3   : > { %v12218_v10 = vadd.f32 %v928_v14, %v572_v12  ;;  %v10519_v23 = vpop.f32.mrf.mxu0  ;;  %10778 = vmatmul.mubr.msk.f32.gmra.mxu0 %vm363_vm1, %v1970_v3  ;;  %v3229_v14 = vld [vmem:[%s11607_s10 + $0x35] sm:$0xff] }
  0xe4   : > { %v10575_v24 = vpop.f32.mrf.mxu1  ;;  %10834 = vmatmul.mubr.msk.f32.gmra.mxu1 %vm363_vm1, %v12212_v7  ;;  %10780 = vmatprep.mubr.msk.f32.mxu0 %vm363_vm1, %v1971_v16 }
  0xe5   : > { %v12229_v31 = vadd.f32 %v10575_v24, %v10519_v23  ;;  %10836 = vmatprep.mubr.msk.f32.mxu1 %vm363_vm1, %v12216_v21  ;;  %v582_v39 = vpop.f32.mrf.mxu0  ;;  %v278_v24 = vld [vmem:[%s15950_s1 + $0xd0] sm:$0xff] }
  0xe6   : > { %v938_v41 = vpop.f32.mrf.mxu1  ;;  %4262 = vperm.xlu0 %11522, %v278_v24  }
  0xe7   : > { %v12239_v45 = vadd.f32 %v938_v41, %v582_v39  ;;  %v10522_v48 = vpop.f32.mrf.mxu0  ;;  %10781 = vmatmul.mubr.msk.f32.gmra.mxu0 %vm363_vm1, %v1972_v33  ;;  %v3231_v39 = vld [vmem:[%s11607_s10 + $0x45] sm:$0xff] }
  0xe8   : > { %v10578_v49 = vpop.f32.mrf.mxu1  ;;  %10837 = vmatmul.mubr.msk.f32.gmra.mxu1 %vm363_vm1, %v12236_v37  ;;  %10841 = vmatprep.mubr.msk.f32.mxu0 %vm363_vm1, %v11905_v59  ;;  %v277_v59 = vld [vmem:[%s15950_s1 + $0xc8] sm:$0xff] }
  0xe9   : > { %v12250_v57 = vadd.f32 %v10578_v49, %v10522_v48  ;;  %10897 = vmatprep.mubr.msk.f32.mxu1 %vm363_vm1, %v3227_v42  ;;  %v592_v63 = vpop.f32.mrf.mxu0  ;;  %4257 = vperm.xlu1 %11523, %v277_v59   ;;  %v3234_v59 = vld [vmem:[%s11607_s10 + $0x5d] sm:$0xff] }
  0xea   : > { %v948_v3 = vpop.f32.mrf.mxu1 }
  0xeb   : > { %v12256_v12 = vadd.f32 %v948_v3, %v592_v63  ;;  %v10525_v16 = vpop.f32.mrf.mxu0  ;;  %10842 = vmatmul.mubr.msk.f32.vlgmr.msra.gmra.mxu0 %vm363_vm1, %v11919_v62 }
  0xec   : > { %v10581_v23 = vpop.f32.mrf.mxu1  ;;  %10898 = vmatmul.mubr.msk.f32.vlgmr.msra.gmra.mxu1 %vm363_vm1, %v3228_v61  ;;  %10952 = vmatpush3.msk.msra.mxu0 %vm472_vm0, %v11912_v60  ;;  %v279_v60 = vld [vmem:[%s15950_s1 + $0xd8] sm:$0xff] }
  0xed   : > { %v12268_v27 = vadd.f32 %v10581_v23, %v10525_v16  ;;  %10844 = vmatprep.mubr.msk.f32.mxu0 %vm363_vm1, %v11925_v0  ;;  %v602_v62 = vpop.f32.mrf.mxu0  ;;  %10900 = vmatprep.mubr.msk.f32.mxu1 %vm363_vm1, %v3229_v14  ;;  %v280_v0 = vld [vmem:[%s15950_s1 + $0xe0] sm:$0xff]  ;;  %v3233_v61 = vld [vmem:[%s11607_s10 + $0x55] sm:$0xff] }
  0xee   : > { %v958_v33 = vpop.f32.mrf.mxu1  ;;  %4267 = vperm.xlu1 %11523, %v279_v60   ;;  %4272 = vperm.xlu0 %11522, %v280_v0   ;;  %v282_v16 = vld [vmem:[%s15950_s1 + $0xf0] sm:$0xff] }
  0xef   : > { %v12277_v41 = vadd.f32 %v958_v33, %v602_v62  ;;  %v10528_v42 = vpop.f32.mrf.mxu0  ;;  %10845 = vmatmul.mubr.msk.f32.gmra.mxu0 %vm363_vm1, %v11939_v2  ;;  %v3236_v60 = vld [vmem:[%s11607_s10 + $0x6d] sm:$0xff] }
  0xf0   : > { %v10584_v48 = vpop.f32.mrf.mxu1  ;;  %10901 = vmatmul.mubr.msk.f32.gmra.mxu1 %vm363_vm1, %v3230_v30  ;;  %10847 = vmatprep.mubr.msk.f32.mxu0 %vm363_vm1, %v11943_v4  ;;  %v281_v4 = vld [vmem:[%s15950_s1 + $0xe8] sm:$0xff] }
  0xf1   : > { %v12288_v49 = vadd.f32 %v10584_v48, %v10528_v42  ;;  %10903 = vmatprep.mubr.msk.f32.mxu1 %vm363_vm1, %v3231_v39  ;;  %v612_v2 = vpop.f32.mrf.mxu0  ;;  %v3235_v30 = vld [vmem:[%s11607_s10 + $0x65] sm:$0xff] }
  0xf2   : > { %v968_v55 = vpop.f32.mrf.mxu1  ;;  %4277 = vperm.xlu1 %11523, %v281_v4   ;;  %4282 = vperm.xlu0 %11522, %v282_v16   ;;  %v284_v42 = vld [vmem:[%s15950_s1 + $0x100] sm:$0xff] }
  0xf3   : > { %v12295_v63 = vadd.f32 %v968_v55, %v612_v2  ;;  %v10531_v3 = vpop.f32.mrf.mxu0  ;;  %10848 = vmatmul.mubr.msk.f32.gmra.mxu0 %vm363_vm1, %v11953_v6  ;;  %v3238_v4 = vld [vmem:[%s11607_s10 + $0x7d] sm:$0xff] }
  0xf4   : > { %v10587_v14 = vpop.f32.mrf.mxu1  ;;  %10904 = vmatmul.mubr.msk.f32.gmra.mxu1 %vm363_vm1, %v3232_v51  ;;  %10850 = vmatprep.mubr.msk.f32.mxu0 %vm363_vm1, %v11957_v8  ;;  %v283_v8 = vld [vmem:[%s15950_s1 + $0xf8] sm:$0xff] }
  0xf5   : > { %v12306_v23 = vadd.f32 %v10587_v14, %v10531_v3  ;;  %10906 = vmatprep.mubr.msk.f32.mxu1 %vm363_vm1, %v3233_v61  ;;  %v622_v6 = vpop.f32.mrf.mxu0  ;;  %v3237_v51 = vld [vmem:[%s11607_s10 + $0x75] sm:$0xff] }
  0xf6   : > { %v978_v24 = vpop.f32.mrf.mxu1  ;;  %4287 = vperm.xlu1 %11523, %v283_v8   ;;  %4292 = vperm.xlu0 %11522, %v284_v42   ;;  %v286_v3 = vld [vmem:[%s15950_s1 + $0x110] sm:$0xff] }
  0xf7   : > { %v12313_v62 = vadd.f32 %v978_v24, %v622_v6  ;;  %v10534_v33 = vpop.f32.mrf.mxu0  ;;  %10851 = vmatmul.mubr.msk.f32.gmra.mxu0 %vm363_vm1, %v11967_v11 }
  0xf8   : > { %v10590_v39 = vpop.f32.mrf.mxu1  ;;  %10907 = vmatmul.mubr.msk.f32.gmra.mxu1 %vm363_vm1, %v3234_v59  ;;  %10853 = vmatprep.mubr.msk.f32.mxu0 %vm363_vm1, %v11971_v13  ;;  %v285_v13 = vld [vmem:[%s15950_s1 + $0x108] sm:$0xff] }
  0xf9   : > { %v12324_v48 = vadd.f32 %v10590_v39, %v10534_v33  ;;  %10909 = vmatprep.mubr.msk.f32.mxu1 %vm363_vm1, %v3235_v30  ;;  %v632_v11 = vpop.f32.mrf.mxu0  ;;  %v3239_v59 = vld [vmem:[%s11607_s10 + $0x85] sm:$0xff]  ;;  %v3240_v39 = vld [vmem:[%s11607_s10 + $0x8d] sm:$0xff] }
  0xfa   : > { %v988_v0 = vpop.f32.mrf.mxu1  ;;  %4297 = vperm.xlu1 %11523, %v285_v13   ;;  %4302 = vperm.xlu0 %11522, %v286_v3   ;;  %v3243_v13 = vld [vmem:[%s11607_s10 + $0xa5] sm:$0xff] }
  0xfb   : > { %v12331_v2 = vadd.f32 %v988_v0, %v632_v11  ;;  %v10537_v55 = vpop.f32.mrf.mxu0  ;;  %10854 = vmatmul.mubr.msk.f32.gmra.mxu0 %vm363_vm1, %v11981_v15 }
  0xfc   : > { %v10593_v61 = vpop.f32.mrf.mxu1  ;;  %10910 = vmatmul.mubr.msk.f32.gmra.mxu1 %vm363_vm1, %v3236_v60  ;;  %10856 = vmatprep.mubr.msk.f32.mxu0 %vm363_vm1, %v11985_v17  ;;  %v287_v17 = vld [vmem:[%s15950_s1 + $0x118] sm:$0xff] }
  0xfd   : > { %v12342_v14 = vadd.f32 %v10593_v61, %v10537_v55  ;;  %10912 = vmatprep.mubr.msk.f32.mxu1 %vm363_vm1, %v3237_v51  ;;  %v642_v15 = vpop.f32.mrf.mxu0  ;;  %v3241_v60 = vld [vmem:[%s11607_s10 + $0x95] sm:$0xff] }
  0xfe   : > { %v998_v16 = vpop.f32.mrf.mxu1  ;;  %4307 = vperm.xlu1 %11523, %v287_v17  }
  0xff   : > { %v12349_v6 = vadd.f32 %v998_v16, %v642_v15  ;;  %v10540_v24 = vpop.f32.mrf.mxu0  ;;  %10857 = vmatmul.mubr.msk.f32.gmra.mxu0 %vm363_vm1, %v11998_v20 }
 0x100   : > { %v10596_v30 = vpop.f32.mrf.mxu1  ;;  %10913 = vmatmul.mubr.msk.f32.gmra.mxu1 %vm363_vm1, %v3238_v4  ;;  %10859 = vmatprep.mubr.msk.f32.mxu0 %vm363_vm1, %v12002_v22  ;;  %v3242_v22 = vld [vmem:[%s11607_s10 + $0x9d] sm:$0xff] }
 0x101   : > { %v12357_v33 = vadd.f32 %v10596_v30, %v10540_v24  ;;  %10915 = vmatprep.mubr.msk.f32.mxu1 %vm363_vm1, %v3239_v59  ;;  %v652_v8 = vpop.f32.mrf.mxu0  ;;  %v3245_v24 = vld [vmem:[%s11607_s10 + $0xb5] sm:$0xff] }
 0x102   : > { %v1008_v42 = vpop.f32.mrf.mxu1 }
 0x103   : > { %v12364_v20 = vadd.f32 %v1008_v42, %v652_v8  ;;  %v10543_v11 = vpop.f32.mrf.mxu0  ;;  %10860 = vmatmul.mubr.msk.f32.gmra.mxu0 %vm363_vm1, %v12018_v26 }
 0x104   : > { %v10599_v0 = vpop.f32.mrf.mxu1  ;;  %10916 = vmatmul.mubr.msk.f32.gmra.mxu1 %vm363_vm1, %v3240_v39  ;;  %10862 = vmatprep.mubr.msk.f32.mxu0 %vm363_vm1, %v12022_v28  ;;  %v3244_v28 = vld [vmem:[%s11607_s10 + $0xad] sm:$0xff] }
 0x105   : > { %v12369_v51 = vadd.f32 %v10599_v0, %v10543_v11  ;;  %10918 = vmatprep.mubr.msk.f32.mxu1 %vm363_vm1, %v3241_v60  ;;  %v662_v55 = vpop.f32.mrf.mxu0  ;;  %v3247_v60 = vld [vmem:[%s11607_s10 + $0xc5] sm:$0xff] }
 0x106   : > { %v1018_v61 = vpop.f32.mrf.mxu1 }
 0x107   : > { %v12376_v3 = vadd.f32 %v1018_v61, %v662_v55  ;;  %v10546_v4 = vpop.f32.mrf.mxu0  ;;  %10863 = vmatmul.mubr.msk.f32.gmra.mxu0 %vm363_vm1, %v12038_v32 }
 0x108   : > { %v10602_v15 = vpop.f32.mrf.mxu1  ;;  %10919 = vmatmul.mubr.msk.f32.gmra.mxu1 %vm363_vm1, %v3242_v22  ;;  %10865 = vmatprep.mubr.msk.f32.mxu0 %vm363_vm1, %v12042_v34  ;;  %v3246_v34 = vld [vmem:[%s11607_s10 + $0xbd] sm:$0xff] }
 0x109   : > { %v12381_v26 = vadd.f32 %v10602_v15, %v10546_v4  ;;  %10921 = vmatprep.mubr.msk.f32.mxu1 %vm363_vm1, %v3243_v13  ;;  %v672_v16 = vpop.f32.mrf.mxu0  ;;  %v3249_v13 = vld [vmem:[%s11607_s10 + $0xd5] sm:$0xff] }
 0x10a   : > { %v1028_v59 = vpop.f32.mrf.mxu1 }
 0x10b   : > { %v12388_v30 = vadd.f32 %v1028_v59, %v672_v16  ;;  %v10549_v17 = vpop.f32.mrf.mxu0  ;;  %10866 = vmatmul.mubr.msk.f32.gmra.mxu0 %vm363_vm1, %v12058_v38 }
 0x10c   : > { %v10605_v39 = vpop.f32.mrf.mxu1  ;;  %10922 = vmatmul.mubr.msk.f32.gmra.mxu1 %vm363_vm1, %v3244_v28  ;;  %10868 = vmatprep.mubr.msk.f32.mxu0 %vm363_vm1, %v12062_v40  ;;  %v3248_v40 = vld [vmem:[%s11607_s10 + $0xcd] sm:$0xff] }
 0x10d   : > { %v12393_v32 = vadd.f32 %v10605_v39, %v10549_v17  ;;  %10924 = vmatprep.mubr.msk.f32.mxu1 %vm363_vm1, %v3245_v24  ;;  %v682_v8 = vpop.f32.mrf.mxu0  ;;  %v3251_v24 = vld [vmem:[%s11607_s10 + $0xe5] sm:$0xff] }
 0x10e   : > { %v1038_v42 = vpop.f32.mrf.mxu1 }
 0x10f   : > { %v12400_v11 = vadd.f32 %v1038_v42, %v682_v8  ;;  %v10552_v0 = vpop.f32.mrf.mxu0  ;;  %10869 = vmatmul.mubr.msk.f32.gmra.mxu0 %vm363_vm1, %v12078_v44  ;;  %v3253_v42 = vld [vmem:[%s11607_s10 + $0xf5] sm:$0xff] }
 0x110   : > { %v10608_v22 = vpop.f32.mrf.mxu1  ;;  %10925 = vmatmul.mubr.msk.f32.gmra.mxu1 %vm363_vm1, %v3246_v34  ;;  %10871 = vmatprep.mubr.msk.f32.mxu0 %vm363_vm1, %v12082_v46  ;;  %v3250_v46 = vld [vmem:[%s11607_s10 + $0xdd] sm:$0xff] }
 0x111   : > { %v12405_v38 = vadd.f32 %v10608_v22, %v10552_v0  ;;  %10927 = vmatprep.mubr.msk.f32.mxu1 %vm363_vm1, %v3247_v60  ;;  %v692_v55 = vpop.f32.mrf.mxu0 }
 0x112   : > { %v1048_v61 = vpop.f32.mrf.mxu1 }
 0x113   : > { %v12412_v4 = vadd.f32 %v1048_v61, %v692_v55  ;;  %v10555_v15 = vpop.f32.mrf.mxu0  ;;  %10872 = vmatmul.mubr.msk.f32.gmra.mxu0 %vm363_vm1, %v12098_v50  ;;  %v3255_v55 = vld [vmem:[%s11607_s10 + $0x105] sm:$0xff] }
 0x114   : > { %v10611_v28 = vpop.f32.mrf.mxu1  ;;  %10928 = vmatmul.mubr.msk.f32.gmra.mxu1 %vm363_vm1, %v3248_v40  ;;  %10874 = vmatprep.mubr.msk.f32.mxu0 %vm363_vm1, %v12102_v52  ;;  %v3252_v52 = vld [vmem:[%s11607_s10 + $0xed] sm:$0xff] }
 0x115   : > { %v12417_v44 = vadd.f32 %v10611_v28, %v10555_v15  ;;  %10930 = vmatprep.mubr.msk.f32.mxu1 %vm363_vm1, %v3249_v13  ;;  %v12423_v16 = vpop.f32.mrf.mxu0  ;;  %v3256_v15 = vld [vmem:[%s11607_s10 + $0x10d] sm:$0xff] }
 0x116   : > { %v12425_v59 = vpop.f32.mrf.mxu1 }
 0x117   : > { %v10558_v17 = vpop.f32.mrf.mxu0  ;;  %10875 = vmatmul.mubr.msk.f32.gmra.mxu0 %vm363_vm1, %v12118_v56 }
 0x118   : > { %v10614_v39 = vpop.f32.mrf.mxu1  ;;  %10931 = vmatmul.mubr.msk.f32.gmra.mxu1 %vm363_vm1, %v3250_v46  ;;  %10877 = vmatprep.mubr.msk.f32.mxu0 %vm363_vm1, %v12122_v58  ;;  %v3254_v58 = vld [vmem:[%s11607_s10 + $0xfd] sm:$0xff]  ;;  %v3257_v46 = vld [vmem:[%s11607_s10 + $0x115] sm:$0xff] }
 0x119   : > { %v12431_v50 = vadd.f32 %v10614_v39, %v10558_v17  ;;  %10933 = vmatprep.mubr.msk.f32.mxu1 %vm363_vm1, %v3251_v24  ;;  %v12437_v34 = vpop.f32.mrf.mxu0  ;;  %v3258_v39 = vld [vmem:[%s11607_s10 + $0x11d] sm:$0xff] }
 0x11a   : > { %v12439_v8 = vpop.f32.mrf.mxu1 }
 0x11b   : > { %v10619_v60 = vpop.f32.mrf.mxu0  ;;  %10878 = vmatmul.mubr.msk.f32.gmra.mxu0 %vm363_vm1, %v12140_v9 }
 0x11c   : > { %v10675_v56 = vpop.f32.mrf.mxu1  ;;  %10934 = vmatmul.mubr.msk.f32.gmra.mxu1 %vm363_vm1, %v3252_v52  ;;  %v1472_v0 = vadd.f32 %v10619_v60, %v12133_v5  ;;  %10880 = vmatprep.mubr.msk.f32.mxu0 %vm363_vm1, %v12144_v18 }
 0x11d   : > { %10936 = vmatprep.mubr.msk.f32.mxu1 %vm363_vm1, %v3253_v42  ;;  %v1292_v22 = vpop.f32.mrf.mxu0  ;;  %v3259_v42 = vld [vmem:[%s11607_s10 + $0x125] sm:$0xff] }
 0x11e   : > { %v12450_v40 = vpop.f32.mrf.mxu1  ;;  %v12454_v61 = vadd.f32 %v1292_v22, %v12146_v19  ;;  %v12456_v9 = vadd.f32 %v10675_v56, %v1472_v0  ;;  %v2831_v22 = vld [vmem:[%s11607_s10 + $0x134] sm:$0xff] }
 0x11f   : > { %v10622_v13 = vpop.f32.mrf.mxu0  ;;  %10881 = vmatmul.mubr.msk.f32.gmra.mxu0 %vm363_vm1, %v12164_v29 }
 0x120   : > { %v10678_v5 = vpop.f32.mrf.mxu1  ;;  %10937 = vmatmul.mubr.msk.f32.gmra.mxu1 %vm363_vm1, %v3254_v58  ;;  %v1474_v18 = vadd.f32 %v10622_v13, %v12157_v25  ;;  %10883 = vmatprep.mubr.msk.f32.mxu0 %vm363_vm1, %v12168_v35 }
 0x121   : > { %10939 = vmatprep.mubr.msk.f32.mxu1 %vm363_vm1, %v3255_v55  ;;  %v1302_v19 = vpop.f32.mrf.mxu0  ;;  %v3261_v55 = vld [vmem:[%s11607_s10 + $0x135] sm:$0xff] }
 0x122   : > { %v12466_v28 = vpop.f32.mrf.mxu1  ;;  %v12470_v24 = vadd.f32 %v1302_v19, %v12170_v36  ;;  %v12472_v29 = vadd.f32 %v10678_v5, %v1474_v18  ;;  %v2832_v18 = vld [vmem:[%s11607_s10 + $0x13c] sm:$0xff] }
 0x123   : > { %v10625_v17 = vpop.f32.mrf.mxu0  ;;  %10884 = vmatmul.mubr.msk.f32.gmra.mxu0 %vm363_vm1, %v12188_v47 }
 0x124   : > { %v10681_v25 = vpop.f32.mrf.mxu1  ;;  %10940 = vmatmul.mubr.msk.f32.gmra.mxu1 %vm363_vm1, %v3256_v15  ;;  %v1476_v35 = vadd.f32 %v10625_v17, %v12181_v43  ;;  %10886 = vmatprep.mubr.msk.f32.mxu0 %vm363_vm1, %v12192_v53 }
 0x125   : > { %10942 = vmatprep.mubr.msk.f32.mxu1 %vm363_vm1, %v3257_v46  ;;  %v1312_v36 = vpop.f32.mrf.mxu0  ;;  %v3657_v46 = vld [vmem:[%s11607_s10 + $0x26] sm:$0xff] }
 0x126   : > { %v12482_v52 = vpop.f32.mrf.mxu1  ;;  %v12486_v47 = vadd.f32 %v1312_v36, %v12194_v54  ;;  %v12488_v60 = vadd.f32 %v10681_v25, %v1476_v35  ;;  %v3260_v54 = vld [vmem:[%s11607_s10 + $0x12d] sm:$0xff] }
 0x127   : > { %v10628_v56 = vpop.f32.mrf.mxu0  ;;  %10887 = vmatmul.mubr.msk.f32.gmra.mxu0 %vm363_vm1, %v12212_v7 }
 0x128   : > { %v10684_v43 = vpop.f32.mrf.mxu1  ;;  %10943 = vmatmul.mubr.msk.f32.gmra.mxu1 %vm363_vm1, %v3258_v39  ;;  %v1478_v53 = vadd.f32 %v10628_v56, %v12205_v1  ;;  %10889 = vmatprep.mubr.msk.f32.mxu0 %vm363_vm1, %v12216_v21  ;;  %v3658_v39 = vld [vmem:[%s11607_s10 + $0x2e] sm:$0xff] }
 0x129   : > { %10945 = vmatprep.mubr.msk.f32.mxu1 %vm363_vm1, %v3259_v42  ;;  %v1322_v0 = vpop.f32.mrf.mxu0 }
 0x12a   : > { %v12498_v58 = vpop.f32.mrf.mxu1  ;;  %v12503_v7 = vadd.f32 %v1322_v0, %v12218_v10  ;;  %v12505_v13 = vadd.f32 %v10684_v43, %v1478_v53  ;;  %v3262_v10 = vld [vmem:[%s11607_s10 + $0x13d] sm:$0xff] }
 0x12b   : > { %v10631_v1 = vpop.f32.mrf.mxu0  ;;  %10890 = vmatmul.mubr.msk.f32.gmra.mxu0 %vm363_vm1, %v12236_v37  ;;  %v3660_v0 = vld [vmem:[%s11607_s10 + $0x3e] sm:$0xff] }
 0x12c   : > { %v10687_v21 = vpop.f32.mrf.mxu1  ;;  %10946 = vmatmul.mubr.msk.f32.gmra.mxu1 %vm363_vm1, %v3260_v54  ;;  %v1480_v5 = vadd.f32 %v10631_v1, %v12229_v31  ;;  %10892 = vmatprep.mubr.msk.f32.mxu0 %vm363_vm1, %v2831_v22  ;;  %v3661_v1 = vld [vmem:[%s11607_s10 + $0x46] sm:$0xff] }
 0x12d   : > { %10948 = vmatprep.mubr.msk.f32.mxu1 %vm363_vm1, %v3261_v55  ;;  %v1332_v15 = vpop.f32.mrf.mxu0 }
 0x12e   : > { %v12515_v19 = vpop.f32.mrf.mxu1  ;;  %v12519_v17 = vadd.f32 %v1332_v15, %v12239_v45  ;;  %v12521_v37 = vadd.f32 %v10687_v21, %v1480_v5  ;;  %v3659_v45 = vld [vmem:[%s11607_s10 + $0x36] sm:$0xff] }
 0x12f   : > { %v10634_v25 = vpop.f32.mrf.mxu0  ;;  %10893 = vmatmul.mubr.msk.f32.gmra.mxu0 %vm363_vm1, %v2832_v18 }
 0x130   : > { %v10690_v31 = vpop.f32.mrf.mxu1  ;;  %10949 = vmatmul.mubr.msk.f32.gmra.mxu1 %vm363_vm1, %v3262_v10  ;;  %v1482_v35 = vadd.f32 %v10634_v25, %v12250_v57  ;;  %10953 = vmatprep.mubr.msk.f32.mxu0 %vm363_vm1, %v3657_v46  ;;  %v3662_v10 = vld [vmem:[%s11607_s10 + $0x4e] sm:$0xff]  ;;  %v3663_v25 = vld [vmem:[%s11607_s10 + $0x56] sm:$0xff] }
 0x131   : > { %v1342_v36 = vpop.f32.mrf.mxu0 }
 0x132   : > { %v12528_v42 = vpop.f32.mrf.mxu1  ;;  %v12532_v56 = vadd.f32 %v1342_v36, %v12256_v12  ;;  %v12534_v43 = vadd.f32 %v10690_v31, %v1482_v35  ;;  %v3664_v36 = vld [vmem:[%s11607_s10 + $0x5e] sm:$0xff] }
 0x133   : > { %v10637_v53 = vpop.f32.mrf.mxu0  ;;  %10954 = vmatmul.mubr.msk.f32.vlgmr.msra.gmra.mxu0 %vm363_vm1, %v3658_v39 }
 0x134   : > { %v10693_v54 = vpop.f32.mrf.mxu1  ;;  %v1484_v57 = vadd.f32 %v10637_v53, %v12268_v27  ;;  %10956 = vmatprep.mubr.msk.f32.mxu0 %vm363_vm1, %v3659_v45 }
 0x135   : > { %v1352_v22 = vpop.f32.mrf.mxu0 }
 0x136   : > { %v12540_v55 = vpop.f32.mrf.mxu1  ;;  %v12544_v12 = vadd.f32 %v1352_v22, %v12277_v41  ;;  %v12546_v21 = vadd.f32 %v10693_v54, %v1484_v57  ;;  %v3665_v54 = vld [vmem:[%s11607_s10 + $0x66] sm:$0xff] }
 0x137   : > { %v10640_v5 = vpop.f32.mrf.mxu0  ;;  %10957 = vmatmul.mubr.msk.f32.gmra.mxu0 %vm363_vm1, %v3660_v0 }
 0x138   : > { %v10696_v18 = vpop.f32.mrf.mxu1  ;;  %v1486_v27 = vadd.f32 %v10640_v5, %v12288_v49  ;;  %10959 = vmatprep.mubr.msk.f32.mxu0 %vm363_vm1, %v3661_v1  ;;  %v3666_v1 = vld [vmem:[%s11607_s10 + $0x6e] sm:$0xff] }
 0x139   : > { %v1362_v15 = vpop.f32.mrf.mxu0 }
 0x13a   : > { %v12552_v46 = vpop.f32.mrf.mxu1  ;;  %v12556_v41 = vadd.f32 %v1362_v15, %v12295_v63  ;;  %v12558_v31 = vadd.f32 %v10696_v18, %v1486_v27  ;;  %v3667_v27 = vld [vmem:[%s11607_s10 + $0x76] sm:$0xff] }
 0x13b   : > { %16036 = vst [vmem:[#allocation3_spill] sm:$0xff] %v12552_v46  ;;  %v10643_v35 = vpop.f32.mrf.mxu0  ;;  %10960 = vmatmul.mubr.msk.f32.gmra.mxu0 %vm363_vm1, %v3662_v10 }
 0x13c   : > { %v10699_v39 = vpop.f32.mrf.mxu1  ;;  %v1488_v49 = vadd.f32 %v10643_v35, %v12306_v23  ;;  %10962 = vmatprep.mubr.msk.f32.mxu0 %vm363_vm1, %v3663_v25  ;;  %v3668_v35 = vld [vmem:[%s11607_s10 + $0x7e] sm:$0xff] }
 0x13d   : > { %v1372_v45 = vpop.f32.mrf.mxu0 }
 0x13e   : > { %v12564_v53 = vpop.f32.mrf.mxu1  ;;  %v12568_v63 = vadd.f32 %v1372_v45, %v12313_v62  ;;  %v12570_v57 = vadd.f32 %v10699_v39, %v1488_v49 }
 0x13f   : > { %16037 = vst [vmem:[#allocation4_spill] sm:$0xff] %v12564_v53  ;;  %v10646_v0 = vpop.f32.mrf.mxu0  ;;  %10963 = vmatmul.mubr.msk.f32.gmra.mxu0 %vm363_vm1, %v3664_v36  ;;  %v3669_v36 = vld [vmem:[%s11607_s10 + $0x86] sm:$0xff] }
 0x140   : > { %16038 = vst [vmem:[#allocation5_spill] sm:$0xff] %v12568_v63  ;;  %v10702_v22 = vpop.f32.mrf.mxu1  ;;  %v1490_v23 = vadd.f32 %v10646_v0, %v12324_v48  ;;  %10965 = vmatprep.mubr.msk.f32.mxu0 %vm363_vm1, %v3665_v54 }
 0x141   : > { %v1382_v5 = vpop.f32.mrf.mxu0 }
 0x142   : > { %v12576_v18 = vpop.f32.mrf.mxu1  ;;  %v12580_v62 = vadd.f32 %v1382_v5, %v12331_v2  ;;  %v12582_v10 = vadd.f32 %v10702_v22, %v1490_v23  ;;  %v3670_v22 = vld [vmem:[%s11607_s10 + $0x8e] sm:$0xff]  ;;  %v3671_v5 = vld [vmem:[%s11607_s10 + $0x96] sm:$0xff] }
 0x143   : > { %16039 = vst [vmem:[#allocation6_spill] sm:$0xff] %v12576_v18  ;;  %v10649_v15 = vpop.f32.mrf.mxu0  ;;  %10966 = vmatmul.mubr.msk.f32.gmra.mxu0 %vm363_vm1, %v3666_v1 }
 0x144   : > { %16040 = vst [vmem:[#allocation7_spill] sm:$0xff] %v12580_v62  ;;  %v10705_v25 = vpop.f32.mrf.mxu1  ;;  %v1492_v48 = vadd.f32 %v10649_v15, %v12342_v14  ;;  %10968 = vmatprep.mubr.msk.f32.mxu0 %vm363_vm1, %v3667_v27 }
 0x145   : > { %v1392_v39 = vpop.f32.mrf.mxu0 }
 0x146   : > { %v12588_v49 = vpop.f32.mrf.mxu1  ;;  %v12592_v2 = vadd.f32 %v1392_v39, %v12349_v6  ;;  %v12594_v45 = vadd.f32 %v10705_v25, %v1492_v48  ;;  %v3672_v48 = vld [vmem:[%s11607_s10 + $0x9e] sm:$0xff] }
 0x147   : > { %16041 = vst [vmem:[#allocation8_spill] sm:$0xff] %v12588_v49  ;;  %v10652_v54 = vpop.f32.mrf.mxu0  ;;  %10969 = vmatmul.mubr.msk.f32.gmra.mxu0 %vm363_vm1, %v3668_v35 }
 0x148   : > { %16042 = vst [vmem:[#allocation9_spill] sm:$0xff] %v12592_v2  ;;  %v10708_v0 = vpop.f32.mrf.mxu1  ;;  %v1494_v14 = vadd.f32 %v10652_v54, %v12357_v33  ;;  %10971 = vmatprep.mubr.msk.f32.mxu0 %vm363_vm1, %v3669_v36  ;;  %v3673_v36 = vld [vmem:[%s11607_s10 + $0xa6] sm:$0xff]  ;;  %v15956_v2 = vmov 0.0  }
 0x149   : > { %v1402_v23 = vpop.f32.mrf.mxu0  ;;  %4687 = vst.msk [vmem:[#allocation2 + $0x18] sm:$0xff] %vm363_vm1, %v15956_v2  ;;  %4688 = vst.msk [vmem:[#allocation2 + $0x20] sm:$0xff] %vm363_vm1, %v15956_v2 }
 0x14a   : > { %v12600_v1 = vpop.f32.mrf.mxu1  ;;  %v12604_v6 = vadd.f32 %v1402_v23, %v12364_v20  ;;  %v12606_v27 = vadd.f32 %v10708_v0, %v1494_v14  ;;  %4684 = vst.msk [vmem:[#allocation2] sm:$0xff] %vm363_vm1, %v15956_v2  ;;  %4685 = vst.msk [vmem:[#allocation2 + $0x8] sm:$0xff] %vm363_vm1, %v15956_v2 }
 0x14b   : > { %16043 = vst [vmem:[#allocation10_spill] sm:$0xff] %v12600_v1  ;;  %v10655_v15 = vpop.f32.mrf.mxu0  ;;  %10972 = vmatmul.mubr.msk.f32.gmra.mxu0 %vm363_vm1, %v3670_v22  ;;  %v3674_v22 = vld [vmem:[%s11607_s10 + $0xae] sm:$0xff]  ;;  %4686 = vst.msk [vmem:[#allocation2 + $0x10] sm:$0xff] %vm363_vm1, %v15956_v2 }
 0x14c   : > { %16044 = vst [vmem:[#allocation11_spill] sm:$0xff] %v12604_v6  ;;  %v10711_v25 = vpop.f32.mrf.mxu1  ;;  %v1496_v33 = vadd.f32 %v10655_v15, %v12369_v51  ;;  %10974 = vmatprep.mubr.msk.f32.mxu0 %vm363_vm1, %v3671_v5  ;;  %v3675_v15 = vld [vmem:[%s11607_s10 + $0xb6] sm:$0xff]  ;;  %4689 = vst.msk [vmem:[#allocation2 + $0x28] sm:$0xff] %vm363_vm1, %v15956_v2 }
 0x14d   : > { %v1412_v35 = vpop.f32.mrf.mxu0  ;;  %4690 = vst.msk [vmem:[#allocation2 + $0x30] sm:$0xff] %vm363_vm1, %v15956_v2  ;;  %4691 = vst.msk [vmem:[#allocation2 + $0x38] sm:$0xff] %vm363_vm1, %v15956_v2 }
 0x14e   : > { %v12612_v39 = vpop.f32.mrf.mxu1  ;;  %v12616_v20 = vadd.f32 %v1412_v35, %v12376_v3  ;;  %v12618_v54 = vadd.f32 %v10711_v25, %v1496_v33  ;;  %v3676_v35 = vld [vmem:[%s11607_s10 + $0xbe] sm:$0xff]  ;;  %4692 = vst.msk [vmem:[#allocation2 + $0x40] sm:$0xff] %vm363_vm1, %v15956_v2  ;;  %4693 = vst.msk [vmem:[#allocation2 + $0x48] sm:$0xff] %vm363_vm1, %v15956_v2 }
 0x14f   : > { %16045 = vst [vmem:[#allocation12_spill] sm:$0xff] %v12612_v39  ;;  %v10658_v0 = vpop.f32.mrf.mxu0  ;;  %10975 = vmatmul.mubr.msk.f32.gmra.mxu0 %vm363_vm1, %v3672_v48  ;;  %v3691_v39 = vld [vmem:[%s11607_s10 + $0x136] sm:$0xff]  ;;  %4694 = vst.msk [vmem:[#allocation2 + $0x50] sm:$0xff] %vm363_vm1, %v15956_v2 }
 0x150   : > { %16046 = vst [vmem:[#allocation13_spill] sm:$0xff] %v12616_v20  ;;  %v10714_v14 = vpop.f32.mrf.mxu1  ;;  %v1498_v51 = vadd.f32 %v10658_v0, %v12381_v26  ;;  %10977 = vmatprep.mubr.msk.f32.mxu0 %vm363_vm1, %v3673_v36  ;;  %4695 = vst.msk [vmem:[#allocation2 + $0x58] sm:$0xff] %vm363_vm1, %v15956_v2 }
 0x151   : > { %v1422_v23 = vpop.f32.mrf.mxu0  ;;  %4696 = vst.msk [vmem:[#allocation2 + $0x60] sm:$0xff] %vm363_vm1, %v15956_v2  ;;  %4697 = vst.msk [vmem:[#allocation2 + $0x68] sm:$0xff] %vm363_vm1, %v15956_v2 }
 0x152   : > { %v12624_v5 = vpop.f32.mrf.mxu1  ;;  %v12628_v3 = vadd.f32 %v1422_v23, %v12388_v30  ;;  %v12630_v25 = vadd.f32 %v10714_v14, %v1498_v51  ;;  %v3678_v23 = vld [vmem:[%s11607_s10 + $0xce] sm:$0xff]  ;;  %4698 = vst.msk [vmem:[#allocation2 + $0x70] sm:$0xff] %vm363_vm1, %v15956_v2  ;;  %4699 = vst.msk [vmem:[#allocation2 + $0x78] sm:$0xff] %vm363_vm1, %v15956_v2 }
 0x153   : > { %16047 = vst [vmem:[#allocation14_spill] sm:$0xff] %v12624_v5  ;;  %v10661_v33 = vpop.f32.mrf.mxu0  ;;  %10978 = vmatmul.mubr.msk.f32.gmra.mxu0 %vm363_vm1, %v3674_v22  ;;  %v3677_v5 = vld [vmem:[%s11607_s10 + $0xc6] sm:$0xff]  ;;  %4700 = vst.msk [vmem:[#allocation2 + $0x80] sm:$0xff] %vm363_vm1, %v15956_v2 }
 0x154   : > { %16048 = vst [vmem:[#allocation15_spill] sm:$0xff] %v12628_v3  ;;  %v10717_v48 = vpop.f32.mrf.mxu1  ;;  %v1500_v26 = vadd.f32 %v10661_v33, %v12393_v32  ;;  %10980 = vmatprep.mubr.msk.f32.mxu0 %vm363_vm1, %v3675_v15  ;;  %4701 = vst.msk [vmem:[#allocation2 + $0x88] sm:$0xff] %vm363_vm1, %v15956_v2 }
 0x155   : > { %v1432_v36 = vpop.f32.mrf.mxu0  ;;  %4702 = vst.msk [vmem:[#allocation2 + $0x90] sm:$0xff] %vm363_vm1, %v15956_v2  ;;  %4703 = vst.msk [vmem:[#allocation2 + $0x98] sm:$0xff] %vm363_vm1, %v15956_v2 }
 0x156   : > { %v12636_v0 = vpop.f32.mrf.mxu1  ;;  %v12640_v30 = vadd.f32 %v1432_v36, %v12400_v11  ;;  %v12642_v14 = vadd.f32 %v10717_v48, %v1500_v26  ;;  %4704 = vst.msk [vmem:[#allocation2 + $0xa0] sm:$0xff] %vm363_vm1, %v15956_v2  ;;  %4705 = vst.msk [vmem:[#allocation2 + $0xa8] sm:$0xff] %vm363_vm1, %v15956_v2 }
 0x157   : > { %16049 = vst [vmem:[#allocation16_spill] sm:$0xff] %v12636_v0  ;;  %v10664_v51 = vpop.f32.mrf.mxu0  ;;  %10981 = vmatmul.mubr.msk.f32.gmra.mxu0 %vm363_vm1, %v3676_v35  ;;  %v3679_v0 = vld [vmem:[%s11607_s10 + $0xd6] sm:$0xff]  ;;  %4706 = vst.msk [vmem:[#allocation2 + $0xb0] sm:$0xff] %vm363_vm1, %v15956_v2 }
 0x158   : > { %16050 = vst [vmem:[#allocation17_spill] sm:$0xff] %v12640_v30  ;;  %v10720_v22 = vpop.f32.mrf.mxu1  ;;  %v1502_v32 = vadd.f32 %v10664_v51, %v12405_v38  ;;  %10983 = vmatprep.mubr.msk.f32.mxu0 %vm363_vm1, %v3677_v5  ;;  %v3680_v5 = vld [vmem:[%s11607_s10 + $0xde] sm:$0xff]  ;;  %v3689_v30 = vld [vmem:[%s11607_s10 + $0x126] sm:$0xff]  ;;  %4707 = vst.msk [vmem:[#allocation2 + $0xb8] sm:$0xff] %vm363_vm1, %v15956_v2 }
 0x159   : > { %v1442_v15 = vpop.f32.mrf.mxu0  ;;  %4708 = vst.msk [vmem:[#allocation2 + $0xc0] sm:$0xff] %vm363_vm1, %v15956_v2  ;;  %4709 = vst.msk [vmem:[#allocation2 + $0xc8] sm:$0xff] %vm363_vm1, %v15956_v2 }
 0x15a   : > { %v12648_v33 = vpop.f32.mrf.mxu1  ;;  %v12652_v11 = vadd.f32 %v1442_v15, %v12412_v4  ;;  %v12654_v48 = vadd.f32 %v10720_v22, %v1502_v32  ;;  %4710 = vst.msk [vmem:[#allocation2 + $0xd0] sm:$0xff] %vm363_vm1, %v15956_v2  ;;  %4711 = vst.msk [vmem:[#allocation2 + $0xd8] sm:$0xff] %vm363_vm1, %v15956_v2 }
 0x15b   : > { %16051 = vst [vmem:[#allocation18_spill] sm:$0xff] %v12648_v33  ;;  %v10667_v26 = vpop.f32.mrf.mxu0  ;;  %10984 = vmatmul.mubr.msk.f32.gmra.mxu0 %vm363_vm1, %v3678_v23  ;;  %v3681_v33 = vld [vmem:[%s11607_s10 + $0xe6] sm:$0xff]  ;;  %4712 = vst.msk [vmem:[#allocation2 + $0xe0] sm:$0xff] %vm363_vm1, %v15956_v2 }
 0x15c   : > { %16052 = vst [vmem:[#allocation19_spill] sm:$0xff] %v12652_v11  ;;  %v10723_v35 = vpop.f32.mrf.mxu1  ;;  %v1504_v38 = vadd.f32 %v10667_v26, %v12417_v44  ;;  %10986 = vmatprep.mubr.msk.f32.mxu0 %vm363_vm1, %v3679_v0  ;;  %v3682_v44 = vld [vmem:[%s11607_s10 + $0xee] sm:$0xff]  ;;  %v3683_v26 = vld [vmem:[%s11607_s10 + $0xf6] sm:$0xff]  ;;  %4713 = vst.msk [vmem:[#allocation2 + $0xe8] sm:$0xff] %vm363_vm1, %v15956_v2 }
 0x15d   : > { %v12660_v36 = vpop.f32.mrf.mxu0  ;;  %4714 = vst.msk [vmem:[#allocation2 + $0xf0] sm:$0xff] %vm363_vm1, %v15956_v2  ;;  %4715 = vst.msk [vmem:[#allocation2 + $0xf8] sm:$0xff] %vm363_vm1, %v15956_v2 }
 0x15e   : > { %16053 = vst [vmem:[#allocation20_spill] sm:$0xff] %v12660_v36  ;;  %v12662_v51 = vpop.f32.mrf.mxu1  ;;  %v12665_v4 = vadd.f32 %v10723_v35, %v1504_v38  ;;  %v3687_v36 = vld [vmem:[%s11607_s10 + $0x116] sm:$0xff]  ;;  %4716 = vst.msk [vmem:[#allocation2 + $0x100] sm:$0xff] %vm363_vm1, %v15956_v2 }
 0x15f   : > { %16054 = vst [vmem:[#allocation21_spill] sm:$0xff] %v12662_v51  ;;  %v10670_v22 = vpop.f32.mrf.mxu0  ;;  %10987 = vmatmul.mubr.msk.f32.gmra.mxu0 %vm363_vm1, %v3680_v5  ;;  %4717 = vst.msk [vmem:[#allocation2 + $0x108] sm:$0xff] %vm363_vm1, %v15956_v2 }
 0x160   : > { %v10726_v32 = vpop.f32.mrf.mxu1  ;;  %v1506_v23 = vadd.f32 %v10670_v22, %v12431_v50  ;;  %10989 = vmatprep.mubr.msk.f32.mxu0 %vm363_vm1, %v3681_v33  ;;  %v3684_v50 = vld [vmem:[%s11607_s10 + $0xfe] sm:$0xff]  ;;  %4718 = vst.msk [vmem:[#allocation2 + $0x110] sm:$0xff] %vm363_vm1, %v15956_v2  ;;  %4719 = vst.msk [vmem:[#allocation2 + $0x118] sm:$0xff] %vm363_vm1, %v15956_v2 }
 0x161   : > { %v12671_v0 = vpop.f32.mrf.mxu0  ;;  %4720 = vst.msk [vmem:[#allocation2 + $0x120] sm:$0xff] %vm363_vm1, %v15956_v2  ;;  %4721 = vst.msk [vmem:[#allocation2 + $0x128] sm:$0xff] %vm363_vm1, %v15956_v2 }
 0x162   : > { %16055 = vst [vmem:[#allocation22_spill] sm:$0xff] %v12671_v0  ;;  %v12673_v15 = vpop.f32.mrf.mxu1  ;;  %v12676_v51 = vadd.f32 %v10726_v32, %v1506_v23  ;;  %v3685_v0 = vld [vmem:[%s11607_s10 + $0x106] sm:$0xff]  ;;  %4722 = vst.msk [vmem:[#allocation2 + $0x130] sm:$0xff] %vm363_vm1, %v15956_v2 }
 0x163   : > { %16056 = vst [vmem:[#allocation23_spill] sm:$0xff] %v12673_v15  ;;  %v10731_v35 = vpop.f32.mrf.mxu0  ;;  %10990 = vmatmul.mubr.msk.f32.gmra.mxu0 %vm363_vm1, %v3682_v44  ;;  %4723 = vst.msk [vmem:[#allocation2 + $0x138] sm:$0xff] %vm363_vm1, %v15956_v2 }
 0x164   : > { %v10787_v38 = vpop.f32.mrf.mxu1  ;;  %v2332_v5 = vadd.f32 %v10731_v35, %v12456_v9  ;;  %10992 = vmatprep.mubr.msk.f32.mxu0 %vm363_vm1, %v3683_v26  ;;  %v3686_v9 = vld [vmem:[%s11607_s10 + $0x10e] sm:$0xff] }
 0x165   : > { %v12682_v33 = vpop.f32.mrf.mxu0 }
 0x166   : > { %v12684_v22 = vpop.f32.mrf.mxu1  ;;  %v12687_v15 = vadd.f32 %v10787_v38, %v2332_v5 }
 0x167   : > { %v10734_v32 = vpop.f32.mrf.mxu0  ;;  %10993 = vmatmul.mubr.msk.f32.gmra.mxu0 %vm363_vm1, %v3684_v50 }
 0x168   : > { %v10790_v23 = vpop.f32.mrf.mxu1  ;;  %v2334_v44 = vadd.f32 %v10734_v32, %v12472_v29  ;;  %10995 = vmatprep.mubr.msk.f32.mxu0 %vm363_vm1, %v3685_v0  ;;  %v3688_v29 = vld [vmem:[%s11607_s10 + $0x11e] sm:$0xff] }
 0x169   : > { %v12693_v26 = vpop.f32.mrf.mxu0 }
 0x16a   : > { %v12695_v35 = vpop.f32.mrf.mxu1  ;;  %v12698_v11 = vadd.f32 %v10790_v23, %v2334_v44 }
 0x16b   : > { %v10737_v38 = vpop.f32.mrf.mxu0  ;;  %10996 = vmatmul.mubr.msk.f32.gmra.mxu0 %vm363_vm1, %v3686_v9 }
 0x16c   : > { %v10793_v5 = vpop.f32.mrf.mxu1  ;;  %v2336_v50 = vadd.f32 %v10737_v38, %v12488_v60  ;;  %10998 = vmatprep.mubr.msk.f32.mxu0 %vm363_vm1, %v3687_v36  ;;  %v3690_v60 = vld [vmem:[%s11607_s10 + $0x12e] sm:$0xff] }
 0x16d   : > { %v12704_v0 = vpop.f32.mrf.mxu0 }
 0x16e   : > { %v12706_v32 = vpop.f32.mrf.mxu1  ;;  %v12709_v3 = vadd.f32 %v10793_v5, %v2336_v50 }
 0x16f   : > { %v10740_v23 = vpop.f32.mrf.mxu0  ;;  %10999 = vmatmul.mubr.msk.f32.gmra.mxu0 %vm363_vm1, %v3688_v29  ;;  %v3692_v29 = vld [vmem:[%s11607_s10 + $0x13e] sm:$0xff] }
 0x170   : > { %v10796_v44 = vpop.f32.mrf.mxu1  ;;  %v2338_v9 = vadd.f32 %v10740_v23, %v12505_v13  ;;  %11001 = vmatprep.mubr.msk.f32.mxu0 %vm363_vm1, %v3689_v30 }
 0x171   : > { %v12715_v38 = vpop.f32.mrf.mxu0 }
 0x172   : > { %v12717_v36 = vpop.f32.mrf.mxu1  ;;  %v12720_v20 = vadd.f32 %v10796_v44, %v2338_v9 }
 0x173   : > { %v10743_v1 = vpop.f32.mrf.mxu0  ;;  %11002 = vmatmul.mubr.msk.f32.gmra.mxu0 %vm363_vm1, %v3690_v60 }
 0x174   : > { %v10799_v5 = vpop.f32.mrf.mxu1  ;;  %v2340_v50 = vadd.f32 %v10743_v1, %v12521_v37  ;;  %11004 = vmatprep.mubr.msk.f32.mxu0 %vm363_vm1, %v3691_v39 }
 0x175   : > { %v12726_v13 = vpop.f32.mrf.mxu0 }
 0x176   : > { %v12728_v30 = vpop.f32.mrf.mxu1  ;;  %v12730_v23 = vadd.f32 %v10799_v5, %v2340_v50 }
 0x177   : > { %16057 = vst [vmem:[#allocation24_spill] sm:$0xff] %v12728_v30  ;;  %v10746_v6 = vpop.f32.mrf.mxu0  ;;  %11005 = vmatmul.mubr.msk.f32.gmra.mxu0 %vm363_vm1, %v3692_v29 }
 0x178   : > { %v10802_v44 = vpop.f32.mrf.mxu1  ;;  %v2342_v9 = vadd.f32 %v10746_v6, %v12534_v43 }
 0x179   : > { %v12734_v49 = vpop.f32.mrf.mxu0 }
 0x17a   : > { %16058 = vst [vmem:[#allocation25_spill] sm:$0xff] %v12734_v49  ;;  %v12736_v60 = vpop.f32.mrf.mxu1  ;;  %v12738_v37 = vadd.f32 %v10802_v44, %v2342_v9 }
 0x17b   : > { %16059 = vst [vmem:[#allocation26_spill] sm:$0xff] %v12736_v60  ;;  %v10749_v1 = vpop.f32.mrf.mxu0 }
 0x17c   : > { %v10805_v39 = vpop.f32.mrf.mxu1  ;;  %v2344_v43 = vadd.f32 %v10749_v1, %v12546_v21 }
 0x17d   : > { %v12821_v6 = vpop.f32.mrf.mxu0 }
 0x17e   : > { %16060 = vst [vmem:[#allocation27_spill] sm:$0xff] %v12821_v6  ;;  %v12823_v5 = vpop.f32.mrf.mxu1  ;;  %v12825_v50 = vadd.f32 %v10805_v39, %v2344_v43 }
 0x17f   : > { %16061 = vst [vmem:[#allocation28_spill] sm:$0xff] %v12823_v5  ;;  %v10752_v29 = vpop.f32.mrf.mxu0 }
 0x180   : > { %v10808_v44 = vpop.f32.mrf.mxu1  ;;  %v2346_v9 = vadd.f32 %v10752_v29, %v12558_v31 }
 0x181   : > { %v12828_v18 = vpop.f32.mrf.mxu0 }
 0x182   : > { %16062 = vst [vmem:[#allocation29_spill] sm:$0xff] %v12828_v18  ;;  %v12830_v62 = vpop.f32.mrf.mxu1  ;;  %v12832_v60 = vadd.f32 %v10808_v44, %v2346_v9 }
 0x183   : > { %16063 = vst [vmem:[#allocation30_spill] sm:$0xff] %v12830_v62  ;;  %v10755_v53 = vpop.f32.mrf.mxu0 }
 0x184   : > { %v10811_v2 = vpop.f32.mrf.mxu1  ;;  %v2348_v21 = vadd.f32 %v10755_v53, %v12570_v57 }
 0x185   : > { %v12835_v1 = vpop.f32.mrf.mxu0 }
 0x186   : > { %16064 = vst [vmem:[#allocation31_spill] sm:$0xff] %v12835_v1  ;;  %v12837_v6 = vpop.f32.mrf.mxu1  ;;  %v12839_v39 = vadd.f32 %v10811_v2, %v2348_v21 }
 0x187   : > { %16065 = vst [vmem:[#allocation32_spill] sm:$0xff] %v12837_v6  ;;  %v10758_v43 = vpop.f32.mrf.mxu0 }
 0x188   : > { %v10814_v5 = vpop.f32.mrf.mxu1  ;;  %v2350_v31 = vadd.f32 %v10758_v43, %v12582_v10 }
 0x189   : > { %v12842_v29 = vpop.f32.mrf.mxu0 }
 0x18a   : > { %16066 = vst [vmem:[#allocation33_spill] sm:$0xff] %v12842_v29  ;;  %v12844_v18 = vpop.f32.mrf.mxu1  ;;  %v12846_v44 = vadd.f32 %v10814_v5, %v2350_v31 }
 0x18b   : > { %16067 = vst [vmem:[#allocation34_spill] sm:$0xff] %v12844_v18  ;;  %v10761_v9 = vpop.f32.mrf.mxu0 }
 0x18c   : > { %v10817_v62 = vpop.f32.mrf.mxu1  ;;  %v2352_v53 = vadd.f32 %v10761_v9, %v12594_v45 }
 0x18d   : > { %v12849_v57 = vpop.f32.mrf.mxu0 }
 0x18e   : > { %16068 = vst [vmem:[#allocation35_spill] sm:$0xff] %v12849_v57  ;;  %v12851_v1 = vpop.f32.mrf.mxu1  ;;  %v12853_v2 = vadd.f32 %v10817_v62, %v2352_v53 }
 0x18f   : > { %16069 = vst [vmem:[#allocation36_spill] sm:$0xff] %v12851_v1  ;;  %v10764_v21 = vpop.f32.mrf.mxu0 }
 0x190   : > { %v10820_v6 = vpop.f32.mrf.mxu1  ;;  %v2354_v10 = vadd.f32 %v10764_v21, %v12606_v27 }
 0x191   : > { %v12856_v43 = vpop.f32.mrf.mxu0 }
 0x192   : > { %16070 = vst [vmem:[#allocation37_spill] sm:$0xff] %v12856_v43  ;;  %v12858_v29 = vpop.f32.mrf.mxu1  ;;  %v12860_v5 = vadd.f32 %v10820_v6, %v2354_v10 }
 0x193   : > { %16071 = vst [vmem:[#allocation38_spill] sm:$0xff] %v12858_v29  ;;  %v10767_v31 = vpop.f32.mrf.mxu0 }
 0x194   : > { %v10823_v18 = vpop.f32.mrf.mxu1  ;;  %v2356_v45 = vadd.f32 %v10767_v31, %v12618_v54 }
 0x195   : > { %v12863_v9 = vpop.f32.mrf.mxu0 }
 0x196   : > { %16072 = vst [vmem:[#allocation39_spill] sm:$0xff] %v12863_v9  ;;  %v12865_v57 = vpop.f32.mrf.mxu1  ;;  %v12867_v62 = vadd.f32 %v10823_v18, %v2356_v45 }
 0x197   : > { %16073 = vst [vmem:[#allocation40_spill] sm:$0xff] %v12865_v57  ;;  %v10770_v53 = vpop.f32.mrf.mxu0 }
 0x198   : > { %v10826_v1 = vpop.f32.mrf.mxu1  ;;  %v2358_v27 = vadd.f32 %v10770_v53, %v12630_v25 }
 0x199   : > { %v12870_v21 = vpop.f32.mrf.mxu0 }
 0x19a   : > { %16074 = vst [vmem:[#allocation41_spill] sm:$0xff] %v12870_v21  ;;  %v12872_v43 = vpop.f32.mrf.mxu1  ;;  %v12874_v6 = vadd.f32 %v10826_v1, %v2358_v27 }
 0x19b   : > { %16075 = vst [vmem:[#allocation42_spill] sm:$0xff] %v12872_v43  ;;  %v10773_v10 = vpop.f32.mrf.mxu0 }
 0x19c   : > { %v10829_v29 = vpop.f32.mrf.mxu1  ;;  %v2360_v54 = vadd.f32 %v10773_v10, %v12642_v14 }
 0x19d   : > { %v12877_v31 = vpop.f32.mrf.mxu0 }
 0x19e   : > { %16076 = vst [vmem:[#allocation43_spill] sm:$0xff] %v12877_v31  ;;  %v12879_v9 = vpop.f32.mrf.mxu1  ;;  %v12881_v18 = vadd.f32 %v10829_v29, %v2360_v54 }
 0x19f   : > { %16077 = vst [vmem:[#allocation44_spill] sm:$0xff] %v12879_v9  ;;  %v10776_v45 = vpop.f32.mrf.mxu0 }
 0x1a0   : > { %v10832_v57 = vpop.f32.mrf.mxu1  ;;  %v2362_v25 = vadd.f32 %v10776_v45, %v12654_v48 }
 0x1a1   : > { %v12884_v53 = vpop.f32.mrf.mxu0 }
 0x1a2   : > { %16078 = vst [vmem:[#allocation45_spill] sm:$0xff] %v12884_v53  ;;  %v12886_v21 = vpop.f32.mrf.mxu1  ;;  %v12888_v1 = vadd.f32 %v10832_v57, %v2362_v25 }
 0x1a3   : > { %16079 = vst [vmem:[#allocation46_spill] sm:$0xff] %v12886_v21  ;;  %v10779_v27 = vpop.f32.mrf.mxu0 }
 0x1a4   : > { %v10835_v43 = vpop.f32.mrf.mxu1  ;;  %v2364_v14 = vadd.f32 %v10779_v27, %v12665_v4 }
 0x1a5   : > { %v12891_v10 = vpop.f32.mrf.mxu0 }
 0x1a6   : > { %16080 = vst [vmem:[#allocation47_spill] sm:$0xff] %v12891_v10  ;;  %v12893_v31 = vpop.f32.mrf.mxu1  ;;  %v12895_v29 = vadd.f32 %v10835_v43, %v2364_v14 }
 0x1a7   : > { %16081 = vst [vmem:[#allocation48_spill] sm:$0xff] %v12893_v31  ;;  %v10782_v54 = vpop.f32.mrf.mxu0 }
 0x1a8   : > { %v10838_v9 = vpop.f32.mrf.mxu1  ;;  %v2366_v48 = vadd.f32 %v10782_v54, %v12676_v51 }
 0x1a9   : > { %v12898_v45 = vpop.f32.mrf.mxu0 }
 0x1aa   : > { %16082 = vst [vmem:[#allocation49_spill] sm:$0xff] %v12898_v45  ;;  %v12900_v53 = vpop.f32.mrf.mxu1  ;;  %v12902_v57 = vadd.f32 %v10838_v9, %v2366_v48 }
 0x1ab   : > { %16083 = vst [vmem:[#allocation50_spill] sm:$0xff] %v12900_v53  ;;  %v10843_v25 = vpop.f32.mrf.mxu0 }
 0x1ac   : > { %v12904_v21 = vpop.f32.mrf.mxu1  ;;  %v12907_v4 = vadd.f32 %v10843_v25, %v12687_v15 }
 0x1ad   : > { %v12909_v27 = vpop.f32.mrf.mxu0 }
 0x1ae   : > { %v12911_v43 = vpop.f32.mrf.mxu1 }
 0x1af   : > { %v10846_v14 = vpop.f32.mrf.mxu0 }
 0x1b0   : > { %v12914_v31 = vadd.f32 %v10846_v14, %v12698_v11  ;;  %v12918_v54 = vpop.f32.mrf.mxu1 }
 0x1b1   : > { %v12916_v51 = vpop.f32.mrf.mxu0 }
 0x1b2   : > { %v12923_v53 = vpop.f32.mrf.mxu1 }
 0x1b3   : > { %v10849_v9 = vpop.f32.mrf.mxu0 }
 0x1b4   : > { %v12921_v48 = vadd.f32 %v10849_v9, %v12709_v3  ;;  %v12930_v10 = vpop.f32.mrf.mxu1 }
 0x1b5   : > { %v12925_v15 = vpop.f32.mrf.mxu0 }
 0x1b6   : > { %v12937_v49 = vpop.f32.mrf.mxu1 }
 0x1b7   : > { %v10852_v25 = vpop.f32.mrf.mxu0 }
 0x1b8   : > { %v12928_v45 = vadd.f32 %v10852_v25, %v12720_v20  ;;  %v12944_v46 = vpop.f32.mrf.mxu1 }
 0x1b9   : > { %v12932_v11 = vpop.f32.mrf.mxu0 }
 0x1ba   : > { %16084 = vst [vmem:[#allocation51_spill] sm:$0xff] %v12928_v45  ;;  %16085 = vst [vmem:[#allocation52_spill] sm:$0xff] %v12932_v11  ;;  %v12951_v11 = vpop.f32.mrf.mxu1 }
 0x1bb   : > { %v10855_v14 = vpop.f32.mrf.mxu0 }
 0x1bc   : > { %v12935_v63 = vadd.f32 %v10855_v14, %v12730_v23 }
 0x1bd   : > { %v12939_v3 = vpop.f32.mrf.mxu0 }
 0x1be   : > { %16086 = vst [vmem:[#allocation53_spill] sm:$0xff] %v12935_v63  ;;  %16087 = vst [vmem:[#allocation54_spill] sm:$0xff] %v12939_v3  ;;  %v12958_v3 = vpop.f32.mrf.mxu1 }
 0x1bf   : > { %v10858_v9 = vpop.f32.mrf.mxu0 }
 0x1c0   : > { %v12942_v30 = vadd.f32 %v10858_v9, %v12738_v37 }
 0x1c1   : > { %v12946_v20 = vpop.f32.mrf.mxu0 }
 0x1c2   : > { %16088 = vst [vmem:[#allocation55_spill] sm:$0xff] %v12942_v30  ;;  %16089 = vst [vmem:[#allocation56_spill] sm:$0xff] %v12946_v20  ;;  %v12965_v20 = vpop.f32.mrf.mxu1 }
 0x1c3   : > { %v10861_v25 = vpop.f32.mrf.mxu0  ;;  %16095 = vst [vmem:[#allocation62_spill] sm:$0xff] %v12965_v20 }
 0x1c4   : > { %v12949_v45 = vadd.f32 %v10861_v25, %v12825_v50 }
 0x1c5   : > { %v12953_v23 = vpop.f32.mrf.mxu0 }
 0x1c6   : > { %16090 = vst [vmem:[#allocation57_spill] sm:$0xff] %v12949_v45  ;;  %16091 = vst [vmem:[#allocation58_spill] sm:$0xff] %v12953_v23  ;;  %v12972_v23 = vpop.f32.mrf.mxu1 }
 0x1c7   : > { %v10864_v14 = vpop.f32.mrf.mxu0  ;;  %16098 = vst [vmem:[#allocation65_spill] sm:$0xff] %v12972_v23 }
 0x1c8   : > { %v12956_v63 = vadd.f32 %v10864_v14, %v12832_v60 }
 0x1c9   : > { %v12960_v37 = vpop.f32.mrf.mxu0 }
 0x1ca   : > { %16092 = vst [vmem:[#allocation59_spill] sm:$0xff] %v12956_v63  ;;  %16093 = vst [vmem:[#allocation60_spill] sm:$0xff] %v12960_v37  ;;  %v12979_v37 = vpop.f32.mrf.mxu1 }
 0x1cb   : > { %v10867_v9 = vpop.f32.mrf.mxu0  ;;  %16101 = vst [vmem:[#allocation68_spill] sm:$0xff] %v12979_v37 }
 0x1cc   : > { %v12963_v30 = vadd.f32 %v10867_v9, %v12839_v39  ;;  %v12983_v9 = vpop.permute.xlu0 %4132 }
 0x1cd   : > { %v12967_v50 = vpop.f32.mrf.mxu0  ;;  %16103 = vst [vmem:[#allocation70_spill] sm:$0xff] %v12983_v9 }
 0x1ce   : > { %16094 = vst [vmem:[#allocation61_spill] sm:$0xff] %v12963_v30  ;;  %16096 = vst [vmem:[#allocation63_spill] sm:$0xff] %v12967_v50  ;;  %v12985_v30 = vpop.permute.xlu1 %4142 }
 0x1cf   : > { %v10870_v25 = vpop.f32.mrf.mxu0  ;;  %16104 = vst [vmem:[#allocation71_spill] sm:$0xff] %v12985_v30 }
 0x1d0   : > { %v12970_v45 = vadd.f32 %v10870_v25, %v12846_v44  ;;  %v12990_v25 = vpop.f32.mrf.mxu1  ;;  %v12994_v23 = vpop.permute.xlu0 %4137 }
 0x1d1   : > { %v12974_v60 = vpop.f32.mrf.mxu0  ;;  %16106 = vst [vmem:[#allocation73_spill] sm:$0xff] %v12990_v25  ;;  %16108 = vst [vmem:[#allocation75_spill] sm:$0xff] %v12994_v23 }
 0x1d2   : > { %16097 = vst [vmem:[#allocation64_spill] sm:$0xff] %v12970_v45  ;;  %16099 = vst [vmem:[#allocation66_spill] sm:$0xff] %v12974_v60 }
 0x1d3   : > { %v10873_v14 = vpop.f32.mrf.mxu0 }
 0x1d4   : > { %v12977_v63 = vadd.f32 %v10873_v14, %v12853_v2  ;;  %v12996_v2 = vpop.permute.xlu1 %4147 }
 0x1d5   : > { %v12981_v39 = vpop.f32.mrf.mxu0  ;;  %16109 = vst [vmem:[#allocation76_spill] sm:$0xff] %v12996_v2 }
 0x1d6   : > { %16100 = vst [vmem:[#allocation67_spill] sm:$0xff] %v12977_v63  ;;  %16102 = vst [vmem:[#allocation69_spill] sm:$0xff] %v12981_v39  ;;  %v13001_v63 = vpop.f32.mrf.mxu1 }
 0x1d7   : > { %v10876_v50 = vpop.f32.mrf.mxu0  ;;  %16111 = vst [vmem:[#allocation78_spill] sm:$0xff] %v13001_v63 }
 0x1d8   : > { %v12988_v44 = vadd.f32 %v10876_v50, %v12860_v5  ;;  %v13008_v50 = vpop.f32.mrf.mxu1  ;;  %v13014_v25 = vpop.permute.xlu1 %4157 }
 0x1d9   : > { %v12992_v45 = vpop.f32.mrf.mxu0  ;;  %16114 = vst [vmem:[#allocation81_spill] sm:$0xff] %v13008_v50  ;;  %16117 = vst [vmem:[#allocation84_spill] sm:$0xff] %v13014_v25 }
 0x1da   : > { %16105 = vst [vmem:[#allocation72_spill] sm:$0xff] %v12988_v44  ;;  %16107 = vst [vmem:[#allocation74_spill] sm:$0xff] %v12992_v45  ;;  %v13012_v45 = vpop.permute.xlu0 %4152 }
 0x1db   : > { %v10879_v60 = vpop.f32.mrf.mxu0  ;;  %16116 = vst [vmem:[#allocation83_spill] sm:$0xff] %v13012_v45 }
 0x1dc   : > { %v12999_v14 = vadd.f32 %v10879_v60, %v12867_v62  ;;  %v13019_v60 = vpop.f32.mrf.mxu1 }
 0x1dd   : > { %v13003_v39 = vpop.f32.mrf.mxu0 }
 0x1de   : > { %16110 = vst [vmem:[#allocation77_spill] sm:$0xff] %v12999_v14  ;;  %16112 = vst [vmem:[#allocation79_spill] sm:$0xff] %v13003_v39  ;;  %v13032_v50 = vpop.f32.mrf.mxu1 }
 0x1df   : > { %v10882_v37 = vpop.f32.mrf.mxu0 }
 0x1e0   : > { %v13006_v5 = vadd.f32 %v10882_v37, %v12874_v6  ;;  %v1901_v6 = vadd.f32 %v12450_v40, %v12454_v61  ;;  %v13025_v37 = vpop.permute.xlu0 %4162  ;;  %v13042_v40 = vpop.f32.mrf.mxu1 }
 0x1e1   : > { %v13010_v44 = vpop.f32.mrf.mxu0  ;;  %16120 = vst [vmem:[#allocation87_spill] sm:$0xff] %v13025_v37 }
 0x1e2   : > { %16113 = vst [vmem:[#allocation80_spill] sm:$0xff] %v13006_v5  ;;  %16115 = vst [vmem:[#allocation82_spill] sm:$0xff] %v13010_v44  ;;  %v13027_v5 = vpop.permute.xlu1 %4167 }
 0x1e3   : > { %v10885_v20 = vpop.f32.mrf.mxu0  ;;  %16121 = vst [vmem:[#allocation88_spill] sm:$0xff] %v13027_v5 }
 0x1e4   : > { %v13017_v62 = vadd.f32 %v10885_v20, %v12881_v18  ;;  %v2331_v18 = vadd.f32 %v12682_v33, %v1901_v6  ;;  %v1905_v33 = vadd.f32 %v12482_v52, %v12486_v47  ;;  %v1907_v52 = vadd.f32 %v12498_v58, %v12503_v7 }
 0x1e5   : > { %v13021_v14 = vpop.f32.mrf.mxu0 }
 0x1e6   : > { %16118 = vst [vmem:[#allocation85_spill] sm:$0xff] %v13017_v62  ;;  %16119 = vst [vmem:[#allocation86_spill] sm:$0xff] %v13021_v14  ;;  %v1903_v62 = vadd.f32 %v12466_v28, %v12470_v24 }
 0x1e7   : > { %v10888_v39 = vpop.f32.mrf.mxu0 }
 0x1e8   : > { %v13030_v44 = vadd.f32 %v10888_v39, %v12888_v1  ;;  %v2761_v1 = vadd.f32 %v12684_v22, %v2331_v18  ;;  %v2333_v39 = vadd.f32 %v12693_v26, %v1903_v62  ;;  %v3622_v62 = vadd.f32 %v12904_v21, %v12907_v4 }
 0x1e9   : > { %v13034_v63 = vpop.f32.mrf.mxu0  ;;  %v2337_v4 = vadd.f32 %v12715_v38, %v1907_v52 }
 0x1ea   : > { %16122 = vst [vmem:[#allocation89_spill] sm:$0xff] %v13030_v44  ;;  %16123 = vst [vmem:[#allocation90_spill] sm:$0xff] %v13034_v63  ;;  %v13048_v44 = vpop.permute.xlu0 %4172  ;;  %v13050_v63 = vpop.permute.xlu1 %4177  ;;  %v3191_v28 = vadd.f32 %v12909_v27, %v2761_v1  ;;  %v2763_v26 = vadd.f32 %v12695_v35, %v2333_v39  ;;  %v3624_v39 = vadd.f32 %v12918_v54, %v12914_v31 }
 0x1eb   : > { %v10891_v20 = vpop.f32.mrf.mxu0  ;;  %16124 = vst [vmem:[#allocation91_spill] sm:$0xff] %v13048_v44  ;;  %16125 = vst [vmem:[#allocation92_spill] sm:$0xff] %v13050_v63  ;;  %v13101_v54 = vadd.f32 %v12439_v8, %v12437_v34 }
 0x1ec   : > { %v13040_v14 = vadd.f32 %v10891_v20, %v12895_v29  ;;  %v2335_v29 = vadd.f32 %v12704_v0, %v1905_v33  ;;  %v13059_v20 = vpop.f32.mrf.mxu1  ;;  %v3621_v0 = vadd.f32 %v12911_v43, %v3191_v28  ;;  %v3193_v27 = vadd.f32 %v12916_v51, %v2763_v26 }
 0x1ed   : > { %v13044_v61 = vpop.f32.mrf.mxu0  ;;  %v1909_v51 = vadd.f32 %v12515_v19, %v12519_v17  ;;  %v2767_v26 = vadd.f32 %v12717_v36, %v2337_v4  ;;  %v3626_v17 = vadd.f32 %v12930_v10, %v12921_v48  ;;  %v1913_v10 = vadd.f32 %v12540_v55, %v12544_v12  ;;  %v16130_v48 = vld [vmem:[#allocation3_spill] sm:$0xff] }
 0x1ee   : > { %v13075_v18 = vpop.permute.xlu0 %4182  ;;  %v13077_v1 = vpop.permute.xlu1 %4187  ;;  %v2765_v21 = vadd.f32 %v12706_v32, %v2335_v29  ;;  %v13093_v32 = vadd.f32 %v12425_v59, %v12423_v16  ;;  %v3623_v38 = vadd.f32 %v12923_v53, %v3193_v27  ;;  %v1915_v52 = vadd.f32 %v16130_v48, %v12556_v41  ;;  %v16131_v27 = vld [vmem:[#allocation52_spill] sm:$0xff] }
 0x1ef   : > { %v10894_v6 = vpop.f32.mrf.mxu0  ;;  %16126 = vst [vmem:[#allocation93_spill] sm:$0xff] %v13075_v18  ;;  %16127 = vst [vmem:[#allocation94_spill] sm:$0xff] %v13077_v1  ;;  %v13081_v58 = vpop.f32.mrf.mxu1  ;;  %v2339_v19 = vadd.f32 %v12726_v13, %v1909_v51  ;;  %v1911_v13 = vadd.f32 %v12528_v42, %v12532_v56  ;;  %v16133_v42 = vld [vmem:[#allocation25_spill] sm:$0xff]  ;;  %v16134_v51 = vld [vmem:[#allocation51_spill] sm:$0xff] }
 0x1f0   : > { %v13056_v24 = vadd.f32 %v10894_v6, %v12902_v57  ;;  %v13071_v57 = vld [vmem:[%s15952_s3] ss:$0 sm:$0xff]  ;;  %v3195_v6 = vadd.f32 %v12925_v15, %v2765_v21  ;;  %v3628_v55 = vadd.f32 %v12944_v46, %v16134_v51 }
 0x1f1   : > { %v13061_v22 = vpop.f32.mrf.mxu0  ;;  %v13107_v15 = vpop.f32.mrf.mxu1  ;;  %v2341_v56 = vadd.f32 %v16133_v42, %v1911_v13  ;;  %v16142_v42 = vld [vmem:[#allocation26_spill] sm:$0xff] }
 0x1f2   : > { %v13109_v59 = vpop.permute.xlu0 %4192  ;;  %v13111_v53 = vpop.permute.xlu1 %4197 }
 0x1f3   : > { %v10955_v47 = vpop.f32.mrf.mxu0  ;;  %16128 = vst [vmem:[#allocation95_spill] sm:$0xff] %v13109_v59  ;;  %16129 = vst [vmem:[#allocation96_spill] sm:$0xff] %v13111_v53  ;;  %v13136_v12 = vpop.f32.mrf.mxu1  ;;  %v2771_v51 = vadd.f32 %v16142_v42, %v2341_v56  ;;  %v16145_v56 = vld [vmem:[#allocation7_spill] sm:$0xff] }
 0x1f4   : > { %v4052_v35 = vadd.f32 %v10955_v47, %v3622_v62  ;;  %v3625_v47 = vadd.f32 %v12937_v49, %v3195_v6 }
 0x1f5   : > { %v3872_v7 = vpop.f32.mrf.mxu0 }
 0x1f6   : > { %v13086_v33 = vadd.f32 %v13071_v57, %v4052_v35  ;;  %v4051_v43 = vadd.f32 %v3872_v7, %v3621_v0  ;;  %v3197_v35 = vadd.f32 %v16131_v27, %v2767_v26  ;;  %v16136_v26 = vld [vmem:[#allocation5_spill] sm:$0xff]  ;;  %v13151_v27 = vpop.permute.xlu0 %4202 }
 0x1f7   : > { %v10958_v28 = vpop.f32.mrf.mxu0  ;;  %16140 = vst [vmem:[#allocation52_spill] sm:$0xff] %v13151_v27 }
 0x1f8   : > { %v13097_v29 = vadd.f32 %v13071_v57, %v4051_v43  ;;  %v4054_v31 = vadd.f32 %v10958_v28, %v3624_v39  ;;  %v4311_v62 = vmul.f32 %v12994_v23, %v13086_v33  ;;  %v16132_v39 = vld [vmem:[#allocation24_spill] sm:$0xff] }
 0x1f9   : > { %v3882_v16 = vpop.f32.mrf.mxu0  ;;  %v2769_v43 = vadd.f32 %v16132_v39, %v2339_v19  ;;  %v16137_v19 = vld [vmem:[#allocation4_spill] sm:$0xff] }
 0x1fa   : > { %v4310_v34 = vmul.f32 %v12983_v9, %v13097_v29  ;;  %v13118_v8 = vadd.f32 %v13071_v57, %v4054_v31  ;;  %v4053_v36 = vadd.f32 %v3882_v16, %v3623_v38  ;;  %v4347_v6 = vsel %vm363_vm1, %v4311_v62, 0.0  ;;  %v16138_v16 = vld [vmem:[#allocation27_spill] sm:$0xff]  ;;  %v13153_v62 = vpop.permute.xlu1 %4207 }
 0x1fb   : > { %v10961_v0 = vpop.f32.mrf.mxu0  ;;  %v2343_v46 = vadd.f32 %v16138_v16, %v1913_v10  ;;  %16141 = vst [vmem:[#allocation24_spill] sm:$0xff] %v13153_v62 }
 0x1fc   : > { %v4346_v21 = vsel %vm363_vm1, %v4310_v34, 0.0  ;;  %v13130_v4 = vadd.f32 %v13071_v57, %v4053_v36  ;;  %v4056_v7 = vadd.f32 %v10961_v0, %v3626_v17  ;;  %v4313_v41 = vmul.f32 %v12996_v2, %v13118_v8  ;;  %v16139_v34 = vld [vmem:[#allocation54_spill] sm:$0xff] }
 0x1fd   : > { %v3892_v49 = vpop.f32.mrf.mxu0  ;;  %v1917_v17 = vadd.f32 %v16137_v19, %v16136_v26  ;;  %v3199_v36 = vadd.f32 %v16139_v34, %v2769_v43  ;;  %v4348_v13 = vadd.f32 %v4347_v6, %v4346_v21  ;;  %v3627_v0 = vadd.f32 %v12951_v11, %v3197_v35  ;;  %v13162_v43 = vpop.f32.mrf.mxu1  ;;  %v16146_v26 = vld [vmem:[#allocation6_spill] sm:$0xff] }
 0x1fe   : > { %v4312_v28 = vmul.f32 %v12985_v30, %v13130_v4  ;;  %v13144_v38 = vadd.f32 %v13071_v57, %v4056_v7  ;;  %v4055_v31 = vadd.f32 %v3892_v49, %v3625_v47  ;;  %v16143_v49 = vld [vmem:[#allocation53_spill] sm:$0xff]  ;;  %v4351_v21 = vsel %vm363_vm1, %v4313_v41, 0.0  ;;  %v16148_v34 = vld [vmem:[#allocation62_spill] sm:$0xff] }
 0x1ff   : > { %v10964_v48 = vpop.f32.mrf.mxu0  ;;  %v3630_v10 = vadd.f32 %v12958_v3, %v16143_v49  ;;  %v1919_v19 = vadd.f32 %v16146_v26, %v16145_v56  ;;  %v16147_v3 = vld [vmem:[#allocation28_spill] sm:$0xff]  ;;  %v13184_v56 = vpop.f32.mrf.mxu1  ;;  %v16156_v26 = vld [vmem:[#allocation9_spill] sm:$0xff] }
 0x200   : > { %16135 = vst [vmem:[#allocation3_spill] sm:$0xff] %v13144_v38  ;;  %v4349_v39 = vsel %vm363_vm1, %v4312_v28, 0.0  ;;  %v13157_v7 = vadd.f32 %v13071_v57, %v4055_v31  ;;  %v4058_v47 = vadd.f32 %v10964_v48, %v3628_v55  ;;  %v4315_v6 = vmul.f32 %v13014_v25, %v13144_v38 }
 0x201   : > { %v4350_v11 = vadd.f32 %v4349_v39, %v4348_v13  ;;  %v3902_v35 = vpop.f32.mrf.mxu0  ;;  %v2773_v16 = vadd.f32 %v16147_v3, %v2343_v46  ;;  %v3629_v48 = vadd.f32 %v16148_v34, %v3199_v36  ;;  %v16149_v39 = vld [vmem:[#allocation56_spill] sm:$0xff] }
 0x202   : > { %v4314_v28 = vmul.f32 %v13012_v45, %v13157_v7  ;;  %v13170_v31 = vadd.f32 %v13071_v57, %v4058_v47  ;;  %v4057_v55 = vadd.f32 %v3902_v35, %v3627_v0  ;;  %v3201_v42 = vadd.f32 %v16149_v39, %v2771_v51  ;;  %v16151_v47 = vld [vmem:[#allocation29_spill] sm:$0xff]  ;;  %v16152_v0 = vld [vmem:[#allocation55_spill] sm:$0xff]  ;;  %v13190_v51 = vpop.permute.xlu1 %4217  ;;  %v16157_v3 = vld [vmem:[#allocation8_spill] sm:$0xff] }
 0x203   : > { %v4352_v41 = vadd.f32 %v4351_v21, %v4350_v11  ;;  %v10967_v13 = vpop.f32.mrf.mxu0  ;;  %v2345_v2 = vadd.f32 %v16151_v47, %v1915_v52  ;;  %v16153_v35 = vld [vmem:[#allocation65_spill] sm:$0xff]  ;;  %v13188_v11 = vpop.permute.xlu0 %4212  ;;  %16155 = vst [vmem:[#allocation4_spill] sm:$0xff] %v13190_v51  ;;  %v1921_v34 = vadd.f32 %v16157_v3, %v16156_v26  ;;  %v16159_v39 = vld [vmem:[#allocation58_spill] sm:$0xff] }
 0x204   : > { %16144 = vst [vmem:[#allocation25_spill] sm:$0xff] %v13170_v31  ;;  %v4353_v49 = vsel %vm363_vm1, %v4314_v28, 0.0  ;;  %v13179_v25 = vadd.f32 %v13071_v57, %v4057_v55  ;;  %v4060_v45 = vadd.f32 %v10967_v13, %v3630_v10  ;;  %v3632_v38 = vadd.f32 %v16153_v35, %v16152_v0  ;;  %16154 = vst [vmem:[#allocation5_spill] sm:$0xff] %v13188_v11  ;;  %v16160_v35 = vld [vmem:[#allocation68_spill] sm:$0xff]  ;;  %v13210_v26 = vpop.f32.mrf.mxu1 }
 0x205   : > { %v4354_v46 = vadd.f32 %v4353_v49, %v4352_v41  ;;  %v4317_v36 = vmul.f32 %v13027_v5, %v13170_v31  ;;  %v3912_v21 = vpop.f32.mrf.mxu0  ;;  %v4355_v28 = vsel %vm363_vm1, %v4315_v6, 0.0  ;;  %v16158_v41 = vld [vmem:[#allocation31_spill] sm:$0xff]  ;;  %v3203_v49 = vadd.f32 %v16159_v39, %v2773_v16 }
 0x206   : > { %16150 = vst [vmem:[#allocation51_spill] sm:$0xff] %v13179_v25  ;;  %v4316_v10 = vmul.f32 %v13025_v37, %v13179_v25  ;;  %v13196_v52 = vadd.f32 %v13071_v57, %v4060_v45  ;;  %v4059_v55 = vadd.f32 %v3912_v21, %v3629_v48  ;;  %v2347_v13 = vadd.f32 %v16158_v41, %v1917_v17  ;;  %v16161_v45 = vld [vmem:[#allocation30_spill] sm:$0xff]  ;;  %v16162_v48 = vld [vmem:[#allocation57_spill] sm:$0xff]  ;;  %v16167_v41 = vld [vmem:[#allocation32_spill] sm:$0xff] }
 0x207   : > { %v4356_v47 = vadd.f32 %v4355_v28, %v4354_v46  ;;  %v10970_v0 = vpop.f32.mrf.mxu0  ;;  %v3631_v5 = vadd.f32 %v16160_v35, %v3201_v42  ;;  %v2775_v25 = vadd.f32 %v16161_v45, %v2345_v2  ;;  %v16163_v21 = vld [vmem:[#allocation73_spill] sm:$0xff]  ;;  %v4359_v17 = vsel %vm363_vm1, %v4317_v36, 0.0  ;;  %v16165_v2 = vld [vmem:[#allocation11_spill] sm:$0xff] }
 0x208   : > { %v4357_v6 = vsel %vm363_vm1, %v4316_v10, 0.0  ;;  %v13205_v31 = vadd.f32 %v13071_v57, %v4059_v55  ;;  %v4062_v37 = vadd.f32 %v10970_v0, %v3632_v38  ;;  %v3634_v30 = vadd.f32 %v16163_v21, %v16162_v48  ;;  %v16166_v55 = vld [vmem:[#allocation10_spill] sm:$0xff]  ;;  %v13225_v48 = vpop.permute.xlu0 %4222  ;;  %v13227_v21 = vpop.permute.xlu1 %4227 }
 0x209   : > { %v4358_v16 = vadd.f32 %v4357_v6, %v4356_v47  ;;  %v3922_v46 = vpop.f32.mrf.mxu0  ;;  %v4319_v42 = vmul.f32 %v13050_v63, %v13196_v52  ;;  %v1923_v3 = vadd.f32 %v16166_v55, %v16165_v2  ;;  %v2777_v39 = vadd.f32 %v16167_v41, %v2347_v13  ;;  %v16168_v0 = vld [vmem:[#allocation78_spill] sm:$0xff]  ;;  %v16169_v6 = vld [vmem:[#allocation60_spill] sm:$0xff]  ;;  %16170 = vst [vmem:[#allocation54_spill] sm:$0xff] %v13225_v48  ;;  %v16174_v55 = vld [vmem:[#allocation59_spill] sm:$0xff] }
 0x20a   : > { %v4318_v28 = vmul.f32 %v13048_v44, %v13205_v31  ;;  %v13218_v10 = vadd.f32 %v13071_v57, %v4062_v37  ;;  %v4061_v38 = vadd.f32 %v3922_v46, %v3631_v5  ;;  %v3633_v35 = vadd.f32 %v16168_v0, %v3203_v49  ;;  %16171 = vst [vmem:[#allocation26_spill] sm:$0xff] %v13227_v21  ;;  %v16173_v46 = vld [vmem:[#allocation33_spill] sm:$0xff]  ;;  %v13236_v49 = vpop.f32.mrf.mxu1 }
 0x20b   : > { %v4360_v36 = vadd.f32 %v4359_v17, %v4358_v16  ;;  %v10973_v47 = vpop.f32.mrf.mxu0  ;;  %v3205_v45 = vadd.f32 %v16169_v6, %v2775_v25  ;;  %v2349_v2 = vadd.f32 %v16173_v46, %v1919_v19  ;;  %v16175_v13 = vld [vmem:[#allocation81_spill] sm:$0xff]  ;;  %v4363_v0 = vsel %vm363_vm1, %v4319_v42, 0.0  ;;  %v16179_v46 = vld [vmem:[#allocation35_spill] sm:$0xff] }
 0x20c   : > { %16164 = vst [vmem:[#allocation27_spill] sm:$0xff] %v13218_v10  ;;  %v4361_v63 = vsel %vm363_vm1, %v4318_v28, 0.0  ;;  %v13231_v37 = vadd.f32 %v13071_v57, %v4061_v38  ;;  %v4064_v5 = vadd.f32 %v10973_v47, %v3634_v30  ;;  %v3636_v41 = vadd.f32 %v16175_v13, %v16174_v55  ;;  %v16177_v19 = vld [vmem:[#allocation13_spill] sm:$0xff]  ;;  %v16178_v47 = vld [vmem:[#allocation12_spill] sm:$0xff]  ;;  %v16180_v13 = vld [vmem:[#allocation63_spill] sm:$0xff] }
 0x20d   : > { %v4362_v17 = vadd.f32 %v4361_v63, %v4360_v36  ;;  %v4321_v25 = vmul.f32 %v13077_v1, %v13218_v10  ;;  %v3932_v16 = vpop.f32.mrf.mxu0  ;;  %v1925_v6 = vadd.f32 %v16178_v47, %v16177_v19  ;;  %v2351_v55 = vadd.f32 %v16179_v46, %v1921_v34  ;;  %v13258_v19 = vpop.f32.mrf.mxu1 }
 0x20e   : > { %16172 = vst [vmem:[#allocation53_spill] sm:$0xff] %v13231_v37  ;;  %v4320_v28 = vmul.f32 %v13075_v18, %v13231_v37  ;;  %v13244_v38 = vadd.f32 %v13071_v57, %v4064_v5  ;;  %v4063_v30 = vadd.f32 %v3932_v16, %v3633_v35  ;;  %v3207_v63 = vadd.f32 %v16180_v13, %v2777_v39  ;;  %v16181_v5 = vld [vmem:[#allocation34_spill] sm:$0xff]  ;;  %v16182_v35 = vld [vmem:[#allocation61_spill] sm:$0xff] }
 0x20f   : > { %v4364_v36 = vadd.f32 %v4363_v0, %v4362_v17  ;;  %v10976_v44 = vpop.f32.mrf.mxu0  ;;  %v3635_v1 = vadd.f32 %v13019_v60, %v3205_v45  ;;  %v2779_v37 = vadd.f32 %v16181_v5, %v2349_v2  ;;  %v3638_v16 = vadd.f32 %v13032_v50, %v16182_v35  ;;  %v13261_v0 = vpop.permute.xlu0 %4232 }
 0x210   : > { %16176 = vst [vmem:[#allocation7_spill] sm:$0xff] %v13244_v38  ;;  %v4365_v42 = vsel %vm363_vm1, %v4320_v28, 0.0  ;;  %v13253_v10 = vadd.f32 %v13071_v57, %v4063_v30  ;;  %v4066_v18 = vadd.f32 %v10976_v44, %v3636_v41  ;;  %v4367_v34 = vsel %vm363_vm1, %v4321_v25, 0.0  ;;  %16183 = vst [vmem:[#allocation6_spill] sm:$0xff] %v13261_v0  ;;  %v13263_v60 = vpop.permute.xlu1 %4237  ;;  %v16185_v41 = vld [vmem:[#allocation15_spill] sm:$0xff]  ;;  %v16186_v28 = vld [vmem:[#allocation14_spill] sm:$0xff] }
 0x211   : > { %v4366_v39 = vadd.f32 %v4365_v42, %v4364_v36  ;;  %v3942_v17 = vpop.f32.mrf.mxu0  ;;  %16184 = vst [vmem:[#allocation28_spill] sm:$0xff] %v13263_v60  ;;  %v4323_v45 = vmul.f32 %v13111_v53, %v13244_v38  ;;  %v1927_v30 = vadd.f32 %v16186_v28, %v16185_v41  ;;  %v16187_v25 = vld [vmem:[#allocation36_spill] sm:$0xff]  ;;  %v3637_v46 = vadd.f32 %v13042_v40, %v3207_v63  ;;  %v16188_v42 = vld [vmem:[#allocation66_spill] sm:$0xff]  ;;  %v13284_v41 = vpop.f32.mrf.mxu1 }
 0x212   : > { %v4322_v44 = vmul.f32 %v13109_v59, %v13253_v10  ;;  %v13270_v2 = vadd.f32 %v13071_v57, %v4066_v18  ;;  %v4065_v50 = vadd.f32 %v3942_v17, %v3635_v1  ;;  %v2781_v47 = vadd.f32 %v16187_v25, %v2351_v55  ;;  %v16189_v18 = vld [vmem:[#allocation37_spill] sm:$0xff]  ;;  %v16190_v1 = vld [vmem:[#allocation64_spill] sm:$0xff] }
 0x213   : > { %v4368_v13 = vadd.f32 %v4367_v34, %v4366_v39  ;;  %v10979_v36 = vpop.f32.mrf.mxu0  ;;  %v3209_v5 = vadd.f32 %v16188_v42, %v2779_v37  ;;  %v2353_v38 = vadd.f32 %v16189_v18, %v1923_v3  ;;  %v3640_v17 = vadd.f32 %v13059_v20, %v16190_v1  ;;  %v16191_v3 = vld [vmem:[#allocation17_spill] sm:$0xff]  ;;  %v16193_v20 = vld [vmem:[#allocation39_spill] sm:$0xff]  ;;  %v13299_v18 = vpop.permute.xlu0 %4242 }
 0x214   : > { %v4369_v35 = vsel %vm363_vm1, %v4322_v44, 0.0  ;;  %v13279_v53 = vadd.f32 %v13071_v57, %v4065_v50  ;;  %v4068_v59 = vadd.f32 %v10979_v36, %v3638_v16  ;;  %v4325_v40 = vmul.f32 %v13153_v62, %v13270_v2  ;;  %v16192_v44 = vld [vmem:[#allocation16_spill] sm:$0xff]  ;;  %v16194_v25 = vld [vmem:[#allocation69_spill] sm:$0xff]  ;;  %16195 = vst [vmem:[#allocation62_spill] sm:$0xff] %v13299_v18 }
 0x215   : > { %v4370_v55 = vadd.f32 %v4369_v35, %v4368_v13  ;;  %v3952_v63 = vpop.f32.mrf.mxu0  ;;  %v4371_v37 = vsel %vm363_vm1, %v4323_v45, 0.0  ;;  %v1929_v50 = vadd.f32 %v16192_v44, %v16191_v3  ;;  %v2355_v28 = vadd.f32 %v16193_v20, %v1925_v6  ;;  %v13301_v45 = vpop.permute.xlu1 %4247  ;;  %v16198_v44 = vld [vmem:[#allocation67_spill] sm:$0xff]  ;;  %v16200_v20 = vld [vmem:[#allocation18_spill] sm:$0xff] }
 0x216   : > { %v4324_v34 = vmul.f32 %v13151_v27, %v13279_v53  ;;  %v13292_v39 = vadd.f32 %v13071_v57, %v4068_v59  ;;  %v4067_v16 = vadd.f32 %v3952_v63, %v3637_v46  ;;  %v3211_v13 = vadd.f32 %v16194_v25, %v2781_v47  ;;  %16196 = vst [vmem:[#allocation56_spill] sm:$0xff] %v13301_v45  ;;  %v16197_v63 = vld [vmem:[#allocation38_spill] sm:$0xff]  ;;  %v13310_v47 = vpop.f32.mrf.mxu1 }
 0x217   : > { %v4372_v36 = vadd.f32 %v4371_v37, %v4370_v55  ;;  %v10982_v42 = vpop.f32.mrf.mxu0  ;;  %v3639_v35 = vadd.f32 %v13081_v58, %v3209_v5  ;;  %v2783_v3 = vadd.f32 %v16197_v63, %v2353_v38  ;;  %v3642_v6 = vadd.f32 %v13107_v15, %v16198_v44  ;;  %v16199_v38 = vld [vmem:[#allocation19_spill] sm:$0xff]  ;;  %v16201_v15 = vld [vmem:[#allocation40_spill] sm:$0xff] }
 0x218   : > { %v4373_v1 = vsel %vm363_vm1, %v4324_v34, 0.0  ;;  %v13305_v59 = vadd.f32 %v13071_v57, %v4067_v16  ;;  %v4070_v46 = vadd.f32 %v10982_v42, %v3640_v17  ;;  %v4375_v55 = vsel %vm363_vm1, %v4325_v40, 0.0 }
 0x219   : > { %v4374_v58 = vadd.f32 %v4373_v1, %v4372_v36  ;;  %v3962_v5 = vpop.f32.mrf.mxu0  ;;  %v4327_v37 = vmul.f32 %v13190_v51, %v13292_v39  ;;  %v1931_v25 = vadd.f32 %v16200_v20, %v16199_v38  ;;  %v2785_v42 = vadd.f32 %v16201_v15, %v2355_v28  ;;  %v16202_v1 = vld [vmem:[#allocation74_spill] sm:$0xff]  ;;  %v13332_v38 = vpop.f32.mrf.mxu1  ;;  %v16209_v15 = vld [vmem:[#allocation79_spill] sm:$0xff] }
 0x21a   : > { %v4326_v34 = vmul.f32 %v13188_v11, %v13305_v59  ;;  %v13318_v16 = vadd.f32 %v13071_v57, %v4070_v46  ;;  %v4069_v17 = vadd.f32 %v3962_v5, %v3639_v35  ;;  %v3641_v63 = vadd.f32 %v13136_v12, %v3211_v13  ;;  %v16203_v46 = vld [vmem:[#allocation41_spill] sm:$0xff]  ;;  %v16204_v35 = vld [vmem:[#allocation72_spill] sm:$0xff] }
 0x21b   : > { %v4376_v40 = vadd.f32 %v4375_v55, %v4374_v58  ;;  %v10985_v36 = vpop.f32.mrf.mxu0  ;;  %v3213_v44 = vadd.f32 %v16202_v1, %v2783_v3  ;;  %v2357_v27 = vadd.f32 %v16203_v46, %v1927_v30  ;;  %v3644_v5 = vadd.f32 %v13162_v43, %v16204_v35  ;;  %v13336_v55 = vpop.permute.xlu0 %4252 }
 0x21c   : > { %v4377_v51 = vsel %vm363_vm1, %v4326_v34, 0.0  ;;  %v13327_v62 = vadd.f32 %v13071_v57, %v4069_v17  ;;  %v4072_v11 = vadd.f32 %v10985_v36, %v3642_v6  ;;  %v4329_v12 = vmul.f32 %v13227_v21, %v13318_v16  ;;  %16205 = vst [vmem:[#allocation29_spill] sm:$0xff] %v13336_v55  ;;  %v13338_v3 = vpop.permute.xlu1 %4257  ;;  %v16207_v34 = vld [vmem:[#allocation20_spill] sm:$0xff]  ;;  %v16208_v17 = vld [vmem:[#allocation43_spill] sm:$0xff] }
 0x21d   : > { %v4378_v28 = vadd.f32 %v4377_v51, %v4376_v40  ;;  %v3972_v13 = vpop.f32.mrf.mxu0  ;;  %16206 = vst [vmem:[#allocation55_spill] sm:$0xff] %v13338_v3  ;;  %v4379_v58 = vsel %vm363_vm1, %v4327_v37, 0.0  ;;  %v1503_v51 = vadd.f32 %v16207_v34, %v13093_v32  ;;  %v2359_v20 = vadd.f32 %v16208_v17, %v1929_v50  ;;  %v10944_v32 = vpop.f32.mrf.mxu1 }
 0x21e   : > { %v4328_v6 = vmul.f32 %v13225_v48, %v13327_v62  ;;  %v13344_v30 = vadd.f32 %v13071_v57, %v4072_v11  ;;  %v4071_v43 = vadd.f32 %v3972_v13, %v3641_v63  ;;  %v3215_v40 = vadd.f32 %v16209_v15, %v2785_v42  ;;  %v16210_v11 = vld [vmem:[#allocation42_spill] sm:$0xff]  ;;  %v16211_v63 = vld [vmem:[#allocation77_spill] sm:$0xff] }
 0x21f   : > { %v4380_v36 = vadd.f32 %v4379_v58, %v4378_v28  ;;  %v10988_v1 = vpop.f32.mrf.mxu0  ;;  %v3643_v46 = vadd.f32 %v13184_v56, %v3213_v44  ;;  %v2787_v48 = vadd.f32 %v16210_v11, %v2357_v27  ;;  %v3646_v13 = vadd.f32 %v13210_v26, %v16211_v63  ;;  %v16212_v58 = vld [vmem:[#allocation21_spill] sm:$0xff]  ;;  %v16214_v15 = vld [vmem:[#allocation82_spill] sm:$0xff] }
 0x220   : > { %v4381_v37 = vsel %vm363_vm1, %v4328_v6, 0.0  ;;  %v13353_v35 = vadd.f32 %v13071_v57, %v4071_v43  ;;  %v4074_v21 = vadd.f32 %v10988_v1, %v3644_v5  ;;  %v4383_v50 = vsel %vm363_vm1, %v4329_v12, 0.0  ;;  %v16213_v6 = vld [vmem:[#allocation44_spill] sm:$0xff]  ;;  %v13370_v1 = vpop.permute.xlu0 %4262  ;;  %v16217_v63 = vld [vmem:[#allocation45_spill] sm:$0xff] }
 0x221   : > { %v4382_v34 = vadd.f32 %v4381_v37, %v4380_v36  ;;  %v3982_v42 = vpop.f32.mrf.mxu0  ;;  %v4331_v28 = vmul.f32 %v13263_v60, %v13344_v30  ;;  %v1933_v27 = vadd.f32 %v16212_v58, %v1503_v51  ;;  %v2789_v43 = vadd.f32 %v16213_v6, %v2359_v20  ;;  %16215 = vst [vmem:[#allocation65_spill] sm:$0xff] %v13370_v1  ;;  %v13372_v37 = vpop.permute.xlu1 %4267  ;;  %v16220_v6 = vld [vmem:[#allocation47_spill] sm:$0xff]  ;;  %v16230_v60 = vld [vmem:[#allocation89_spill] sm:$0xff] }
 0x222   : > { %v4330_v56 = vmul.f32 %v13261_v0, %v13353_v35  ;;  %v13364_v44 = vadd.f32 %v13071_v57, %v4074_v21  ;;  %v4073_v5 = vadd.f32 %v3982_v42, %v3643_v46  ;;  %v3645_v26 = vadd.f32 %v13236_v49, %v3215_v40  ;;  %16216 = vst [vmem:[#allocation9_spill] sm:$0xff] %v13372_v37  ;;  %v16218_v42 = vld [vmem:[#allocation80_spill] sm:$0xff]  ;;  %v3592_v49 = vpop.f32.mrf.mxu1 }
 0x223   : > { %v4384_v17 = vadd.f32 %v4383_v50, %v4382_v34  ;;  %v10991_v12 = vpop.f32.mrf.mxu0  ;;  %v3217_v36 = vadd.f32 %v16214_v15, %v2787_v48  ;;  %v2361_v51 = vadd.f32 %v16217_v63, %v1931_v25  ;;  %v3648_v20 = vadd.f32 %v13258_v19, %v16218_v42  ;;  %v16219_v25 = vld [vmem:[#allocation22_spill] sm:$0xff] }
 0x224   : > { %v4385_v11 = vsel %vm363_vm1, %v4330_v56, 0.0  ;;  %v13376_v21 = vadd.f32 %v13071_v57, %v4073_v5  ;;  %v4076_v46 = vadd.f32 %v10991_v12, %v3646_v13  ;;  %v4333_v48 = vmul.f32 %v13301_v45, %v13364_v44  ;;  %v16221_v12 = vld [vmem:[#allocation86_spill] sm:$0xff] }
 0x225   : > { %v4386_v40 = vadd.f32 %v4385_v11, %v4384_v17  ;;  %v3992_v50 = vpop.f32.mrf.mxu0  ;;  %v4387_v34 = vsel %vm363_vm1, %v4331_v28, 0.0  ;;  %v1505_v58 = vadd.f32 %v16219_v25, %v13101_v54  ;;  %v2363_v19 = vadd.f32 %v16220_v6, %v1933_v27  ;;  %v10947_v54 = vpop.f32.mrf.mxu1 }
 0x226   : > { %v4332_v56 = vmul.f32 %v13299_v18, %v13376_v21  ;;  %v13387_v5 = vadd.f32 %v13071_v57, %v4076_v46  ;;  %v4075_v13 = vadd.f32 %v3992_v50, %v3645_v26  ;;  %v3219_v17 = vadd.f32 %v16221_v12, %v2789_v43  ;;  %v16222_v46 = vld [vmem:[#allocation46_spill] sm:$0xff]  ;;  %v16223_v26 = vld [vmem:[#allocation85_spill] sm:$0xff] }
 0x227   : > { %v4388_v15 = vadd.f32 %v4387_v34, %v4386_v40  ;;  %v10994_v11 = vpop.f32.mrf.mxu0  ;;  %v3647_v63 = vadd.f32 %v13284_v41, %v3217_v36  ;;  %v2791_v18 = vadd.f32 %v16222_v46, %v2361_v51  ;;  %v3650_v50 = vadd.f32 %v13310_v47, %v16223_v26  ;;  %v13402_v40 = vpop.permute.xlu0 %4272  ;;  %v16226_v47 = vld [vmem:[#allocation23_spill] sm:$0xff] }
 0x228   : > { %v4389_v28 = vsel %vm363_vm1, %v4332_v56, 0.0  ;;  %v13396_v42 = vadd.f32 %v13071_v57, %v4075_v13  ;;  %v4078_v45 = vadd.f32 %v10994_v11, %v3648_v20  ;;  %v4391_v27 = vsel %vm363_vm1, %v4333_v48, 0.0  ;;  %16224 = vst [vmem:[#allocation8_spill] sm:$0xff] %v13402_v40  ;;  %v13404_v34 = vpop.permute.xlu1 %4277  ;;  %v16227_v13 = vld [vmem:[#allocation48_spill] sm:$0xff]  ;;  %v16228_v11 = vld [vmem:[#allocation90_spill] sm:$0xff] }
 0x229   : > { %v4390_v25 = vadd.f32 %v4389_v28, %v4388_v15  ;;  %v4002_v43 = vpop.f32.mrf.mxu0  ;;  %16225 = vst [vmem:[#allocation31_spill] sm:$0xff] %v13404_v34  ;;  %v4335_v41 = vmul.f32 %v13338_v3, %v13387_v5  ;;  %v1935_v56 = vadd.f32 %v16226_v47, %v1505_v58  ;;  %v2793_v48 = vadd.f32 %v16227_v13, %v2363_v19  ;;  %v16233_v13 = vld [vmem:[#allocation50_spill] sm:$0xff] }
 0x22a   : > { %v4334_v36 = vmul.f32 %v13336_v55, %v13396_v42  ;;  %v13411_v51 = vadd.f32 %v13071_v57, %v4078_v45  ;;  %v4077_v20 = vadd.f32 %v4002_v43, %v3647_v63  ;;  %v3649_v6 = vadd.f32 %v13332_v38, %v3219_v17  ;;  %v16229_v55 = vld [vmem:[#allocation49_spill] sm:$0xff]  ;;  %v3602_v43 = vpop.f32.mrf.mxu1 }
 0x22b   : > { %v4392_v12 = vadd.f32 %v4391_v27, %v4390_v25  ;;  %v10997_v15 = vpop.f32.mrf.mxu0  ;;  %v3221_v28 = vadd.f32 %v16228_v11, %v2791_v18  ;;  %v2365_v45 = vadd.f32 %v16229_v55, %v1935_v56  ;;  %v3652_v63 = vadd.f32 %v10944_v32, %v16230_v60  ;;  %v13432_v32 = vpop.permute.xlu0 %4282 }
 0x22c   : > { %v4393_v46 = vsel %vm363_vm1, %v4334_v36, 0.0  ;;  %v13419_v26 = vadd.f32 %v13071_v57, %v4077_v20  ;;  %v4080_v3 = vadd.f32 %v10997_v15, %v3650_v50  ;;  %v4337_v19 = vmul.f32 %v13372_v37, %v13411_v51  ;;  %16231 = vst [vmem:[#allocation58_spill] sm:$0xff] %v13432_v32  ;;  %v13434_v20 = vpop.permute.xlu1 %4287 }
 0x22d   : > { %v4394_v58 = vadd.f32 %v4393_v46, %v4392_v12  ;;  %v4012_v38 = vpop.f32.mrf.mxu0  ;;  %v4395_v17 = vsel %vm363_vm1, %v4335_v41, 0.0  ;;  %v3223_v50 = vadd.f32 %v13044_v61, %v2793_v48  ;;  %v3651_v60 = vadd.f32 %v3592_v49, %v3221_v28  ;;  %16232 = vst [vmem:[#allocation68_spill] sm:$0xff] %v13434_v20 }
 0x22e   : > { %v4336_v18 = vmul.f32 %v13370_v1, %v13419_v26  ;;  %v13429_v27 = vadd.f32 %v13071_v57, %v4080_v3  ;;  %v4079_v25 = vadd.f32 %v4012_v38, %v3649_v6  ;;  %v2795_v12 = vadd.f32 %v16233_v13, %v2365_v45  ;;  %v10950_v6 = vpop.f32.mrf.mxu1 }
 0x22f   : > { %v4396_v55 = vadd.f32 %v4395_v17, %v4394_v58  ;;  %v11000_v36 = vpop.f32.mrf.mxu0  ;;  %v3654_v3 = vadd.f32 %v10947_v54, %v13040_v14  ;;  %v4399_v61 = vsel %vm363_vm1, %v4337_v19, 0.0  ;;  %v3656_v17 = vadd.f32 %v10950_v6, %v13056_v24 }
 0x230   : > { %v4397_v47 = vsel %vm363_vm1, %v4336_v18, 0.0  ;;  %v13438_v41 = vadd.f32 %v13071_v57, %v4079_v25  ;;  %v4082_v56 = vadd.f32 %v11000_v36, %v3652_v63  ;;  %v4339_v49 = vmul.f32 %v13404_v34, %v13429_v27  ;;  %v3612_v18 = vpop.f32.mrf.mxu1 }
 0x231   : > { %v4398_v48 = vadd.f32 %v4397_v47, %v4396_v55  ;;  %v4022_v15 = vpop.f32.mrf.mxu0  ;;  %v3653_v63 = vadd.f32 %v3602_v43, %v3223_v50  ;;  %v3225_v14 = vadd.f32 %v13061_v22, %v2795_v12 }
 0x232   : > { %v4338_v11 = vmul.f32 %v13402_v40, %v13438_v41  ;;  %v13448_v28 = vadd.f32 %v13071_v57, %v4082_v56  ;;  %v4081_v46 = vadd.f32 %v4022_v15, %v3651_v60  ;;  %v13458_v60 = vpop.permute.xlu0 %4292  ;;  %v4403_v43 = vsel %vm363_vm1, %v4339_v49, 0.0  ;;  %v13466_v56 = vpop.permute.xlu1 %4297 }
 0x233   : > { %v4400_v58 = vadd.f32 %v4399_v61, %v4398_v48  ;;  %v11003_v45 = vpop.f32.mrf.mxu0  ;;  %16234 = vst [vmem:[#allocation30_spill] sm:$0xff] %v13458_v60  ;;  %16235 = vst [vmem:[#allocation57_spill] sm:$0xff] %v13466_v56  ;;  %v3655_v12 = vadd.f32 %v3612_v18, %v3225_v14 }
 0x234   : > { %v4401_v54 = vsel %vm363_vm1, %v4338_v11, 0.0  ;;  %v13453_v19 = vadd.f32 %v13071_v57, %v4081_v46  ;;  %v4084_v38 = vadd.f32 %v11003_v45, %v3654_v3  ;;  %v4341_v55 = vmul.f32 %v13434_v20, %v13448_v28 }
 0x235   : > { %v4402_v25 = vadd.f32 %v4401_v54, %v4400_v58  ;;  %v4032_v36 = vpop.f32.mrf.mxu0 }
 0x236   : > { %v4340_v22 = vmul.f32 %v13432_v32, %v13453_v19  ;;  %v13464_v50 = vadd.f32 %v13071_v57, %v4084_v38  ;;  %v4083_v47 = vadd.f32 %v4032_v36, %v3653_v63  ;;  %v4407_v48 = vsel %vm363_vm1, %v4341_v55, 0.0  ;;  %v13484_v38 = vpop.permute.xlu0 %4302 }
 0x237   : > { %v4404_v24 = vadd.f32 %v4403_v43, %v4402_v25  ;;  %v11006_v13 = vpop.f32.mrf.mxu0  ;;  %16236 = vst [vmem:[#allocation73_spill] sm:$0xff] %v13484_v38 }
 0x238   : > { %v4405_v3 = vsel %vm363_vm1, %v4340_v22, 0.0  ;;  %v13470_v6 = vadd.f32 %v13071_v57, %v4083_v47  ;;  %v4086_v61 = vadd.f32 %v11006_v13, %v3656_v17  ;;  %v4343_v11 = vmul.f32 %v13466_v56, %v13464_v50  ;;  %v13486_v17 = vpop.permute.xlu1 %4307 }
 0x239   : > { %v4406_v15 = vadd.f32 %v4405_v3, %v4404_v24  ;;  %v4042_v49 = vpop.f32.mrf.mxu0  ;;  %16237 = vst [vmem:[#allocation11_spill] sm:$0xff] %v13486_v17 }
 0x23a   : > { %v4342_v46 = vmul.f32 %v13458_v60, %v13470_v6  ;;  %v13478_v63 = vadd.f32 %v13071_v57, %v4086_v61  ;;  %v4085_v58 = vadd.f32 %v4042_v49, %v3655_v12  ;;  %v4411_v25 = vsel %vm363_vm1, %v4343_v11, 0.0 }
 0x23b   : > { %v4408_v45 = vadd.f32 %v4407_v48, %v4406_v15 }
 0x23c   : > { %v4409_v14 = vsel %vm363_vm1, %v4342_v46, 0.0  ;;  %v13482_v54 = vadd.f32 %v13071_v57, %v4085_v58  ;;  %v4345_v55 = vmul.f32 %v13486_v17, %v13478_v63 }
 0x23d   : > { %v4410_v18 = vadd.f32 %v4409_v14, %v4408_v45 }
 0x23e   : > { %v4344_v36 = vmul.f32 %v13484_v38, %v13482_v54  ;;  %v4415_v57 = vsel %vm363_vm1, %v4345_v55, 0.0  ;;  %v9568_v55 = vld [vmem:[%s15953_s4 + $0x8] sm:$0xf] }
 0x23f   : > { %v4412_v43 = vadd.f32 %v4411_v25, %v4410_v18  ;;  %v16242_v25 = vld [vmem:[#allocation83_spill] sm:$0xff] }
 0x240   : > { %v4413_v22 = vsel %vm363_vm1, %v4344_v36, 0.0 }
 0x241   : > { %v4414_v47 = vadd.f32 %v4413_v22, %v4412_v43  ;;  %v16240_v22 = vld [vmem:[#allocation76_spill] sm:$0xff] }
 0x243   : > { %v4416_v24 = vadd.f32 %v4415_v57, %v4414_v47  ;;  %v16239_v57 = vld [vmem:[#allocation3_spill] sm:$0xff] }
 0x245   : > { %v4417_v13 = vrot.slane %v4416_v24, 4 }
 0x247   : > { %v4418_v12 = vadd.f32 %v4417_v13, %v4416_v24  ;;  %v9493_v24 = vld [vmem:[%s15953_s4 + $0x4] sm:$0xf] }
 0x248   : > { %11007 = vmatprep.subr.msk.mxu1 %vm472_vm0, %v9493_v24 }
 0x249   : > { %v4419_v3 = vrot.slane %v4418_v12, 2  ;;  %11008 = vmatpush3.msk.msra.mxu1 %vm472_vm0, %v9493_v24  ;;  %v4763_v24 = vld [vmem:[#allocation2 + $0x8] sm:$0xff] }
 0x24a   : > { %11119 = vmatprep.subr.msk.mxu1 %vm472_vm0, %v9568_v55 }
 0x24b   : > { %v4420_v61 = vadd.f32 %v4419_v3, %v4418_v12 }
 0x24d   : > { %v4421_v48 = vrot.slane %v4420_v61, 1 }
 0x24f   : > { %v4422_v15 = vadd.f32 %v4421_v48, %v4420_v61 }
 0x251   : > { %v13495_v49 = vmul.f32 0.00390625, %v4422_v15 }
 0x253   : > { %v4424_v13 = vsub.f32 %v13097_v29, %v13495_v49  ;;  %v4425_v12 = vsub.f32 %v13086_v33, %v13495_v49  ;;  %v4426_v3 = vsub.f32 %v13130_v4, %v13495_v49  ;;  %v4427_v61 = vsub.f32 %v13118_v8, %v13495_v49  ;;  %v4798_v33 = vld [vmem:[%s15953_s4] sm:$0xf]  ;;  %v16238_v4 = vld [vmem:[#allocation71_spill] sm:$0xff] }
 0x254   : > { %v4799_v29 = vld [vmem:[#allocation2 + $0x1] sm:$0xff]  ;;  %v4428_v8 = vsub.f32 %v13157_v7, %v13495_v49  ;;  %11063 = vmatprep.subr.msk.mxu0 %vm472_vm0, %v4798_v33  ;;  %v4429_v47 = vsub.f32 %v16239_v57, %v13495_v49 }
 0x255   : > { %v13548_v48 = vmul.f32 %v4424_v13, %v12983_v9  ;;  %v13551_v15 = vmul.f32 %v4425_v12, %v12994_v23  ;;  %v13563_v13 = vmul.f32 %v4426_v3, %v16238_v4  ;;  %v4762_v12 = vld [vmem:[#allocation2] sm:$0xff]  ;;  %v13570_v43 = vmul.f32 %v4427_v61, %v16240_v22  ;;  %11009 = vmatprep.mubr.msk.f32.mxu1 %vm363_vm1, %v4799_v29  ;;  %v4800_v3 = vld [vmem:[#allocation2 + $0x9] sm:$0xff]  ;;  %v16243_v29 = vld [vmem:[#allocation25_spill] sm:$0xff] }
 0x256   : > { %11064 = vmatpush3.msk.msra.mxu0 %vm472_vm0, %v4798_v33  ;;  %v16241_v57 = vld [vmem:[#allocation51_spill] sm:$0xff]  ;;  %v13584_v18 = vmul.f32 %v4428_v8, %v16242_v25  ;;  %11065 = vmatprep.mubr.msk.f32.mxu0 %vm363_vm1, %v4762_v12  ;;  %v4431_v45 = vsub.f32 %v16243_v29, %v13495_v49  ;;  %v16244_v33 = vld [vmem:[#allocation84_spill] sm:$0xff] }
 0x257   : > { %v4496_v36 = vmul.f32 %v13548_v48, %v13548_v48  ;;  %v4497_v7 = vmul.f32 %v13551_v15, %v13551_v15  ;;  %v4430_v61 = vsub.f32 %v16241_v57, %v13495_v49  ;;  %v4498_v14 = vmul.f32 %v13563_v13, %v13563_v13  ;;  %11010 = vmatmul.mubr.msk.f32.vlgmr.msra.gmra.mxu1 %vm363_vm1, %v4800_v3  ;;  %v16245_v29 = vld [vmem:[#allocation87_spill] sm:$0xff] }
 0x258   : > { %v13593_v58 = vmul.f32 %v4429_v47, %v16244_v33  ;;  %v4499_v46 = vmul.f32 %v13570_v43, %v13570_v43  ;;  %11066 = vmatmul.mubr.msk.f32.vlgmr.msra.gmra.mxu0 %vm363_vm1, %v4763_v24  ;;  %11120 = vmatpush3.msk.msra.mxu1 %vm472_vm0, %v9568_v55  ;;  %v4432_v3 = vsub.f32 %v13205_v31, %v13495_v49  ;;  %v16246_v24 = vld [vmem:[#allocation88_spill] sm:$0xff] }
 0x259   : > { %v4532_v57 = vsel %vm363_vm1, %v4496_v36, 0.0  ;;  %v4533_v8 = vsel %vm363_vm1, %v4497_v7, 0.0  ;;  %v13605_v47 = vmul.f32 %v4430_v61, %v16245_v29  ;;  %v4500_v11 = vmul.f32 %v13584_v18, %v13584_v18  ;;  %v16247_v61 = vld [vmem:[#allocation53_spill] sm:$0xff]  ;;  %v16248_v29 = vld [vmem:[#allocation91_spill] sm:$0xff] }
 0x25a   : > { %v4534_v12 = vadd.f32 %v4533_v8, %v4532_v57  ;;  %v4535_v36 = vsel %vm363_vm1, %v4498_v14, 0.0  ;;  %v4433_v7 = vsub.f32 %v13196_v52, %v13495_v49  ;;  %v13613_v33 = vmul.f32 %v4431_v45, %v16246_v24  ;;  %v16249_v45 = vld [vmem:[#allocation27_spill] sm:$0xff]  ;;  %v16250_v24 = vld [vmem:[#allocation92_spill] sm:$0xff] }
 0x25b   : > { %v4501_v55 = vmul.f32 %v13593_v58, %v13593_v58  ;;  %v4537_v31 = vsel %vm363_vm1, %v4499_v46, 0.0  ;;  %v4434_v8 = vsub.f32 %v16247_v61, %v13495_v49  ;;  %v13621_v4 = vmul.f32 %v4432_v3, %v16248_v29  ;;  %v16251_v61 = vld [vmem:[#allocation93_spill] sm:$0xff] }
 0x25c   : > { %v4536_v25 = vadd.f32 %v4535_v36, %v4534_v12  ;;  %v4502_v14 = vmul.f32 %v13605_v47, %v13605_v47  ;;  %v4539_v52 = vsel %vm363_vm1, %v4500_v11, 0.0  ;;  %v4435_v36 = vsub.f32 %v16249_v45, %v13495_v49 }
 0x25d   : > { %v13629_v22 = vmul.f32 %v4433_v7, %v16250_v24  ;;  %v4503_v46 = vmul.f32 %v13613_v33, %v13613_v33  ;;  %v4436_v3 = vsub.f32 %v13253_v10, %v13495_v49  ;;  %v13637_v29 = vmul.f32 %v4434_v8, %v16251_v61  ;;  %v16252_v7 = vld [vmem:[#allocation7_spill] sm:$0xff]  ;;  %v16253_v24 = vld [vmem:[#allocation94_spill] sm:$0xff] }
 0x25e   : > { %v4538_v57 = vadd.f32 %v4537_v31, %v4536_v25  ;;  %v4541_v25 = vsel %vm363_vm1, %v4501_v55, 0.0  ;;  %v4504_v11 = vmul.f32 %v13621_v4, %v13621_v4  ;;  %v4437_v45 = vsub.f32 %v16252_v7, %v13495_v49  ;;  %v16254_v8 = vld [vmem:[#allocation95_spill] sm:$0xff] }
 0x25f   : > { %v13645_v9 = vmul.f32 %v4435_v36, %v16253_v24  ;;  %v4505_v55 = vmul.f32 %v13629_v22, %v13629_v22  ;;  %v4545_v10 = vsel %vm363_vm1, %v4503_v46, 0.0  ;;  %v4506_v61 = vmul.f32 %v13637_v29, %v13637_v29  ;;  %v16255_v36 = vld [vmem:[#allocation96_spill] sm:$0xff] }
 0x260   : > { %v4540_v12 = vadd.f32 %v4539_v52, %v4538_v57  ;;  %v4543_v57 = vsel %vm363_vm1, %v4502_v14, 0.0  ;;  %v4547_v14 = vsel %vm363_vm1, %v4504_v11, 0.0  ;;  %v13659_v7 = vmul.f32 %v4437_v45, %v16255_v36  ;;  %v16258_v45 = vld [vmem:[#allocation24_spill] sm:$0xff] }
 0x261   : > { %v4507_v24 = vmul.f32 %v13645_v9, %v13645_v9  ;;  %v4549_v46 = vsel %vm363_vm1, %v4505_v55, 0.0 }
 0x262   : > { %v4542_v31 = vadd.f32 %v4541_v25, %v4540_v12  ;;  %v13651_v25 = vmul.f32 %v4436_v3, %v16254_v8  ;;  %v16256_v3 = vld [vmem:[#allocation52_spill] sm:$0xff]  ;;  %v4509_v36 = vmul.f32 %v13659_v7, %v13659_v7 }
 0x263   : > { %v4553_v55 = vsel %vm363_vm1, %v4507_v24, 0.0 }
 0x264   : > { %v4544_v52 = vadd.f32 %v4543_v57, %v4542_v31  ;;  %v4439_v57 = vsub.f32 %v13270_v2, %v13495_v49  ;;  %v4508_v11 = vmul.f32 %v13651_v25, %v13651_v25  ;;  %v4551_v2 = vsel %vm363_vm1, %v4506_v61, 0.0 }
 0x266   : > { %v4546_v12 = vadd.f32 %v4545_v10, %v4544_v52  ;;  %v16257_v10 = vsub.f32 %v13279_v53, %v13495_v49  ;;  %v16260_v53 = vsub.f32 %v13305_v59, %v13495_v49  ;;  %v4555_v61 = vsel %vm363_vm1, %v4508_v11, 0.0 }
 0x268   : > { %v4548_v31 = vadd.f32 %v4547_v14, %v4546_v12  ;;  %v13668_v8 = vmul.f32 %v16257_v10, %v16256_v3  ;;  %v13674_v14 = vmul.f32 %v4439_v57, %v16258_v45  ;;  %v16261_v57 = vld [vmem:[#allocation4_spill] sm:$0xff] }
 0x26a   : > { %v4550_v52 = vadd.f32 %v4549_v46, %v4548_v31  ;;  %v16259_v46 = vld [vmem:[#allocation5_spill] sm:$0xff]  ;;  %v4510_v3 = vmul.f32 %v13668_v8, %v13668_v8  ;;  %v4511_v24 = vmul.f32 %v13674_v14, %v13674_v14 }
 0x26b   : > { %v13683_v10 = vmul.f32 %v16260_v53, %v16259_v46  ;;  %v16264_v53 = vsub.f32 %v13327_v62, %v13495_v49 }
 0x26c   : > { %v4552_v12 = vadd.f32 %v4551_v2, %v4550_v52  ;;  %v16262_v2 = vsub.f32 %v13292_v39, %v13495_v49 }
 0x26d   : > { %v4512_v11 = vmul.f32 %v13683_v10, %v13683_v10 }
 0x26e   : > { %v4554_v31 = vadd.f32 %v4553_v55, %v4552_v12  ;;  %v13692_v45 = vmul.f32 %v16262_v2, %v16261_v57  ;;  %v4557_v12 = vsel %vm363_vm1, %v4509_v36, 0.0  ;;  %v16263_v55 = vld [vmem:[#allocation54_spill] sm:$0xff]  ;;  %v16266_v2 = vsub.f32 %v13318_v16, %v13495_v49 }
 0x26f   : > { %v13701_v46 = vmul.f32 %v16264_v53, %v16263_v55 }
 0x270   : > { %v4556_v52 = vadd.f32 %v4555_v61, %v4554_v31  ;;  %v4559_v31 = vsel %vm363_vm1, %v4510_v3, 0.0  ;;  %v16265_v61 = vld [vmem:[#allocation26_spill] sm:$0xff]  ;;  %v4513_v36 = vmul.f32 %v13692_v45, %v13692_v45 }
 0x271   : > { %v13710_v57 = vmul.f32 %v16266_v2, %v16265_v61  ;;  %v4514_v3 = vmul.f32 %v13701_v46, %v13701_v46  ;;  %v16269_v2 = vsub.f32 %v13344_v30, %v13495_v49 }
 0x272   : > { %v4558_v59 = vadd.f32 %v4557_v12, %v4556_v52  ;;  %v4561_v52 = vsel %vm363_vm1, %v4511_v24, 0.0  ;;  %v16267_v12 = vsub.f32 %v13353_v35, %v13495_v49 }
 0x273   : > { %v4515_v24 = vmul.f32 %v13710_v57, %v13710_v57 }
 0x274   : > { %v4560_v39 = vadd.f32 %v4559_v31, %v4558_v59  ;;  %v13719_v53 = vmul.f32 %v16267_v12, %v13261_v0  ;;  %v4563_v59 = vsel %vm363_vm1, %v4512_v11, 0.0  ;;  %v16268_v31 = vld [vmem:[#allocation28_spill] sm:$0xff]  ;;  %v16271_v12 = vsub.f32 %v13376_v21, %v13495_v49 }
 0x275   : > { %v13728_v55 = vmul.f32 %v16269_v2, %v16268_v31  ;;  %v16273_v2 = vsub.f32 %v13364_v44, %v13495_v49 }
 0x276   : > { %v4562_v62 = vadd.f32 %v4561_v52, %v4560_v39  ;;  %v4565_v39 = vsel %vm363_vm1, %v4513_v36, 0.0  ;;  %v16270_v52 = vld [vmem:[#allocation62_spill] sm:$0xff]  ;;  %v4516_v11 = vmul.f32 %v13719_v53, %v13719_v53 }
 0x277   : > { %v13737_v0 = vmul.f32 %v16271_v12, %v16270_v52  ;;  %v4517_v36 = vmul.f32 %v13728_v55, %v13728_v55  ;;  %v16275_v12 = vsub.f32 %v13396_v42, %v13495_v49 }
 0x278   : > { %v4564_v16 = vadd.f32 %v4563_v59, %v4562_v62  ;;  %v4567_v62 = vsel %vm363_vm1, %v4514_v3, 0.0  ;;  %v16272_v59 = vld [vmem:[#allocation56_spill] sm:$0xff] }
 0x279   : > { %v13746_v31 = vmul.f32 %v16273_v2, %v16272_v59  ;;  %v4518_v3 = vmul.f32 %v13737_v0, %v13737_v0  ;;  %v16277_v2 = vsub.f32 %v13387_v5, %v13495_v49 }
 0x27a   : > { %v4566_v35 = vadd.f32 %v4565_v39, %v4564_v16  ;;  %v4569_v16 = vsel %vm363_vm1, %v4515_v24, 0.0  ;;  %v16274_v39 = vld [vmem:[#allocation29_spill] sm:$0xff] }
 0x27b   : > { %v13755_v52 = vmul.f32 %v16275_v12, %v16274_v39  ;;  %v4519_v24 = vmul.f32 %v13746_v31, %v13746_v31 }
 0x27c   : > { %v4568_v30 = vadd.f32 %v4567_v62, %v4566_v35  ;;  %v4571_v35 = vsel %vm363_vm1, %v4516_v11, 0.0  ;;  %v16276_v62 = vld [vmem:[#allocation55_spill] sm:$0xff] }
 0x27d   : > { %v13764_v59 = vmul.f32 %v16277_v2, %v16276_v62  ;;  %v4520_v11 = vmul.f32 %v13755_v52, %v13755_v52 }
 0x27e   : > { %v4570_v21 = vadd.f32 %v4569_v16, %v4568_v30  ;;  %v4573_v30 = vsel %vm363_vm1, %v4517_v36, 0.0  ;;  %v16278_v16 = vsub.f32 %v13419_v26, %v13495_v49 }
 0x27f   : > { %v4521_v36 = vmul.f32 %v13764_v59, %v13764_v59 }
 0x280   : > { %v4572_v44 = vadd.f32 %v4571_v35, %v4570_v21  ;;  %v13773_v12 = vmul.f32 %v16278_v16, %v13370_v1  ;;  %v4575_v21 = vsel %vm363_vm1, %v4518_v3, 0.0  ;;  %v16279_v35 = vsub.f32 %v13411_v51, %v13495_v49 }
 0x282   : > { %v4574_v42 = vadd.f32 %v4573_v30, %v4572_v44  ;;  %v13782_v2 = vmul.f32 %v16279_v35, %v13372_v37  ;;  %v4577_v44 = vsel %vm363_vm1, %v4519_v24, 0.0  ;;  %v16280_v30 = vsub.f32 %v13438_v41, %v13495_v49 }
 0x283   : > { %v4522_v3 = vmul.f32 %v13773_v12, %v13773_v12 }
 0x284   : > { %v4576_v5 = vadd.f32 %v4575_v21, %v4574_v42  ;;  %v13791_v16 = vmul.f32 %v16280_v30, %v13402_v40  ;;  %v4579_v42 = vsel %vm363_vm1, %v4520_v11, 0.0  ;;  %v16281_v21 = vsub.f32 %v13429_v27, %v13495_v49 }
 0x285   : > { %v4523_v24 = vmul.f32 %v13782_v2, %v13782_v2 }
 0x286   : > { %v4578_v26 = vadd.f32 %v4577_v44, %v4576_v5  ;;  %v13800_v35 = vmul.f32 %v16281_v21, %v13404_v34  ;;  %v4581_v5 = vsel %vm363_vm1, %v4521_v36, 0.0  ;;  %v16282_v44 = vsub.f32 %v13453_v19, %v13495_v49 }
 0x287   : > { %v4524_v11 = vmul.f32 %v13791_v16, %v13791_v16 }
 0x288   : > { %v4580_v51 = vadd.f32 %v4579_v42, %v4578_v26  ;;  %v13809_v30 = vmul.f32 %v16282_v44, %v13432_v32  ;;  %v4583_v26 = vsel %vm363_vm1, %v4522_v3, 0.0  ;;  %v16283_v42 = vsub.f32 %v13448_v28, %v13495_v49 }
 0x289   : > { %v4525_v36 = vmul.f32 %v13800_v35, %v13800_v35 }
 0x28a   : > { %v4582_v41 = vadd.f32 %v4581_v5, %v4580_v51  ;;  %v13818_v21 = vmul.f32 %v16283_v42, %v13434_v20  ;;  %v4585_v51 = vsel %vm363_vm1, %v4523_v24, 0.0  ;;  %v16284_v5 = vsub.f32 %v13470_v6, %v13495_v49 }
 0x28b   : > { %v4526_v3 = vmul.f32 %v13809_v30, %v13809_v30 }
 0x28c   : > { %v4584_v27 = vadd.f32 %v4583_v26, %v4582_v41  ;;  %v13827_v44 = vmul.f32 %v16284_v5, %v13458_v60  ;;  %v4587_v41 = vsel %vm363_vm1, %v4524_v11, 0.0  ;;  %v16285_v26 = vsub.f32 %v13464_v50, %v13495_v49 }
 0x28d   : > { %v4527_v24 = vmul.f32 %v13818_v21, %v13818_v21  ;;  %v16286_v11 = vsub.f32 %v13482_v54, %v13495_v49  ;;  %v4591_v5 = vsel %vm363_vm1, %v4526_v3, 0.0  ;;  %v16287_v54 = vsub.f32 %v13478_v63, %v13495_v49 }
 0x28e   : > { %v4586_v19 = vadd.f32 %v4585_v51, %v4584_v27  ;;  %v13836_v42 = vmul.f32 %v16285_v26, %v13466_v56  ;;  %v4589_v27 = vsel %vm363_vm1, %v4525_v36, 0.0  ;;  %v9606_v51 = vld [vmem:[%s15953_s4 + $0xc] sm:$0xf]  ;;  %v4528_v50 = vmul.f32 %v13827_v44, %v13827_v44  ;;  %v13855_v36 = vld [vmem:[%s15953_s4 + $0x10] sm:$0xf] }
 0x28f   : > { %11175 = vmatprep.subr.msk.mxu0 %vm472_vm0, %v9606_v51  ;;  %11231 = vmatprep.subr.msk.mxu1 %vm472_vm0, %v13855_v36  ;;  %v4593_v26 = vsel %vm363_vm1, %v4527_v24, 0.0 }
 0x290   : > { %v4588_v28 = vadd.f32 %v4587_v41, %v4586_v19  ;;  %v4494_v19 = vmul.f32 %v16286_v11, %v13484_v38  ;;  %11176 = vmatpush3.msk.msra.mxu0 %vm472_vm0, %v9606_v51  ;;  %v4529_v3 = vmul.f32 %v13836_v42, %v13836_v42  ;;  %v4595_v38 = vsel %vm363_vm1, %v4528_v50, 0.0 }
 0x292   : > { %v4590_v6 = vadd.f32 %v4589_v27, %v4588_v28  ;;  %v4495_v28 = vmul.f32 %v16287_v54, %v13486_v17  ;;  %v4530_v11 = vmul.f32 %v4494_v19, %v4494_v19  ;;  %v4597_v51 = vsel %vm363_vm1, %v4529_v3, 0.0 }
 0x294   : > { %v4592_v41 = vadd.f32 %v4591_v5, %v4590_v6  ;;  %v4531_v5 = vmul.f32 %v4495_v28, %v4495_v28  ;;  %v4599_v56 = vsel %vm363_vm1, %v4530_v11, 0.0 }
 0x296   : > { %v4594_v27 = vadd.f32 %v4593_v26, %v4592_v41  ;;  %v4601_v63 = vsel %vm363_vm1, %v4531_v5, 0.0 }
 0x298   : > { %v4596_v6 = vadd.f32 %v4595_v38, %v4594_v27 }
 0x29a   : > { %v4598_v60 = vadd.f32 %v4597_v51, %v4596_v6 }
 0x29c   : > { %v4600_v32 = vadd.f32 %v4599_v56, %v4598_v60 }
 0x29e   : > { %v4602_v49 = vadd.f32 %v4601_v63, %v4600_v32 }
 0x2a0   : > { %v4603_v54 = vrot.slane %v4602_v49, 4 }
 0x2a2   : > { %v4604_v17 = vadd.f32 %v4603_v54, %v4602_v49 }
 0x2a4   : > { %v4605_v20 = vrot.slane %v4604_v17, 2 }
 0x2a6   : > { %v4606_v40 = vadd.f32 %v4605_v20, %v4604_v17 }
 0x2a8   : > { %v4607_v24 = vrot.slane %v4606_v40, 1 }
 0x2aa   : > { %v4608_v41 = vadd.f32 %v4607_v24, %v4606_v40 }
 0x2ac   : > { %v4609_v26 = vmul.f32 0.00390625, %v4608_v41 }
 0x2ae   : > { %v4610_v34 = vadd.f32 1e-05, %v4609_v26 }
 0x2b0   : > { %11524 = vrsqrt.f32 %v4610_v34 }
 0x2bd   : > { %v11525_v38 = vpop.eup %11524 }
 0x2be   : > { %v4646_v50 = vmul.f32 %v11525_v38, %v4494_v19  ;;  %v4612_v3 = vmul.f32 %v11525_v38, %v13548_v48  ;;  %v4613_v27 = vmul.f32 %v11525_v38, %v13551_v15  ;;  %v4614_v60 = vmul.f32 %v11525_v38, %v13563_v13 }
 0x2bf   : > { %v4615_v56 = vmul.f32 %v11525_v38, %v13570_v43  ;;  %v4616_v32 = vmul.f32 %v11525_v38, %v13584_v18  ;;  %v4617_v11 = vmul.f32 %v11525_v38, %v13593_v58  ;;  %v4618_v20 = vmul.f32 %v11525_v38, %v13605_v47 }
 0x2c0   : > { %v4682_v40 = vmax.f32 %v4646_v50, 0.0  ;;  %v4619_v17 = vmul.f32 %v11525_v38, %v13613_v33  ;;  %v4620_v34 = vmul.f32 %v11525_v38, %v13621_v4  ;;  %v4621_v19 = vmul.f32 %v11525_v38, %v13629_v22 }
 0x2c1   : > { %v4622_v48 = vmul.f32 %v11525_v38, %v13637_v29  ;;  %v4623_v15 = vmul.f32 %v11525_v38, %v13645_v9  ;;  %v4624_v13 = vmul.f32 %v11525_v38, %v13651_v25  ;;  %v4625_v43 = vmul.f32 %v11525_v38, %v13659_v7 }
 0x2c2   : > { %4760 = vst.msk [vmem:[#allocation2 + $0x123] sm:$0xff] %vm363_vm1, %v4682_v40  ;;  %v4626_v58 = vmul.f32 %v11525_v38, %v13668_v8  ;;  %v13888_v18 = vmul.f32 %v11525_v38, %v13674_v14  ;;  %v13891_v33 = vmul.f32 %v11525_v38, %v13683_v10  ;;  %v13894_v22 = vmul.f32 %v11525_v38, %v13692_v45 }
 0x2c3   : > { %v13897_v4 = vmul.f32 %v11525_v38, %v13701_v46  ;;  %v13900_v9 = vmul.f32 %v11525_v38, %v13710_v57  ;;  %v13903_v29 = vmul.f32 %v11525_v38, %v13719_v53  ;;  %v13906_v47 = vmul.f32 %v11525_v38, %v13728_v55 }
 0x2c4   : > { %v13909_v8 = vmul.f32 %v11525_v38, %v13737_v0  ;;  %v13912_v25 = vmul.f32 %v11525_v38, %v13746_v31  ;;  %v13915_v7 = vmul.f32 %v11525_v38, %v13755_v52  ;;  %v13918_v45 = vmul.f32 %v11525_v38, %v13764_v59 }
 0x2c5   : > { %v13921_v14 = vmul.f32 %v11525_v38, %v13773_v12  ;;  %v13924_v46 = vmul.f32 %v11525_v38, %v13782_v2  ;;  %v13927_v10 = vmul.f32 %v11525_v38, %v13791_v16  ;;  %v13930_v0 = vmul.f32 %v11525_v38, %v13800_v35 }
 0x2c6   : > { %v13933_v57 = vmul.f32 %v11525_v38, %v13809_v30  ;;  %v13936_v55 = vmul.f32 %v11525_v38, %v13818_v21  ;;  %v13939_v53 = vmul.f32 %v11525_v38, %v13827_v44  ;;  %v13942_v31 = vmul.f32 %v11525_v38, %v13836_v42 }
 0x2c7   : > { %v13944_v52 = vmul.f32 %v11525_v38, %v4495_v28  ;;  %v4648_v59 = vmax.f32 %v4612_v3, 0.0  ;;  %v4649_v12 = vmax.f32 %v4613_v27, 0.0  ;;  %v4650_v2 = vmax.f32 %v4614_v60, 0.0 }
 0x2c8   : > { %v4651_v16 = vmax.f32 %v4615_v56, 0.0  ;;  %v4652_v35 = vmax.f32 %v4616_v32, 0.0  ;;  %v4653_v6 = vmax.f32 %v4617_v11, 0.0  ;;  %v4654_v5 = vmax.f32 %v4618_v20, 0.0 }
 0x2c9   : > { %v4655_v30 = vmax.f32 %v4619_v17, 0.0  ;;  %v4656_v51 = vmax.f32 %v4620_v34, 0.0  ;;  %v4657_v63 = vmax.f32 %v4621_v19, 0.0  ;;  %v4658_v21 = vmax.f32 %v4622_v48, 0.0  ;;  %4726 = vst.msk [vmem:[#allocation2 + $0x13] sm:$0xff] %vm363_vm1, %v4648_v59  ;;  %4727 = vst.msk [vmem:[#allocation2 + $0x1b] sm:$0xff] %vm363_vm1, %v4649_v12 }
 0x2ca   : > { %4728 = vst.msk [vmem:[#allocation2 + $0x23] sm:$0xff] %vm363_vm1, %v4650_v2  ;;  %v4659_v44 = vmax.f32 %v4623_v15, 0.0  ;;  %v4660_v42 = vmax.f32 %v4624_v13, 0.0  ;;  %v4661_v28 = vmax.f32 %v4625_v43, 0.0  ;;  %v4662_v49 = vmax.f32 %v4626_v58, 0.0  ;;  %4729 = vst.msk [vmem:[#allocation2 + $0x2b] sm:$0xff] %vm363_vm1, %v4651_v16 }
 0x2cb   : > { %4730 = vst.msk [vmem:[#allocation2 + $0x33] sm:$0xff] %vm363_vm1, %v4652_v35  ;;  %4731 = vst.msk [vmem:[#allocation2 + $0x3b] sm:$0xff] %vm363_vm1, %v4653_v6  ;;  %v4663_v54 = vmax.f32 %v13888_v18, 0.0  ;;  %v4664_v24 = vmax.f32 %v13891_v33, 0.0  ;;  %v4665_v41 = vmax.f32 %v13894_v22, 0.0  ;;  %v4666_v26 = vmax.f32 %v13897_v4, 0.0 }
 0x2cc   : > { %4732 = vst.msk [vmem:[#allocation2 + $0x43] sm:$0xff] %vm363_vm1, %v4654_v5  ;;  %4733 = vst.msk [vmem:[#allocation2 + $0x4b] sm:$0xff] %vm363_vm1, %v4655_v30  ;;  %v4667_v38 = vmax.f32 %v13900_v9, 0.0  ;;  %v4668_v50 = vmax.f32 %v13903_v29, 0.0  ;;  %v4669_v3 = vmax.f32 %v13906_v47, 0.0  ;;  %v4670_v27 = vmax.f32 %v13909_v8, 0.0 }
 0x2cd   : > { %4734 = vst.msk [vmem:[#allocation2 + $0x53] sm:$0xff] %vm363_vm1, %v4656_v51  ;;  %4735 = vst.msk [vmem:[#allocation2 + $0x5b] sm:$0xff] %vm363_vm1, %v4657_v63  ;;  %v4671_v60 = vmax.f32 %v13912_v25, 0.0  ;;  %v4672_v56 = vmax.f32 %v13915_v7, 0.0  ;;  %v4673_v32 = vmax.f32 %v13918_v45, 0.0  ;;  %v4674_v11 = vmax.f32 %v13921_v14, 0.0 }
 0x2ce   : > { %4736 = vst.msk [vmem:[#allocation2 + $0x63] sm:$0xff] %vm363_vm1, %v4658_v21  ;;  %4737 = vst.msk [vmem:[#allocation2 + $0x6b] sm:$0xff] %vm363_vm1, %v4659_v44  ;;  %v4675_v20 = vmax.f32 %v13924_v46, 0.0  ;;  %v4676_v40 = vmax.f32 %v13927_v10, 0.0  ;;  %v4677_v17 = vmax.f32 %v13930_v0, 0.0  ;;  %v4678_v34 = vmax.f32 %v13933_v57, 0.0 }
 0x2cf   : > { %4738 = vst.msk [vmem:[#allocation2 + $0x73] sm:$0xff] %vm363_vm1, %v4660_v42  ;;  %4739 = vst.msk [vmem:[#allocation2 + $0x7b] sm:$0xff] %vm363_vm1, %v4661_v28  ;;  %v4679_v19 = vmax.f32 %v13936_v55, 0.0  ;;  %v4680_v48 = vmax.f32 %v13939_v53, 0.0  ;;  %v4681_v15 = vmax.f32 %v13942_v31, 0.0  ;;  %v4683_v13 = vmax.f32 %v13944_v52, 0.0 }
 0x2d0   : > { %4740 = vst.msk [vmem:[#allocation2 + $0x83] sm:$0xff] %vm363_vm1, %v4662_v49  ;;  %4741 = vst.msk [vmem:[#allocation2 + $0x8b] sm:$0xff] %vm363_vm1, %v4663_v54  ;;  %v4801_v43 = vld [vmem:[#allocation2 + $0x11] sm:$0xff]  ;;  %v4802_v18 = vld [vmem:[#allocation2 + $0x19] sm:$0xff] }
 0x2d1   : > { %4742 = vst.msk [vmem:[#allocation2 + $0x93] sm:$0xff] %vm363_vm1, %v4664_v24  ;;  %4743 = vst.msk [vmem:[#allocation2 + $0x9b] sm:$0xff] %vm363_vm1, %v4665_v41  ;;  %v4764_v58 = vld [vmem:[#allocation2 + $0x10] sm:$0xff]  ;;  %11012 = vmatprep.mubr.msk.f32.mxu1 %vm363_vm1, %v4801_v43  ;;  %v4765_v33 = vld [vmem:[#allocation2 + $0x18] sm:$0xff] }
 0x2d2   : > { %4744 = vst.msk [vmem:[#allocation2 + $0xa3] sm:$0xff] %vm363_vm1, %v4666_v26  ;;  %4745 = vst.msk [vmem:[#allocation2 + $0xab] sm:$0xff] %vm363_vm1, %v4667_v38  ;;  %11068 = vmatprep.mubr.msk.f32.mxu0 %vm363_vm1, %v4764_v58  ;;  %11013 = vmatmul.mubr.msk.f32.gmra.mxu1 %vm363_vm1, %v4802_v18  ;;  %v4803_v22 = vld [vmem:[#allocation2 + $0x21] sm:$0xff]  ;;  %v4804_v9 = vld [vmem:[#allocation2 + $0x29] sm:$0xff] }
 0x2d3   : > { %4746 = vst.msk [vmem:[#allocation2 + $0xb3] sm:$0xff] %vm363_vm1, %v4668_v50  ;;  %4747 = vst.msk [vmem:[#allocation2 + $0xbb] sm:$0xff] %vm363_vm1, %v4669_v3  ;;  %11069 = vmatmul.mubr.msk.f32.gmra.mxu0 %vm363_vm1, %v4765_v33  ;;  %v4766_v4 = vld [vmem:[#allocation2 + $0x20] sm:$0xff]  ;;  %11015 = vmatprep.mubr.msk.f32.mxu1 %vm363_vm1, %v4803_v22  ;;  %v4767_v29 = vld [vmem:[#allocation2 + $0x28] sm:$0xff] }
 0x2d4   : > { %4748 = vst.msk [vmem:[#allocation2 + $0xc3] sm:$0xff] %vm363_vm1, %v4670_v27  ;;  %4749 = vst.msk [vmem:[#allocation2 + $0xcb] sm:$0xff] %vm363_vm1, %v4671_v60  ;;  %11071 = vmatprep.mubr.msk.f32.mxu0 %vm363_vm1, %v4766_v4  ;;  %v4805_v47 = vld [vmem:[#allocation2 + $0x31] sm:$0xff]  ;;  %v4806_v25 = vld [vmem:[#allocation2 + $0x39] sm:$0xff] }
 0x2d5   : > { %4750 = vst.msk [vmem:[#allocation2 + $0xd3] sm:$0xff] %vm363_vm1, %v4672_v56  ;;  %4751 = vst.msk [vmem:[#allocation2 + $0xdb] sm:$0xff] %vm363_vm1, %v4673_v32  ;;  %v4768_v8 = vld [vmem:[#allocation2 + $0x30] sm:$0xff]  ;;  %v4769_v7 = vld [vmem:[#allocation2 + $0x38] sm:$0xff] }
 0x2d6   : > { %4752 = vst.msk [vmem:[#allocation2 + $0xe3] sm:$0xff] %vm363_vm1, %v4674_v11  ;;  %4753 = vst.msk [vmem:[#allocation2 + $0xeb] sm:$0xff] %vm363_vm1, %v4675_v20  ;;  %11016 = vmatmul.mubr.msk.f32.gmra.mxu1 %vm363_vm1, %v4804_v9  ;;  %v4807_v45 = vld [vmem:[#allocation2 + $0x41] sm:$0xff]  ;;  %v4808_v46 = vld [vmem:[#allocation2 + $0x49] sm:$0xff] }
 0x2d7   : > { %4754 = vst.msk [vmem:[#allocation2 + $0xf3] sm:$0xff] %vm363_vm1, %v4676_v40  ;;  %4755 = vst.msk [vmem:[#allocation2 + $0xfb] sm:$0xff] %vm363_vm1, %v4677_v17  ;;  %11072 = vmatmul.mubr.msk.f32.gmra.mxu0 %vm363_vm1, %v4767_v29  ;;  %11018 = vmatprep.mubr.msk.f32.mxu1 %vm363_vm1, %v4805_v47  ;;  %v4770_v14 = vld [vmem:[#allocation2 + $0x40] sm:$0xff]  ;;  %v4771_v10 = vld [vmem:[#allocation2 + $0x48] sm:$0xff] }
 0x2d8   : > { %4756 = vst.msk [vmem:[#allocation2 + $0x103] sm:$0xff] %vm363_vm1, %v4678_v34  ;;  %4757 = vst.msk [vmem:[#allocation2 + $0x10b] sm:$0xff] %vm363_vm1, %v4679_v19  ;;  %11074 = vmatprep.mubr.msk.f32.mxu0 %vm363_vm1, %v4768_v8  ;;  %v4809_v0 = vld [vmem:[#allocation2 + $0x51] sm:$0xff]  ;;  %v4810_v55 = vld [vmem:[#allocation2 + $0x59] sm:$0xff] }
 0x2d9   : > { %4758 = vst.msk [vmem:[#allocation2 + $0x113] sm:$0xff] %vm363_vm1, %v4680_v48  ;;  %4759 = vst.msk [vmem:[#allocation2 + $0x11b] sm:$0xff] %vm363_vm1, %v4681_v15  ;;  %v4772_v57 = vld [vmem:[#allocation2 + $0x50] sm:$0xff]  ;;  %v4773_v53 = vld [vmem:[#allocation2 + $0x58] sm:$0xff] }
 0x2da   : > { %4761 = vst.msk [vmem:[#allocation2 + $0x12b] sm:$0xff] %vm363_vm1, %v4683_v13  ;;  %11019 = vmatmul.mubr.msk.f32.gmra.mxu1 %vm363_vm1, %v4806_v25  ;;  %v4811_v31 = vld [vmem:[#allocation2 + $0x61] sm:$0xff]  ;;  %v4812_v59 = vld [vmem:[#allocation2 + $0x69] sm:$0xff]  ;;  %v4813_v2 = vld [vmem:[#allocation2 + $0x71] sm:$0xff] }
 0x2db   : > { %11075 = vmatmul.mubr.msk.f32.gmra.mxu0 %vm363_vm1, %v4769_v7  ;;  %11021 = vmatprep.mubr.msk.f32.mxu1 %vm363_vm1, %v4807_v45  ;;  %v4774_v52 = vld [vmem:[#allocation2 + $0x60] sm:$0xff]  ;;  %v4775_v12 = vld [vmem:[#allocation2 + $0x68] sm:$0xff]  ;;  %v4776_v16 = vld [vmem:[#allocation2 + $0x70] sm:$0xff] }
 0x2dc   : > { %11077 = vmatprep.mubr.msk.f32.mxu0 %vm363_vm1, %v4770_v14  ;;  %v4814_v35 = vld [vmem:[#allocation2 + $0x79] sm:$0xff]  ;;  %v4815_v5 = vld [vmem:[#allocation2 + $0x81] sm:$0xff]  ;;  %v4816_v51 = vld [vmem:[#allocation2 + $0x89] sm:$0xff] }
 0x2dd   : > { %v4777_v6 = vld [vmem:[#allocation2 + $0x78] sm:$0xff]  ;;  %v4778_v30 = vld [vmem:[#allocation2 + $0x80] sm:$0xff]  ;;  %v4779_v63 = vld [vmem:[#allocation2 + $0x88] sm:$0xff] }
 0x2de   : > { %11022 = vmatmul.mubr.msk.f32.gmra.mxu1 %vm363_vm1, %v4808_v46  ;;  %v4817_v21 = vld [vmem:[#allocation2 + $0x91] sm:$0xff]  ;;  %v4818_v42 = vld [vmem:[#allocation2 + $0x99] sm:$0xff]  ;;  %v4819_v49 = vld [vmem:[#allocation2 + $0xa1] sm:$0xff] }
 0x2df   : > { %11078 = vmatmul.mubr.msk.f32.gmra.mxu0 %vm363_vm1, %v4771_v10  ;;  %11024 = vmatprep.mubr.msk.f32.mxu1 %vm363_vm1, %v4809_v0  ;;  %v4780_v44 = vld [vmem:[#allocation2 + $0x90] sm:$0xff]  ;;  %v4781_v28 = vld [vmem:[#allocation2 + $0x98] sm:$0xff]  ;;  %v4782_v54 = vld [vmem:[#allocation2 + $0xa0] sm:$0xff] }
 0x2e0   : > { %11080 = vmatprep.mubr.msk.f32.mxu0 %vm363_vm1, %v4772_v57  ;;  %v14042_v24 = vld [vmem:[%s15953_s4 + $0x14] sm:$0xf]  ;;  %v4820_v41 = vld [vmem:[#allocation2 + $0xa9] sm:$0xff]  ;;  %v4822_v3 = vld [vmem:[#allocation2 + $0xb9] sm:$0xff] }
 0x2e1   : > { %11287 = vmatprep.subr.msk.mxu0 %vm472_vm0, %v14042_v24  ;;  %v4783_v26 = vld [vmem:[#allocation2 + $0xa8] sm:$0xff]  ;;  %v4821_v38 = vld [vmem:[#allocation2 + $0xb1] sm:$0xff]  ;;  %v4786_v56 = vld [vmem:[#allocation2 + $0xc0] sm:$0xff] }
 0x2e2   : > { %11025 = vmatmul.mubr.msk.f32.gmra.mxu1 %vm363_vm1, %v4810_v55  ;;  %v4784_v50 = vld [vmem:[#allocation2 + $0xb0] sm:$0xff]  ;;  %v4785_v27 = vld [vmem:[#allocation2 + $0xb8] sm:$0xff]  ;;  %v4823_v60 = vld [vmem:[#allocation2 + $0xc1] sm:$0xff] }
 0x2e3   : > { %11081 = vmatmul.mubr.msk.f32.gmra.mxu0 %vm363_vm1, %v4773_v53  ;;  %11027 = vmatprep.mubr.msk.f32.mxu1 %vm363_vm1, %v4811_v31  ;;  %v4824_v32 = vld [vmem:[#allocation2 + $0xc9] sm:$0xff]  ;;  %v4825_v20 = vld [vmem:[#allocation2 + $0xd1] sm:$0xff]  ;;  %v4826_v17 = vld [vmem:[#allocation2 + $0xd9] sm:$0xff] }
 0x2e4   : > { %11083 = vmatprep.mubr.msk.f32.mxu0 %vm363_vm1, %v4774_v52  ;;  %v4787_v11 = vld [vmem:[#allocation2 + $0xc8] sm:$0xff]  ;;  %v4788_v40 = vld [vmem:[#allocation2 + $0xd0] sm:$0xff]  ;;  %v4789_v34 = vld [vmem:[#allocation2 + $0xd8] sm:$0xff] }
 0x2e5   : > { %v4827_v19 = vld [vmem:[#allocation2 + $0xe1] sm:$0xff]  ;;  %v4828_v15 = vld [vmem:[#allocation2 + $0xe9] sm:$0xff]  ;;  %v4829_v43 = vld [vmem:[#allocation2 + $0xf1] sm:$0xff] }
 0x2e6   : > { %11028 = vmatmul.mubr.msk.f32.gmra.mxu1 %vm363_vm1, %v4812_v59  ;;  %v4790_v48 = vld [vmem:[#allocation2 + $0xe0] sm:$0xff]  ;;  %v4791_v13 = vld [vmem:[#allocation2 + $0xe8] sm:$0xff]  ;;  %v4792_v58 = vld [vmem:[#allocation2 + $0xf0] sm:$0xff] }
 0x2e7   : > { %11084 = vmatmul.mubr.msk.f32.gmra.mxu0 %vm363_vm1, %v4775_v12  ;;  %11030 = vmatprep.mubr.msk.f32.mxu1 %vm363_vm1, %v4813_v2  ;;  %v4830_v18 = vld [vmem:[#allocation2 + $0xf9] sm:$0xff]  ;;  %v4831_v22 = vld [vmem:[#allocation2 + $0x101] sm:$0xff]  ;;  %v4832_v9 = vld [vmem:[#allocation2 + $0x109] sm:$0xff] }
 0x2e8   : > { %11086 = vmatprep.mubr.msk.f32.mxu0 %vm363_vm1, %v4776_v16  ;;  %v4793_v33 = vld [vmem:[#allocation2 + $0xf8] sm:$0xff]  ;;  %v4794_v4 = vld [vmem:[#allocation2 + $0x100] sm:$0xff]  ;;  %v4795_v29 = vld [vmem:[#allocation2 + $0x108] sm:$0xff] }
 0x2e9   : > { %v4833_v47 = vld [vmem:[#allocation2 + $0x111] sm:$0xff]  ;;  %v5549_v25 = vld [vmem:[#allocation2 + $0x2] sm:$0xff]  ;;  %v4834_v7 = vld [vmem:[#allocation2 + $0x119] sm:$0xff] }
 0x2ea   : > { %11031 = vmatmul.mubr.msk.f32.gmra.mxu1 %vm363_vm1, %v4814_v35  ;;  %v4796_v8 = vld [vmem:[#allocation2 + $0x110] sm:$0xff]  ;;  %v4797_v45 = vld [vmem:[#allocation2 + $0x118] sm:$0xff]  ;;  %v5981_v57 = vld [vmem:[#allocation2 + $0x22] sm:$0xff] }
 0x2eb   : > { %11087 = vmatmul.mubr.msk.f32.gmra.mxu0 %vm363_vm1, %v4777_v6  ;;  %11033 = vmatprep.mubr.msk.f32.mxu1 %vm363_vm1, %v4815_v5  ;;  %v5979_v14 = vld [vmem:[#allocation2 + $0x12] sm:$0xff]  ;;  %v5550_v46 = vld [vmem:[#allocation2 + $0xa] sm:$0xff]  ;;  %v5980_v10 = vld [vmem:[#allocation2 + $0x1a] sm:$0xff] }
 0x2ec   : > { %11089 = vmatprep.mubr.msk.f32.mxu0 %vm363_vm1, %v4778_v30  ;;  %v14083_v0 = vld [vmem:[%s15953_s4 + $0x18] sm:$0xf]  ;;  %v5982_v55 = vld [vmem:[#allocation2 + $0x2a] sm:$0xff]  ;;  %v5985_v12 = vld [vmem:[#allocation2 + $0x42] sm:$0xff] }
 0x2ed   : > { %v5983_v52 = vld [vmem:[#allocation2 + $0x32] sm:$0xff]  ;;  %v5984_v59 = vld [vmem:[#allocation2 + $0x3a] sm:$0xff]  ;;  %v5986_v2 = vld [vmem:[#allocation2 + $0x4a] sm:$0xff] }
 0x2ee   : > { %11034 = vmatmul.mubr.msk.f32.gmra.mxu1 %vm363_vm1, %v4816_v51  ;;  %v5987_v16 = vld [vmem:[#allocation2 + $0x52] sm:$0xff]  ;;  %v14110_v35 = vld [vmem:[%s15953_s4 + $0x1c] sm:$0xf]  ;;  %v5989_v5 = vld [vmem:[#allocation2 + $0x62] sm:$0xff] }
 0x2ef   : > { %11090 = vmatmul.mubr.msk.f32.gmra.mxu0 %vm363_vm1, %v4779_v63  ;;  %11036 = vmatprep.mubr.msk.f32.mxu1 %vm363_vm1, %v4817_v21  ;;  %v5988_v6 = vld [vmem:[#allocation2 + $0x5a] sm:$0xff]  ;;  %v5990_v30 = vld [vmem:[#allocation2 + $0x6a] sm:$0xff]  ;;  %v5991_v51 = vld [vmem:[#allocation2 + $0x72] sm:$0xff] }
 0x2f0   : > { %11092 = vmatprep.mubr.msk.f32.mxu0 %vm363_vm1, %v4780_v44  ;;  %v5992_v63 = vld [vmem:[#allocation2 + $0x7a] sm:$0xff]  ;;  %v5993_v21 = vld [vmem:[#allocation2 + $0x82] sm:$0xff]  ;;  %v5994_v44 = vld [vmem:[#allocation2 + $0x8a] sm:$0xff] }
 0x2f2   : > { %11037 = vmatmul.mubr.msk.f32.gmra.mxu1 %vm363_vm1, %v4818_v42  ;;  %v5995_v42 = vld [vmem:[#allocation2 + $0x92] sm:$0xff] }
 0x2f3   : > { %11093 = vmatmul.mubr.msk.f32.gmra.mxu0 %vm363_vm1, %v4781_v28  ;;  %11039 = vmatprep.mubr.msk.f32.mxu1 %vm363_vm1, %v4819_v49  ;;  %v5996_v28 = vld [vmem:[#allocation2 + $0x9a] sm:$0xff]  ;;  %v5997_v49 = vld [vmem:[#allocation2 + $0xa2] sm:$0xff] }
 0x2f4   : > { %11095 = vmatprep.mubr.msk.f32.mxu0 %vm363_vm1, %v4782_v54  ;;  %v5998_v54 = vld [vmem:[#allocation2 + $0xaa] sm:$0xff] }
 0x2f6   : > { %11040 = vmatmul.mubr.msk.f32.gmra.mxu1 %vm363_vm1, %v4820_v41  ;;  %v6000_v41 = vld [vmem:[#allocation2 + $0xba] sm:$0xff] }
 0x2f7   : > { %11096 = vmatmul.mubr.msk.f32.gmra.mxu0 %vm363_vm1, %v4783_v26  ;;  %11042 = vmatprep.mubr.msk.f32.mxu1 %vm363_vm1, %v4821_v38  ;;  %v6001_v26 = vld [vmem:[#allocation2 + $0xc2] sm:$0xff]  ;;  %v6002_v38 = vld [vmem:[#allocation2 + $0xca] sm:$0xff] }
 0x2f8   : > { %11098 = vmatprep.mubr.msk.f32.mxu0 %vm363_vm1, %v4784_v50  ;;  %v6003_v50 = vld [vmem:[#allocation2 + $0xd2] sm:$0xff] }
 0x2fa   : > { %11043 = vmatmul.mubr.msk.f32.gmra.mxu1 %vm363_vm1, %v4822_v3  ;;  %v6004_v3 = vld [vmem:[#allocation2 + $0xda] sm:$0xff] }
 0x2fb   : > { %11099 = vmatmul.mubr.msk.f32.gmra.mxu0 %vm363_vm1, %v4785_v27  ;;  %11045 = vmatprep.mubr.msk.f32.mxu1 %vm363_vm1, %v4823_v60  ;;  %v6005_v27 = vld [vmem:[#allocation2 + $0xe2] sm:$0xff]  ;;  %v6006_v60 = vld [vmem:[#allocation2 + $0xea] sm:$0xff] }
 0x2fc   : > { %11101 = vmatprep.mubr.msk.f32.mxu0 %vm363_vm1, %v4786_v56  ;;  %v6007_v56 = vld [vmem:[#allocation2 + $0xf2] sm:$0xff] }
 0x2fe   : > { %11046 = vmatmul.mubr.msk.f32.gmra.mxu1 %vm363_vm1, %v4824_v32  ;;  %v6008_v32 = vld [vmem:[#allocation2 + $0xfa] sm:$0xff] }
 0x2ff   : > { %11102 = vmatmul.mubr.msk.f32.gmra.mxu0 %vm363_vm1, %v4787_v11  ;;  %11048 = vmatprep.mubr.msk.f32.mxu1 %vm363_vm1, %v4825_v20  ;;  %v6009_v11 = vld [vmem:[#allocation2 + $0x102] sm:$0xff]  ;;  %v6010_v20 = vld [vmem:[#allocation2 + $0x10a] sm:$0xff] }
 0x300   : > { %11104 = vmatprep.mubr.msk.f32.mxu0 %vm363_vm1, %v4788_v40  ;;  %v6011_v40 = vld [vmem:[#allocation2 + $0x112] sm:$0xff] }
 0x302   : > { %11049 = vmatmul.mubr.msk.f32.gmra.mxu1 %vm363_vm1, %v4826_v17  ;;  %v6012_v17 = vld [vmem:[#allocation2 + $0x11a] sm:$0xff] }
 0x303   : > { %11105 = vmatmul.mubr.msk.f32.gmra.mxu0 %vm363_vm1, %v4789_v34  ;;  %11051 = vmatprep.mubr.msk.f32.mxu1 %vm363_vm1, %v4827_v19  ;;  %v6013_v34 = vld [vmem:[#allocation2 + $0x122] sm:$0xff]  ;;  %v6014_v19 = vld [vmem:[#allocation2 + $0x12a] sm:$0xff] }
 0x304   : > { %11107 = vmatprep.mubr.msk.f32.mxu0 %vm363_vm1, %v4790_v48  ;;  %v6409_v48 = vld [vmem:[#allocation2 + $0x13] sm:$0xff] }
 0x306   : > { %11052 = vmatmul.mubr.msk.f32.gmra.mxu1 %vm363_vm1, %v4828_v15  ;;  %v6839_v15 = vld [vmem:[#allocation2 + $0x14] sm:$0xff] }
 0x307   : > { %11108 = vmatmul.mubr.msk.f32.gmra.mxu0 %vm363_vm1, %v4791_v13  ;;  %11054 = vmatprep.mubr.msk.f32.mxu1 %vm363_vm1, %v4829_v43  ;;  %v6410_v13 = vld [vmem:[#allocation2 + $0x1b] sm:$0xff] }
 0x308   : > { %11110 = vmatprep.mubr.msk.f32.mxu0 %vm363_vm1, %v4792_v58  ;;  %v6840_v43 = vld [vmem:[#allocation2 + $0x1c] sm:$0xff] }
 0x309   : > { %v6411_v58 = vld [vmem:[#allocation2 + $0x23] sm:$0xff] }
 0x30a   : > { %11055 = vmatmul.mubr.msk.f32.gmra.mxu1 %vm363_vm1, %v4830_v18  ;;  %v14175_v18 = vld [vmem:[%s15953_s4 + $0x20] sm:$0xf] }
 0x30b   : > { %11111 = vmatmul.mubr.msk.f32.gmra.mxu0 %vm363_vm1, %v4793_v33  ;;  %11057 = vmatprep.mubr.msk.f32.mxu1 %vm363_vm1, %v4831_v22  ;;  %v14180_v33 = vld [vmem:[#allocation2 + $0x24] sm:$0xff] }
 0x30c   : > { %11113 = vmatprep.mubr.msk.f32.mxu0 %vm363_vm1, %v4794_v4  ;;  %v6412_v22 = vld [vmem:[#allocation2 + $0x2b] sm:$0xff] }
 0x30d   : > { %v14186_v4 = vld [vmem:[#allocation2 + $0x2c] sm:$0xff] }
 0x30e   : > { %11058 = vmatmul.mubr.msk.f32.gmra.mxu1 %vm363_vm1, %v4832_v9  ;;  %v6413_v9 = vld [vmem:[#allocation2 + $0x33] sm:$0xff] }
 0x30f   : > { %11114 = vmatmul.mubr.msk.f32.gmra.mxu0 %vm363_vm1, %v4795_v29  ;;  %11060 = vmatprep.mubr.msk.f32.mxu1 %vm363_vm1, %v4833_v47  ;;  %v14193_v29 = vld [vmem:[#allocation2 + $0x34] sm:$0xff] }
 0x310   : > { %11116 = vmatprep.mubr.msk.f32.mxu0 %vm363_vm1, %v4796_v8  ;;  %v6414_v47 = vld [vmem:[#allocation2 + $0x3b] sm:$0xff] }
 0x311   : > { %v14198_v8 = vld [vmem:[#allocation2 + $0x3c] sm:$0xff] }
 0x312   : > { %11061 = vmatmul.mubr.msk.f32.gmra.mxu1 %vm363_vm1, %v4834_v7  ;;  %v14203_v7 = vld [vmem:[#allocation2 + $0x44] sm:$0xff] }
 0x313   : > { %11117 = vmatmul.mubr.msk.f32.gmra.mxu0 %vm363_vm1, %v4797_v45  ;;  %11121 = vmatprep.mubr.msk.f32.mxu1 %vm363_vm1, %v5549_v25  ;;  %v6415_v25 = vld [vmem:[#allocation2 + $0x43] sm:$0xff]  ;;  %v6416_v45 = vld [vmem:[#allocation2 + $0x4b] sm:$0xff] }
 0x314   : > { %11177 = vmatprep.mubr.msk.f32.mxu0 %vm363_vm1, %v5979_v14 }
 0x316   : > { %11122 = vmatmul.mubr.msk.f32.vlgmr.msra.gmra.mxu1 %vm363_vm1, %v5550_v46  ;;  %v6417_v46 = vld [vmem:[#allocation2 + $0x53] sm:$0xff] }
 0x317   : > { %11178 = vmatmul.mubr.msk.f32.vlgmr.msra.gmra.mxu0 %vm363_vm1, %v5980_v10  ;;  %11232 = vmatpush3.msk.msra.mxu1 %vm472_vm0, %v13855_v36  ;;  %v11011_v53 = vpop.f32.mrf.mxu1 }
 0x318   : > { %11124 = vmatprep.mubr.msk.f32.mxu1 %vm363_vm1, %v5979_v14  ;;  %11180 = vmatprep.mubr.msk.f32.mxu0 %vm363_vm1, %v5981_v57  ;;  %v11067_v31 = vpop.f32.mrf.mxu0  ;;  %v14208_v14 = vld [vmem:[#allocation2 + $0x4c] sm:$0xff] }
 0x319   : > { %11288 = vmatpush3.msk.msra.mxu0 %vm472_vm0, %v14042_v24  ;;  %11343 = vmatprep.subr.msk.mxu1 %vm472_vm0, %v14083_v0  ;;  %v14095_v36 = vadd.f32 %v11067_v31, %v11011_v53  ;;  %v5999_v24 = vld [vmem:[#allocation2 + $0xb2] sm:$0xff]  ;;  %v14230_v53 = vld [vmem:[#allocation2 + $0x64] sm:$0xff]  ;;  %v16288_v31 = vmov 0.0  }
 0x31a   : > { %11125 = vmatmul.mubr.msk.f32.gmra.mxu1 %vm363_vm1, %v5980_v10  ;;  %11399 = vmatprep.subr.msk.mxu0 %vm472_vm0, %v14110_v35  ;;  %v14213_v10 = vld [vmem:[#allocation2 + $0x54] sm:$0xff]  ;;  %4725 = vst.msk [vmem:[#allocation2 + $0x140] sm:$0x3f] %vm4724_vm2, %v16288_v31  ;;  %9016 = vst.msk [vmem:[%s14225_s15 + $0x140] sm:$0x3f] %vm4724_vm2, %v16288_v31 }
 0x31b   : > { %11181 = vmatmul.mubr.msk.f32.gmra.mxu0 %vm363_vm1, %v5982_v55  ;;  %11127 = vmatprep.mubr.msk.f32.mxu1 %vm363_vm1, %v5981_v57  ;;  %v14218_v57 = vld [vmem:[#allocation2 + $0x5c] sm:$0xff]  ;;  %8976 = vst.msk [vmem:[%s14225_s15] sm:$0xff] %vm363_vm1, %v16288_v31  ;;  %8977 = vst.msk [vmem:[%s14225_s15 + $0x8] sm:$0xff] %vm363_vm1, %v16288_v31 }
 0x31c   : > { %11183 = vmatprep.mubr.msk.f32.mxu0 %vm363_vm1, %v5983_v52  ;;  %8978 = vst.msk [vmem:[%s14225_s15 + $0x10] sm:$0xff] %vm363_vm1, %v16288_v31  ;;  %8979 = vst.msk [vmem:[%s14225_s15 + $0x18] sm:$0xff] %vm363_vm1, %v16288_v31 }
 0x31d   : > { %8980 = vst.msk [vmem:[%s14225_s15 + $0x20] sm:$0xff] %vm363_vm1, %v16288_v31  ;;  %8981 = vst.msk [vmem:[%s14225_s15 + $0x28] sm:$0xff] %vm363_vm1, %v16288_v31 }
 0x31e   : > { %11128 = vmatmul.mubr.msk.f32.gmra.mxu1 %vm363_vm1, %v5982_v55  ;;  %v6419_v55 = vld [vmem:[#allocation2 + $0x63] sm:$0xff]  ;;  %8982 = vst.msk [vmem:[%s14225_s15 + $0x30] sm:$0xff] %vm363_vm1, %v16288_v31  ;;  %8983 = vst.msk [vmem:[%s14225_s15 + $0x38] sm:$0xff] %vm363_vm1, %v16288_v31 }
 0x31f   : > { %11184 = vmatmul.mubr.msk.f32.gmra.mxu0 %vm363_vm1, %v5984_v59  ;;  %11130 = vmatprep.mubr.msk.f32.mxu1 %vm363_vm1, %v5983_v52  ;;  %8984 = vst.msk [vmem:[%s14225_s15 + $0x40] sm:$0xff] %vm363_vm1, %v16288_v31  ;;  %8985 = vst.msk [vmem:[%s14225_s15 + $0x48] sm:$0xff] %vm363_vm1, %v16288_v31  ;;  %v6420_v52 = vld [vmem:[#allocation2 + $0x6b] sm:$0xff] }
 0x320   : > { %11186 = vmatprep.mubr.msk.f32.mxu0 %vm363_vm1, %v5985_v12  ;;  %8986 = vst.msk [vmem:[%s14225_s15 + $0x50] sm:$0xff] %vm363_vm1, %v16288_v31  ;;  %8987 = vst.msk [vmem:[%s14225_s15 + $0x58] sm:$0xff] %vm363_vm1, %v16288_v31 }
 0x321   : > { %8988 = vst.msk [vmem:[%s14225_s15 + $0x60] sm:$0xff] %vm363_vm1, %v16288_v31  ;;  %8989 = vst.msk [vmem:[%s14225_s15 + $0x68] sm:$0xff] %vm363_vm1, %v16288_v31 }
 0x322   : > { %11131 = vmatmul.mubr.msk.f32.gmra.mxu1 %vm363_vm1, %v5984_v59  ;;  %8990 = vst.msk [vmem:[%s14225_s15 + $0x70] sm:$0xff] %vm363_vm1, %v16288_v31  ;;  %8991 = vst.msk [vmem:[%s14225_s15 + $0x78] sm:$0xff] %vm363_vm1, %v16288_v31  ;;  %v14358_v59 = vld [vmem:[#allocation2 + $0x6c] sm:$0xff] }
 0x323   : > { %11187 = vmatmul.mubr.msk.f32.gmra.mxu0 %vm363_vm1, %v5986_v2  ;;  %11133 = vmatprep.mubr.msk.f32.mxu1 %vm363_vm1, %v5985_v12  ;;  %8992 = vst.msk [vmem:[%s14225_s15 + $0x80] sm:$0xff] %vm363_vm1, %v16288_v31  ;;  %8993 = vst.msk [vmem:[%s14225_s15 + $0x88] sm:$0xff] %vm363_vm1, %v16288_v31  ;;  %v6421_v12 = vld [vmem:[#allocation2 + $0x73] sm:$0xff] }
 0x324   : > { %11189 = vmatprep.mubr.msk.f32.mxu0 %vm363_vm1, %v5987_v16  ;;  %8994 = vst.msk [vmem:[%s14225_s15 + $0x90] sm:$0xff] %vm363_vm1, %v16288_v31  ;;  %8995 = vst.msk [vmem:[%s14225_s15 + $0x98] sm:$0xff] %vm363_vm1, %v16288_v31 }
 0x325   : > { %8996 = vst.msk [vmem:[%s14225_s15 + $0xa0] sm:$0xff] %vm363_vm1, %v16288_v31  ;;  %8997 = vst.msk [vmem:[%s14225_s15 + $0xa8] sm:$0xff] %vm363_vm1, %v16288_v31 }
 0x326   : > { %11134 = vmatmul.mubr.msk.f32.gmra.mxu1 %vm363_vm1, %v5986_v2  ;;  %8998 = vst.msk [vmem:[%s14225_s15 + $0xb0] sm:$0xff] %vm363_vm1, %v16288_v31  ;;  %8999 = vst.msk [vmem:[%s14225_s15 + $0xb8] sm:$0xff] %vm363_vm1, %v16288_v31  ;;  %v14363_v2 = vld [vmem:[#allocation2 + $0x74] sm:$0xff] }
 0x327   : > { %11190 = vmatmul.mubr.msk.f32.gmra.mxu0 %vm363_vm1, %v5988_v6  ;;  %11136 = vmatprep.mubr.msk.f32.mxu1 %vm363_vm1, %v5987_v16  ;;  %9000 = vst.msk [vmem:[%s14225_s15 + $0xc0] sm:$0xff] %vm363_vm1, %v16288_v31  ;;  %9001 = vst.msk [vmem:[%s14225_s15 + $0xc8] sm:$0xff] %vm363_vm1, %v16288_v31  ;;  %v6422_v16 = vld [vmem:[#allocation2 + $0x7b] sm:$0xff] }
 0x328   : > { %11192 = vmatprep.mubr.msk.f32.mxu0 %vm363_vm1, %v5989_v5  ;;  %9002 = vst.msk [vmem:[%s14225_s15 + $0xd0] sm:$0xff] %vm363_vm1, %v16288_v31  ;;  %9003 = vst.msk [vmem:[%s14225_s15 + $0xd8] sm:$0xff] %vm363_vm1, %v16288_v31 }
 0x329   : > { %9004 = vst.msk [vmem:[%s14225_s15 + $0xe0] sm:$0xff] %vm363_vm1, %v16288_v31  ;;  %9005 = vst.msk [vmem:[%s14225_s15 + $0xe8] sm:$0xff] %vm363_vm1, %v16288_v31 }
 0x32a   : > { %11137 = vmatmul.mubr.msk.f32.gmra.mxu1 %vm363_vm1, %v5988_v6  ;;  %9006 = vst.msk [vmem:[%s14225_s15 + $0xf0] sm:$0xff] %vm363_vm1, %v16288_v31  ;;  %9007 = vst.msk [vmem:[%s14225_s15 + $0xf8] sm:$0xff] %vm363_vm1, %v16288_v31  ;;  %v6423_v6 = vld [vmem:[#allocation2 + $0x83] sm:$0xff] }
 0x32b   : > { %11193 = vmatmul.mubr.msk.f32.gmra.mxu0 %vm363_vm1, %v5990_v30  ;;  %11139 = vmatprep.mubr.msk.f32.mxu1 %vm363_vm1, %v5989_v5  ;;  %9008 = vst.msk [vmem:[%s14225_s15 + $0x100] sm:$0xff] %vm363_vm1, %v16288_v31  ;;  %9009 = vst.msk [vmem:[%s14225_s15 + $0x108] sm:$0xff] %vm363_vm1, %v16288_v31  ;;  %v14373_v5 = vld [vmem:[#allocation2 + $0x84] sm:$0xff] }
 0x32c   : > { %11195 = vmatprep.mubr.msk.f32.mxu0 %vm363_vm1, %v5991_v51  ;;  %9010 = vst.msk [vmem:[%s14225_s15 + $0x110] sm:$0xff] %vm363_vm1, %v16288_v31  ;;  %9011 = vst.msk [vmem:[%s14225_s15 + $0x118] sm:$0xff] %vm363_vm1, %v16288_v31 }
 0x32d   : > { %9012 = vst.msk [vmem:[%s14225_s15 + $0x120] sm:$0xff] %vm363_vm1, %v16288_v31  ;;  %9013 = vst.msk [vmem:[%s14225_s15 + $0x128] sm:$0xff] %vm363_vm1, %v16288_v31 }
 0x32e   : > { %11140 = vmatmul.mubr.msk.f32.gmra.mxu1 %vm363_vm1, %v5990_v30  ;;  %9014 = vst.msk [vmem:[%s14225_s15 + $0x130] sm:$0xff] %vm363_vm1, %v16288_v31  ;;  %9015 = vst.msk [vmem:[%s14225_s15 + $0x138] sm:$0xff] %vm363_vm1, %v16288_v31  ;;  %v6424_v30 = vld [vmem:[#allocation2 + $0x8b] sm:$0xff] }
 0x32f   : > { %11196 = vmatmul.mubr.msk.f32.gmra.mxu0 %vm363_vm1, %v5992_v63  ;;  %11142 = vmatprep.mubr.msk.f32.mxu1 %vm363_vm1, %v5991_v51  ;;  %v14378_v51 = vld [vmem:[#allocation2 + $0x8c] sm:$0xff] }
 0x330   : > { %11198 = vmatprep.mubr.msk.f32.mxu0 %vm363_vm1, %v5993_v21 }
 0x332   : > { %11143 = vmatmul.mubr.msk.f32.gmra.mxu1 %vm363_vm1, %v5992_v63  ;;  %v6425_v63 = vld [vmem:[#allocation2 + $0x93] sm:$0xff] }
 0x333   : > { %11199 = vmatmul.mubr.msk.f32.gmra.mxu0 %vm363_vm1, %v5994_v44  ;;  %11145 = vmatprep.mubr.msk.f32.mxu1 %vm363_vm1, %v5993_v21  ;;  %v14383_v21 = vld [vmem:[#allocation2 + $0x94] sm:$0xff] }
 0x334   : > { %11201 = vmatprep.mubr.msk.f32.mxu0 %vm363_vm1, %v5995_v42 }
 0x336   : > { %11146 = vmatmul.mubr.msk.f32.gmra.mxu1 %vm363_vm1, %v5994_v44  ;;  %v6426_v44 = vld [vmem:[#allocation2 + $0x9b] sm:$0xff] }
 0x337   : > { %11202 = vmatmul.mubr.msk.f32.gmra.mxu0 %vm363_vm1, %v5996_v28  ;;  %11148 = vmatprep.mubr.msk.f32.mxu1 %vm363_vm1, %v5995_v42  ;;  %v14388_v42 = vld [vmem:[#allocation2 + $0x9c] sm:$0xff] }
 0x338   : > { %11204 = vmatprep.mubr.msk.f32.mxu0 %vm363_vm1, %v5997_v49 }
 0x33a   : > { %11149 = vmatmul.mubr.msk.f32.gmra.mxu1 %vm363_vm1, %v5996_v28  ;;  %v6427_v28 = vld [vmem:[#allocation2 + $0xa3] sm:$0xff] }
 0x33b   : > { %11205 = vmatmul.mubr.msk.f32.gmra.mxu0 %vm363_vm1, %v5998_v54  ;;  %11151 = vmatprep.mubr.msk.f32.mxu1 %vm363_vm1, %v5997_v49  ;;  %v14393_v49 = vld [vmem:[#allocation2 + $0xa4] sm:$0xff] }
 0x33c   : > { %11207 = vmatprep.mubr.msk.f32.mxu0 %vm363_vm1, %v5999_v24 }
 0x33e   : > { %11152 = vmatmul.mubr.msk.f32.gmra.mxu1 %vm363_vm1, %v5998_v54  ;;  %v6428_v54 = vld [vmem:[#allocation2 + $0xab] sm:$0xff] }
 0x33f   : > { %11208 = vmatmul.mubr.msk.f32.gmra.mxu0 %vm363_vm1, %v6000_v41  ;;  %11154 = vmatprep.mubr.msk.f32.mxu1 %vm363_vm1, %v5999_v24  ;;  %v14398_v24 = vld [vmem:[#allocation2 + $0xac] sm:$0xff] }
 0x340   : > { %11210 = vmatprep.mubr.msk.f32.mxu0 %vm363_vm1, %v6001_v26 }
 0x342   : > { %11155 = vmatmul.mubr.msk.f32.gmra.mxu1 %vm363_vm1, %v6000_v41  ;;  %v6429_v41 = vld [vmem:[#allocation2 + $0xb3] sm:$0xff] }
 0x343   : > { %11211 = vmatmul.mubr.msk.f32.gmra.mxu0 %vm363_vm1, %v6002_v38  ;;  %11157 = vmatprep.mubr.msk.f32.mxu1 %vm363_vm1, %v6001_v26  ;;  %v14403_v26 = vld [vmem:[#allocation2 + $0xb4] sm:$0xff] }
 0x344   : > { %11213 = vmatprep.mubr.msk.f32.mxu0 %vm363_vm1, %v6003_v50 }
 0x346   : > { %11158 = vmatmul.mubr.msk.f32.gmra.mxu1 %vm363_vm1, %v6002_v38  ;;  %v6430_v38 = vld [vmem:[#allocation2 + $0xbb] sm:$0xff] }
 0x347   : > { %11214 = vmatmul.mubr.msk.f32.gmra.mxu0 %vm363_vm1, %v6004_v3  ;;  %11160 = vmatprep.mubr.msk.f32.mxu1 %vm363_vm1, %v6003_v50  ;;  %v14408_v50 = vld [vmem:[#allocation2 + $0xbc] sm:$0xff] }
 0x348   : > { %11216 = vmatprep.mubr.msk.f32.mxu0 %vm363_vm1, %v6005_v27 }
 0x34a   : > { %11161 = vmatmul.mubr.msk.f32.gmra.mxu1 %vm363_vm1, %v6004_v3  ;;  %v6431_v3 = vld [vmem:[#allocation2 + $0xc3] sm:$0xff] }
 0x34b   : > { %11217 = vmatmul.mubr.msk.f32.gmra.mxu0 %vm363_vm1, %v6006_v60  ;;  %11163 = vmatprep.mubr.msk.f32.mxu1 %vm363_vm1, %v6005_v27  ;;  %v14413_v27 = vld [vmem:[#allocation2 + $0xc4] sm:$0xff] }
 0x34c   : > { %11219 = vmatprep.mubr.msk.f32.mxu0 %vm363_vm1, %v6007_v56 }
 0x34e   : > { %11164 = vmatmul.mubr.msk.f32.gmra.mxu1 %vm363_vm1, %v6006_v60  ;;  %v6432_v60 = vld [vmem:[#allocation2 + $0xcb] sm:$0xff] }
 0x34f   : > { %11220 = vmatmul.mubr.msk.f32.gmra.mxu0 %vm363_vm1, %v6008_v32  ;;  %11166 = vmatprep.mubr.msk.f32.mxu1 %vm363_vm1, %v6007_v56  ;;  %v14418_v56 = vld [vmem:[#allocation2 + $0xcc] sm:$0xff] }
 0x350   : > { %11222 = vmatprep.mubr.msk.f32.mxu0 %vm363_vm1, %v6009_v11 }
 0x352   : > { %11167 = vmatmul.mubr.msk.f32.gmra.mxu1 %vm363_vm1, %v6008_v32  ;;  %v6433_v32 = vld [vmem:[#allocation2 + $0xd3] sm:$0xff] }
 0x353   : > { %11223 = vmatmul.mubr.msk.f32.gmra.mxu0 %vm363_vm1, %v6010_v20  ;;  %11169 = vmatprep.mubr.msk.f32.mxu1 %vm363_vm1, %v6009_v11  ;;  %v14423_v11 = vld [vmem:[#allocation2 + $0xd4] sm:$0xff] }
 0x354   : > { %11225 = vmatprep.mubr.msk.f32.mxu0 %vm363_vm1, %v6011_v40 }
 0x356   : > { %11170 = vmatmul.mubr.msk.f32.gmra.mxu1 %vm363_vm1, %v6010_v20  ;;  %v6434_v20 = vld [vmem:[#allocation2 + $0xdb] sm:$0xff] }
 0x357   : > { %11226 = vmatmul.mubr.msk.f32.gmra.mxu0 %vm363_vm1, %v6012_v17  ;;  %11172 = vmatprep.mubr.msk.f32.mxu1 %vm363_vm1, %v6011_v40  ;;  %v14428_v40 = vld [vmem:[#allocation2 + $0xdc] sm:$0xff] }
 0x358   : > { %11228 = vmatprep.mubr.msk.f32.mxu0 %vm363_vm1, %v6013_v34  ;;  %v14433_v34 = vld [vmem:[#allocation2 + $0xe4] sm:$0xff] }
 0x35a   : > { %11173 = vmatmul.mubr.msk.f32.gmra.mxu1 %vm363_vm1, %v6012_v17  ;;  %v6435_v17 = vld [vmem:[#allocation2 + $0xe3] sm:$0xff] }
 0x35b   : > { %11229 = vmatmul.mubr.msk.f32.gmra.mxu0 %vm363_vm1, %v6014_v19  ;;  %11233 = vmatprep.mubr.msk.f32.mxu1 %vm363_vm1, %v6409_v48  ;;  %v14438_v19 = vpop.f32.mrf.mxu1  ;;  %v14440_v48 = vpop.f32.mrf.mxu0 }
 0x35c   : > { %11289 = vmatprep.mubr.msk.f32.mxu0 %vm363_vm1, %v6839_v15  ;;  %v6436_v15 = vld [vmem:[#allocation2 + $0xeb] sm:$0xff] }
 0x35e   : > { %11234 = vmatmul.mubr.msk.f32.vlgmr.msra.gmra.mxu1 %vm363_vm1, %v6410_v13  ;;  %v14442_v13 = vld [vmem:[#allocation2 + $0xec] sm:$0xff] }
 0x35f   : > { %11290 = vmatmul.mubr.msk.f32.vlgmr.msra.gmra.mxu0 %vm363_vm1, %v6840_v43  ;;  %11344 = vmatpush3.msk.msra.mxu1 %vm472_vm0, %v14083_v0  ;;  %v6418_v0 = vld [vmem:[#allocation2 + $0x5b] sm:$0xff] }
 0x360   : > { %11236 = vmatprep.mubr.msk.f32.mxu1 %vm363_vm1, %v6411_v58  ;;  %11292 = vmatprep.mubr.msk.f32.mxu0 %vm363_vm1, %v14180_v33 }
 0x361   : > { %11400 = vmatpush3.msk.msra.mxu0 %vm472_vm0, %v14110_v35  ;;  %11455 = vmatprep.subr.msk.mxu1 %vm472_vm0, %v14175_v18  ;;  %v14368_v35 = vld [vmem:[#allocation2 + $0x7c] sm:$0xff] }
 0x362   : > { %11237 = vmatmul.mubr.msk.f32.gmra.mxu1 %vm363_vm1, %v6412_v22  ;;  %v6437_v22 = vld [vmem:[#allocation2 + $0xf3] sm:$0xff] }
 0x363   : > { %11293 = vmatmul.mubr.msk.f32.gmra.mxu0 %vm363_vm1, %v14186_v4  ;;  %11239 = vmatprep.mubr.msk.f32.mxu1 %vm363_vm1, %v6413_v9  ;;  %v14447_v9 = vld [vmem:[#allocation2 + $0xf4] sm:$0xff] }
 0x364   : > { %11295 = vmatprep.mubr.msk.f32.mxu0 %vm363_vm1, %v14193_v29 }
 0x366   : > { %11240 = vmatmul.mubr.msk.f32.gmra.mxu1 %vm363_vm1, %v6414_v47 }
 0x367   : > { %11296 = vmatmul.mubr.msk.f32.gmra.mxu0 %vm363_vm1, %v14198_v8  ;;  %11242 = vmatprep.mubr.msk.f32.mxu1 %vm363_vm1, %v6415_v25 }
 0x368   : > { %11298 = vmatprep.mubr.msk.f32.mxu0 %vm363_vm1, %v14203_v7 }
 0x36a   : > { %11243 = vmatmul.mubr.msk.f32.gmra.mxu1 %vm363_vm1, %v6416_v45 }
 0x36b   : > { %11299 = vmatmul.mubr.msk.f32.gmra.mxu0 %vm363_vm1, %v14208_v14  ;;  %11245 = vmatprep.mubr.msk.f32.mxu1 %vm363_vm1, %v6417_v46 }
 0x36c   : > { %11301 = vmatprep.mubr.msk.f32.mxu0 %vm363_vm1, %v14213_v10 }
 0x36e   : > { %11246 = vmatmul.mubr.msk.f32.gmra.mxu1 %vm363_vm1, %v6418_v0  ;;  %v6438_v0 = vld [vmem:[#allocation2 + $0xfb] sm:$0xff] }
 0x36f   : > { %11302 = vmatmul.mubr.msk.f32.gmra.mxu0 %vm363_vm1, %v14218_v57  ;;  %11248 = vmatprep.mubr.msk.f32.mxu1 %vm363_vm1, %v6419_v55  ;;  %v14456_v55 = vld [vmem:[#allocation2 + $0xfc] sm:$0xff] }
 0x370   : > { %11304 = vmatprep.mubr.msk.f32.mxu0 %vm363_vm1, %v14230_v53 }
 0x372   : > { %11249 = vmatmul.mubr.msk.f32.gmra.mxu1 %vm363_vm1, %v6420_v52 }
 0x373   : > { %11305 = vmatmul.mubr.msk.f32.gmra.mxu0 %vm363_vm1, %v14358_v59  ;;  %11251 = vmatprep.mubr.msk.f32.mxu1 %vm363_vm1, %v6421_v12  ;;  %v6439_v12 = vld [vmem:[#allocation2 + $0x103] sm:$0xff] }
 0x374   : > { %11307 = vmatprep.mubr.msk.f32.mxu0 %vm363_vm1, %v14363_v2 }
 0x376   : > { %11252 = vmatmul.mubr.msk.f32.gmra.mxu1 %vm363_vm1, %v6422_v16  ;;  %v14461_v16 = vld [vmem:[#allocation2 + $0x104] sm:$0xff] }
 0x377   : > { %11308 = vmatmul.mubr.msk.f32.gmra.mxu0 %vm363_vm1, %v14368_v35  ;;  %11254 = vmatprep.mubr.msk.f32.mxu1 %vm363_vm1, %v6423_v6 }
 0x378   : > { %11310 = vmatprep.mubr.msk.f32.mxu0 %vm363_vm1, %v14373_v5 }
 0x37a   : > { %11255 = vmatmul.mubr.msk.f32.gmra.mxu1 %vm363_vm1, %v6424_v30 }
 0x37b   : > { %11311 = vmatmul.mubr.msk.f32.gmra.mxu0 %vm363_vm1, %v14378_v51  ;;  %11257 = vmatprep.mubr.msk.f32.mxu1 %vm363_vm1, %v6425_v63 }
 0x37c   : > { %11313 = vmatprep.mubr.msk.f32.mxu0 %vm363_vm1, %v14383_v21 }
 0x37e   : > { %11258 = vmatmul.mubr.msk.f32.gmra.mxu1 %vm363_vm1, %v6426_v44 }
 0x37f   : > { %11314 = vmatmul.mubr.msk.f32.gmra.mxu0 %vm363_vm1, %v14388_v42  ;;  %11260 = vmatprep.mubr.msk.f32.mxu1 %vm363_vm1, %v6427_v28  ;;  %v6440_v28 = vld [vmem:[#allocation2 + $0x10b] sm:$0xff] }
 0x380   : > { %11316 = vmatprep.mubr.msk.f32.mxu0 %vm363_vm1, %v14393_v49 }
 0x382   : > { %11261 = vmatmul.mubr.msk.f32.gmra.mxu1 %vm363_vm1, %v6428_v54  ;;  %v14470_v54 = vld [vmem:[#allocation2 + $0x10c] sm:$0xff] }
 0x383   : > { %11317 = vmatmul.mubr.msk.f32.gmra.mxu0 %vm363_vm1, %v14398_v24  ;;  %11263 = vmatprep.mubr.msk.f32.mxu1 %vm363_vm1, %v6429_v41 }
 0x384   : > { %11319 = vmatprep.mubr.msk.f32.mxu0 %vm363_vm1, %v14403_v26 }
 0x386   : > { %11264 = vmatmul.mubr.msk.f32.gmra.mxu1 %vm363_vm1, %v6430_v38 }
 0x387   : > { %11320 = vmatmul.mubr.msk.f32.gmra.mxu0 %vm363_vm1, %v14408_v50  ;;  %11266 = vmatprep.mubr.msk.f32.mxu1 %vm363_vm1, %v6431_v3  ;;  %v6441_v3 = vld [vmem:[#allocation2 + $0x113] sm:$0xff] }
 0x388   : > { %11322 = vmatprep.mubr.msk.f32.mxu0 %vm363_vm1, %v14413_v27 }
 0x38a   : > { %11267 = vmatmul.mubr.msk.f32.gmra.mxu1 %vm363_vm1, %v6432_v60  ;;  %v14475_v60 = vld [vmem:[#allocation2 + $0x114] sm:$0xff] }
 0x38b   : > { %11323 = vmatmul.mubr.msk.f32.gmra.mxu0 %vm363_vm1, %v14418_v56  ;;  %11269 = vmatprep.mubr.msk.f32.mxu1 %vm363_vm1, %v6433_v32 }
 0x38c   : > { %11325 = vmatprep.mubr.msk.f32.mxu0 %vm363_vm1, %v14423_v11 }
 0x38e   : > { %11270 = vmatmul.mubr.msk.f32.gmra.mxu1 %vm363_vm1, %v6434_v20 }
 0x38f   : > { %11326 = vmatmul.mubr.msk.f32.gmra.mxu0 %vm363_vm1, %v14428_v40  ;;  %11272 = vmatprep.mubr.msk.f32.mxu1 %vm363_vm1, %v6435_v17 }
 0x390   : > { %11328 = vmatprep.mubr.msk.f32.mxu0 %vm363_vm1, %v14433_v34 }
 0x392   : > { %v11014_v43 = vpop.f32.mrf.mxu1  ;;  %11273 = vmatmul.mubr.msk.f32.gmra.mxu1 %vm363_vm1, %v6436_v15 }
 0x393   : > { %v11070_v58 = vpop.f32.mrf.mxu0  ;;  %11329 = vmatmul.mubr.msk.f32.gmra.mxu0 %vm363_vm1, %v14442_v13  ;;  %11275 = vmatprep.mubr.msk.f32.mxu1 %vm363_vm1, %v6437_v22 }
 0x394   : > { %v14449_v47 = vadd.f32 %v11070_v58, %v11014_v43  ;;  %11331 = vmatprep.mubr.msk.f32.mxu0 %vm363_vm1, %v14447_v9  ;;  %v5024_v25 = vpop.f32.mrf.mxu1  ;;  %v6442_v43 = vld [vmem:[#allocation2 + $0x11b] sm:$0xff] }
 0x395   : > { %v5380_v45 = vpop.f32.mrf.mxu0  ;;  %v14484_v58 = vld [vmem:[#allocation2 + $0x11c] sm:$0xff] }
 0x396   : > { %v14454_v46 = vadd.f32 %v5380_v45, %v5024_v25  ;;  %v11017_v31 = vpop.f32.mrf.mxu1  ;;  %11276 = vmatmul.mubr.msk.f32.gmra.mxu1 %vm363_vm1, %v6438_v0  ;;  %v6443_v45 = vld [vmem:[#allocation2 + $0x123] sm:$0xff] }
 0x397   : > { %v11073_v52 = vpop.f32.mrf.mxu0  ;;  %11332 = vmatmul.mubr.msk.f32.gmra.mxu0 %vm363_vm1, %v14456_v55  ;;  %11278 = vmatprep.mubr.msk.f32.mxu1 %vm363_vm1, %v6439_v12  ;;  %v14489_v0 = vld [vmem:[#allocation2 + $0x124] sm:$0xff] }
 0x398   : > { %v14463_v6 = vadd.f32 %v11073_v52, %v11017_v31  ;;  %11334 = vmatprep.mubr.msk.f32.mxu0 %vm363_vm1, %v14461_v16  ;;  %v5034_v30 = vpop.f32.mrf.mxu1 }
 0x399   : > { %v5390_v63 = vpop.f32.mrf.mxu0 }
 0x39a   : > { %v14468_v44 = vadd.f32 %v5390_v63, %v5034_v30  ;;  %v11020_v41 = vpop.f32.mrf.mxu1  ;;  %11279 = vmatmul.mubr.msk.f32.gmra.mxu1 %vm363_vm1, %v6440_v28  ;;  %v6444_v63 = vld [vmem:[#allocation2 + $0x12b] sm:$0xff] }
 0x39b   : > { %v11076_v38 = vpop.f32.mrf.mxu0  ;;  %11335 = vmatmul.mubr.msk.f32.gmra.mxu0 %vm363_vm1, %v14470_v54  ;;  %11281 = vmatprep.mubr.msk.f32.mxu1 %vm363_vm1, %v6441_v3  ;;  %v14498_v28 = vld [vmem:[#allocation2 + $0x12c] sm:$0xff] }
 0x39c   : > { %v14477_v32 = vadd.f32 %v11076_v38, %v11020_v41  ;;  %11337 = vmatprep.mubr.msk.f32.mxu0 %vm363_vm1, %v14475_v60  ;;  %v5044_v20 = vpop.f32.mrf.mxu1  ;;  %v7699_v3 = vld [vmem:[#allocation2 + $0x25] sm:$0xff] }
 0x39d   : > { %v5400_v17 = vpop.f32.mrf.mxu0 }
 0x39e   : > { %v14482_v15 = vadd.f32 %v5400_v17, %v5044_v20  ;;  %v11023_v22 = vpop.f32.mrf.mxu1  ;;  %11282 = vmatmul.mubr.msk.f32.gmra.mxu1 %vm363_vm1, %v6442_v43 }
 0x39f   : > { %v11079_v25 = vpop.f32.mrf.mxu0  ;;  %11338 = vmatmul.mubr.msk.f32.gmra.mxu0 %vm363_vm1, %v14484_v58  ;;  %11284 = vmatprep.mubr.msk.f32.mxu1 %vm363_vm1, %v6443_v45 }
 0x3a0   : > { %v14491_v31 = vadd.f32 %v11079_v25, %v11023_v22  ;;  %11340 = vmatprep.mubr.msk.f32.mxu0 %vm363_vm1, %v14489_v0  ;;  %v5054_v52 = vpop.f32.mrf.mxu1  ;;  %v7700_v25 = vld [vmem:[#allocation2 + $0x2d] sm:$0xff] }
 0x3a1   : > { %v5410_v12 = vpop.f32.mrf.mxu0 }
 0x3a2   : > { %v14496_v30 = vadd.f32 %v5410_v12, %v5054_v52  ;;  %v11026_v41 = vpop.f32.mrf.mxu1  ;;  %11285 = vmatmul.mubr.msk.f32.gmra.mxu1 %vm363_vm1, %v6444_v63 }
 0x3a3   : > { %v11082_v38 = vpop.f32.mrf.mxu0  ;;  %11341 = vmatmul.mubr.msk.f32.gmra.mxu0 %vm363_vm1, %v14498_v28  ;;  %11345 = vmatprep.mubr.msk.f32.mxu1 %vm363_vm1, %v14180_v33  ;;  %v7701_v33 = vld [vmem:[#allocation2 + $0x35] sm:$0xff] }
 0x3a4   : > { %v14503_v20 = vadd.f32 %v11082_v38, %v11026_v41  ;;  %11401 = vmatprep.mubr.msk.f32.mxu0 %vm363_vm1, %v7699_v3  ;;  %v5064_v17 = vpop.f32.mrf.mxu1  ;;  %v7702_v3 = vld [vmem:[#allocation2 + $0x3d] sm:$0xff] }
 0x3a5   : > { %v5420_v43 = vpop.f32.mrf.mxu0 }
 0x3a6   : > { %v14508_v22 = vadd.f32 %v5420_v43, %v5064_v17  ;;  %v11029_v45 = vpop.f32.mrf.mxu1  ;;  %11346 = vmatmul.mubr.msk.f32.vlgmr.msra.gmra.mxu1 %vm363_vm1, %v14186_v4  ;;  %v7703_v43 = vld [vmem:[#allocation2 + $0x45] sm:$0xff] }
 0x3a7   : > { %v11085_v52 = vpop.f32.mrf.mxu0  ;;  %11402 = vmatmul.mubr.msk.f32.vlgmr.msra.gmra.mxu0 %vm363_vm1, %v7700_v25  ;;  %11456 = vmatpush3.msk.msra.mxu1 %vm472_vm0, %v14175_v18 }
 0x3a8   : > { %v14513_v12 = vadd.f32 %v11085_v52, %v11029_v45  ;;  %11348 = vmatprep.mubr.msk.f32.mxu1 %vm363_vm1, %v14193_v29  ;;  %11404 = vmatprep.mubr.msk.f32.mxu0 %vm363_vm1, %v7701_v33  ;;  %v5074_v63 = vpop.f32.mrf.mxu1  ;;  %v7704_v52 = vld [vmem:[#allocation2 + $0x4d] sm:$0xff] }
 0x3a9   : > { %v5430_v41 = vpop.f32.mrf.mxu0 }
 0x3aa   : > { %v14520_v38 = vadd.f32 %v5430_v41, %v5074_v63  ;;  %v11032_v17 = vpop.f32.mrf.mxu1  ;;  %11349 = vmatmul.mubr.msk.f32.gmra.mxu1 %vm363_vm1, %v14198_v8  ;;  %v7705_v8 = vld [vmem:[#allocation2 + $0x55] sm:$0xff] }
 0x3ab   : > { %v11088_v4 = vpop.f32.mrf.mxu0  ;;  %11405 = vmatmul.mubr.msk.f32.gmra.mxu0 %vm363_vm1, %v7702_v3  ;;  %11351 = vmatprep.mubr.msk.f32.mxu1 %vm363_vm1, %v14203_v7 }
 0x3ac   : > { %v14525_v18 = vadd.f32 %v11088_v4, %v11032_v17  ;;  %11407 = vmatprep.mubr.msk.f32.mxu0 %vm363_vm1, %v7703_v43  ;;  %v5084_v29 = vpop.f32.mrf.mxu1  ;;  %v7706_v4 = vld [vmem:[#allocation2 + $0x5d] sm:$0xff] }
 0x3ad   : > { %v5440_v25 = vpop.f32.mrf.mxu0 }
 0x3ae   : > { %v14530_v45 = vadd.f32 %v5440_v25, %v5084_v29  ;;  %v11035_v33 = vpop.f32.mrf.mxu1  ;;  %11352 = vmatmul.mubr.msk.f32.gmra.mxu1 %vm363_vm1, %v14208_v14  ;;  %v7707_v14 = vld [vmem:[#allocation2 + $0x65] sm:$0xff] }
 0x3af   : > { %v11091_v63 = vpop.f32.mrf.mxu0  ;;  %11408 = vmatmul.mubr.msk.f32.gmra.mxu0 %vm363_vm1, %v7704_v52  ;;  %11354 = vmatprep.mubr.msk.f32.mxu1 %vm363_vm1, %v14213_v10 }
 0x3b0   : > { %v14535_v41 = vadd.f32 %v11091_v63, %v11035_v33  ;;  %11410 = vmatprep.mubr.msk.f32.mxu0 %vm363_vm1, %v7705_v8  ;;  %v5094_v7 = vpop.f32.mrf.mxu1  ;;  %v7708_v63 = vld [vmem:[#allocation2 + $0x6d] sm:$0xff] }
 0x3b1   : > { %v5450_v3 = vpop.f32.mrf.mxu0 }
 0x3b2   : > { %v14540_v17 = vadd.f32 %v5450_v3, %v5094_v7  ;;  %v11038_v43 = vpop.f32.mrf.mxu1  ;;  %11355 = vmatmul.mubr.msk.f32.gmra.mxu1 %vm363_vm1, %v14218_v57  ;;  %v7709_v57 = vld [vmem:[#allocation2 + $0x75] sm:$0xff] }
 0x3b3   : > { %v11094_v29 = vpop.f32.mrf.mxu0  ;;  %11411 = vmatmul.mubr.msk.f32.gmra.mxu0 %vm363_vm1, %v7706_v4  ;;  %11357 = vmatprep.mubr.msk.f32.mxu1 %vm363_vm1, %v14230_v53 }
 0x3b4   : > { %v14545_v25 = vadd.f32 %v11094_v29, %v11038_v43  ;;  %11413 = vmatprep.mubr.msk.f32.mxu0 %vm363_vm1, %v7707_v14  ;;  %v5104_v10 = vpop.f32.mrf.mxu1  ;;  %v7710_v29 = vld [vmem:[#allocation2 + $0x7d] sm:$0xff] }
 0x3b5   : > { %v5460_v52 = vpop.f32.mrf.mxu0 }
 0x3b6   : > { %v14550_v33 = vadd.f32 %v5460_v52, %v5104_v10  ;;  %v11041_v8 = vpop.f32.mrf.mxu1  ;;  %11358 = vmatmul.mubr.msk.f32.gmra.mxu1 %vm363_vm1, %v14358_v59  ;;  %v7711_v59 = vld [vmem:[#allocation2 + $0x85] sm:$0xff] }
 0x3b7   : > { %v11097_v7 = vpop.f32.mrf.mxu0  ;;  %11414 = vmatmul.mubr.msk.f32.gmra.mxu0 %vm363_vm1, %v7708_v63  ;;  %11360 = vmatprep.mubr.msk.f32.mxu1 %vm363_vm1, %v14363_v2 }
 0x3b8   : > { %v14555_v3 = vadd.f32 %v11097_v7, %v11041_v8  ;;  %11416 = vmatprep.mubr.msk.f32.mxu0 %vm363_vm1, %v7709_v57  ;;  %v5114_v53 = vpop.f32.mrf.mxu1  ;;  %v7712_v7 = vld [vmem:[#allocation2 + $0x8d] sm:$0xff] }
 0x3b9   : > { %v5470_v4 = vpop.f32.mrf.mxu0 }
 0x3ba   : > { %v14560_v43 = vadd.f32 %v5470_v4, %v5114_v53  ;;  %v11044_v14 = vpop.f32.mrf.mxu1  ;;  %11361 = vmatmul.mubr.msk.f32.gmra.mxu1 %vm363_vm1, %v14368_v35  ;;  %v7713_v35 = vld [vmem:[#allocation2 + $0x95] sm:$0xff] }
 0x3bb   : > { %v11100_v10 = vpop.f32.mrf.mxu0  ;;  %11417 = vmatmul.mubr.msk.f32.gmra.mxu0 %vm363_vm1, %v7710_v29  ;;  %11363 = vmatprep.mubr.msk.f32.mxu1 %vm363_vm1, %v14373_v5 }
 0x3bc   : > { %v14565_v52 = vadd.f32 %v11100_v10, %v11044_v14  ;;  %11419 = vmatprep.mubr.msk.f32.mxu0 %vm363_vm1, %v7711_v59  ;;  %v5124_v2 = vpop.f32.mrf.mxu1  ;;  %v7714_v10 = vld [vmem:[#allocation2 + $0x9d] sm:$0xff] }
 0x3bd   : > { %v5480_v63 = vpop.f32.mrf.mxu0 }
 0x3be   : > { %v14570_v8 = vadd.f32 %v5480_v63, %v5124_v2  ;;  %v11047_v57 = vpop.f32.mrf.mxu1  ;;  %11364 = vmatmul.mubr.msk.f32.gmra.mxu1 %vm363_vm1, %v14378_v51  ;;  %v7715_v51 = vld [vmem:[#allocation2 + $0xa5] sm:$0xff] }
 0x3bf   : > { %v11103_v53 = vpop.f32.mrf.mxu0  ;;  %11420 = vmatmul.mubr.msk.f32.gmra.mxu0 %vm363_vm1, %v7712_v7  ;;  %11366 = vmatprep.mubr.msk.f32.mxu1 %vm363_vm1, %v14383_v21 }
 0x3c0   : > { %v14575_v4 = vadd.f32 %v11103_v53, %v11047_v57  ;;  %11422 = vmatprep.mubr.msk.f32.mxu0 %vm363_vm1, %v7713_v35  ;;  %v5134_v5 = vpop.f32.mrf.mxu1  ;;  %v7716_v53 = vld [vmem:[#allocation2 + $0xad] sm:$0xff] }
 0x3c1   : > { %v5490_v29 = vpop.f32.mrf.mxu0 }
 0x3c2   : > { %v14580_v14 = vadd.f32 %v5490_v29, %v5134_v5  ;;  %v11050_v59 = vpop.f32.mrf.mxu1  ;;  %11367 = vmatmul.mubr.msk.f32.gmra.mxu1 %vm363_vm1, %v14388_v42  ;;  %v7717_v42 = vld [vmem:[#allocation2 + $0xb5] sm:$0xff] }
 0x3c3   : > { %v11106_v2 = vpop.f32.mrf.mxu0  ;;  %11423 = vmatmul.mubr.msk.f32.gmra.mxu0 %vm363_vm1, %v7714_v10  ;;  %11369 = vmatprep.mubr.msk.f32.mxu1 %vm363_vm1, %v14393_v49 }
 0x3c4   : > { %v14585_v63 = vadd.f32 %v11106_v2, %v11050_v59  ;;  %11425 = vmatprep.mubr.msk.f32.mxu0 %vm363_vm1, %v7715_v51  ;;  %v5144_v21 = vpop.f32.mrf.mxu1  ;;  %v7718_v2 = vld [vmem:[#allocation2 + $0xbd] sm:$0xff] }
 0x3c5   : > { %v5500_v7 = vpop.f32.mrf.mxu0 }
 0x3c6   : > { %v14590_v57 = vadd.f32 %v5500_v7, %v5144_v21  ;;  %v11053_v35 = vpop.f32.mrf.mxu1  ;;  %11370 = vmatmul.mubr.msk.f32.gmra.mxu1 %vm363_vm1, %v14398_v24  ;;  %v7719_v24 = vld [vmem:[#allocation2 + $0xc5] sm:$0xff] }
 0x3c7   : > { %v11109_v5 = vpop.f32.mrf.mxu0  ;;  %11426 = vmatmul.mubr.msk.f32.gmra.mxu0 %vm363_vm1, %v7716_v53  ;;  %11372 = vmatprep.mubr.msk.f32.mxu1 %vm363_vm1, %v14403_v26 }
 0x3c8   : > { %v14595_v29 = vadd.f32 %v11109_v5, %v11053_v35  ;;  %11428 = vmatprep.mubr.msk.f32.mxu0 %vm363_vm1, %v7717_v42  ;;  %v5154_v49 = vpop.f32.mrf.mxu1  ;;  %v7720_v5 = vld [vmem:[#allocation2 + $0xcd] sm:$0xff] }
 0x3c9   : > { %v5510_v10 = vpop.f32.mrf.mxu0 }
 0x3ca   : > { %v14600_v59 = vadd.f32 %v5510_v10, %v5154_v49  ;;  %v11056_v51 = vpop.f32.mrf.mxu1  ;;  %11373 = vmatmul.mubr.msk.f32.gmra.mxu1 %vm363_vm1, %v14408_v50  ;;  %v7721_v50 = vld [vmem:[#allocation2 + $0xd5] sm:$0xff] }
 0x3cb   : > { %v11112_v21 = vpop.f32.mrf.mxu0  ;;  %11429 = vmatmul.mubr.msk.f32.gmra.mxu0 %vm363_vm1, %v7718_v2  ;;  %11375 = vmatprep.mubr.msk.f32.mxu1 %vm363_vm1, %v14413_v27 }
 0x3cc   : > { %v14605_v7 = vadd.f32 %v11112_v21, %v11056_v51  ;;  %11431 = vmatprep.mubr.msk.f32.mxu0 %vm363_vm1, %v7719_v24  ;;  %v5164_v26 = vpop.f32.mrf.mxu1  ;;  %v7722_v21 = vld [vmem:[#allocation2 + $0xdd] sm:$0xff] }
 0x3cd   : > { %v5520_v53 = vpop.f32.mrf.mxu0 }
 0x3ce   : > { %v14610_v35 = vadd.f32 %v5520_v53, %v5164_v26  ;;  %v11059_v42 = vpop.f32.mrf.mxu1  ;;  %11376 = vmatmul.mubr.msk.f32.gmra.mxu1 %vm363_vm1, %v14418_v56  ;;  %v7723_v56 = vld [vmem:[#allocation2 + $0xe5] sm:$0xff] }
 0x3cf   : > { %v11115_v49 = vpop.f32.mrf.mxu0  ;;  %11432 = vmatmul.mubr.msk.f32.gmra.mxu0 %vm363_vm1, %v7720_v5  ;;  %11378 = vmatprep.mubr.msk.f32.mxu1 %vm363_vm1, %v14423_v11 }
 0x3d0   : > { %v14615_v10 = vadd.f32 %v11115_v49, %v11059_v42  ;;  %11434 = vmatprep.mubr.msk.f32.mxu0 %vm363_vm1, %v7721_v50  ;;  %v5174_v27 = vpop.f32.mrf.mxu1  ;;  %v7724_v49 = vld [vmem:[#allocation2 + $0xed] sm:$0xff] }
 0x3d1   : > { %v5530_v2 = vpop.f32.mrf.mxu0 }
 0x3d2   : > { %v14620_v51 = vadd.f32 %v5530_v2, %v5174_v27  ;;  %v11062_v24 = vpop.f32.mrf.mxu1  ;;  %11379 = vmatmul.mubr.msk.f32.gmra.mxu1 %vm363_vm1, %v14428_v40  ;;  %v7725_v40 = vld [vmem:[#allocation2 + $0xf5] sm:$0xff]  ;;  %v5371_v2 = vadd.f32 %v14440_v48, %v14438_v19  ;;  %v7727_v19 = vld [vmem:[#allocation2 + $0x105] sm:$0xff] }
 0x3d3   : > { %v11118_v26 = vpop.f32.mrf.mxu0  ;;  %11435 = vmatmul.mubr.msk.f32.gmra.mxu0 %vm363_vm1, %v7722_v21  ;;  %11381 = vmatprep.mubr.msk.f32.mxu1 %vm363_vm1, %v14433_v34 }
 0x3d4   : > { %v14625_v53 = vadd.f32 %v11118_v26, %v11062_v24  ;;  %11437 = vmatprep.mubr.msk.f32.mxu0 %vm363_vm1, %v7723_v56  ;;  %v5184_v11 = vpop.f32.mrf.mxu1 }
 0x3d5   : > { %v5540_v5 = vpop.f32.mrf.mxu0 }
 0x3d6   : > { %v14630_v42 = vadd.f32 %v5540_v5, %v5184_v11  ;;  %v11123_v50 = vpop.f32.mrf.mxu1  ;;  %11382 = vmatmul.mubr.msk.f32.gmra.mxu1 %vm363_vm1, %v14442_v13  ;;  %v7726_v11 = vld [vmem:[#allocation2 + $0xfd] sm:$0xff] }
 0x3d7   : > { %v11179_v27 = vpop.f32.mrf.mxu0  ;;  %11438 = vmatmul.mubr.msk.f32.gmra.mxu0 %vm363_vm1, %v7724_v49  ;;  %v5944_v34 = vadd.f32 %v11123_v50, %v14095_v36  ;;  %11384 = vmatprep.mubr.msk.f32.mxu1 %vm363_vm1, %v14447_v9 }
 0x3d8   : > { %11440 = vmatprep.mubr.msk.f32.mxu0 %vm363_vm1, %v7725_v40  ;;  %v5764_v21 = vpop.f32.mrf.mxu1  ;;  %v7728_v40 = vld [vmem:[#allocation2 + $0x10d] sm:$0xff] }
 0x3d9   : > { %v6194_v24 = vpop.f32.mrf.mxu0  ;;  %v14641_v26 = vadd.f32 %v11179_v27, %v5944_v34  ;;  %v5943_v56 = vadd.f32 %v5764_v21, %v5371_v2 }
 0x3da   : > { %v11126_v13 = vpop.f32.mrf.mxu1  ;;  %11385 = vmatmul.mubr.msk.f32.gmra.mxu1 %vm363_vm1, %v14456_v55 }
 0x3db   : > { %v11182_v5 = vpop.f32.mrf.mxu0  ;;  %11441 = vmatmul.mubr.msk.f32.gmra.mxu0 %vm363_vm1, %v7726_v11  ;;  %v14646_v36 = vadd.f32 %v6194_v24, %v5943_v56  ;;  %v5946_v48 = vadd.f32 %v11126_v13, %v14449_v47  ;;  %11387 = vmatprep.mubr.msk.f32.mxu1 %vm363_vm1, %v14461_v16  ;;  %v7729_v47 = vld [vmem:[#allocation2 + $0x115] sm:$0xff]  ;;  %v7730_v11 = vld [vmem:[#allocation2 + $0x11d] sm:$0xff] }
 0x3dc   : > { %11443 = vmatprep.mubr.msk.f32.mxu0 %vm363_vm1, %v7727_v19  ;;  %v5774_v9 = vpop.f32.mrf.mxu1 }
 0x3dd   : > { %v6204_v49 = vpop.f32.mrf.mxu0  ;;  %v14652_v50 = vadd.f32 %v11182_v5, %v5946_v48  ;;  %v5945_v27 = vadd.f32 %v5774_v9, %v14454_v46  ;;  %v7303_v48 = vld [vmem:[#allocation2 + $0x134] sm:$0xff] }
 0x3de   : > { %v11129_v55 = vpop.f32.mrf.mxu1  ;;  %11388 = vmatmul.mubr.msk.f32.gmra.mxu1 %vm363_vm1, %v14470_v54  ;;  %v7733_v9 = vld [vmem:[#allocation2 + $0x135] sm:$0xff] }
 0x3df   : > { %v11185_v2 = vpop.f32.mrf.mxu0  ;;  %11444 = vmatmul.mubr.msk.f32.gmra.mxu0 %vm363_vm1, %v7728_v40  ;;  %v14658_v34 = vadd.f32 %v6204_v49, %v5945_v27  ;;  %v5948_v16 = vadd.f32 %v11129_v55, %v14463_v6  ;;  %11390 = vmatprep.mubr.msk.f32.mxu1 %vm363_vm1, %v14475_v60  ;;  %v7731_v6 = vld [vmem:[#allocation2 + $0x125] sm:$0xff]  ;;  %v7732_v27 = vld [vmem:[#allocation2 + $0x12d] sm:$0xff] }
 0x3e0   : > { %11446 = vmatprep.mubr.msk.f32.mxu0 %vm363_vm1, %v7729_v47  ;;  %v5784_v21 = vpop.f32.mrf.mxu1  ;;  %v7734_v47 = vld [vmem:[#allocation2 + $0x13d] sm:$0xff] }
 0x3e1   : > { %v6214_v46 = vpop.f32.mrf.mxu0  ;;  %v14664_v24 = vadd.f32 %v11185_v2, %v5948_v16  ;;  %v5947_v56 = vadd.f32 %v5784_v21, %v14468_v44  ;;  %v7304_v2 = vld [vmem:[#allocation2 + $0x13c] sm:$0xff] }
 0x3e2   : > { %v11132_v54 = vpop.f32.mrf.mxu1  ;;  %11391 = vmatmul.mubr.msk.f32.gmra.mxu1 %vm363_vm1, %v14484_v58 }
 0x3e3   : > { %v11188_v13 = vpop.f32.mrf.mxu0  ;;  %11447 = vmatmul.mubr.msk.f32.gmra.mxu0 %vm363_vm1, %v7730_v11  ;;  %v14670_v5 = vadd.f32 %v6214_v46, %v5947_v56  ;;  %v5950_v60 = vadd.f32 %v11132_v54, %v14477_v32  ;;  %11393 = vmatprep.mubr.msk.f32.mxu1 %vm363_vm1, %v14489_v0  ;;  %v8129_v11 = vld [vmem:[#allocation2 + $0x26] sm:$0xff] }
 0x3e4   : > { %11449 = vmatprep.mubr.msk.f32.mxu0 %vm363_vm1, %v7731_v6  ;;  %v5794_v19 = vpop.f32.mrf.mxu1 }
 0x3e5   : > { %v6224_v44 = vpop.f32.mrf.mxu0  ;;  %v14676_v49 = vadd.f32 %v11188_v13, %v5950_v60  ;;  %v5949_v58 = vadd.f32 %v5794_v19, %v14482_v15 }
 0x3e6   : > { %v11135_v40 = vpop.f32.mrf.mxu1  ;;  %11394 = vmatmul.mubr.msk.f32.gmra.mxu1 %vm363_vm1, %v14498_v28 }
 0x3e7   : > { %v11191_v55 = vpop.f32.mrf.mxu0  ;;  %11450 = vmatmul.mubr.msk.f32.gmra.mxu0 %vm363_vm1, %v7732_v27  ;;  %v14682_v32 = vadd.f32 %v6224_v44, %v5949_v58  ;;  %v5952_v0 = vadd.f32 %v11135_v40, %v14491_v31  ;;  %11396 = vmatprep.mubr.msk.f32.mxu1 %vm363_vm1, %v7303_v48 }
 0x3e8   : > { %11452 = vmatprep.mubr.msk.f32.mxu0 %vm363_vm1, %v7733_v9  ;;  %v5804_v16 = vpop.f32.mrf.mxu1  ;;  %v8131_v9 = vld [vmem:[#allocation2 + $0x36] sm:$0xff] }
 0x3e9   : > { %v6234_v15 = vpop.f32.mrf.mxu0  ;;  %v14687_v21 = vadd.f32 %v11191_v55, %v5952_v0  ;;  %v5951_v46 = vadd.f32 %v5804_v16, %v14496_v30  ;;  %v8130_v30 = vld [vmem:[#allocation2 + $0x2e] sm:$0xff]  ;;  %v8133_v16 = vld [vmem:[#allocation2 + $0x46] sm:$0xff] }
 0x3ea   : > { %v11138_v56 = vpop.f32.mrf.mxu1  ;;  %11397 = vmatmul.mubr.msk.f32.gmra.mxu1 %vm363_vm1, %v7304_v2  ;;  %v8132_v2 = vld [vmem:[#allocation2 + $0x3e] sm:$0xff] }
 0x3eb   : > { %v11194_v28 = vpop.f32.mrf.mxu0  ;;  %11453 = vmatmul.mubr.msk.f32.gmra.mxu0 %vm363_vm1, %v7734_v47  ;;  %v14692_v31 = vadd.f32 %v6234_v15, %v5951_v46  ;;  %v5954_v54 = vadd.f32 %v11138_v56, %v14503_v20  ;;  %11457 = vmatprep.mubr.msk.f32.mxu1 %vm363_vm1, %v8129_v11 }
 0x3ec   : > { %v5814_v13 = vpop.f32.mrf.mxu1 }
 0x3ed   : > { %v6244_v6 = vpop.f32.mrf.mxu0  ;;  %v14696_v60 = vadd.f32 %v11194_v28, %v5954_v54  ;;  %v5953_v19 = vadd.f32 %v5814_v13, %v14508_v22  ;;  %v8134_v54 = vld [vmem:[#allocation2 + $0x4e] sm:$0xff] }
 0x3ee   : > { %v11141_v44 = vpop.f32.mrf.mxu1  ;;  %11458 = vmatmul.mubr.msk.f32.vlgmr.msra.gmra.mxu1 %vm363_vm1, %v8130_v30 }
 0x3ef   : > { %v11197_v48 = vpop.f32.mrf.mxu0  ;;  %v14700_v58 = vadd.f32 %v6244_v6, %v5953_v19  ;;  %v5956_v27 = vadd.f32 %v11141_v44, %v14513_v12  ;;  %11460 = vmatprep.mubr.msk.f32.mxu1 %vm363_vm1, %v8131_v9  ;;  %v8135_v6 = vld [vmem:[#allocation2 + $0x56] sm:$0xff] }
 0x3f0   : > { %v5824_v20 = vpop.f32.mrf.mxu1 }
 0x3f1   : > { %v6254_v40 = vpop.f32.mrf.mxu0  ;;  %v14704_v55 = vadd.f32 %v11197_v48, %v5956_v27  ;;  %v5955_v0 = vadd.f32 %v5824_v20, %v14520_v38  ;;  %v8136_v27 = vld [vmem:[#allocation2 + $0x5e] sm:$0xff] }
 0x3f2   : > { %v11144_v22 = vpop.f32.mrf.mxu1  ;;  %11461 = vmatmul.mubr.msk.f32.gmra.mxu1 %vm363_vm1, %v8132_v2 }
 0x3f3   : > { %v11200_v47 = vpop.f32.mrf.mxu0  ;;  %v14708_v15 = vadd.f32 %v6254_v40, %v5955_v0  ;;  %v5958_v46 = vadd.f32 %v11144_v22, %v14525_v18  ;;  %11463 = vmatprep.mubr.msk.f32.mxu1 %vm363_vm1, %v8133_v16  ;;  %v8137_v40 = vld [vmem:[#allocation2 + $0x66] sm:$0xff] }
 0x3f4   : > { %v5834_v12 = vpop.f32.mrf.mxu1 }
 0x3f5   : > { %v6264_v56 = vpop.f32.mrf.mxu0  ;;  %v14712_v28 = vadd.f32 %v11200_v47, %v5958_v46  ;;  %v5957_v11 = vadd.f32 %v5834_v12, %v14530_v45  ;;  %v8138_v46 = vld [vmem:[#allocation2 + $0x6e] sm:$0xff] }
 0x3f6   : > { %v11147_v38 = vpop.f32.mrf.mxu1  ;;  %11464 = vmatmul.mubr.msk.f32.gmra.mxu1 %vm363_vm1, %v8134_v54 }
 0x3f7   : > { %v11203_v13 = vpop.f32.mrf.mxu0  ;;  %v14716_v19 = vadd.f32 %v6264_v56, %v5957_v11  ;;  %v5960_v30 = vadd.f32 %v11147_v38, %v14535_v41  ;;  %11466 = vmatprep.mubr.msk.f32.mxu1 %vm363_vm1, %v8135_v6  ;;  %v8139_v56 = vld [vmem:[#allocation2 + $0x76] sm:$0xff] }
 0x3f8   : > { %v5844_v18 = vpop.f32.mrf.mxu1 }
 0x3f9   : > { %v6274_v44 = vpop.f32.mrf.mxu0  ;;  %v14720_v48 = vadd.f32 %v11203_v13, %v5960_v30  ;;  %v5959_v9 = vadd.f32 %v5844_v18, %v14540_v17  ;;  %v8140_v30 = vld [vmem:[#allocation2 + $0x7e] sm:$0xff] }
 0x3fa   : > { %v11150_v45 = vpop.f32.mrf.mxu1  ;;  %11467 = vmatmul.mubr.msk.f32.gmra.mxu1 %vm363_vm1, %v8136_v27 }
 0x3fb   : > { %v11206_v20 = vpop.f32.mrf.mxu0  ;;  %v14724_v0 = vadd.f32 %v6274_v44, %v5959_v9  ;;  %v5962_v2 = vadd.f32 %v11150_v45, %v14545_v25  ;;  %11469 = vmatprep.mubr.msk.f32.mxu1 %vm363_vm1, %v8137_v40  ;;  %v8141_v44 = vld [vmem:[#allocation2 + $0x86] sm:$0xff] }
 0x3fc   : > { %v5854_v41 = vpop.f32.mrf.mxu1 }
 0x3fd   : > { %v6284_v22 = vpop.f32.mrf.mxu0  ;;  %v14728_v47 = vadd.f32 %v11206_v20, %v5962_v2  ;;  %v5961_v16 = vadd.f32 %v5854_v41, %v14550_v33  ;;  %v8142_v2 = vld [vmem:[#allocation2 + $0x8e] sm:$0xff] }
 0x3fe   : > { %v11153_v17 = vpop.f32.mrf.mxu1  ;;  %11470 = vmatmul.mubr.msk.f32.gmra.mxu1 %vm363_vm1, %v8138_v46 }
 0x3ff   : > { %v11209_v12 = vpop.f32.mrf.mxu0  ;;  %v14732_v11 = vadd.f32 %v6284_v22, %v5961_v16  ;;  %v5964_v54 = vadd.f32 %v11153_v17, %v14555_v3  ;;  %11472 = vmatprep.mubr.msk.f32.mxu1 %vm363_vm1, %v8139_v56  ;;  %v8143_v22 = vld [vmem:[#allocation2 + $0x96] sm:$0xff] }
 0x400   : > { %v5864_v25 = vpop.f32.mrf.mxu1 }
 0x401   : > { %v6294_v38 = vpop.f32.mrf.mxu0  ;;  %v14736_v13 = vadd.f32 %v11209_v12, %v5964_v54  ;;  %v5963_v6 = vadd.f32 %v5864_v25, %v14560_v43  ;;  %v8144_v54 = vld [vmem:[#allocation2 + $0x9e] sm:$0xff] }
 0x402   : > { %v11156_v33 = vpop.f32.mrf.mxu1  ;;  %11473 = vmatmul.mubr.msk.f32.gmra.mxu1 %vm363_vm1, %v8140_v30 }
 0x403   : > { %v11212_v18 = vpop.f32.mrf.mxu0  ;;  %v14740_v9 = vadd.f32 %v6294_v38, %v5963_v6  ;;  %v5966_v27 = vadd.f32 %v11156_v33, %v14565_v52  ;;  %11475 = vmatprep.mubr.msk.f32.mxu1 %vm363_vm1, %v8141_v44  ;;  %v8145_v38 = vld [vmem:[#allocation2 + $0xa6] sm:$0xff] }
 0x404   : > { %v5874_v3 = vpop.f32.mrf.mxu1 }
 0x405   : > { %v6304_v45 = vpop.f32.mrf.mxu0  ;;  %v14744_v20 = vadd.f32 %v11212_v18, %v5966_v27  ;;  %v5965_v40 = vadd.f32 %v5874_v3, %v14570_v8  ;;  %v8146_v27 = vld [vmem:[#allocation2 + $0xae] sm:$0xff] }
 0x406   : > { %v11159_v43 = vpop.f32.mrf.mxu1  ;;  %11476 = vmatmul.mubr.msk.f32.gmra.mxu1 %vm363_vm1, %v8142_v2 }
 0x407   : > { %v11215_v41 = vpop.f32.mrf.mxu0  ;;  %v14748_v16 = vadd.f32 %v6304_v45, %v5965_v40  ;;  %v5968_v46 = vadd.f32 %v11159_v43, %v14575_v4  ;;  %11478 = vmatprep.mubr.msk.f32.mxu1 %vm363_vm1, %v8143_v22  ;;  %v8147_v45 = vld [vmem:[#allocation2 + $0xb6] sm:$0xff] }
 0x408   : > { %v5884_v52 = vpop.f32.mrf.mxu1 }
 0x409   : > { %v6314_v17 = vpop.f32.mrf.mxu0  ;;  %v14752_v12 = vadd.f32 %v11215_v41, %v5968_v46  ;;  %v5967_v56 = vadd.f32 %v5884_v52, %v14580_v14  ;;  %v8148_v46 = vld [vmem:[#allocation2 + $0xbe] sm:$0xff] }
 0x40a   : > { %v11162_v8 = vpop.f32.mrf.mxu1  ;;  %11479 = vmatmul.mubr.msk.f32.gmra.mxu1 %vm363_vm1, %v8144_v54 }
 0x40b   : > { %v11218_v25 = vpop.f32.mrf.mxu0  ;;  %v14756_v6 = vadd.f32 %v6314_v17, %v5967_v56  ;;  %v5970_v30 = vadd.f32 %v11162_v8, %v14585_v63  ;;  %11481 = vmatprep.mubr.msk.f32.mxu1 %vm363_vm1, %v8145_v38  ;;  %v8149_v17 = vld [vmem:[#allocation2 + $0xc6] sm:$0xff] }
 0x40c   : > { %v5894_v4 = vpop.f32.mrf.mxu1 }
 0x40d   : > { %v6324_v33 = vpop.f32.mrf.mxu0  ;;  %v14760_v18 = vadd.f32 %v11218_v25, %v5970_v30  ;;  %v5969_v44 = vadd.f32 %v5894_v4, %v14590_v57  ;;  %v8150_v30 = vld [vmem:[#allocation2 + $0xce] sm:$0xff] }
 0x40e   : > { %v11165_v14 = vpop.f32.mrf.mxu1  ;;  %11482 = vmatmul.mubr.msk.f32.gmra.mxu1 %vm363_vm1, %v8146_v27 }
 0x40f   : > { %v11221_v3 = vpop.f32.mrf.mxu0  ;;  %v14764_v40 = vadd.f32 %v6324_v33, %v5969_v44  ;;  %v5972_v2 = vadd.f32 %v11165_v14, %v14595_v29  ;;  %11484 = vmatprep.mubr.msk.f32.mxu1 %vm363_vm1, %v8147_v45  ;;  %v8151_v33 = vld [vmem:[#allocation2 + $0xd6] sm:$0xff] }
 0x410   : > { %v5904_v63 = vpop.f32.mrf.mxu1 }
 0x411   : > { %v6334_v43 = vpop.f32.mrf.mxu0  ;;  %v14768_v41 = vadd.f32 %v11221_v3, %v5972_v2  ;;  %v5971_v22 = vadd.f32 %v5904_v63, %v14600_v59  ;;  %v8152_v2 = vld [vmem:[#allocation2 + $0xde] sm:$0xff] }
 0x412   : > { %v11168_v57 = vpop.f32.mrf.mxu1  ;;  %11485 = vmatmul.mubr.msk.f32.gmra.mxu1 %vm363_vm1, %v8148_v46 }
 0x413   : > { %v11224_v52 = vpop.f32.mrf.mxu0  ;;  %v14772_v56 = vadd.f32 %v6334_v43, %v5971_v22  ;;  %v5974_v54 = vadd.f32 %v11168_v57, %v14605_v7  ;;  %11487 = vmatprep.mubr.msk.f32.mxu1 %vm363_vm1, %v8149_v17  ;;  %v8153_v43 = vld [vmem:[#allocation2 + $0xe6] sm:$0xff] }
 0x414   : > { %v5914_v29 = vpop.f32.mrf.mxu1 }
 0x415   : > { %v6344_v8 = vpop.f32.mrf.mxu0  ;;  %v14776_v25 = vadd.f32 %v11224_v52, %v5974_v54  ;;  %v5973_v38 = vadd.f32 %v5914_v29, %v14610_v35  ;;  %v8154_v54 = vld [vmem:[#allocation2 + $0xee] sm:$0xff] }
 0x416   : > { %v11171_v59 = vpop.f32.mrf.mxu1  ;;  %11488 = vmatmul.mubr.msk.f32.gmra.mxu1 %vm363_vm1, %v8150_v30 }
 0x417   : > { %v11227_v4 = vpop.f32.mrf.mxu0  ;;  %v14780_v44 = vadd.f32 %v6344_v8, %v5973_v38  ;;  %v5976_v27 = vadd.f32 %v11171_v59, %v14615_v10  ;;  %11490 = vmatprep.mubr.msk.f32.mxu1 %vm363_vm1, %v8151_v33  ;;  %v8155_v8 = vld [vmem:[#allocation2 + $0xf6] sm:$0xff] }
 0x418   : > { %v5924_v7 = vpop.f32.mrf.mxu1 }
 0x419   : > { %v6354_v14 = vpop.f32.mrf.mxu0  ;;  %v14784_v3 = vadd.f32 %v11227_v4, %v5976_v27  ;;  %v5975_v45 = vadd.f32 %v5924_v7, %v14620_v51  ;;  %v8156_v27 = vld [vmem:[#allocation2 + $0xfe] sm:$0xff] }
 0x41a   : > { %v11174_v35 = vpop.f32.mrf.mxu1  ;;  %11491 = vmatmul.mubr.msk.f32.gmra.mxu1 %vm363_vm1, %v8152_v2 }
 0x41b   : > { %v11230_v63 = vpop.f32.mrf.mxu0  ;;  %v14788_v22 = vadd.f32 %v6354_v14, %v5975_v45  ;;  %v5978_v46 = vadd.f32 %v11174_v35, %v14625_v53  ;;  %11493 = vmatprep.mubr.msk.f32.mxu1 %vm363_vm1, %v8153_v43  ;;  %v8157_v14 = vld [vmem:[#allocation2 + $0x106] sm:$0xff] }
 0x41c   : > { %v5934_v10 = vpop.f32.mrf.mxu1 }
 0x41d   : > { %v6364_v57 = vpop.f32.mrf.mxu0  ;;  %v14792_v52 = vadd.f32 %v11230_v63, %v5978_v46  ;;  %v5977_v17 = vadd.f32 %v5934_v10, %v14630_v42  ;;  %v8158_v46 = vld [vmem:[#allocation2 + $0x10e] sm:$0xff] }
 0x41e   : > { %v11235_v51 = vpop.f32.mrf.mxu1  ;;  %11494 = vmatmul.mubr.msk.f32.gmra.mxu1 %vm363_vm1, %v8154_v54 }
 0x41f   : > { %v11291_v29 = vpop.f32.mrf.mxu0  ;;  %v14796_v38 = vadd.f32 %v6364_v57, %v5977_v17  ;;  %v6804_v30 = vadd.f32 %v11235_v51, %v14641_v26  ;;  %11496 = vmatprep.mubr.msk.f32.mxu1 %vm363_vm1, %v8155_v8  ;;  %v8159_v57 = vld [vmem:[#allocation2 + $0x116] sm:$0xff] }
 0x420   : > { %v6624_v53 = vpop.f32.mrf.mxu1 }
 0x421   : > { %v7054_v59 = vpop.f32.mrf.mxu0  ;;  %v14800_v4 = vadd.f32 %v11291_v29, %v6804_v30  ;;  %v6803_v33 = vadd.f32 %v6624_v53, %v14646_v36  ;;  %v8160_v30 = vld [vmem:[#allocation2 + $0x11e] sm:$0xff] }
 0x422   : > { %v11238_v42 = vpop.f32.mrf.mxu1  ;;  %11497 = vmatmul.mubr.msk.f32.gmra.mxu1 %vm363_vm1, %v8156_v27 }
 0x423   : > { %v11294_v7 = vpop.f32.mrf.mxu0  ;;  %v14804_v45 = vadd.f32 %v7054_v59, %v6803_v33  ;;  %v6806_v2 = vadd.f32 %v11238_v42, %v14652_v50  ;;  %11499 = vmatprep.mubr.msk.f32.mxu1 %vm363_vm1, %v8157_v14  ;;  %v8161_v59 = vld [vmem:[#allocation2 + $0x126] sm:$0xff] }
 0x424   : > { %v6634_v26 = vpop.f32.mrf.mxu1 }
 0x425   : > { %v7064_v35 = vpop.f32.mrf.mxu0  ;;  %v14808_v63 = vadd.f32 %v11294_v7, %v6806_v2  ;;  %v6805_v43 = vadd.f32 %v6634_v26, %v14658_v34  ;;  %v8163_v7 = vld [vmem:[#allocation2 + $0x136] sm:$0xff] }
 0x426   : > { %v11241_v36 = vpop.f32.mrf.mxu1  ;;  %11500 = vmatmul.mubr.msk.f32.gmra.mxu1 %vm363_vm1, %v8158_v46 }
 0x427   : > { %v11297_v10 = vpop.f32.mrf.mxu0  ;;  %v14812_v17 = vadd.f32 %v7064_v35, %v6805_v43  ;;  %v6808_v54 = vadd.f32 %v11241_v36, %v14664_v24  ;;  %11502 = vmatprep.mubr.msk.f32.mxu1 %vm363_vm1, %v8159_v57 }
 0x428   : > { %v6644_v50 = vpop.f32.mrf.mxu1 }
 0x429   : > { %v7074_v51 = vpop.f32.mrf.mxu0  ;;  %v14816_v29 = vadd.f32 %v11297_v10, %v6808_v54  ;;  %v6807_v8 = vadd.f32 %v6644_v50, %v14670_v5  ;;  %v8162_v5 = vld [vmem:[#allocation2 + $0x12e] sm:$0xff] }
 0x42a   : > { %v11244_v34 = vpop.f32.mrf.mxu1  ;;  %11503 = vmatmul.mubr.msk.f32.gmra.mxu1 %vm363_vm1, %v8160_v30 }
 0x42b   : > { %v11300_v53 = vpop.f32.mrf.mxu0  ;;  %v14820_v33 = vadd.f32 %v7074_v51, %v6807_v8  ;;  %v6810_v27 = vadd.f32 %v11244_v34, %v14676_v49  ;;  %11505 = vmatprep.mubr.msk.f32.mxu1 %vm363_vm1, %v8161_v59  ;;  %v8164_v49 = vld [vmem:[#allocation2 + $0x13e] sm:$0xff] }
 0x42c   : > { %v6654_v24 = vpop.f32.mrf.mxu1 }
 0x42d   : > { %v7084_v42 = vpop.f32.mrf.mxu0  ;;  %v14824_v14 = vadd.f32 %v11300_v53, %v6810_v27  ;;  %v6809_v2 = vadd.f32 %v6654_v24, %v14682_v32 }
 0x42e   : > { %v11247_v26 = vpop.f32.mrf.mxu1  ;;  %11506 = vmatmul.mubr.msk.f32.gmra.mxu1 %vm363_vm1, %v8162_v5 }
 0x42f   : > { %v11303_v35 = vpop.f32.mrf.mxu0  ;;  %v14828_v43 = vadd.f32 %v7084_v42, %v6809_v2  ;;  %v6812_v46 = vadd.f32 %v11247_v26, %v14687_v21  ;;  %11508 = vmatprep.mubr.msk.f32.mxu1 %vm363_vm1, %v8163_v7 }
 0x430   : > { %v6664_v36 = vpop.f32.mrf.mxu1 }
 0x431   : > { %v7094_v10 = vpop.f32.mrf.mxu0  ;;  %v14832_v57 = vadd.f32 %v11303_v35, %v6812_v46  ;;  %v6811_v54 = vadd.f32 %v6664_v36, %v14692_v31 }
 0x432   : > { %v11250_v50 = vpop.f32.mrf.mxu1  ;;  %11509 = vmatmul.mubr.msk.f32.gmra.mxu1 %vm363_vm1, %v8164_v49 }
 0x433   : > { %v11306_v32 = vpop.f32.mrf.mxu0  ;;  %v14836_v51 = vadd.f32 %v7094_v10, %v6811_v54  ;;  %v6814_v8 = vadd.f32 %v11250_v50, %v14696_v60 }
 0x434   : > { %v6674_v30 = vpop.f32.mrf.mxu1 }
 0x435   : > { %v7104_v34 = vpop.f32.mrf.mxu0  ;;  %v14839_v21 = vadd.f32 %v11306_v32, %v6814_v8  ;;  %v6813_v53 = vadd.f32 %v6674_v30, %v14700_v58 }
 0x436   : > { %v11253_v59 = vpop.f32.mrf.mxu1 }
 0x437   : > { %v11309_v27 = vpop.f32.mrf.mxu0  ;;  %v14842_v24 = vadd.f32 %v7104_v34, %v6813_v53  ;;  %v6816_v31 = vadd.f32 %v11253_v59, %v14704_v55 }
 0x438   : > { %v6684_v42 = vpop.f32.mrf.mxu1 }
 0x439   : > { %v7114_v7 = vpop.f32.mrf.mxu0  ;;  %v14845_v2 = vadd.f32 %v11309_v27, %v6816_v31  ;;  %v6815_v5 = vadd.f32 %v6684_v42, %v14708_v15 }
 0x43a   : > { %v11256_v26 = vpop.f32.mrf.mxu1 }
 0x43b   : > { %v11312_v60 = vpop.f32.mrf.mxu0  ;;  %v14848_v35 = vadd.f32 %v7114_v7, %v6815_v5  ;;  %v6818_v46 = vadd.f32 %v11256_v26, %v14712_v28 }
 0x43c   : > { %v6694_v49 = vpop.f32.mrf.mxu1 }
 0x43d   : > { %v7124_v58 = vpop.f32.mrf.mxu0  ;;  %v14851_v36 = vadd.f32 %v11312_v60, %v6818_v46  ;;  %v6817_v10 = vadd.f32 %v6694_v49, %v14716_v19 }
 0x43e   : > { %v11259_v54 = vpop.f32.mrf.mxu1 }
 0x43f   : > { %v11315_v55 = vpop.f32.mrf.mxu0  ;;  %v14854_v50 = vadd.f32 %v7124_v58, %v6817_v10  ;;  %v6820_v32 = vadd.f32 %v11259_v54, %v14720_v48 }
 0x440   : > { %v6704_v8 = vpop.f32.mrf.mxu1 }
 0x441   : > { %v7134_v15 = vpop.f32.mrf.mxu0  ;;  %v14857_v30 = vadd.f32 %v11315_v55, %v6820_v32  ;;  %v6819_v34 = vadd.f32 %v6704_v8, %v14724_v0 }
 0x442   : > { %v11262_v53 = vpop.f32.mrf.mxu1 }
 0x443   : > { %v11318_v28 = vpop.f32.mrf.mxu0  ;;  %v14860_v59 = vadd.f32 %v7134_v15, %v6819_v34  ;;  %v6822_v27 = vadd.f32 %v11262_v53, %v14728_v47 }
 0x444   : > { %v6714_v31 = vpop.f32.mrf.mxu1 }
 0x445   : > { %v7144_v19 = vpop.f32.mrf.mxu0  ;;  %v14863_v42 = vadd.f32 %v11318_v28, %v6822_v27  ;;  %v6821_v7 = vadd.f32 %v6714_v31, %v14732_v11 }
 0x446   : > { %v11265_v5 = vpop.f32.mrf.mxu1 }
 0x447   : > { %v11321_v48 = vpop.f32.mrf.mxu0  ;;  %v14866_v26 = vadd.f32 %v7144_v19, %v6821_v7  ;;  %v6824_v60 = vadd.f32 %v11265_v5, %v14736_v13 }
 0x448   : > { %v6724_v46 = vpop.f32.mrf.mxu1 }
 0x449   : > { %v7154_v0 = vpop.f32.mrf.mxu0  ;;  %v14869_v49 = vadd.f32 %v11321_v48, %v6824_v60  ;;  %v6823_v58 = vadd.f32 %v6724_v46, %v14740_v9 }
 0x44a   : > { %v11268_v10 = vpop.f32.mrf.mxu1 }
 0x44b   : > { %v11324_v47 = vpop.f32.mrf.mxu0  ;;  %v14872_v54 = vadd.f32 %v7154_v0, %v6823_v58  ;;  %v6826_v55 = vadd.f32 %v11268_v10, %v14744_v20 }
 0x44c   : > { %v6734_v32 = vpop.f32.mrf.mxu1 }
 0x44d   : > { %v7164_v11 = vpop.f32.mrf.mxu0  ;;  %v14875_v8 = vadd.f32 %v11324_v47, %v6826_v55  ;;  %v6825_v15 = vadd.f32 %v6734_v32, %v14748_v16 }
 0x44e   : > { %v11271_v34 = vpop.f32.mrf.mxu1 }
 0x44f   : > { %v11327_v13 = vpop.f32.mrf.mxu0  ;;  %v14878_v53 = vadd.f32 %v7164_v11, %v6825_v15  ;;  %v6828_v28 = vadd.f32 %v11271_v34, %v14752_v12 }
 0x450   : > { %v6744_v27 = vpop.f32.mrf.mxu1 }
 0x451   : > { %v7174_v9 = vpop.f32.mrf.mxu0  ;;  %v14881_v31 = vadd.f32 %v11327_v13, %v6828_v28  ;;  %v6827_v19 = vadd.f32 %v6744_v27, %v14756_v6 }
 0x452   : > { %v11274_v7 = vpop.f32.mrf.mxu1 }
 0x453   : > { %v11330_v20 = vpop.f32.mrf.mxu0  ;;  %v14884_v5 = vadd.f32 %v7174_v9, %v6827_v19  ;;  %v6830_v48 = vadd.f32 %v11274_v7, %v14760_v18 }
 0x454   : > { %v6754_v60 = vpop.f32.mrf.mxu1 }
 0x455   : > { %v7184_v16 = vpop.f32.mrf.mxu0  ;;  %v14887_v46 = vadd.f32 %v11330_v20, %v6830_v48  ;;  %v6829_v0 = vadd.f32 %v6754_v60, %v14764_v40 }
 0x456   : > { %v11277_v58 = vpop.f32.mrf.mxu1 }
 0x457   : > { %v11333_v12 = vpop.f32.mrf.mxu0  ;;  %v14890_v10 = vadd.f32 %v7184_v16, %v6829_v0  ;;  %v6832_v47 = vadd.f32 %v11277_v58, %v14768_v41 }
 0x458   : > { %v6764_v55 = vpop.f32.mrf.mxu1 }
 0x459   : > { %v7194_v6 = vpop.f32.mrf.mxu0  ;;  %v14893_v32 = vadd.f32 %v11333_v12, %v6832_v47  ;;  %v6831_v11 = vadd.f32 %v6764_v55, %v14772_v56 }
 0x45a   : > { %v11280_v15 = vpop.f32.mrf.mxu1 }
 0x45b   : > { %v11336_v18 = vpop.f32.mrf.mxu0  ;;  %v14896_v34 = vadd.f32 %v7194_v6, %v6831_v11  ;;  %v6834_v13 = vadd.f32 %v11280_v15, %v14776_v25 }
 0x45c   : > { %v6774_v28 = vpop.f32.mrf.mxu1 }
 0x45d   : > { %v7204_v40 = vpop.f32.mrf.mxu0  ;;  %v14899_v27 = vadd.f32 %v11336_v18, %v6834_v13  ;;  %v6833_v9 = vadd.f32 %v6774_v28, %v14780_v44 }
 0x45e   : > { %v11283_v19 = vpop.f32.mrf.mxu1 }
 0x45f   : > { %v11339_v41 = vpop.f32.mrf.mxu0  ;;  %v14902_v7 = vadd.f32 %v7204_v40, %v6833_v9  ;;  %v6836_v20 = vadd.f32 %v11283_v19, %v14784_v3 }
 0x460   : > { %v6784_v48 = vpop.f32.mrf.mxu1 }
 0x461   : > { %v7214_v56 = vpop.f32.mrf.mxu0  ;;  %v14905_v60 = vadd.f32 %v11339_v41, %v6836_v20  ;;  %v6835_v16 = vadd.f32 %v6784_v48, %v14788_v22 }
 0x462   : > { %v11286_v0 = vpop.f32.mrf.mxu1 }
 0x463   : > { %v11342_v25 = vpop.f32.mrf.mxu0  ;;  %v14908_v58 = vadd.f32 %v7214_v56, %v6835_v16  ;;  %v6838_v12 = vadd.f32 %v11286_v0, %v14792_v52 }
 0x464   : > { %v6794_v47 = vpop.f32.mrf.mxu1 }
 0x465   : > { %v7224_v44 = vpop.f32.mrf.mxu0  ;;  %v14911_v55 = vadd.f32 %v11342_v25, %v6838_v12  ;;  %v6837_v6 = vadd.f32 %v6794_v47, %v14796_v38 }
 0x466   : > { %v11347_v11 = vpop.f32.mrf.mxu1 }
 0x467   : > { %v14914_v3 = vpop.f32.mrf.mxu0  ;;  %v14916_v15 = vadd.f32 %v7224_v44, %v6837_v6  ;;  %v14919_v18 = vadd.f32 %v11347_v11, %v14800_v4 }
 0x468   : > { %v7484_v22 = vpop.f32.mrf.mxu1 }
 0x469   : > { %v14922_v13 = vadd.f32 %v7484_v22, %v14804_v45  ;;  %v14924_v28 = vpop.f32.mrf.mxu0 }
 0x46a   : > { %v11350_v52 = vpop.f32.mrf.mxu1 }
 0x46b   : > { %v14927_v40 = vadd.f32 %v11350_v52, %v14808_v63  ;;  %v14932_v19 = vpop.f32.mrf.mxu0 }
 0x46c   : > { %v7494_v9 = vpop.f32.mrf.mxu1 }
 0x46d   : > { %v14930_v38 = vadd.f32 %v7494_v9, %v14812_v17  ;;  %v14940_v48 = vpop.f32.mrf.mxu0 }
 0x46e   : > { %v11353_v41 = vpop.f32.mrf.mxu1 }
 0x46f   : > { %v14935_v4 = vadd.f32 %v11353_v41, %v14816_v29  ;;  %v14948_v0 = vpop.f32.mrf.mxu0 }
 0x470   : > { %v7504_v20 = vpop.f32.mrf.mxu1 }
 0x471   : > { %v14938_v45 = vadd.f32 %v7504_v20, %v14820_v33  ;;  %v14956_v47 = vpop.f32.mrf.mxu0 }
 0x472   : > { %v11356_v56 = vpop.f32.mrf.mxu1 }
 0x473   : > { %v14943_v63 = vadd.f32 %v11356_v56, %v14824_v14  ;;  %v14964_v11 = vpop.f32.mrf.mxu0 }
 0x474   : > { %v7514_v16 = vpop.f32.mrf.mxu1 }
 0x475   : > { %v14946_v17 = vadd.f32 %v7514_v16, %v14828_v43  ;;  %v14972_v9 = vpop.f32.mrf.mxu0 }
 0x476   : > { %v11359_v25 = vpop.f32.mrf.mxu1 }
 0x477   : > { %v14951_v29 = vadd.f32 %v11359_v25, %v14832_v57  ;;  %v14980_v56 = vpop.f32.mrf.mxu0 }
 0x478   : > { %v7524_v12 = vpop.f32.mrf.mxu1 }
 0x479   : > { %v14954_v33 = vadd.f32 %v7524_v12, %v14836_v51  ;;  %v14988_v12 = vpop.f32.mrf.mxu0 }
 0x47a   : > { %v11362_v44 = vpop.f32.mrf.mxu1 }
 0x47b   : > { %v14959_v14 = vadd.f32 %v11362_v44, %v14839_v21 }
 0x47c   : > { %v7534_v6 = vpop.f32.mrf.mxu1 }
 0x47d   : > { %v14962_v43 = vadd.f32 %v7534_v6, %v14842_v24 }
 0x47e   : > { %v11365_v22 = vpop.f32.mrf.mxu1 }
 0x47f   : > { %v14967_v57 = vadd.f32 %v11365_v22, %v14845_v2  ;;  %v14996_v22 = vpop.f32.mrf.mxu0 }
 0x480   : > { %v7544_v52 = vpop.f32.mrf.mxu1 }
 0x481   : > { %v14970_v51 = vadd.f32 %v7544_v52, %v14848_v35 }
 0x482   : > { %v11368_v41 = vpop.f32.mrf.mxu1 }
 0x483   : > { %v14975_v21 = vadd.f32 %v11368_v41, %v14851_v36 }
 0x484   : > { %v7554_v20 = vpop.f32.mrf.mxu1 }
 0x485   : > { %v14978_v24 = vadd.f32 %v7554_v20, %v14854_v50  ;;  %v15004_v20 = vpop.f32.mrf.mxu0 }
 0x486   : > { %v11371_v16 = vpop.f32.mrf.mxu1 }
 0x487   : > { %v14983_v2 = vadd.f32 %v11371_v16, %v14857_v30 }
 0x488   : > { %v7564_v25 = vpop.f32.mrf.mxu1 }
 0x489   : > { %v14986_v35 = vadd.f32 %v7564_v25, %v14860_v59 }
 0x48a   : > { %v11374_v44 = vpop.f32.mrf.mxu1 }
 0x48b   : > { %v14991_v36 = vadd.f32 %v11374_v44, %v14863_v42  ;;  %v15012_v44 = vpop.f32.mrf.mxu0 }
 0x48c   : > { %v7574_v6 = vpop.f32.mrf.mxu1 }
 0x48d   : > { %v14994_v50 = vadd.f32 %v7574_v6, %v14866_v26 }
 0x48e   : > { %v11377_v52 = vpop.f32.mrf.mxu1 }
 0x48f   : > { %v14999_v30 = vadd.f32 %v11377_v52, %v14869_v49 }
 0x490   : > { %v7584_v41 = vpop.f32.mrf.mxu1 }
 0x491   : > { %v15002_v59 = vadd.f32 %v7584_v41, %v14872_v54  ;;  %v15020_v41 = vpop.f32.mrf.mxu0 }
 0x492   : > { %v11380_v16 = vpop.f32.mrf.mxu1 }
 0x493   : > { %v15007_v42 = vadd.f32 %v11380_v16, %v14875_v8 }
 0x494   : > { %v7594_v25 = vpop.f32.mrf.mxu1 }
 0x495   : > { %v15010_v26 = vadd.f32 %v7594_v25, %v14878_v53  ;;  %v15028_v25 = vpop.f32.mrf.mxu0 }
 0x496   : > { %v11383_v6 = vpop.f32.mrf.mxu1 }
 0x497   : > { %v15015_v49 = vadd.f32 %v11383_v6, %v14881_v31 }
 0x498   : > { %v7604_v52 = vpop.f32.mrf.mxu1 }
 0x499   : > { %v15018_v54 = vadd.f32 %v7604_v52, %v14884_v5  ;;  %v15036_v52 = vpop.f32.mrf.mxu0 }
 0x49a   : > { %v11386_v1 = vpop.f32.mrf.mxu1 }
 0x49b   : > { %v15023_v8 = vadd.f32 %v11386_v1, %v14887_v46 }
 0x49c   : > { %v7614_v16 = vpop.f32.mrf.mxu1 }
 0x49d   : > { %v15026_v53 = vadd.f32 %v7614_v16, %v14890_v10  ;;  %v15044_v16 = vpop.f32.mrf.mxu0 }
 0x49e   : > { %v11389_v37 = vpop.f32.mrf.mxu1 }
 0x49f   : > { %v15031_v31 = vadd.f32 %v11389_v37, %v14893_v32 }
 0x4a0   : > { %v7624_v6 = vpop.f32.mrf.mxu1 }
 0x4a1   : > { %v15034_v5 = vadd.f32 %v7624_v6, %v14896_v34  ;;  %v15052_v6 = vpop.f32.mrf.mxu0 }
 0x4a2   : > { %v11392_v39 = vpop.f32.mrf.mxu1 }
 0x4a3   : > { %16289 = vst [vmem:[#allocation10_spill] sm:$0xff] %v15034_v5  ;;  %v15039_v1 = vadd.f32 %v11392_v39, %v14899_v27 }
 0x4a4   : > { %v7634_v46 = vpop.f32.mrf.mxu1 }
 0x4a5   : > { %v15042_v10 = vadd.f32 %v7634_v46, %v14902_v7  ;;  %v8094_v7 = vadd.f32 %v14914_v3, %v14919_v18 }
 0x4a6   : > { %v11395_v62 = vpop.f32.mrf.mxu1 }
 0x4a7   : > { %16290 = vst [vmem:[#allocation32_spill] sm:$0xff] %v15042_v10  ;;  %v15047_v37 = vadd.f32 %v11395_v62, %v14905_v60  ;;  %v15062_v10 = vpop.f32.mrf.mxu0  ;;  %v15067_v60 = vld [vmem:[%s15954_s5] ss:$0 sm:$0xff] }
 0x4a8   : > { %v7644_v32 = vpop.f32.mrf.mxu1 }
 0x4a9   : > { %v15050_v34 = vadd.f32 %v7644_v32, %v14908_v58  ;;  %v8093_v58 = vadd.f32 %v14924_v28, %v14922_v13  ;;  %v8096_v32 = vadd.f32 %v14932_v19, %v14927_v40  ;;  %v15076_v18 = vpop.f32.mrf.mxu0  ;;  %v8098_v13 = vadd.f32 %v14948_v0, %v14935_v4  ;;  %v16294_v19 = vld [vmem:[#allocation70_spill] sm:$0xff] }
 0x4aa   : > { %v11398_v5 = vpop.f32.mrf.mxu1 }
 0x4ab   : > { %16291 = vst [vmem:[#allocation78_spill] sm:$0xff] %v15050_v34  ;;  %v15055_v39 = vadd.f32 %v11398_v5, %v14911_v55 }
 0x4ac   : > { %v7654_v27 = vpop.f32.mrf.mxu1 }
 0x4ad   : > { %16292 = vst [vmem:[#allocation60_spill] sm:$0xff] %v15055_v39  ;;  %v15060_v46 = vadd.f32 %v7654_v27, %v14916_v15 }
 0x4ae   : > { %v11459_v62 = vpop.f32.mrf.mxu1 }
 0x4af   : > { %16293 = vst [vmem:[#allocation33_spill] sm:$0xff] %v15060_v46  ;;  %v8524_v55 = vadd.f32 %v11459_v62, %v8094_v7  ;;  %v8095_v46 = vadd.f32 %v14940_v48, %v14930_v38  ;;  %v8097_v48 = vadd.f32 %v14956_v47, %v14938_v45 }
 0x4b0   : > { %v8344_v5 = vpop.f32.mrf.mxu1 }
 0x4b1   : > { %v15074_v3 = vadd.f32 %v15067_v60, %v8524_v55  ;;  %v8523_v15 = vadd.f32 %v8344_v5, %v8093_v58  ;;  %v15092_v55 = vpop.f32.mrf.mxu0 }
 0x4b2   : > { %v11462_v27 = vpop.f32.mrf.mxu1 }
 0x4b3   : > { %v15081_v39 = vadd.f32 %v15067_v60, %v8523_v15  ;;  %v8526_v34 = vadd.f32 %v11462_v27, %v8096_v32  ;;  %v8603_v40 = vmul.f32 %v15074_v3, %v12994_v23  ;;  %v8100_v32 = vadd.f32 %v14964_v11, %v14943_v63  ;;  %v16295_v15 = vld [vmem:[#allocation76_spill] sm:$0xff] }
 0x4b4   : > { %v8354_v28 = vpop.f32.mrf.mxu1  ;;  %v8099_v63 = vadd.f32 %v14972_v9, %v14946_v17 }
 0x4b5   : > { %v8602_v7 = vmul.f32 %v15081_v39, %v16294_v19  ;;  %v15090_v62 = vadd.f32 %v15067_v60, %v8526_v34  ;;  %v8525_v58 = vadd.f32 %v8354_v28, %v8095_v46  ;;  %v8639_v46 = vsel %vm363_vm1, %v8603_v40, 0.0  ;;  %v16296_v28 = vld [vmem:[#allocation71_spill] sm:$0xff] }
 0x4b6   : > { %v11465_v38 = vpop.f32.mrf.mxu1 }
 0x4b7   : > { %v8638_v5 = vsel %vm363_vm1, %v8602_v7, 0.0  ;;  %v15098_v4 = vadd.f32 %v15067_v60, %v8525_v58  ;;  %v8528_v0 = vadd.f32 %v11465_v38, %v8098_v13  ;;  %v8605_v34 = vmul.f32 %v15090_v62, %v16295_v15  ;;  %v15110_v7 = vpop.f32.mrf.mxu0 }
 0x4b8   : > { %v8364_v27 = vpop.f32.mrf.mxu1  ;;  %v8640_v58 = vadd.f32 %v8639_v46, %v8638_v5  ;;  %v8102_v15 = vadd.f32 %v14980_v56, %v14951_v29  ;;  %v16298_v46 = vld [vmem:[#allocation83_spill] sm:$0xff]  ;;  %v8101_v29 = vadd.f32 %v14988_v12, %v14954_v33 }
 0x4b9   : > { %v8604_v23 = vmul.f32 %v15098_v4, %v16296_v28  ;;  %v15108_v45 = vadd.f32 %v15067_v60, %v8528_v0  ;;  %v8527_v47 = vadd.f32 %v8364_v27, %v8097_v48  ;;  %v8643_v0 = vsel %vm363_vm1, %v8605_v34, 0.0  ;;  %v16297_v27 = vld [vmem:[#allocation84_spill] sm:$0xff]  ;;  %v15128_v9 = vpop.f32.mrf.mxu0 }
 0x4ba   : > { %v11468_v13 = vpop.f32.mrf.mxu1 }
 0x4bb   : > { %v8641_v11 = vsel %vm363_vm1, %v8604_v23, 0.0  ;;  %v15116_v38 = vadd.f32 %v15067_v60, %v8527_v47  ;;  %v8530_v40 = vadd.f32 %v11468_v13, %v8100_v32  ;;  %v8607_v5 = vmul.f32 %v15108_v45, %v16297_v27 }
 0x4bc   : > { %v8642_v28 = vadd.f32 %v8641_v11, %v8640_v58  ;;  %v8374_v48 = vpop.f32.mrf.mxu1  ;;  %v8104_v13 = vadd.f32 %v14996_v22, %v14959_v14  ;;  %v8103_v14 = vadd.f32 %v15004_v20, %v14962_v43 }
 0x4bd   : > { %v8606_v19 = vmul.f32 %v15116_v38, %v16298_v46  ;;  %v15126_v17 = vadd.f32 %v15067_v60, %v8530_v40  ;;  %v8529_v23 = vadd.f32 %v8374_v48, %v8099_v63  ;;  %v16299_v40 = vld [vmem:[#allocation88_spill] sm:$0xff] }
 0x4be   : > { %v8644_v32 = vadd.f32 %v8643_v0, %v8642_v28  ;;  %v11471_v47 = vpop.f32.mrf.mxu1  ;;  %v8647_v28 = vsel %vm363_vm1, %v8607_v5, 0.0  ;;  %v16300_v0 = vld [vmem:[#allocation87_spill] sm:$0xff] }
 0x4bf   : > { %v8645_v56 = vsel %vm363_vm1, %v8606_v19, 0.0  ;;  %v15134_v34 = vadd.f32 %v15067_v60, %v8529_v23  ;;  %v8532_v58 = vadd.f32 %v11471_v47, %v8102_v15  ;;  %v8609_v63 = vmul.f32 %v15126_v17, %v16299_v40  ;;  %v15146_v19 = vpop.f32.mrf.mxu0 }
 0x4c0   : > { %v8646_v11 = vadd.f32 %v8645_v56, %v8644_v32  ;;  %v8384_v48 = vpop.f32.mrf.mxu1  ;;  %v8106_v47 = vadd.f32 %v15012_v44, %v14967_v57  ;;  %v8105_v57 = vadd.f32 %v15020_v41, %v14970_v51 }
 0x4c1   : > { %v8608_v27 = vmul.f32 %v15134_v34, %v16300_v0  ;;  %v15144_v33 = vadd.f32 %v15067_v60, %v8532_v58  ;;  %v8531_v12 = vadd.f32 %v8384_v48, %v8101_v29  ;;  %v8651_v56 = vsel %vm363_vm1, %v8609_v63, 0.0  ;;  %v16301_v48 = vld [vmem:[#allocation92_spill] sm:$0xff] }
 0x4c2   : > { %v8648_v15 = vadd.f32 %v8647_v28, %v8646_v11  ;;  %v11474_v23 = vpop.f32.mrf.mxu1  ;;  %v16302_v28 = vld [vmem:[#allocation91_spill] sm:$0xff] }
 0x4c3   : > { %v8649_v22 = vsel %vm363_vm1, %v8608_v27, 0.0  ;;  %v15152_v32 = vadd.f32 %v15067_v60, %v8531_v12  ;;  %v8534_v5 = vadd.f32 %v11474_v23, %v8104_v13  ;;  %v8611_v11 = vmul.f32 %v15144_v33, %v16301_v48  ;;  %v15164_v27 = vpop.f32.mrf.mxu0 }
 0x4c4   : > { %v8650_v58 = vadd.f32 %v8649_v22, %v8648_v15  ;;  %v8394_v29 = vpop.f32.mrf.mxu1  ;;  %v8108_v23 = vadd.f32 %v15028_v25, %v14975_v21  ;;  %v8107_v21 = vadd.f32 %v15036_v52, %v14978_v24 }
 0x4c5   : > { %v8610_v40 = vmul.f32 %v15152_v32, %v16302_v28  ;;  %v15162_v43 = vadd.f32 %v15067_v60, %v8534_v5  ;;  %v8533_v20 = vadd.f32 %v8394_v29, %v8103_v14  ;;  %v16303_v5 = vld [vmem:[#allocation94_spill] sm:$0xff] }
 0x4c6   : > { %v8652_v13 = vadd.f32 %v8651_v56, %v8650_v58  ;;  %v11477_v12 = vpop.f32.mrf.mxu1  ;;  %v8655_v56 = vsel %vm363_vm1, %v8611_v11, 0.0  ;;  %v16304_v58 = vld [vmem:[#allocation93_spill] sm:$0xff] }
 0x4c7   : > { %v8653_v44 = vsel %vm363_vm1, %v8610_v40, 0.0  ;;  %v15170_v63 = vadd.f32 %v15067_v60, %v8533_v20  ;;  %v8536_v15 = vadd.f32 %v11477_v12, %v8106_v47  ;;  %v8613_v14 = vmul.f32 %v15162_v43, %v16303_v5  ;;  %v15182_v40 = vpop.f32.mrf.mxu0 }
 0x4c8   : > { %v8654_v22 = vadd.f32 %v8653_v44, %v8652_v13  ;;  %v8404_v29 = vpop.f32.mrf.mxu1  ;;  %v8110_v12 = vadd.f32 %v15044_v16, %v14983_v2  ;;  %v8109_v2 = vadd.f32 %v15052_v6, %v14986_v35 }
 0x4c9   : > { %v8612_v48 = vmul.f32 %v15170_v63, %v16304_v58  ;;  %v15180_v51 = vadd.f32 %v15067_v60, %v8536_v15  ;;  %v8535_v41 = vadd.f32 %v8404_v29, %v8105_v57  ;;  %v8659_v44 = vsel %vm363_vm1, %v8613_v14, 0.0  ;;  %v16305_v29 = vld [vmem:[#allocation96_spill] sm:$0xff] }
 0x4ca   : > { %v8656_v47 = vadd.f32 %v8655_v56, %v8654_v22  ;;  %v11480_v20 = vpop.f32.mrf.mxu1  ;;  %v16306_v56 = vld [vmem:[#allocation95_spill] sm:$0xff] }
 0x4cb   : > { %v8657_v25 = vsel %vm363_vm1, %v8612_v48, 0.0  ;;  %v15188_v13 = vadd.f32 %v15067_v60, %v8535_v41  ;;  %v8538_v11 = vadd.f32 %v11480_v20, %v8108_v23  ;;  %v8615_v22 = vmul.f32 %v15180_v51, %v16305_v29  ;;  %v15200_v48 = vpop.f32.mrf.mxu0 }
 0x4cc   : > { %v8658_v15 = vadd.f32 %v8657_v25, %v8656_v47  ;;  %v8414_v57 = vpop.f32.mrf.mxu1  ;;  %v8112_v20 = vadd.f32 %v15062_v10, %v14991_v36  ;;  %v8111_v36 = vadd.f32 %v15076_v18, %v14994_v50 }
 0x4cd   : > { %v8614_v5 = vmul.f32 %v15188_v13, %v16306_v56  ;;  %v15198_v24 = vadd.f32 %v15067_v60, %v8538_v11  ;;  %v8537_v52 = vadd.f32 %v8414_v57, %v8107_v21  ;;  %v16307_v11 = vld [vmem:[#allocation24_spill] sm:$0xff] }
 0x4ce   : > { %v8660_v23 = vadd.f32 %v8659_v44, %v8658_v15  ;;  %v11483_v41 = vpop.f32.mrf.mxu1  ;;  %v8663_v44 = vsel %vm363_vm1, %v8615_v22, 0.0  ;;  %v16308_v15 = vld [vmem:[#allocation52_spill] sm:$0xff] }
 0x4cf   : > { %v8661_v16 = vsel %vm363_vm1, %v8614_v5, 0.0  ;;  %v15206_v14 = vadd.f32 %v15067_v60, %v8537_v52  ;;  %v8540_v47 = vadd.f32 %v11483_v41, %v8110_v12  ;;  %v8617_v21 = vmul.f32 %v15198_v24, %v16307_v11  ;;  %v15218_v5 = vpop.f32.mrf.mxu0 }
 0x4d0   : > { %v8662_v25 = vadd.f32 %v8661_v16, %v8660_v23  ;;  %v8424_v57 = vpop.f32.mrf.mxu1  ;;  %v8114_v41 = vadd.f32 %v15092_v55, %v14999_v30  ;;  %v8113_v30 = vadd.f32 %v15110_v7, %v15002_v59 }
 0x4d1   : > { %v8616_v29 = vmul.f32 %v15206_v14, %v16308_v15  ;;  %v15216_v35 = vadd.f32 %v15067_v60, %v8540_v47  ;;  %v8539_v6 = vadd.f32 %v8424_v57, %v8109_v2  ;;  %v8667_v16 = vsel %vm363_vm1, %v8617_v21, 0.0  ;;  %v16309_v57 = vld [vmem:[#allocation4_spill] sm:$0xff] }
 0x4d2   : > { %v8664_v12 = vadd.f32 %v8663_v44, %v8662_v25  ;;  %v11486_v52 = vpop.f32.mrf.mxu1  ;;  %v16310_v44 = vld [vmem:[#allocation5_spill] sm:$0xff] }
 0x4d3   : > { %v8665_v10 = vsel %vm363_vm1, %v8616_v29, 0.0  ;;  %v15224_v23 = vadd.f32 %v15067_v60, %v8539_v6  ;;  %v8542_v22 = vadd.f32 %v11486_v52, %v8112_v20  ;;  %v8619_v25 = vmul.f32 %v15216_v35, %v16309_v57  ;;  %v11445_v29 = vpop.f32.mrf.mxu0 }
 0x4d4   : > { %v8666_v47 = vadd.f32 %v8665_v10, %v8664_v12  ;;  %v8434_v2 = vpop.f32.mrf.mxu1  ;;  %v8116_v52 = vadd.f32 %v15128_v9, %v15007_v42  ;;  %v8115_v42 = vadd.f32 %v15146_v19, %v15010_v26 }
 0x4d5   : > { %v8618_v11 = vmul.f32 %v15224_v23, %v16310_v44  ;;  %v15234_v50 = vadd.f32 %v15067_v60, %v8542_v22  ;;  %v8541_v18 = vadd.f32 %v8434_v2, %v8111_v36 }
 0x4d6   : > { %v8668_v6 = vadd.f32 %v8667_v16, %v8666_v47  ;;  %v11489_v20 = vpop.f32.mrf.mxu1  ;;  %v8671_v16 = vsel %vm363_vm1, %v8619_v25, 0.0  ;;  %v16311_v47 = vld [vmem:[#allocation54_spill] sm:$0xff]  ;;  %v8118_v25 = vadd.f32 %v15164_v27, %v15015_v49  ;;  %v8117_v49 = vadd.f32 %v15182_v40, %v15018_v54 }
 0x4d7   : > { %v8669_v55 = vsel %vm363_vm1, %v8618_v11, 0.0  ;;  %v15240_v21 = vadd.f32 %v15067_v60, %v8541_v18  ;;  %v8544_v12 = vadd.f32 %v11489_v20, %v8114_v41  ;;  %v8621_v22 = vmul.f32 %v15234_v50, %v16265_v61  ;;  %v8054_v11 = vpop.f32.mrf.mxu0 }
 0x4d8   : > { %v8670_v10 = vadd.f32 %v8669_v55, %v8668_v6  ;;  %v8444_v36 = vpop.f32.mrf.mxu1 }
 0x4d9   : > { %v8620_v2 = vmul.f32 %v15240_v21, %v16311_v47  ;;  %v15250_v59 = vadd.f32 %v15067_v60, %v8544_v12  ;;  %v8543_v7 = vadd.f32 %v8444_v36, %v8113_v30  ;;  %v8675_v55 = vsel %vm363_vm1, %v8621_v22, 0.0  ;;  %v16312_v30 = vld [vmem:[#allocation28_spill] sm:$0xff]  ;;  %v16313_v36 = vld [vmem:[#allocation6_spill] sm:$0xff] }
 0x4da   : > { %v8672_v18 = vadd.f32 %v8671_v16, %v8670_v10  ;;  %v11492_v41 = vpop.f32.mrf.mxu1  ;;  %v16326_v47 = vld [vmem:[#allocation68_spill] sm:$0xff] }
 0x4db   : > { %v8673_v9 = vsel %vm363_vm1, %v8620_v2, 0.0  ;;  %v15256_v6 = vadd.f32 %v15067_v60, %v8543_v7  ;;  %v8546_v20 = vadd.f32 %v11492_v41, %v8116_v52  ;;  %v8623_v10 = vmul.f32 %v15250_v59, %v16312_v30  ;;  %v11448_v2 = vpop.f32.mrf.mxu0  ;;  %v16314_v30 = vld [vmem:[#allocation56_spill] sm:$0xff] }
 0x4dc   : > { %v8674_v12 = vadd.f32 %v8673_v9, %v8672_v18  ;;  %v8454_v61 = vpop.f32.mrf.mxu1  ;;  %v8120_v41 = vadd.f32 %v15200_v48, %v15023_v8  ;;  %v8119_v8 = vadd.f32 %v15218_v5, %v15026_v53 }
 0x4dd   : > { %v8622_v16 = vmul.f32 %v15256_v6, %v16313_v36  ;;  %v15266_v26 = vadd.f32 %v15067_v60, %v8546_v20  ;;  %v8545_v19 = vadd.f32 %v8454_v61, %v8115_v42  ;;  %v8679_v42 = vsel %vm363_vm1, %v8623_v10, 0.0  ;;  %v16322_v36 = vld [vmem:[#allocation31_spill] sm:$0xff] }
 0x4de   : > { %v8676_v7 = vadd.f32 %v8675_v55, %v8674_v12  ;;  %v11495_v52 = vpop.f32.mrf.mxu1  ;;  %v16315_v55 = vld [vmem:[#allocation62_spill] sm:$0xff]  ;;  %v8122_v10 = vadd.f32 %v11445_v29, %v15031_v31 }
 0x4df   : > { %v8677_v27 = vsel %vm363_vm1, %v8622_v16, 0.0  ;;  %v15272_v22 = vadd.f32 %v15067_v60, %v8545_v19  ;;  %v8548_v18 = vadd.f32 %v11495_v52, %v8118_v25  ;;  %v8625_v20 = vmul.f32 %v15266_v26, %v16314_v30  ;;  %v8064_v16 = vpop.f32.mrf.mxu0 }
 0x4e0   : > { %v8678_v9 = vadd.f32 %v8677_v27, %v8676_v7  ;;  %v8464_v61 = vpop.f32.mrf.mxu1 }
 0x4e1   : > { %v8624_v12 = vmul.f32 %v15272_v22, %v16315_v55  ;;  %v15282_v54 = vadd.f32 %v15067_v60, %v8548_v18  ;;  %v8547_v40 = vadd.f32 %v8464_v61, %v8117_v49  ;;  %v8683_v27 = vsel %vm363_vm1, %v8625_v20, 0.0  ;;  %v16316_v55 = vld [vmem:[#allocation55_spill] sm:$0xff] }
 0x4e2   : > { %v8680_v19 = vadd.f32 %v8679_v42, %v8678_v9  ;;  %v11498_v25 = vpop.f32.mrf.mxu1  ;;  %v16317_v9 = vld [vmem:[#allocation29_spill] sm:$0xff]  ;;  %v11451_v42 = vpop.f32.mrf.mxu0 }
 0x4e3   : > { %v8681_v48 = vsel %vm363_vm1, %v8624_v12, 0.0  ;;  %v15288_v7 = vadd.f32 %v15067_v60, %v8547_v40  ;;  %v8550_v52 = vadd.f32 %v11498_v25, %v8120_v41  ;;  %v8627_v49 = vmul.f32 %v15282_v54, %v16316_v55  ;;  %v16318_v41 = vld [vmem:[#allocation10_spill] sm:$0xff]  ;;  %v16319_v55 = vld [vmem:[#allocation9_spill] sm:$0xff] }
 0x4e4   : > { %v8682_v30 = vadd.f32 %v8681_v48, %v8680_v19  ;;  %v8474_v18 = vpop.f32.mrf.mxu1  ;;  %v8121_v25 = vadd.f32 %v8054_v11, %v16318_v41  ;;  %v8124_v19 = vadd.f32 %v11448_v2, %v15039_v1 }
 0x4e5   : > { %v8626_v61 = vmul.f32 %v15288_v7, %v16317_v9  ;;  %v15297_v53 = vadd.f32 %v15067_v60, %v8550_v52  ;;  %v8549_v5 = vadd.f32 %v8474_v18, %v8119_v8  ;;  %v8687_v8 = vsel %vm363_vm1, %v8627_v49, 0.0  ;;  %v16320_v18 = vld [vmem:[#allocation65_spill] sm:$0xff] }
 0x4e6   : > { %v8684_v12 = vadd.f32 %v8683_v27, %v8682_v30  ;;  %v11501_v40 = vpop.f32.mrf.mxu1  ;;  %v8126_v49 = vadd.f32 %v11451_v42, %v15047_v37 }
 0x4e7   : > { %v8685_v31 = vsel %vm363_vm1, %v8626_v61, 0.0  ;;  %v15302_v29 = vadd.f32 %v15067_v60, %v8549_v5  ;;  %v8552_v20 = vadd.f32 %v11501_v40, %v8122_v10  ;;  %v8629_v9 = vmul.f32 %v15297_v53, %v16319_v55  ;;  %v8074_v61 = vpop.f32.mrf.mxu0  ;;  %v16321_v10 = vld [vmem:[#allocation32_spill] sm:$0xff] }
 0x4e8   : > { %v8686_v48 = vadd.f32 %v8685_v31, %v8684_v12  ;;  %v8484_v52 = vpop.f32.mrf.mxu1  ;;  %v8123_v40 = vadd.f32 %v8064_v16, %v16321_v10 }
 0x4e9   : > { %v8628_v30 = vmul.f32 %v15302_v29, %v16320_v18  ;;  %v15311_v11 = vadd.f32 %v15067_v60, %v8552_v20  ;;  %v8551_v27 = vadd.f32 %v8484_v52, %v8121_v25  ;;  %v11454_v31 = vpop.f32.mrf.mxu0  ;;  %v8691_v55 = vsel %vm363_vm1, %v8629_v9, 0.0 }
 0x4ea   : > { %v8688_v5 = vadd.f32 %v8687_v8, %v8686_v48  ;;  %v11504_v41 = vpop.f32.mrf.mxu1  ;;  %v16323_v48 = vld [vmem:[#allocation8_spill] sm:$0xff] }
 0x4eb   : > { %v8689_v1 = vsel %vm363_vm1, %v8628_v30, 0.0  ;;  %v15316_v2 = vadd.f32 %v15067_v60, %v8551_v27  ;;  %v8554_v12 = vadd.f32 %v11504_v41, %v8124_v19  ;;  %v8631_v25 = vmul.f32 %v15311_v11, %v16322_v36  ;;  %v16324_v19 = vld [vmem:[#allocation78_spill] sm:$0xff] }
 0x4ec   : > { %v8690_v18 = vadd.f32 %v8689_v1, %v8688_v5  ;;  %v8494_v20 = vpop.f32.mrf.mxu1  ;;  %v8125_v41 = vadd.f32 %v8074_v61, %v16324_v19  ;;  %v16325_v5 = vld [vmem:[#allocation60_spill] sm:$0xff]  ;;  %v8084_v1 = vpop.f32.mrf.mxu0 }
 0x4ed   : > { %v8630_v52 = vmul.f32 %v15316_v2, %v16323_v48  ;;  %v15325_v16 = vadd.f32 %v15067_v60, %v8554_v12  ;;  %v8553_v8 = vadd.f32 %v8494_v20, %v8123_v40  ;;  %v8128_v10 = vadd.f32 %v11454_v31, %v16325_v5 }
 0x4ee   : > { %v8692_v30 = vadd.f32 %v8691_v55, %v8690_v18  ;;  %v11507_v27 = vpop.f32.mrf.mxu1  ;;  %v8695_v40 = vsel %vm363_vm1, %v8631_v25, 0.0  ;;  %v16327_v55 = vld [vmem:[#allocation58_spill] sm:$0xff] }
 0x4ef   : > { %v8693_v37 = vsel %vm363_vm1, %v8630_v52, 0.0  ;;  %v15330_v9 = vadd.f32 %v15067_v60, %v8553_v8  ;;  %v8556_v42 = vadd.f32 %v11507_v27, %v8126_v49  ;;  %v8633_v48 = vmul.f32 %v15325_v16, %v16326_v47  ;;  %v16328_v49 = vld [vmem:[#allocation33_spill] sm:$0xff] }
 0x4f0   : > { %v8694_v36 = vadd.f32 %v8693_v37, %v8692_v30  ;;  %v8504_v12 = vpop.f32.mrf.mxu1  ;;  %v8127_v27 = vadd.f32 %v8084_v1, %v16328_v49  ;;  %v16329_v47 = vld [vmem:[#allocation57_spill] sm:$0xff] }
 0x4f1   : > { %v8632_v18 = vmul.f32 %v15330_v9, %v16327_v55  ;;  %v15339_v61 = vadd.f32 %v15067_v60, %v8556_v42  ;;  %v8555_v20 = vadd.f32 %v8504_v12, %v8125_v41  ;;  %v8699_v37 = vsel %vm363_vm1, %v8633_v48, 0.0  ;;  %v16330_v42 = vld [vmem:[#allocation30_spill] sm:$0xff] }
 0x4f2   : > { %v8696_v52 = vadd.f32 %v8695_v40, %v8694_v36  ;;  %v11510_v8 = vpop.f32.mrf.mxu1 }
 0x4f3   : > { %v8697_v31 = vsel %vm363_vm1, %v8632_v18, 0.0  ;;  %v15344_v30 = vadd.f32 %v15067_v60, %v8555_v20  ;;  %v8558_v19 = vadd.f32 %v11510_v8, %v8128_v10  ;;  %v8635_v55 = vmul.f32 %v15339_v61, %v16329_v47  ;;  %v16331_v20 = vld [vmem:[#allocation11_spill] sm:$0xff]  ;;  %v16332_v8 = vld [vmem:[#allocation73_spill] sm:$0xff] }
 0x4f4   : > { %v8698_v25 = vadd.f32 %v8697_v31, %v8696_v52  ;;  %v8514_v5 = vpop.f32.mrf.mxu1 }
 0x4f5   : > { %v8634_v41 = vmul.f32 %v15344_v30, %v16330_v42  ;;  %v15352_v36 = vadd.f32 %v15067_v60, %v8558_v19  ;;  %v8557_v1 = vadd.f32 %v8514_v5, %v8127_v27  ;;  %v8703_v48 = vsel %vm363_vm1, %v8635_v55, 0.0 }
 0x4f6   : > { %v8700_v12 = vadd.f32 %v8699_v37, %v8698_v25 }
 0x4f7   : > { %v8701_v40 = vsel %vm363_vm1, %v8634_v41, 0.0  ;;  %v15356_v18 = vadd.f32 %v15067_v60, %v8557_v1  ;;  %v8637_v52 = vmul.f32 %v15352_v36, %v16331_v20 }
 0x4f8   : > { %v8702_v10 = vadd.f32 %v8701_v40, %v8700_v12 }
 0x4f9   : > { %v8636_v49 = vmul.f32 %v15356_v18, %v16332_v8  ;;  %v8707_v27 = vsel %vm363_vm1, %v8637_v52, 0.0 }
 0x4fa   : > { %v8704_v31 = vadd.f32 %v8703_v48, %v8702_v10 }
 0x4fb   : > { %v8705_v19 = vsel %vm363_vm1, %v8636_v49, 0.0  ;;  %v16336_v49 = vld [vmem:[#allocation76_spill] sm:$0xff] }
 0x4fc   : > { %v8706_v47 = vadd.f32 %v8705_v19, %v8704_v31  ;;  %v16334_v19 = vld [vmem:[#allocation75_spill] sm:$0xff] }
 0x4fd   : > { %v16335_v31 = vld [vmem:[#allocation71_spill] sm:$0xff] }
 0x4fe   : > { %v8708_v37 = vadd.f32 %v8707_v27, %v8706_v47  ;;  %v16333_v27 = vld [vmem:[#allocation70_spill] sm:$0xff]  ;;  %v16338_v47 = vld [vmem:[#allocation88_spill] sm:$0xff] }
 0x500   : > { %v8709_v25 = vrot.slane %v8708_v37, 4 }
 0x502   : > { %v8710_v5 = vadd.f32 %v8709_v25, %v8708_v37 }
 0x504   : > { %v8711_v60 = vrot.slane %v8710_v5, 2 }
 0x506   : > { %v8712_v41 = vadd.f32 %v8711_v60, %v8710_v5 }
 0x508   : > { %v8713_v1 = vrot.slane %v8712_v41, 1 }
 0x50a   : > { %v8714_v12 = vadd.f32 %v8713_v1, %v8712_v41 }
 0x50c   : > { %v15365_v55 = vmul.f32 0.00390625, %v8714_v12 }
 0x50e   : > { %v8730_v40 = vsub.f32 %v15206_v14, %v15365_v55  ;;  %v8732_v10 = vsub.f32 %v15224_v23, %v15365_v55  ;;  %v8733_v48 = vsub.f32 %v15216_v35, %v15365_v55  ;;  %v8716_v1 = vsub.f32 %v15081_v39, %v15365_v55 }
 0x50f   : > { %v8717_v12 = vsub.f32 %v15074_v3, %v15365_v55  ;;  %v8718_v37 = vsub.f32 %v15098_v4, %v15365_v55  ;;  %v8719_v25 = vsub.f32 %v15090_v62, %v15365_v55  ;;  %v8720_v41 = vsub.f32 %v15116_v38, %v15365_v55 }
 0x510   : > { %v15418_v5 = vmul.f32 %v8716_v1, %v16333_v27  ;;  %v8721_v3 = vsub.f32 %v15108_v45, %v15365_v55  ;;  %v8723_v45 = vsub.f32 %v15126_v17, %v15365_v55  ;;  %v8725_v52 = vsub.f32 %v15144_v33, %v15365_v55 }
 0x511   : > { %v15421_v60 = vmul.f32 %v8717_v12, %v16334_v19  ;;  %v15426_v39 = vmul.f32 %v8718_v37, %v16335_v31  ;;  %v15431_v4 = vmul.f32 %v8719_v25, %v16336_v49  ;;  %v8722_v19 = vsub.f32 %v15134_v34, %v15365_v55  ;;  %v16337_v49 = vld [vmem:[#allocation84_spill] sm:$0xff] }
 0x512   : > { %v8788_v62 = vmul.f32 %v15418_v5, %v15418_v5  ;;  %v15440_v38 = vmul.f32 %v8720_v41, %v16298_v46  ;;  %v15447_v37 = vmul.f32 %v8721_v3, %v16337_v49  ;;  %v8724_v46 = vsub.f32 %v15152_v32, %v15365_v55 }
 0x513   : > { %v8789_v27 = vmul.f32 %v15421_v60, %v15421_v60  ;;  %v8790_v31 = vmul.f32 %v15426_v39, %v15426_v39  ;;  %v8791_v25 = vmul.f32 %v15431_v4, %v15431_v4  ;;  %v15456_v41 = vmul.f32 %v8722_v19, %v16300_v0 }
 0x514   : > { %v8824_v1 = vsel %vm363_vm1, %v8788_v62, 0.0  ;;  %v8792_v17 = vmul.f32 %v15440_v38, %v15440_v38  ;;  %v15464_v62 = vmul.f32 %v8723_v45, %v16338_v47  ;;  %v8726_v0 = vsub.f32 %v15170_v63, %v15365_v55  ;;  %v16339_v45 = vld [vmem:[#allocation92_spill] sm:$0xff] }
 0x515   : > { %v8825_v12 = vsel %vm363_vm1, %v8789_v27, 0.0  ;;  %v8827_v3 = vsel %vm363_vm1, %v8790_v31, 0.0  ;;  %v8793_v27 = vmul.f32 %v15447_v37, %v15447_v37  ;;  %v8829_v32 = vsel %vm363_vm1, %v8791_v25, 0.0 }
 0x516   : > { %v8826_v34 = vadd.f32 %v8825_v12, %v8824_v1  ;;  %v15472_v19 = vmul.f32 %v8724_v46, %v16302_v28  ;;  %v8794_v31 = vmul.f32 %v15456_v41, %v15456_v41  ;;  %v8831_v33 = vsel %vm363_vm1, %v8792_v17, 0.0 }
 0x517   : > { %v8727_v47 = vsub.f32 %v15162_v43, %v15365_v55  ;;  %v8795_v25 = vmul.f32 %v15464_v62, %v15464_v62  ;;  %v8833_v63 = vsel %vm363_vm1, %v8793_v27, 0.0  ;;  %v8728_v28 = vsub.f32 %v15188_v13, %v15365_v55 }
 0x518   : > { %v8828_v49 = vadd.f32 %v8827_v3, %v8826_v34  ;;  %v15480_v34 = vmul.f32 %v8725_v52, %v16339_v45  ;;  %v15488_v46 = vmul.f32 %v8726_v0, %v16304_v58  ;;  %v8796_v17 = vmul.f32 %v15472_v19, %v15472_v19 }
 0x519   : > { %v8835_v43 = vsel %vm363_vm1, %v8794_v31, 0.0  ;;  %v8729_v52 = vsub.f32 %v15180_v51, %v15365_v55  ;;  %v8837_v13 = vsel %vm363_vm1, %v8795_v25, 0.0  ;;  %v15502_v58 = vmul.f32 %v8728_v28, %v16306_v56 }
 0x51a   : > { %v8830_v1 = vadd.f32 %v8829_v32, %v8828_v49  ;;  %v16340_v32 = vld [vmem:[#allocation94_spill] sm:$0xff]  ;;  %v8797_v27 = vmul.f32 %v15480_v34, %v15480_v34  ;;  %v8798_v0 = vmul.f32 %v15488_v46, %v15488_v46  ;;  %v8839_v31 = vsel %vm363_vm1, %v8796_v17, 0.0 }
 0x51b   : > { %v8731_v51 = vsub.f32 %v15198_v24, %v15365_v55  ;;  %v15519_v56 = vmul.f32 %v8730_v40, %v16308_v15  ;;  %v8800_v28 = vmul.f32 %v15502_v58, %v15502_v58  ;;  %v15534_v14 = vmul.f32 %v8732_v10, %v16310_v44  ;;  %v16343_v44 = vld [vmem:[#allocation54_spill] sm:$0xff] }
 0x51c   : > { %v8832_v12 = vadd.f32 %v8831_v33, %v8830_v1  ;;  %v15496_v1 = vmul.f32 %v8727_v47, %v16340_v32  ;;  %v16341_v47 = vld [vmem:[#allocation96_spill] sm:$0xff]  ;;  %v8841_v25 = vsel %vm363_vm1, %v8797_v27, 0.0  ;;  %v8843_v24 = vsel %vm363_vm1, %v8798_v0, 0.0 }
 0x51d   : > { %v15510_v45 = vmul.f32 %v8729_v52, %v16341_v47  ;;  %v8802_v15 = vmul.f32 %v15519_v56, %v15519_v56  ;;  %v8847_v40 = vsel %vm363_vm1, %v8800_v28, 0.0  ;;  %v16344_v10 = vsub.f32 %v15240_v21, %v15365_v55  ;;  %v16347_v28 = vld [vmem:[#allocation6_spill] sm:$0xff] }
 0x51e   : > { %v8834_v3 = vadd.f32 %v8833_v63, %v8832_v12  ;;  %v8799_v63 = vmul.f32 %v15496_v1, %v15496_v1 }
 0x51f   : > { %v8801_v52 = vmul.f32 %v15510_v45, %v15510_v45  ;;  %v8851_v47 = vsel %vm363_vm1, %v8802_v15, 0.0 }
 0x520   : > { %v8836_v49 = vadd.f32 %v8835_v43, %v8834_v3  ;;  %v16342_v43 = vld [vmem:[#allocation24_spill] sm:$0xff]  ;;  %v8845_v32 = vsel %vm363_vm1, %v8799_v63, 0.0 }
 0x522   : > { %v8838_v33 = vadd.f32 %v8837_v13, %v8836_v49  ;;  %v15525_v49 = vmul.f32 %v8731_v51, %v16342_v43  ;;  %v8804_v51 = vmul.f32 %v15534_v14, %v15534_v14 }
 0x524   : > { %v8840_v12 = vadd.f32 %v8839_v31, %v8838_v33  ;;  %v15543_v33 = vmul.f32 %v8733_v48, %v16309_v57  ;;  %v8803_v0 = vmul.f32 %v15525_v49, %v15525_v49  ;;  %v8849_v31 = vsel %vm363_vm1, %v8801_v52, 0.0  ;;  %v16345_v57 = vld [vmem:[#allocation26_spill] sm:$0xff] }
 0x525   : > { %v16346_v48 = vsub.f32 %v15234_v50, %v15365_v55  ;;  %v8855_v52 = vsel %vm363_vm1, %v8804_v51, 0.0  ;;  %v16353_v51 = vld [vmem:[#allocation56_spill] sm:$0xff] }
 0x526   : > { %v8842_v3 = vadd.f32 %v8841_v25, %v8840_v12  ;;  %v15552_v12 = vmul.f32 %v16344_v10, %v16343_v44  ;;  %v8805_v25 = vmul.f32 %v15543_v33, %v15543_v33 }
 0x527   : > { %v15561_v63 = vmul.f32 %v16346_v48, %v16345_v57 }
 0x528   : > { %v8844_v17 = vadd.f32 %v8843_v24, %v8842_v3  ;;  %v8853_v3 = vsel %vm363_vm1, %v8803_v0, 0.0  ;;  %v16348_v24 = vsub.f32 %v15256_v6, %v15365_v55  ;;  %v8806_v43 = vmul.f32 %v15552_v12, %v15552_v12  ;;  %v16351_v0 = vld [vmem:[#allocation62_spill] sm:$0xff] }
 0x52a   : > { %v8846_v27 = vadd.f32 %v8845_v32, %v8844_v17  ;;  %v15570_v17 = vmul.f32 %v16348_v24, %v16347_v28  ;;  %v16349_v32 = vld [vmem:[#allocation28_spill] sm:$0xff]  ;;  %v8859_v10 = vsel %vm363_vm1, %v8806_v43, 0.0  ;;  %v16357_v43 = vld [vmem:[#allocation55_spill] sm:$0xff] }
 0x52c   : > { %v8848_v13 = vadd.f32 %v8847_v40, %v8846_v27  ;;  %v16350_v27 = vsub.f32 %v15250_v59, %v15365_v55  ;;  %v8807_v40 = vmul.f32 %v15561_v63, %v15561_v63  ;;  %v8808_v44 = vmul.f32 %v15570_v17, %v15570_v17 }
 0x52e   : > { %v8850_v23 = vadd.f32 %v8849_v31, %v8848_v13  ;;  %v15579_v15 = vmul.f32 %v16350_v27, %v16349_v32  ;;  %v8857_v13 = vsel %vm363_vm1, %v8805_v25, 0.0  ;;  %v16352_v31 = vsub.f32 %v15272_v22, %v15365_v55  ;;  %v16355_v25 = vld [vmem:[#allocation29_spill] sm:$0xff] }
 0x52f   : > { %v8861_v48 = vsel %vm363_vm1, %v8807_v40, 0.0  ;;  %v8863_v24 = vsel %vm363_vm1, %v8808_v44, 0.0  ;;  %v16359_v40 = vld [vmem:[#allocation65_spill] sm:$0xff] }
 0x530   : > { %v8852_v35 = vadd.f32 %v8851_v47, %v8850_v23  ;;  %v15588_v23 = vmul.f32 %v16352_v31, %v16351_v0  ;;  %v16354_v47 = vsub.f32 %v15266_v26, %v15365_v55  ;;  %v8809_v57 = vmul.f32 %v15579_v15, %v15579_v15  ;;  %v16361_v44 = vld [vmem:[#allocation9_spill] sm:$0xff] }
 0x532   : > { %v8854_v21 = vadd.f32 %v8853_v3, %v8852_v35  ;;  %v15597_v35 = vmul.f32 %v16354_v47, %v16353_v51  ;;  %v16356_v3 = vsub.f32 %v15288_v7, %v15365_v55  ;;  %v8810_v28 = vmul.f32 %v15588_v23, %v15588_v23 }
 0x533   : > { %v8865_v27 = vsel %vm363_vm1, %v8809_v57, 0.0  ;;  %v16363_v57 = vld [vmem:[#allocation8_spill] sm:$0xff] }
 0x534   : > { %v8856_v50 = vadd.f32 %v8855_v52, %v8854_v21  ;;  %v15606_v21 = vmul.f32 %v16356_v3, %v16355_v25  ;;  %v16358_v52 = vsub.f32 %v15282_v54, %v15365_v55  ;;  %v8811_v32 = vmul.f32 %v15597_v35, %v15597_v35 }
 0x535   : > { %v8867_v31 = vsel %vm363_vm1, %v8810_v28, 0.0  ;;  %v16365_v28 = vld [vmem:[#allocation31_spill] sm:$0xff] }
 0x536   : > { %v8858_v6 = vadd.f32 %v8857_v13, %v8856_v50  ;;  %v15615_v50 = vmul.f32 %v16358_v52, %v16357_v43  ;;  %v16360_v13 = vsub.f32 %v15302_v29, %v15365_v55  ;;  %v8812_v0 = vmul.f32 %v15606_v21, %v15606_v21 }
 0x537   : > { %v8869_v47 = vsel %vm363_vm1, %v8811_v32, 0.0  ;;  %v16367_v32 = vld [vmem:[#allocation58_spill] sm:$0xff] }
 0x538   : > { %v8860_v59 = vadd.f32 %v8859_v10, %v8858_v6  ;;  %v15624_v6 = vmul.f32 %v16360_v13, %v16359_v40  ;;  %v16362_v10 = vsub.f32 %v15297_v53, %v15365_v55  ;;  %v8813_v51 = vmul.f32 %v15615_v50, %v15615_v50 }
 0x539   : > { %v8871_v3 = vsel %vm363_vm1, %v8812_v0, 0.0  ;;  %v16369_v0 = vld [vmem:[#allocation68_spill] sm:$0xff] }
 0x53a   : > { %v8862_v22 = vadd.f32 %v8861_v48, %v8860_v59  ;;  %v15633_v59 = vmul.f32 %v16362_v10, %v16361_v44  ;;  %v16364_v48 = vsub.f32 %v15316_v2, %v15365_v55  ;;  %v8814_v25 = vmul.f32 %v15624_v6, %v15624_v6 }
 0x53b   : > { %v8873_v52 = vsel %vm363_vm1, %v8813_v51, 0.0  ;;  %v16371_v51 = vsub.f32 %v15344_v30, %v15365_v55 }
 0x53c   : > { %v8864_v26 = vadd.f32 %v8863_v24, %v8862_v22  ;;  %v15642_v22 = vmul.f32 %v16364_v48, %v16363_v57  ;;  %v16366_v24 = vsub.f32 %v15311_v11, %v15365_v55  ;;  %v8815_v43 = vmul.f32 %v15633_v59, %v15633_v59  ;;  %v16372_v48 = vld [vmem:[#allocation57_spill] sm:$0xff] }
 0x53d   : > { %v8875_v13 = vsel %vm363_vm1, %v8814_v25, 0.0  ;;  %v16373_v25 = vsub.f32 %v15339_v61, %v15365_v55 }
 0x53e   : > { %v8866_v7 = vadd.f32 %v8865_v27, %v8864_v26  ;;  %v15651_v26 = vmul.f32 %v16366_v24, %v16365_v28  ;;  %v16368_v27 = vsub.f32 %v15330_v9, %v15365_v55  ;;  %v8816_v40 = vmul.f32 %v15642_v22, %v15642_v22 }
 0x53f   : > { %v8877_v10 = vsel %vm363_vm1, %v8815_v43, 0.0 }
 0x540   : > { %v8868_v54 = vadd.f32 %v8867_v31, %v8866_v7  ;;  %v15660_v7 = vmul.f32 %v16368_v27, %v16367_v32  ;;  %v16370_v31 = vsub.f32 %v15325_v16, %v15365_v55  ;;  %v8817_v44 = vmul.f32 %v15651_v26, %v15651_v26 }
 0x541   : > { %v8879_v57 = vsel %vm363_vm1, %v8816_v40, 0.0 }
 0x542   : > { %v8870_v29 = vadd.f32 %v8869_v47, %v8868_v54  ;;  %v15669_v54 = vmul.f32 %v16370_v31, %v16369_v0  ;;  %v15678_v47 = vmul.f32 %v16371_v51, %v16330_v42  ;;  %v8881_v28 = vsel %vm363_vm1, %v8817_v44, 0.0 }
 0x543   : > { %v16374_v42 = vsub.f32 %v15356_v18, %v15365_v55 }
 0x544   : > { %v8872_v53 = vadd.f32 %v8871_v3, %v8870_v29  ;;  %v8818_v29 = vmul.f32 %v15660_v7, %v15660_v7  ;;  %v15687_v3 = vmul.f32 %v16373_v25, %v16372_v48  ;;  %v8820_v43 = vmul.f32 %v15678_v47, %v15678_v47 }
 0x545   : > { %v15696_v24 = vmul.f32 %v16374_v42, %v16332_v8 }
 0x546   : > { %v8874_v2 = vadd.f32 %v8873_v52, %v8872_v53  ;;  %v8819_v53 = vmul.f32 %v15669_v54, %v15669_v54  ;;  %v8883_v52 = vsel %vm363_vm1, %v8818_v29, 0.0  ;;  %v8821_v27 = vmul.f32 %v15687_v3, %v15687_v3 }
 0x547   : > { %v8822_v8 = vmul.f32 %v15696_v24, %v15696_v24 }
 0x548   : > { %v8876_v11 = vadd.f32 %v8875_v13, %v8874_v2  ;;  %v16375_v2 = vsub.f32 %v15352_v36, %v15365_v55  ;;  %v8885_v40 = vsel %vm363_vm1, %v8819_v53, 0.0  ;;  %v8887_v13 = vsel %vm363_vm1, %v8820_v43, 0.0 }
 0x549   : > { %v8889_v31 = vsel %vm363_vm1, %v8821_v27, 0.0 }
 0x54a   : > { %v8878_v9 = vadd.f32 %v8877_v10, %v8876_v11  ;;  %v15705_v32 = vmul.f32 %v16375_v2, %v16331_v20  ;;  %v8891_v20 = vsel %vm363_vm1, %v8822_v8, 0.0  ;;  %v8945_v8 = vld [vmem:[%s11607_s10 + $0x3b] sm:$0xff] }
 0x54c   : > { %v8880_v16 = vadd.f32 %v8879_v57, %v8878_v9  ;;  %v8823_v0 = vmul.f32 %v15705_v32, %v15705_v32 }
 0x54e   : > { %v8882_v30 = vadd.f32 %v8881_v28, %v8880_v16  ;;  %v8893_v44 = vsel %vm363_vm1, %v8823_v0, 0.0 }
 0x550   : > { %v8884_v61 = vadd.f32 %v8883_v52, %v8882_v30 }
 0x552   : > { %v8886_v18 = vadd.f32 %v8885_v40, %v8884_v61 }
 0x554   : > { %v8888_v11 = vadd.f32 %v8887_v13, %v8886_v18  ;;  %v8944_v18 = vld [vmem:[%s11607_s10 + $0x33] sm:$0xff]  ;;  %v8946_v13 = vld [vmem:[%s11607_s10 + $0x43] sm:$0xff] }
 0x556   : > { %v8890_v36 = vadd.f32 %v8889_v31, %v8888_v11  ;;  %v8947_v11 = vld [vmem:[%s11607_s10 + $0x4b] sm:$0xff]  ;;  %v8949_v31 = vld [vmem:[%s11607_s10 + $0x5b] sm:$0xff] }
 0x558   : > { %v8892_v55 = vadd.f32 %v8891_v20, %v8890_v36  ;;  %v8950_v36 = vld [vmem:[%s11607_s10 + $0x63] sm:$0xff]  ;;  %v8951_v20 = vld [vmem:[%s11607_s10 + $0x6b] sm:$0xff] }
 0x55a   : > { %v8894_v10 = vadd.f32 %v8893_v44, %v8892_v55  ;;  %v8952_v55 = vld [vmem:[%s11607_s10 + $0x73] sm:$0xff]  ;;  %v8953_v44 = vld [vmem:[%s11607_s10 + $0x7b] sm:$0xff] }
 0x55c   : > { %v8895_v9 = vrot.slane %v8894_v10, 4 }
 0x55e   : > { %v8896_v51 = vadd.f32 %v8895_v9, %v8894_v10  ;;  %v8954_v10 = vld [vmem:[%s11607_s10 + $0x83] sm:$0xff] }
 0x560   : > { %v8897_v29 = vrot.slane %v8896_v51, 2 }
 0x562   : > { %v8898_v57 = vadd.f32 %v8897_v29, %v8896_v51  ;;  %v8956_v51 = vld [vmem:[%s11607_s10 + $0x93] sm:$0xff]  ;;  %v8957_v29 = vld [vmem:[%s11607_s10 + $0x9b] sm:$0xff] }
 0x564   : > { %v8899_v16 = vrot.slane %v8898_v57, 1 }
 0x566   : > { %v8900_v48 = vadd.f32 %v8899_v16, %v8898_v57  ;;  %v8958_v57 = vld [vmem:[%s11607_s10 + $0xa3] sm:$0xff]  ;;  %v8959_v16 = vld [vmem:[%s11607_s10 + $0xab] sm:$0xff] }
 0x568   : > { %v8901_v25 = vmul.f32 0.00390625, %v8900_v48 }
 0x56a   : > { %v8902_v53 = vadd.f32 1e-05, %v8901_v25 }
 0x56c   : > { %11526 = vrsqrt.f32 %v8902_v53 }
 0x579   : > { %v11527_v28 = vpop.eup %11526 }
 0x57a   : > { %v8904_v30 = vmul.f32 %v11527_v28, %v15418_v5  ;;  %v8905_v42 = vmul.f32 %v11527_v28, %v15421_v60  ;;  %v8906_v43 = vmul.f32 %v11527_v28, %v15426_v39  ;;  %v8907_v52 = vmul.f32 %v11527_v28, %v15431_v4 }
 0x57b   : > { %v8908_v61 = vmul.f32 %v11527_v28, %v15440_v38  ;;  %v8909_v2 = vmul.f32 %v11527_v28, %v15447_v37  ;;  %v8910_v27 = vmul.f32 %v11527_v28, %v15456_v41  ;;  %v8911_v40 = vmul.f32 %v11527_v28, %v15464_v62 }
 0x57c   : > { %v15727_v5 = vmul.f32 %v11527_v28, %v15472_v19  ;;  %v15730_v60 = vmul.f32 %v11527_v28, %v15480_v34  ;;  %v15733_v39 = vmul.f32 %v11527_v28, %v15488_v46  ;;  %v15736_v4 = vmul.f32 %v11527_v28, %v15496_v1 }
 0x57d   : > { %v15739_v38 = vmul.f32 %v11527_v28, %v15502_v58  ;;  %v15742_v37 = vmul.f32 %v11527_v28, %v15510_v45  ;;  %v15745_v41 = vmul.f32 %v11527_v28, %v15519_v56  ;;  %v15748_v62 = vmul.f32 %v11527_v28, %v15525_v49  ;;  %v8940_v58 = vld [vmem:[%s11607_s10 + $0x13] sm:$0xff]  ;;  %v8941_v45 = vld [vmem:[%s11607_s10 + $0x1b] sm:$0xff]  ;;  %v8942_v56 = vld [vmem:[%s11607_s10 + $0x23] sm:$0xff] }
 0x57e   : > { %v15751_v19 = vmul.f32 %v11527_v28, %v15534_v14  ;;  %v15754_v34 = vmul.f32 %v11527_v28, %v15543_v33  ;;  %v15757_v46 = vmul.f32 %v11527_v28, %v15552_v12  ;;  %v15760_v1 = vmul.f32 %v11527_v28, %v15561_v63  ;;  %v8943_v49 = vld [vmem:[%s11607_s10 + $0x2b] sm:$0xff] }
 0x57f   : > { %v15767_v14 = vmul.f32 %v11527_v28, %v15570_v17  ;;  %v15770_v33 = vmul.f32 %v11527_v28, %v15579_v15  ;;  %v15773_v12 = vmul.f32 %v11527_v28, %v15588_v23  ;;  %v15776_v63 = vmul.f32 %v11527_v28, %v15597_v35  ;;  %v8948_v35 = vld [vmem:[%s11607_s10 + $0x53] sm:$0xff] }
 0x580   : > { %v15783_v0 = vmul.f32 %v11527_v28, %v15606_v21  ;;  %v15786_v17 = vmul.f32 %v11527_v28, %v15615_v50  ;;  %v15789_v15 = vmul.f32 %v11527_v28, %v15624_v6  ;;  %v15792_v23 = vmul.f32 %v11527_v28, %v15633_v59 }
 0x581   : > { %v15799_v21 = vmul.f32 %v11527_v28, %v15642_v22  ;;  %v15802_v50 = vmul.f32 %v11527_v28, %v15651_v26  ;;  %v15805_v6 = vmul.f32 %v11527_v28, %v15660_v7  ;;  %v15808_v59 = vmul.f32 %v11527_v28, %v15669_v54  ;;  %v8955_v54 = vld [vmem:[%s11607_s10 + $0x8b] sm:$0xff] }
 0x582   : > { %v15814_v9 = vmul.f32 %v11527_v28, %v15678_v47  ;;  %v15817_v22 = vmul.f32 %v11527_v28, %v15687_v3  ;;  %v15820_v26 = vmul.f32 %v11527_v28, %v15696_v24  ;;  %v15823_v7 = vmul.f32 %v11527_v28, %v15705_v32  ;;  %v8960_v47 = vld [vmem:[%s11607_s10 + $0xb3] sm:$0xff]  ;;  %v8961_v24 = vld [vmem:[%s11607_s10 + $0xbb] sm:$0xff]  ;;  %v8963_v32 = vld [vmem:[%s11607_s10 + $0xcb] sm:$0xff] }
 0x583   : > { %16376 = vst [vmem:[#allocation59_spill] sm:$0xff] %v15805_v6  ;;  %16377 = vst [vmem:[#allocation81_spill] sm:$0xff] %v15808_v59  ;;  %v9017_v48 = vadd.f32 %v8940_v58, %v8904_v30  ;;  %v9018_v25 = vadd.f32 %v8941_v45, %v8905_v42  ;;  %v9019_v53 = vadd.f32 %v8942_v56, %v8906_v43  ;;  %v8964_v59 = vld [vmem:[%s11607_s10 + $0xd3] sm:$0xff]  ;;  %v8965_v6 = vld [vmem:[%s11607_s10 + $0xdb] sm:$0xff] }
 0x584   : > { %16378 = vst [vmem:[#allocation13_spill] sm:$0xff] %v15814_v9  ;;  %16379 = vst [vmem:[#allocation12_spill] sm:$0xff] %v15817_v22  ;;  %v9020_v3 = vadd.f32 %v8943_v49, %v8907_v52  ;;  %v9021_v28 = vadd.f32 %v8944_v18, %v8908_v61  ;;  %v9023_v22 = vadd.f32 %v8946_v13, %v8910_v27  ;;  %v8966_v30 = vld [vmem:[%s11607_s10 + $0xe3] sm:$0xff]  ;;  %v8968_v27 = vld [vmem:[%s11607_s10 + $0xf3] sm:$0xff] }
 0x585   : > { %16380 = vst [vmem:[#allocation35_spill] sm:$0xff] %v15820_v26  ;;  %16381 = vst [vmem:[#allocation63_spill] sm:$0xff] %v15823_v7  ;;  %v8962_v26 = vld [vmem:[%s11607_s10 + $0xc3] sm:$0xff]  ;;  %v9022_v7 = vadd.f32 %v8945_v8, %v8909_v2  ;;  %v9024_v9 = vadd.f32 %v8947_v11, %v8911_v40  ;;  %v9025_v42 = vadd.f32 %v8948_v35, %v15727_v5  ;;  %v8967_v2 = vld [vmem:[%s11607_s10 + $0xeb] sm:$0xff] }
 0x586   : > { %v9026_v43 = vadd.f32 %v8949_v31, %v15730_v60  ;;  %v9027_v52 = vadd.f32 %v8950_v36, %v15733_v39  ;;  %v9028_v61 = vadd.f32 %v8951_v20, %v15736_v4  ;;  %9053 = vst.msk [vmem:[%s14225_s15 + $0x13] sm:$0xff] %vm363_vm1, %v9017_v48  ;;  %9054 = vst.msk [vmem:[%s14225_s15 + $0x1b] sm:$0xff] %vm363_vm1, %v9018_v25  ;;  %v8969_v40 = vld [vmem:[%s11607_s10 + $0xfb] sm:$0xff]  ;;  %v8971_v58 = vld [vmem:[%s11607_s10 + $0x10b] sm:$0xff] }
 0x587   : > { %9055 = vst.msk [vmem:[%s14225_s15 + $0x23] sm:$0xff] %vm363_vm1, %v9019_v53  ;;  %9056 = vst.msk [vmem:[%s14225_s15 + $0x2b] sm:$0xff] %vm363_vm1, %v9020_v3  ;;  %v9029_v5 = vadd.f32 %v8952_v55, %v15739_v38  ;;  %v9030_v60 = vadd.f32 %v8953_v44, %v15742_v37  ;;  %v9031_v39 = vadd.f32 %v8954_v10, %v15745_v41  ;;  %v8970_v38 = vld [vmem:[%s11607_s10 + $0x103] sm:$0xff]  ;;  %v8972_v37 = vld [vmem:[%s11607_s10 + $0x113] sm:$0xff] }
 0x588   : > { %v9032_v4 = vadd.f32 %v8955_v54, %v15748_v62  ;;  %9057 = vst.msk [vmem:[%s14225_s15 + $0x33] sm:$0xff] %vm363_vm1, %v9021_v28  ;;  %9058 = vst.msk [vmem:[%s14225_s15 + $0x3b] sm:$0xff] %vm363_vm1, %v9022_v7  ;;  %v9033_v41 = vadd.f32 %v8956_v51, %v15751_v19  ;;  %v9034_v62 = vadd.f32 %v8957_v29, %v15754_v34  ;;  %v8973_v49 = vld [vmem:[%s11607_s10 + $0x11b] sm:$0xff]  ;;  %v8974_v19 = vld [vmem:[%s11607_s10 + $0x123] sm:$0xff] }
 0x589   : > { %9059 = vst.msk [vmem:[%s14225_s15 + $0x43] sm:$0xff] %vm363_vm1, %v9023_v22  ;;  %9060 = vst.msk [vmem:[%s14225_s15 + $0x4b] sm:$0xff] %vm363_vm1, %v9024_v9  ;;  %v9035_v45 = vadd.f32 %v8958_v57, %v15757_v46  ;;  %v9036_v56 = vadd.f32 %v8959_v16, %v15760_v1  ;;  %v8975_v34 = vld [vmem:[%s11607_s10 + $0x12b] sm:$0xff]  ;;  %v9037_v46 = vadd.f32 %v8960_v47, %v15767_v14 }
 0x58a   : > { %9061 = vst.msk [vmem:[%s14225_s15 + $0x53] sm:$0xff] %vm363_vm1, %v9025_v42  ;;  %9062 = vst.msk [vmem:[%s14225_s15 + $0x5b] sm:$0xff] %vm363_vm1, %v9026_v43  ;;  %v9038_v18 = vadd.f32 %v8961_v24, %v15770_v33  ;;  %v9039_v1 = vadd.f32 %v8962_v26, %v15773_v12  ;;  %v9040_v8 = vadd.f32 %v8963_v32, %v15776_v63 }
 0x58b   : > { %9063 = vst.msk [vmem:[%s14225_s15 + $0x63] sm:$0xff] %vm363_vm1, %v9027_v52  ;;  %9064 = vst.msk [vmem:[%s14225_s15 + $0x6b] sm:$0xff] %vm363_vm1, %v9028_v61  ;;  %v9041_v14 = vadd.f32 %v8964_v59, %v15783_v0  ;;  %v9042_v33 = vadd.f32 %v8965_v6, %v15786_v17  ;;  %v9043_v12 = vadd.f32 %v8966_v30, %v15789_v15  ;;  %v16382_v0 = vld [vmem:[#allocation59_spill] sm:$0xff]  ;;  %v16383_v15 = vld [vmem:[#allocation81_spill] sm:$0xff] }
 0x58c   : > { %9065 = vst.msk [vmem:[%s14225_s15 + $0x73] sm:$0xff] %vm363_vm1, %v9029_v5  ;;  %9066 = vst.msk [vmem:[%s14225_s15 + $0x7b] sm:$0xff] %vm363_vm1, %v9030_v60  ;;  %v9044_v63 = vadd.f32 %v8967_v2, %v15792_v23  ;;  %v9045_v13 = vadd.f32 %v8968_v27, %v15799_v21  ;;  %v9046_v11 = vadd.f32 %v8969_v40, %v15802_v50  ;;  %v16384_v35 = vld [vmem:[#allocation13_spill] sm:$0xff]  ;;  %v16385_v36 = vld [vmem:[#allocation12_spill] sm:$0xff] }
 0x58d   : > { %9067 = vst.msk [vmem:[%s14225_s15 + $0x83] sm:$0xff] %vm363_vm1, %v9031_v39  ;;  %9068 = vst.msk [vmem:[%s14225_s15 + $0x8b] sm:$0xff] %vm363_vm1, %v9032_v4  ;;  %v9047_v17 = vadd.f32 %v8970_v38, %v16382_v0  ;;  %v9048_v23 = vadd.f32 %v8971_v58, %v16383_v15  ;;  %v9049_v31 = vadd.f32 %v8972_v37, %v16384_v35  ;;  %v16386_v21 = vld [vmem:[#allocation35_spill] sm:$0xff] }
 0x58e   : > { %9069 = vst.msk [vmem:[%s14225_s15 + $0x93] sm:$0xff] %vm363_vm1, %v9033_v41  ;;  %9070 = vst.msk [vmem:[%s14225_s15 + $0x9b] sm:$0xff] %vm363_vm1, %v9034_v62  ;;  %v9050_v20 = vadd.f32 %v8973_v49, %v16385_v36  ;;  %v9051_v50 = vadd.f32 %v8974_v19, %v16386_v21  ;;  %v16387_v6 = vld [vmem:[#allocation63_spill] sm:$0xff] }
 0x58f   : > { %9071 = vst.msk [vmem:[%s14225_s15 + $0xa3] sm:$0xff] %vm363_vm1, %v9035_v45  ;;  %9072 = vst.msk [vmem:[%s14225_s15 + $0xab] sm:$0xff] %vm363_vm1, %v9036_v56  ;;  %v9052_v59 = vadd.f32 %v8975_v34, %v16387_v6 }
 0x590   : > { %9073 = vst.msk [vmem:[%s14225_s15 + $0xb3] sm:$0xff] %vm363_vm1, %v9037_v46  ;;  %9074 = vst.msk [vmem:[%s14225_s15 + $0xbb] sm:$0xff] %vm363_vm1, %v9038_v18 }
 0x591   : > { %9075 = vst.msk [vmem:[%s14225_s15 + $0xc3] sm:$0xff] %vm363_vm1, %v9039_v1  ;;  %9076 = vst.msk [vmem:[%s14225_s15 + $0xcb] sm:$0xff] %vm363_vm1, %v9040_v8 }
 0x592   : > { %9077 = vst.msk [vmem:[%s14225_s15 + $0xd3] sm:$0xff] %vm363_vm1, %v9041_v14  ;;  %9078 = vst.msk [vmem:[%s14225_s15 + $0xdb] sm:$0xff] %vm363_vm1, %v9042_v33 }
 0x593   : > { %9079 = vst.msk [vmem:[%s14225_s15 + $0xe3] sm:$0xff] %vm363_vm1, %v9043_v12  ;;  %9080 = vst.msk [vmem:[%s14225_s15 + $0xeb] sm:$0xff] %vm363_vm1, %v9044_v63 }
 0x594   : > { %9081 = vst.msk [vmem:[%s14225_s15 + $0xf3] sm:$0xff] %vm363_vm1, %v9045_v13  ;;  %9082 = vst.msk [vmem:[%s14225_s15 + $0xfb] sm:$0xff] %vm363_vm1, %v9046_v11 }
 0x595   : > { %9083 = vst.msk [vmem:[%s14225_s15 + $0x103] sm:$0xff] %vm363_vm1, %v9047_v17  ;;  %9084 = vst.msk [vmem:[%s14225_s15 + $0x10b] sm:$0xff] %vm363_vm1, %v9048_v23 }
 0x596   : > { %9085 = vst.msk [vmem:[%s14225_s15 + $0x113] sm:$0xff] %vm363_vm1, %v9049_v31  ;;  %9086 = vst.msk [vmem:[%s14225_s15 + $0x11b] sm:$0xff] %vm363_vm1, %v9050_v20 }
 0x597   : > { %9087 = vst.msk [vmem:[%s14225_s15 + $0x123] sm:$0xff] %vm363_vm1, %v9051_v50  ;;  %9088 = vst.msk [vmem:[%s14225_s15 + $0x12b] sm:$0xff] %vm363_vm1, %v9052_v59 }
 0x598 PF: > { %s16_s21 = sadd.s32 1, %s11534_s21  }
 0x599   : > { %p13_p4 = scmp.ge.s32.totalorder %s16_s21, 4  }
 0x59b   :  { %15 = sbr.rel (!%p13_p4) target bundleno = 1 (0x1), region = 90 }

</bundles_post_ra>
